<compile_context>
chip_gen: v5e
topology: v5e:2x2
jax: 0.10.0
libtpu: 0.0.40
codegen_flags: <defaults>
</compile_context>

<pallas_src>
import functools

import jax
import jax.numpy as jnp
import numpy as np
from jax import lax
from jax.experimental import pallas as pl
from jax.experimental.pallas import tpu as pltpu

BN_EPS = 1e-5          # PyTorch BatchNorm2d default
LANE = 128             # TPU lane width


def _round_up(x, m):
    return (x + m - 1) // m * m


# ---------------------------------------------------------------------------
# In-kernel 3x3 conv: 9 per-tap MXU matmuls accumulated in f32 (no im2col)
# ---------------------------------------------------------------------------
def _conv3x3_taps(src, w_ref, hout, wout, stride):
    """src   : (Hs, Ws, C) bf16 value, halo-padded by 1 on every side.
       w_ref : (9, C, Cout_p) bf16 ref; w_ref[ky*3+kx][ci, co] = W[co, ci, ky, kx].
       Returns (hout*wout, Cout_p) f32.
    """
    # TODO(synk): on v6e/v7x (256-deep MXU) group taps by ky into 3 matmuls of
    # 3*C-deep contraction; 9 x C-deep matmuls already saturate v5e's MXU.
    if stride == 1:
        phases = {(0, 0): src}
    else:
        # Polyphase decomposition: stride**2 strided extractions (done once)
        # replace 9 strided tap gathers.
        phases = {(p, q): src[p::stride, q::stride, :]
                  for p in range(stride) for q in range(stride)}
    acc = None
    for ky in range(3):
        for kx in range(3):
            ph = phases[(ky % stride, kx % stride)]
            y0, x0 = ky // stride, kx // stride
            tap = ph[y0:y0 + hout, x0:x0 + wout, :]
            tap = tap.reshape(hout * wout, tap.shape[-1])
            part = jnp.dot(tap, w_ref[ky * 3 + kx],
                           preferred_element_type=jnp.float32)
            acc = part if acc is None else acc + part
    return acc


# ---------------------------------------------------------------------------
# Fused BasicBlock kernel: one grid step == one batch image
# ---------------------------------------------------------------------------
def _basic_block_kernel(*refs, Hout, Wout, stride, c1_p, has_projection):
    """
    refs (projection variant):
      xpad (1, H+2, W+2, Cin_p) bf16 | w1 (9, Cin_p, C1_p) bf16
      s1, b1 (1, C1_p) f32           | w2 (9, C1_p, C1_p) bf16
      s2, b2 (1, C1_p) f32           | wsc (Cin_p, C1_p) bf16
      ssc, bsc (1, C1_p) f32         | out (1, Hout, Wout, C1_p) bf16
      p1 (Hout+2, Wout+2, C1_p) bf16 VMEM scratch (conv1 output + zero halo)
    Identity-shortcut variant (trace-time specialization): wsc/ssc/bsc absent.
    """
    if has_projection:
        (xpad_ref, w1_ref, s1_ref, b1_ref, w2_ref, s2_ref, b2_ref,
         wsc_ref, ssc_ref, bsc_ref, out_ref, p1_ref) = refs
    else:
        (xpad_ref, w1_ref, s1_ref, b1_ref, w2_ref, s2_ref, b2_ref,
         out_ref, p1_ref) = refs

    xp = xpad_ref[0]                                     # (Hp, Wp, Cin_p) bf16

    # ---- conv1 (3x3, stride) + bn1 + relu ----------------------------------
    y1 = _conv3x3_taps(xp, w1_ref, Hout, Wout, stride)
    y1 = jnp.maximum(y1 * s1_ref[...] + b1_ref[...], 0.0)          # f32, VPU

    # Stash relu(bn1(conv1(x))) in a halo-padded bf16 VMEM scratch: the
    # intermediate never leaves VMEM and conv2's zero padding comes from the
    # halo ring.  Only the 1-wide halo border + the interior are (re)written
    # each step -- no full-scratch zeroing pass.
    # TODO(synk): H-only halo + pltpu.roll/iota-mask on the kx=0/2 taps would
    # make the interior store fully sublane-aligned.
    y1_img = y1.astype(p1_ref.dtype).reshape(Hout, Wout, c1_p)
    zrow = jnp.zeros((1, Wout + 2, c1_p), p1_ref.dtype)
    zcol = jnp.zeros((Hout, 1, c1_p), p1_ref.dtype)
    p1_ref[0:1, :, :] = zrow
    p1_ref[Hout + 1:Hout + 2, :, :] = zrow
    p1_ref[1:Hout + 1, 0:1, :] = zcol
    p1_ref[1:Hout + 1, Wout + 1:Wout + 2, :] = zcol
    p1_ref[1:Hout + 1, 1:Wout + 1, :] = y1_img

    # ---- conv2 (3x3, stride 1) + bn2 (no relu yet) -------------------------
    y2 = _conv3x3_taps(p1_ref[...], w2_ref, Hout, Wout, 1)
    y2 = y2 * s2_ref[...] + b2_ref[...]

    # ---- shortcut -----------------------------------------------------------
    if stride == 1:
        xs = xp[1:1 + Hout, 1:1 + Wout, :]
    else:
        xs = xp[1::stride, 1::stride, :][:Hout, :Wout, :]
    xs = xs.reshape(Hout * Wout, xs.shape[-1])
    if has_projection:
        ysc = jnp.dot(xs, wsc_ref[...], preferred_element_type=jnp.float32)
        ysc = ysc * ssc_ref[...] + bsc_ref[...]
    else:
        # Identity shortcut (in_c == out_c, stride 1): no matmul, no affine.
        # NOTE: residual is bf16-quantized (x is stored bf16 in HBM) -- the
        # documented mixed-precision choice of this kernel.
        ysc = xs.astype(jnp.float32)

    # ---- residual add + final relu ------------------------------------------
    out_ref[0] = (jnp.maximum(y2 + ysc, 0.0)
                  .reshape(Hout, Wout, c1_p).astype(out_ref.dtype))


# ---------------------------------------------------------------------------
# Parameter construction (deterministic, mirrors the PyTorch module layers)
# ---------------------------------------------------------------------------
def make_conv_bn_params(key, cin, cout, k):
    kw, kb, kg, kbt, km, kv = jax.random.split(key, 6)
    return {
        "w_oihw": 0.1 * jax.random.normal(kw, (cout, cin, k, k), jnp.float32),
        "conv_b": 0.1 * jax.random.normal(kb, (cout,), jnp.float32),
        "gamma":  1.0 + 0.1 * jax.random.normal(kg, (cout,), jnp.float32),
        "beta":   0.1 * jax.random.normal(kbt, (cout,), jnp.float32),
        "mean":   0.1 * jax.random.normal(km, (cout,), jnp.float32),
        "var":    1.0 + 0.1 * jax.random.uniform(kv, (cout,), jnp.float32),
    }


def make_basic_block_params(key, in_channels, out_channels, stride=1):
    k1, k2, k3 = jax.random.split(key, 3)
    params = {
        "in_channels": in_channels,
        "out_channels": out_channels,
        "stride": stride,
        "conv1": make_conv_bn_params(k1, in_channels, out_channels, 3),
        "conv2": make_conv_bn_params(k2, out_channels, out_channels, 3),
        "has_projection": (stride != 1) or (in_channels != out_channels),
    }
    if params["has_projection"]:
        params["shortcut"] = make_conv_bn_params(k3, in_channels, out_channels, 1)
    return params


def _fold_bn(p, cout_p):
    """Fold conv bias + BN (eval mode) into a per-channel (scale, bias)."""
    scale = p["gamma"] / jnp.sqrt(p["var"] + BN_EPS)
    bias = p["beta"] + scale * (p["conv_b"] - p["mean"])
    pad = cout_p - scale.shape[0]
    scale = jnp.pad(scale, (0, pad)).reshape(1, cout_p).astype(jnp.float32)
    bias = jnp.pad(bias, (0, pad)).reshape(1, cout_p).astype(jnp.float32)
    return scale, bias


def _prep_conv3x3_weights(w_oihw, cin_p, cout_p):
    """(Cout, Cin, 3, 3) -> lane-padded per-tap (9, Cin_p, Cout_p) bf16."""
    cout, cin, kh, kw = w_oihw.shape
    w = jnp.transpose(w_oihw, (2, 3, 1, 0))                     # (K, K, Cin, Cout)
    w = jnp.pad(w, ((0, 0), (0, 0), (0, cin_p - cin), (0, cout_p - cout)))
    return w.reshape(kh * kw, cin_p, cout_p).astype(jnp.bfloat16)


def _prep_conv1x1_weights(w_oihw, cin_p, cout_p):
    """(Cout, Cin, 1, 1) -> lane-padded (Cin_p, Cout_p) bf16."""
    cout, cin = w_oihw.shape[:2]
    w = jnp.transpose(w_oihw[:, :, 0, 0], (1, 0))               # (Cin, Cout)
    w = jnp.pad(w, ((0, cin_p - cin), (0, cout_p - cout)))
    return w.astype(jnp.bfloat16)


def _const_spec(shape):
    nd = len(shape)

    def index_map(i):
        return (0,) * nd

    return pl.BlockSpec(shape, index_map)


def _vmem_limit_bytes():
    # Generation-dependent scoped-VMEM budget: ~85% of physical per-core VMEM
    # (v5e/v6e: 128 MiB, v7x: 64 MiB), capped at 110 MiB.
    try:
        cap = pltpu.get_tpu_info().vmem_capacity_bytes
    except Exception:
        cap = 64 * 1024 * 1024          # conservative fallback (v7x-sized)
    return min(int(cap * 0.85), 110 * 1024 * 1024)


# ---------------------------------------------------------------------------
# Forward wrapper (single pallas_call)
# ---------------------------------------------------------------------------
def basic_block_forward(x_nchw, params):
    in_c = params["in_channels"]
    out_c = params["out_channels"]
    stride = params["stride"]
    has_projection = params["has_projection"]

    # TODO(synk): fold the NCHW<->NHWC transposes into the kernel's index_maps
    # instead of XLA-side transposes.
    x = jnp.transpose(x_nchw, (0, 2, 3, 1)).astype(jnp.float32)  # NHWC
    N, H, W, _ = x.shape
    Hout = (H - 1) // stride + 1
    Wout = (W - 1) // stride + 1

    cin_p = _round_up(in_c, LANE)
    c1_p = _round_up(out_c, LANE)

    # One pad for the conv halo + channel lane-padding; bf16 halves HBM/DMA
    # traffic and feeds the MXU directly.
    # TODO(synk): pass the true channel count (full-dim last block dim) and
    # lane-pad inside the kernel to avoid reading padded channels from HBM
    # when in_c is not a multiple of 128.
    xpad = jnp.pad(x, ((0, 0), (1, 1), (1, 1), (0, cin_p - in_c))).astype(jnp.bfloat16)
    Hp, Wp = H + 2, W + 2

    w1 = _prep_conv3x3_weights(params["conv1"]["w_oihw"], cin_p, c1_p)
    s1, b1 = _fold_bn(params["conv1"], c1_p)
    w2 = _prep_conv3x3_weights(params["conv2"]["w_oihw"], c1_p, c1_p)
    s2, b2 = _fold_bn(params["conv2"], c1_p)

    args = [xpad, w1, s1, b1, w2, s2, b2]
    in_specs = [pl.BlockSpec((1, Hp, Wp, cin_p), lambda i: (i, 0, 0, 0))]
    in_specs += [_const_spec(a.shape) for a in (w1, s1, b1, w2, s2, b2)]
    if has_projection:
        wsc = _prep_conv1x1_weights(params["shortcut"]["w_oihw"], cin_p, c1_p)
        ssc, bsc = _fold_bn(params["shortcut"], c1_p)
        args += [wsc, ssc, bsc]
        in_specs += [_const_spec(a.shape) for a in (wsc, ssc, bsc)]
    # TODO(synk): mark the constant weight/scale specs pipeline_mode=
    # pl.Buffered(1) to drop their double-buffer VMEM reservation.

    kern = functools.partial(_basic_block_kernel, Hout=Hout, Wout=Wout,
                             stride=stride, c1_p=c1_p,
                             has_projection=has_projection)

    flops = 2 * N * Hout * Wout * (9 * cin_p * c1_p + 9 * c1_p * c1_p
                                   + (cin_p * c1_p if has_projection else 0))
    bytes_accessed = int(sum(int(a.size) * a.dtype.itemsize for a in args)
                         + N * Hout * Wout * c1_p * 2)

    # TODO(synk): add a second "parallel" grid axis over output-row tiles
    # (overlapping input halo rows) so per-step VMEM stays bounded for large
    # H*W on v7x (64 MiB/TC) and its second TensorCore gets work when N == 1.
    out = pl.pallas_call(
        kern,
        out_shape=jax.ShapeDtypeStruct((N, Hout, Wout, c1_p), jnp.bfloat16),
        grid=(N,),
        in_specs=in_specs,
        out_specs=pl.BlockSpec((1, Hout, Wout, c1_p), lambda i: (i, 0, 0, 0)),
        scratch_shapes=[pltpu.VMEM((Hout + 2, Wout + 2, c1_p), jnp.bfloat16)],
        compiler_params=pltpu.CompilerParams(
            dimension_semantics=("parallel",),          # batch across TCs
            vmem_limit_bytes=_vmem_limit_bytes()),
        cost_estimate=pl.CostEstimate(flops=flops, transcendentals=0,
                                      bytes_accessed=bytes_accessed),
    )(*args)

    out = out[..., :out_c].astype(jnp.float32)          # drop lane padding, f32
    return jnp.transpose(out, (0, 3, 1, 2))             # NHWC -> NCHW


# ---------------------------------------------------------------------------
# Pure-JAX reference (lax.conv) for a correctness check
# ---------------------------------------------------------------------------
def _ref_conv_bn(x, p, stride, pad):
    y = lax.conv_general_dilated(
        x, p["w_oihw"], window_strides=(stride, stride),
        padding=[(pad, pad), (pad, pad)],
        dimension_numbers=("NCHW", "OIHW", "NCHW"))
    y = y + p["conv_b"][None, :, None, None]
    inv = (p["gamma"] / jnp.sqrt(p["var"] + BN_EPS))[None, :, None, None]
    return (y - p["mean"][None, :, None, None]) * inv + p["beta"][None, :, None, None]


def basic_block_reference(x_nchw, params):
    out = jnp.maximum(_ref_conv_bn(x_nchw, params["conv1"], params["stride"], 1), 0.0)
    out = _ref_conv_bn(out, params["conv2"], 1, 1)
    if params["has_projection"]:
        sc = _ref_conv_bn(x_nchw, params["shortcut"], params["stride"], 0)
    else:
        sc = x_nchw
    return jnp.maximum(out + sc, 0.0)


# ---------------------------------------------------------------------------
if __name__ == "__main__":
    key = jax.random.PRNGKey(0)
    k_x, k_x2, k_p, k_p2 = jax.random.split(key, 4)

    # Config A: in != out  ->  exercises the 1x1 projection shortcut path.
    N, C_in, H, W = 2, 4, 16, 16
    C_out, stride = 8, 1
    x = jax.random.normal(k_x, (N, C_in, H, W), dtype=jnp.float32)
    params = make_basic_block_params(k_p, C_in, C_out, stride)

    out = jax.block_until_ready(basic_block_forward(x, params))
    assert out.shape == (N, C_out, H, W), out.shape
    ref = jax.block_until_ready(basic_block_reference(x, params))
    np.testing.assert_allclose(np.asarray(out), np.asarray(ref), rtol=2e-2, atol=2e-2)

    # Config B: in == out, stride 1  ->  exercises the trace-time specialized
    # identity shortcut (no projection operands, no residual matmul).
    x2 = jax.random.normal(k_x2, (N, C_out, H, W), dtype=jnp.float32)
    params_id = make_basic_block_params(k_p2, C_out, C_out, 1)

    out2 = jax.block_until_ready(basic_block_forward(x2, params_id))
    assert out2.shape == (N, C_out, H, W), out2.shape
    ref2 = jax.block_until_ready(basic_block_reference(x2, params_id))
    np.testing.assert_allclose(np.asarray(out2), np.asarray(ref2), rtol=2e-2, atol=2e-2)

    print("KERNEL_OK")
</pallas_src>

<mosaic_0001>
module attributes {stable_mosaic.version = 11 : i64} {
  func.func @_basic_block_kernel(%arg0: i32, %arg1: memref<1x18x18x128xbf16, #tpu.memory_space<vmem>>, %arg2: memref<9x128x128xbf16, #tpu.memory_space<vmem>>, %arg3: memref<1x128xf32, #tpu.memory_space<vmem>>, %arg4: memref<1x128xf32, #tpu.memory_space<vmem>>, %arg5: memref<9x128x128xbf16, #tpu.memory_space<vmem>>, %arg6: memref<1x128xf32, #tpu.memory_space<vmem>>, %arg7: memref<1x128xf32, #tpu.memory_space<vmem>>, %arg8: memref<128x128xbf16, #tpu.memory_space<vmem>>, %arg9: memref<1x128xf32, #tpu.memory_space<vmem>>, %arg10: memref<1x128xf32, #tpu.memory_space<vmem>>, %arg11: memref<1x16x16x128xbf16, #tpu.memory_space<vmem>>, %arg12: memref<18x18x128xbf16, #tpu.memory_space<vmem>>) attributes {dimension_semantics = [#tpu.dimension_semantics<parallel>], iteration_bounds = array<i64: 2>, scalar_prefetch = 0 : i64, scratch_operands = 1 : i64, tpu.core_type = #tpu.core_type<tc>, window_params = [{transform_indices = @transform_0, window_bounds = array<i64: 1, 18, 18, 128>}, {pipeline_mode = #tpu.pipeline_mode<synchronous>, transform_indices = @transform_1, window_bounds = array<i64: 9, 128, 128>}, {pipeline_mode = #tpu.pipeline_mode<synchronous>, transform_indices = @transform_2, window_bounds = array<i64: 1, 128>}, {pipeline_mode = #tpu.pipeline_mode<synchronous>, transform_indices = @transform_3, window_bounds = array<i64: 1, 128>}, {pipeline_mode = #tpu.pipeline_mode<synchronous>, transform_indices = @transform_4, window_bounds = array<i64: 9, 128, 128>}, {pipeline_mode = #tpu.pipeline_mode<synchronous>, transform_indices = @transform_5, window_bounds = array<i64: 1, 128>}, {pipeline_mode = #tpu.pipeline_mode<synchronous>, transform_indices = @transform_6, window_bounds = array<i64: 1, 128>}, {pipeline_mode = #tpu.pipeline_mode<synchronous>, transform_indices = @transform_7, window_bounds = array<i64: 128, 128>}, {pipeline_mode = #tpu.pipeline_mode<synchronous>, transform_indices = @transform_8, window_bounds = array<i64: 1, 128>}, {pipeline_mode = #tpu.pipeline_mode<synchronous>, transform_indices = @transform_9, window_bounds = array<i64: 1, 128>}, {transform_indices = @transform_10, window_bounds = array<i64: 1, 16, 16, 128>}]} {
    %c0 = arith.constant 0 : index
    %c0_0 = arith.constant 0 : index
    %c0_1 = arith.constant 0 : index
    %c0_2 = arith.constant 0 : index
    %0 = vector.load %arg1[%c0, %c0_0, %c0_1, %c0_2] : memref<1x18x18x128xbf16, #tpu.memory_space<vmem>>, vector<1x18x18x128xbf16>
    %1 = vector.shape_cast %0 : vector<1x18x18x128xbf16> to vector<18x18x128xbf16>
    %2 = vector.extract_strided_slice %1 {offsets = [0, 0, 0], sizes = [16, 16, 128], strides = [1, 1, 1]} : vector<18x18x128xbf16> to vector<16x16x128xbf16>
    %3 = vector.shape_cast %2 : vector<16x16x128xbf16> to vector<256x128xbf16>
    %c0_3 = arith.constant 0 : index
    %c0_4 = arith.constant 0 : index
    %c0_5 = arith.constant 0 : index
    %4 = vector.load %arg2[%c0_3, %c0_4, %c0_5] : memref<9x128x128xbf16, #tpu.memory_space<vmem>>, vector<1x128x128xbf16>
    %5 = vector.shape_cast %4 : vector<1x128x128xbf16> to vector<128x128xbf16>
    %cst = arith.constant dense<0.000000e+00> : vector<256x128xf32>
    %6 = tpu.matmul %3, %5, %cst {dimension_numbers = #tpu.dot_dimension_numbers<[1], [0], [0], [1], [0, 0, 1, 1], [], []>} : vector<256x128xbf16>, vector<128x128xbf16>, vector<256x128xf32> -> vector<256x128xf32>
    %7 = vector.extract_strided_slice %1 {offsets = [0, 1, 0], sizes = [16, 16, 128], strides = [1, 1, 1]} : vector<18x18x128xbf16> to vector<16x16x128xbf16>
    %8 = vector.shape_cast %7 : vector<16x16x128xbf16> to vector<256x128xbf16>
    %c1 = arith.constant 1 : index
    %c0_6 = arith.constant 0 : index
    %c0_7 = arith.constant 0 : index
    %9 = vector.load %arg2[%c1, %c0_6, %c0_7] : memref<9x128x128xbf16, #tpu.memory_space<vmem>>, vector<1x128x128xbf16>
    %10 = vector.shape_cast %9 : vector<1x128x128xbf16> to vector<128x128xbf16>
    %cst_8 = arith.constant dense<0.000000e+00> : vector<256x128xf32>
    %11 = tpu.matmul %8, %10, %cst_8 {dimension_numbers = #tpu.dot_dimension_numbers<[1], [0], [0], [1], [0, 0, 1, 1], [], []>} : vector<256x128xbf16>, vector<128x128xbf16>, vector<256x128xf32> -> vector<256x128xf32>
    %12 = arith.addf %6, %11 : vector<256x128xf32>
    %13 = vector.extract_strided_slice %1 {offsets = [0, 2, 0], sizes = [16, 16, 128], strides = [1, 1, 1]} : vector<18x18x128xbf16> to vector<16x16x128xbf16>
    %14 = vector.shape_cast %13 : vector<16x16x128xbf16> to vector<256x128xbf16>
    %c2 = arith.constant 2 : index
    %c0_9 = arith.constant 0 : index
    %c0_10 = arith.constant 0 : index
    %15 = vector.load %arg2[%c2, %c0_9, %c0_10] : memref<9x128x128xbf16, #tpu.memory_space<vmem>>, vector<1x128x128xbf16>
    %16 = vector.shape_cast %15 : vector<1x128x128xbf16> to vector<128x128xbf16>
    %cst_11 = arith.constant dense<0.000000e+00> : vector<256x128xf32>
    %17 = tpu.matmul %14, %16, %cst_11 {dimension_numbers = #tpu.dot_dimension_numbers<[1], [0], [0], [1], [0, 0, 1, 1], [], []>} : vector<256x128xbf16>, vector<128x128xbf16>, vector<256x128xf32> -> vector<256x128xf32>
    %18 = arith.addf %12, %17 : vector<256x128xf32>
    %19 = vector.extract_strided_slice %1 {offsets = [1, 0, 0], sizes = [16, 16, 128], strides = [1, 1, 1]} : vector<18x18x128xbf16> to vector<16x16x128xbf16>
    %20 = vector.shape_cast %19 : vector<16x16x128xbf16> to vector<256x128xbf16>
    %c3 = arith.constant 3 : index
    %c0_12 = arith.constant 0 : index
    %c0_13 = arith.constant 0 : index
    %21 = vector.load %arg2[%c3, %c0_12, %c0_13] : memref<9x128x128xbf16, #tpu.memory_space<vmem>>, vector<1x128x128xbf16>
    %22 = vector.shape_cast %21 : vector<1x128x128xbf16> to vector<128x128xbf16>
    %cst_14 = arith.constant dense<0.000000e+00> : vector<256x128xf32>
    %23 = tpu.matmul %20, %22, %cst_14 {dimension_numbers = #tpu.dot_dimension_numbers<[1], [0], [0], [1], [0, 0, 1, 1], [], []>} : vector<256x128xbf16>, vector<128x128xbf16>, vector<256x128xf32> -> vector<256x128xf32>
    %24 = arith.addf %18, %23 : vector<256x128xf32>
    %25 = vector.extract_strided_slice %1 {offsets = [1, 1, 0], sizes = [16, 16, 128], strides = [1, 1, 1]} : vector<18x18x128xbf16> to vector<16x16x128xbf16>
    %26 = vector.shape_cast %25 : vector<16x16x128xbf16> to vector<256x128xbf16>
    %c4 = arith.constant 4 : index
    %c0_15 = arith.constant 0 : index
    %c0_16 = arith.constant 0 : index
    %27 = vector.load %arg2[%c4, %c0_15, %c0_16] : memref<9x128x128xbf16, #tpu.memory_space<vmem>>, vector<1x128x128xbf16>
    %28 = vector.shape_cast %27 : vector<1x128x128xbf16> to vector<128x128xbf16>
    %cst_17 = arith.constant dense<0.000000e+00> : vector<256x128xf32>
    %29 = tpu.matmul %26, %28, %cst_17 {dimension_numbers = #tpu.dot_dimension_numbers<[1], [0], [0], [1], [0, 0, 1, 1], [], []>} : vector<256x128xbf16>, vector<128x128xbf16>, vector<256x128xf32> -> vector<256x128xf32>
    %30 = arith.addf %24, %29 : vector<256x128xf32>
    %31 = vector.extract_strided_slice %1 {offsets = [1, 2, 0], sizes = [16, 16, 128], strides = [1, 1, 1]} : vector<18x18x128xbf16> to vector<16x16x128xbf16>
    %32 = vector.shape_cast %31 : vector<16x16x128xbf16> to vector<256x128xbf16>
    %c5 = arith.constant 5 : index
    %c0_18 = arith.constant 0 : index
    %c0_19 = arith.constant 0 : index
    %33 = vector.load %arg2[%c5, %c0_18, %c0_19] : memref<9x128x128xbf16, #tpu.memory_space<vmem>>, vector<1x128x128xbf16>
    %34 = vector.shape_cast %33 : vector<1x128x128xbf16> to vector<128x128xbf16>
    %cst_20 = arith.constant dense<0.000000e+00> : vector<256x128xf32>
    %35 = tpu.matmul %32, %34, %cst_20 {dimension_numbers = #tpu.dot_dimension_numbers<[1], [0], [0], [1], [0, 0, 1, 1], [], []>} : vector<256x128xbf16>, vector<128x128xbf16>, vector<256x128xf32> -> vector<256x128xf32>
    %36 = arith.addf %30, %35 : vector<256x128xf32>
    %37 = vector.extract_strided_slice %1 {offsets = [2, 0, 0], sizes = [16, 16, 128], strides = [1, 1, 1]} : vector<18x18x128xbf16> to vector<16x16x128xbf16>
    %38 = vector.shape_cast %37 : vector<16x16x128xbf16> to vector<256x128xbf16>
    %c6 = arith.constant 6 : index
    %c0_21 = arith.constant 0 : index
    %c0_22 = arith.constant 0 : index
    %39 = vector.load %arg2[%c6, %c0_21, %c0_22] : memref<9x128x128xbf16, #tpu.memory_space<vmem>>, vector<1x128x128xbf16>
    %40 = vector.shape_cast %39 : vector<1x128x128xbf16> to vector<128x128xbf16>
    %cst_23 = arith.constant dense<0.000000e+00> : vector<256x128xf32>
    %41 = tpu.matmul %38, %40, %cst_23 {dimension_numbers = #tpu.dot_dimension_numbers<[1], [0], [0], [1], [0, 0, 1, 1], [], []>} : vector<256x128xbf16>, vector<128x128xbf16>, vector<256x128xf32> -> vector<256x128xf32>
    %42 = arith.addf %36, %41 : vector<256x128xf32>
    %43 = vector.extract_strided_slice %1 {offsets = [2, 1, 0], sizes = [16, 16, 128], strides = [1, 1, 1]} : vector<18x18x128xbf16> to vector<16x16x128xbf16>
    %44 = vector.shape_cast %43 : vector<16x16x128xbf16> to vector<256x128xbf16>
    %c7 = arith.constant 7 : index
    %c0_24 = arith.constant 0 : index
    %c0_25 = arith.constant 0 : index
    %45 = vector.load %arg2[%c7, %c0_24, %c0_25] : memref<9x128x128xbf16, #tpu.memory_space<vmem>>, vector<1x128x128xbf16>
    %46 = vector.shape_cast %45 : vector<1x128x128xbf16> to vector<128x128xbf16>
    %cst_26 = arith.constant dense<0.000000e+00> : vector<256x128xf32>
    %47 = tpu.matmul %44, %46, %cst_26 {dimension_numbers = #tpu.dot_dimension_numbers<[1], [0], [0], [1], [0, 0, 1, 1], [], []>} : vector<256x128xbf16>, vector<128x128xbf16>, vector<256x128xf32> -> vector<256x128xf32>
    %48 = arith.addf %42, %47 : vector<256x128xf32>
    %49 = vector.extract_strided_slice %1 {offsets = [2, 2, 0], sizes = [16, 16, 128], strides = [1, 1, 1]} : vector<18x18x128xbf16> to vector<16x16x128xbf16>
    %50 = vector.shape_cast %49 : vector<16x16x128xbf16> to vector<256x128xbf16>
    %c8 = arith.constant 8 : index
    %c0_27 = arith.constant 0 : index
    %c0_28 = arith.constant 0 : index
    %51 = vector.load %arg2[%c8, %c0_27, %c0_28] : memref<9x128x128xbf16, #tpu.memory_space<vmem>>, vector<1x128x128xbf16>
    %52 = vector.shape_cast %51 : vector<1x128x128xbf16> to vector<128x128xbf16>
    %cst_29 = arith.constant dense<0.000000e+00> : vector<256x128xf32>
    %53 = tpu.matmul %50, %52, %cst_29 {dimension_numbers = #tpu.dot_dimension_numbers<[1], [0], [0], [1], [0, 0, 1, 1], [], []>} : vector<256x128xbf16>, vector<128x128xbf16>, vector<256x128xf32> -> vector<256x128xf32>
    %54 = arith.addf %48, %53 : vector<256x128xf32>
    %c0_30 = arith.constant 0 : index
    %c0_31 = arith.constant 0 : index
    %55 = vector.load %arg3[%c0_30, %c0_31] : memref<1x128xf32, #tpu.memory_space<vmem>>, vector<1x128xf32>
    %56 = vector.broadcast %55 : vector<1x128xf32> to vector<256x128xf32>
    %57 = arith.mulf %54, %56 : vector<256x128xf32>
    %c0_32 = arith.constant 0 : index
    %c0_33 = arith.constant 0 : index
    %58 = vector.load %arg4[%c0_32, %c0_33] : memref<1x128xf32, #tpu.memory_space<vmem>>, vector<1x128xf32>
    %59 = vector.broadcast %58 : vector<1x128xf32> to vector<256x128xf32>
    %60 = arith.addf %57, %59 : vector<256x128xf32>
    %cst_34 = arith.constant 0.000000e+00 : f32
    %61 = vector.broadcast %cst_34 : f32 to vector<256x128xf32>
    %62 = arith.maximumf %60, %61 : vector<256x128xf32>
    %63 = arith.truncf %62 : vector<256x128xf32> to vector<256x128xbf16>
    %64 = vector.shape_cast %63 : vector<256x128xbf16> to vector<16x16x128xbf16>
    %cst_35 = arith.constant 0.000000e+00 : bf16
    %65 = vector.broadcast %cst_35 : bf16 to vector<1x18x128xbf16>
    %cst_36 = arith.constant 0.000000e+00 : bf16
    %66 = vector.broadcast %cst_36 : bf16 to vector<16x1x128xbf16>
    %c0_37 = arith.constant 0 : index
    %c0_38 = arith.constant 0 : index
    %c0_39 = arith.constant 0 : index
    %67 = vector.load %arg12[%c0_37, %c0_38, %c0_39] : memref<18x18x128xbf16, #tpu.memory_space<vmem>>, vector<1x18x128xbf16>
    tpu.vector_store %arg12[%c0_37, %c0_38, %c0_39], %65 {strides = array<i32>} : memref<18x18x128xbf16, #tpu.memory_space<vmem>>, vector<1x18x128xbf16>,
    %c17 = arith.constant 17 : index
    %c0_40 = arith.constant 0 : index
    %c0_41 = arith.constant 0 : index
    %68 = vector.load %arg12[%c17, %c0_40, %c0_41] : memref<18x18x128xbf16, #tpu.memory_space<vmem>>, vector<1x18x128xbf16>
    tpu.vector_store %arg12[%c17, %c0_40, %c0_41], %65 {strides = array<i32>} : memref<18x18x128xbf16, #tpu.memory_space<vmem>>, vector<1x18x128xbf16>,
    %c1_42 = arith.constant 1 : index
    %c0_43 = arith.constant 0 : index
    %c0_44 = arith.constant 0 : index
    %69 = vector.load %arg12[%c1_42, %c0_43, %c0_44] : memref<18x18x128xbf16, #tpu.memory_space<vmem>>, vector<16x1x128xbf16>
    tpu.vector_store %arg12[%c1_42, %c0_43, %c0_44], %66 {strides = array<i32>} : memref<18x18x128xbf16, #tpu.memory_space<vmem>>, vector<16x1x128xbf16>,
    %c1_45 = arith.constant 1 : index
    %c17_46 = arith.constant 17 : index
    %c0_47 = arith.constant 0 : index
    %70 = vector.load %arg12[%c1_45, %c17_46, %c0_47] : memref<18x18x128xbf16, #tpu.memory_space<vmem>>, vector<16x1x128xbf16>
    tpu.vector_store %arg12[%c1_45, %c17_46, %c0_47], %66 {strides = array<i32>} : memref<18x18x128xbf16, #tpu.memory_space<vmem>>, vector<16x1x128xbf16>,
    %c1_48 = arith.constant 1 : index
    %c1_49 = arith.constant 1 : index
    %c0_50 = arith.constant 0 : index
    %71 = vector.load %arg12[%c1_48, %c1_49, %c0_50] : memref<18x18x128xbf16, #tpu.memory_space<vmem>>, vector<16x16x128xbf16>
    tpu.vector_store %arg12[%c1_48, %c1_49, %c0_50], %64 {strides = array<i32>} : memref<18x18x128xbf16, #tpu.memory_space<vmem>>, vector<16x16x128xbf16>,
    %c0_51 = arith.constant 0 : index
    %c0_52 = arith.constant 0 : index
    %c0_53 = arith.constant 0 : index
    %72 = vector.load %arg12[%c0_51, %c0_52, %c0_53] : memref<18x18x128xbf16, #tpu.memory_space<vmem>>, vector<18x18x128xbf16>
    %73 = vector.extract_strided_slice %72 {offsets = [0, 0, 0], sizes = [16, 16, 128], strides = [1, 1, 1]} : vector<18x18x128xbf16> to vector<16x16x128xbf16>
    %74 = vector.shape_cast %73 : vector<16x16x128xbf16> to vector<256x128xbf16>
    %c0_54 = arith.constant 0 : index
    %c0_55 = arith.constant 0 : index
    %c0_56 = arith.constant 0 : index
    %75 = vector.load %arg5[%c0_54, %c0_55, %c0_56] : memref<9x128x128xbf16, #tpu.memory_space<vmem>>, vector<1x128x128xbf16>
    %76 = vector.shape_cast %75 : vector<1x128x128xbf16> to vector<128x128xbf16>
    %cst_57 = arith.constant dense<0.000000e+00> : vector<256x128xf32>
    %77 = tpu.matmul %74, %76, %cst_57 {dimension_numbers = #tpu.dot_dimension_numbers<[1], [0], [0], [1], [0, 0, 1, 1], [], []>} : vector<256x128xbf16>, vector<128x128xbf16>, vector<256x128xf32> -> vector<256x128xf32>
    %78 = vector.extract_strided_slice %72 {offsets = [0, 1, 0], sizes = [16, 16, 128], strides = [1, 1, 1]} : vector<18x18x128xbf16> to vector<16x16x128xbf16>
    %79 = vector.shape_cast %78 : vector<16x16x128xbf16> to vector<256x128xbf16>
    %c1_58 = arith.constant 1 : index
    %c0_59 = arith.constant 0 : index
    %c0_60 = arith.constant 0 : index
    %80 = vector.load %arg5[%c1_58, %c0_59, %c0_60] : memref<9x128x128xbf16, #tpu.memory_space<vmem>>, vector<1x128x128xbf16>
    %81 = vector.shape_cast %80 : vector<1x128x128xbf16> to vector<128x128xbf16>
    %cst_61 = arith.constant dense<0.000000e+00> : vector<256x128xf32>
    %82 = tpu.matmul %79, %81, %cst_61 {dimension_numbers = #tpu.dot_dimension_numbers<[1], [0], [0], [1], [0, 0, 1, 1], [], []>} : vector<256x128xbf16>, vector<128x128xbf16>, vector<256x128xf32> -> vector<256x128xf32>
    %83 = arith.addf %77, %82 : vector<256x128xf32>
    %84 = vector.extract_strided_slice %72 {offsets = [0, 2, 0], sizes = [16, 16, 128], strides = [1, 1, 1]} : vector<18x18x128xbf16> to vector<16x16x128xbf16>
    %85 = vector.shape_cast %84 : vector<16x16x128xbf16> to vector<256x128xbf16>
    %c2_62 = arith.constant 2 : index
    %c0_63 = arith.constant 0 : index
    %c0_64 = arith.constant 0 : index
    %86 = vector.load %arg5[%c2_62, %c0_63, %c0_64] : memref<9x128x128xbf16, #tpu.memory_space<vmem>>, vector<1x128x128xbf16>
    %87 = vector.shape_cast %86 : vector<1x128x128xbf16> to vector<128x128xbf16>
    %cst_65 = arith.constant dense<0.000000e+00> : vector<256x128xf32>
    %88 = tpu.matmul %85, %87, %cst_65 {dimension_numbers = #tpu.dot_dimension_numbers<[1], [0], [0], [1], [0, 0, 1, 1], [], []>} : vector<256x128xbf16>, vector<128x128xbf16>, vector<256x128xf32> -> vector<256x128xf32>
    %89 = arith.addf %83, %88 : vector<256x128xf32>
    %90 = vector.extract_strided_slice %72 {offsets = [1, 0, 0], sizes = [16, 16, 128], strides = [1, 1, 1]} : vector<18x18x128xbf16> to vector<16x16x128xbf16>
    %91 = vector.shape_cast %90 : vector<16x16x128xbf16> to vector<256x128xbf16>
    %c3_66 = arith.constant 3 : index
    %c0_67 = arith.constant 0 : index
    %c0_68 = arith.constant 0 : index
    %92 = vector.load %arg5[%c3_66, %c0_67, %c0_68] : memref<9x128x128xbf16, #tpu.memory_space<vmem>>, vector<1x128x128xbf16>
    %93 = vector.shape_cast %92 : vector<1x128x128xbf16> to vector<128x128xbf16>
    %cst_69 = arith.constant dense<0.000000e+00> : vector<256x128xf32>
    %94 = tpu.matmul %91, %93, %cst_69 {dimension_numbers = #tpu.dot_dimension_numbers<[1], [0], [0], [1], [0, 0, 1, 1], [], []>} : vector<256x128xbf16>, vector<128x128xbf16>, vector<256x128xf32> -> vector<256x128xf32>
    %95 = arith.addf %89, %94 : vector<256x128xf32>
    %96 = vector.extract_strided_slice %72 {offsets = [1, 1, 0], sizes = [16, 16, 128], strides = [1, 1, 1]} : vector<18x18x128xbf16> to vector<16x16x128xbf16>
    %97 = vector.shape_cast %96 : vector<16x16x128xbf16> to vector<256x128xbf16>
    %c4_70 = arith.constant 4 : index
    %c0_71 = arith.constant 0 : index
    %c0_72 = arith.constant 0 : index
    %98 = vector.load %arg5[%c4_70, %c0_71, %c0_72] : memref<9x128x128xbf16, #tpu.memory_space<vmem>>, vector<1x128x128xbf16>
    %99 = vector.shape_cast %98 : vector<1x128x128xbf16> to vector<128x128xbf16>
    %cst_73 = arith.constant dense<0.000000e+00> : vector<256x128xf32>
    %100 = tpu.matmul %97, %99, %cst_73 {dimension_numbers = #tpu.dot_dimension_numbers<[1], [0], [0], [1], [0, 0, 1, 1], [], []>} : vector<256x128xbf16>, vector<128x128xbf16>, vector<256x128xf32> -> vector<256x128xf32>
    %101 = arith.addf %95, %100 : vector<256x128xf32>
    %102 = vector.extract_strided_slice %72 {offsets = [1, 2, 0], sizes = [16, 16, 128], strides = [1, 1, 1]} : vector<18x18x128xbf16> to vector<16x16x128xbf16>
    %103 = vector.shape_cast %102 : vector<16x16x128xbf16> to vector<256x128xbf16>
    %c5_74 = arith.constant 5 : index
    %c0_75 = arith.constant 0 : index
    %c0_76 = arith.constant 0 : index
    %104 = vector.load %arg5[%c5_74, %c0_75, %c0_76] : memref<9x128x128xbf16, #tpu.memory_space<vmem>>, vector<1x128x128xbf16>
    %105 = vector.shape_cast %104 : vector<1x128x128xbf16> to vector<128x128xbf16>
    %cst_77 = arith.constant dense<0.000000e+00> : vector<256x128xf32>
    %106 = tpu.matmul %103, %105, %cst_77 {dimension_numbers = #tpu.dot_dimension_numbers<[1], [0], [0], [1], [0, 0, 1, 1], [], []>} : vector<256x128xbf16>, vector<128x128xbf16>, vector<256x128xf32> -> vector<256x128xf32>
    %107 = arith.addf %101, %106 : vector<256x128xf32>
    %108 = vector.extract_strided_slice %72 {offsets = [2, 0, 0], sizes = [16, 16, 128], strides = [1, 1, 1]} : vector<18x18x128xbf16> to vector<16x16x128xbf16>
    %109 = vector.shape_cast %108 : vector<16x16x128xbf16> to vector<256x128xbf16>
    %c6_78 = arith.constant 6 : index
    %c0_79 = arith.constant 0 : index
    %c0_80 = arith.constant 0 : index
    %110 = vector.load %arg5[%c6_78, %c0_79, %c0_80] : memref<9x128x128xbf16, #tpu.memory_space<vmem>>, vector<1x128x128xbf16>
    %111 = vector.shape_cast %110 : vector<1x128x128xbf16> to vector<128x128xbf16>
    %cst_81 = arith.constant dense<0.000000e+00> : vector<256x128xf32>
    %112 = tpu.matmul %109, %111, %cst_81 {dimension_numbers = #tpu.dot_dimension_numbers<[1], [0], [0], [1], [0, 0, 1, 1], [], []>} : vector<256x128xbf16>, vector<128x128xbf16>, vector<256x128xf32> -> vector<256x128xf32>
    %113 = arith.addf %107, %112 : vector<256x128xf32>
    %114 = vector.extract_strided_slice %72 {offsets = [2, 1, 0], sizes = [16, 16, 128], strides = [1, 1, 1]} : vector<18x18x128xbf16> to vector<16x16x128xbf16>
    %115 = vector.shape_cast %114 : vector<16x16x128xbf16> to vector<256x128xbf16>
    %c7_82 = arith.constant 7 : index
    %c0_83 = arith.constant 0 : index
    %c0_84 = arith.constant 0 : index
    %116 = vector.load %arg5[%c7_82, %c0_83, %c0_84] : memref<9x128x128xbf16, #tpu.memory_space<vmem>>, vector<1x128x128xbf16>
    %117 = vector.shape_cast %116 : vector<1x128x128xbf16> to vector<128x128xbf16>
    %cst_85 = arith.constant dense<0.000000e+00> : vector<256x128xf32>
    %118 = tpu.matmul %115, %117, %cst_85 {dimension_numbers = #tpu.dot_dimension_numbers<[1], [0], [0], [1], [0, 0, 1, 1], [], []>} : vector<256x128xbf16>, vector<128x128xbf16>, vector<256x128xf32> -> vector<256x128xf32>
    %119 = arith.addf %113, %118 : vector<256x128xf32>
    %120 = vector.extract_strided_slice %72 {offsets = [2, 2, 0], sizes = [16, 16, 128], strides = [1, 1, 1]} : vector<18x18x128xbf16> to vector<16x16x128xbf16>
    %121 = vector.shape_cast %120 : vector<16x16x128xbf16> to vector<256x128xbf16>
    %c8_86 = arith.constant 8 : index
    %c0_87 = arith.constant 0 : index
    %c0_88 = arith.constant 0 : index
    %122 = vector.load %arg5[%c8_86, %c0_87, %c0_88] : memref<9x128x128xbf16, #tpu.memory_space<vmem>>, vector<1x128x128xbf16>
    %123 = vector.shape_cast %122 : vector<1x128x128xbf16> to vector<128x128xbf16>
    %cst_89 = arith.constant dense<0.000000e+00> : vector<256x128xf32>
    %124 = tpu.matmul %121, %123, %cst_89 {dimension_numbers = #tpu.dot_dimension_numbers<[1], [0], [0], [1], [0, 0, 1, 1], [], []>} : vector<256x128xbf16>, vector<128x128xbf16>, vector<256x128xf32> -> vector<256x128xf32>
    %125 = arith.addf %119, %124 : vector<256x128xf32>
    %c0_90 = arith.constant 0 : index
    %c0_91 = arith.constant 0 : index
    %126 = vector.load %arg6[%c0_90, %c0_91] : memref<1x128xf32, #tpu.memory_space<vmem>>, vector<1x128xf32>
    %127 = vector.broadcast %126 : vector<1x128xf32> to vector<256x128xf32>
    %128 = arith.mulf %125, %127 : vector<256x128xf32>
    %c0_92 = arith.constant 0 : index
    %c0_93 = arith.constant 0 : index
    %129 = vector.load %arg7[%c0_92, %c0_93] : memref<1x128xf32, #tpu.memory_space<vmem>>, vector<1x128xf32>
    %130 = vector.broadcast %129 : vector<1x128xf32> to vector<256x128xf32>
    %131 = arith.addf %128, %130 : vector<256x128xf32>
    %132 = vector.extract_strided_slice %1 {offsets = [1, 1, 0], sizes = [16, 16, 128], strides = [1, 1, 1]} : vector<18x18x128xbf16> to vector<16x16x128xbf16>
    %133 = vector.shape_cast %132 : vector<16x16x128xbf16> to vector<256x128xbf16>
    %c0_94 = arith.constant 0 : index
    %c0_95 = arith.constant 0 : index
    %134 = vector.load %arg8[%c0_94, %c0_95] : memref<128x128xbf16, #tpu.memory_space<vmem>>, vector<128x128xbf16>
    %cst_96 = arith.constant dense<0.000000e+00> : vector<256x128xf32>
    %135 = tpu.matmul %133, %134, %cst_96 {dimension_numbers = #tpu.dot_dimension_numbers<[1], [0], [0], [1], [0, 0, 1, 1], [], []>} : vector<256x128xbf16>, vector<128x128xbf16>, vector<256x128xf32> -> vector<256x128xf32>
    %c0_97 = arith.constant 0 : index
    %c0_98 = arith.constant 0 : index
    %136 = vector.load %arg9[%c0_97, %c0_98] : memref<1x128xf32, #tpu.memory_space<vmem>>, vector<1x128xf32>
    %137 = vector.broadcast %136 : vector<1x128xf32> to vector<256x128xf32>
    %138 = arith.mulf %135, %137 : vector<256x128xf32>
    %c0_99 = arith.constant 0 : index
    %c0_100 = arith.constant 0 : index
    %139 = vector.load %arg10[%c0_99, %c0_100] : memref<1x128xf32, #tpu.memory_space<vmem>>, vector<1x128xf32>
    %140 = vector.broadcast %139 : vector<1x128xf32> to vector<256x128xf32>
    %141 = arith.addf %138, %140 : vector<256x128xf32>
    %142 = arith.addf %131, %141 : vector<256x128xf32>
    %cst_101 = arith.constant 0.000000e+00 : f32
    %143 = vector.broadcast %cst_101 : f32 to vector<256x128xf32>
    %144 = arith.maximumf %142, %143 : vector<256x128xf32>
    %145 = vector.shape_cast %144 : vector<256x128xf32> to vector<16x16x128xf32>
    %146 = arith.truncf %145 : vector<16x16x128xf32> to vector<16x16x128xbf16>
    %c0_102 = arith.constant 0 : index
    %c0_103 = arith.constant 0 : index
    %c0_104 = arith.constant 0 : index
    %c0_105 = arith.constant 0 : index
    %147 = vector.load %arg11[%c0_102, %c0_103, %c0_104, %c0_105] : memref<1x16x16x128xbf16, #tpu.memory_space<vmem>>, vector<1x16x16x128xbf16>
    %148 = vector.shape_cast %147 : vector<1x16x16x128xbf16> to vector<16x16x128xbf16>
    %149 = vector.shape_cast %146 : vector<16x16x128xbf16> to vector<1x16x16x128xbf16>
    tpu.vector_store %arg11[%c0_102, %c0_103, %c0_104, %c0_105], %149 {strides = array<i32>} : memref<1x16x16x128xbf16, #tpu.memory_space<vmem>>, vector<1x16x16x128xbf16>,
    return
  }
  func.func @transform_0(%arg0: i32) -> (i32, i32, i32, i32) {
    %c0_i32 = arith.constant 0 : i32
    %c0_i32_0 = arith.constant 0 : i32
    %c0_i32_1 = arith.constant 0 : i32
    %c0_i32_2 = arith.constant 0 : i32
    return %arg0, %c0_i32, %c0_i32_0, %c0_i32_1 : i32, i32, i32, i32
  }
  func.func @transform_1(%arg0: i32) -> (i32, i32, i32) {
    %c0_i32 = arith.constant 0 : i32
    %c0_i32_0 = arith.constant 0 : i32
    %c0_i32_1 = arith.constant 0 : i32
    %c0_i32_2 = arith.constant 0 : i32
    return %c0_i32, %c0_i32_0, %c0_i32_1 : i32, i32, i32
  }
  func.func @transform_2(%arg0: i32) -> (i32, i32) {
    %c0_i32 = arith.constant 0 : i32
    %c0_i32_0 = arith.constant 0 : i32
    %c0_i32_1 = arith.constant 0 : i32
    return %c0_i32, %c0_i32_0 : i32, i32
  }
  func.func @transform_3(%arg0: i32) -> (i32, i32) {
    %c0_i32 = arith.constant 0 : i32
    %c0_i32_0 = arith.constant 0 : i32
    %c0_i32_1 = arith.constant 0 : i32
    return %c0_i32, %c0_i32_0 : i32, i32
  }
  func.func @transform_4(%arg0: i32) -> (i32, i32, i32) {
    %c0_i32 = arith.constant 0 : i32
    %c0_i32_0 = arith.constant 0 : i32
    %c0_i32_1 = arith.constant 0 : i32
    %c0_i32_2 = arith.constant 0 : i32
    return %c0_i32, %c0_i32_0, %c0_i32_1 : i32, i32, i32
  }
  func.func @transform_5(%arg0: i32) -> (i32, i32) {
    %c0_i32 = arith.constant 0 : i32
    %c0_i32_0 = arith.constant 0 : i32
    %c0_i32_1 = arith.constant 0 : i32
    return %c0_i32, %c0_i32_0 : i32, i32
  }
  func.func @transform_6(%arg0: i32) -> (i32, i32) {
    %c0_i32 = arith.constant 0 : i32
    %c0_i32_0 = arith.constant 0 : i32
    %c0_i32_1 = arith.constant 0 : i32
    return %c0_i32, %c0_i32_0 : i32, i32
  }
  func.func @transform_7(%arg0: i32) -> (i32, i32) {
    %c0_i32 = arith.constant 0 : i32
    %c0_i32_0 = arith.constant 0 : i32
    %c0_i32_1 = arith.constant 0 : i32
    return %c0_i32, %c0_i32_0 : i32, i32
  }
  func.func @transform_8(%arg0: i32) -> (i32, i32) {
    %c0_i32 = arith.constant 0 : i32
    %c0_i32_0 = arith.constant 0 : i32
    %c0_i32_1 = arith.constant 0 : i32
    return %c0_i32, %c0_i32_0 : i32, i32
  }
  func.func @transform_9(%arg0: i32) -> (i32, i32) {
    %c0_i32 = arith.constant 0 : i32
    %c0_i32_0 = arith.constant 0 : i32
    %c0_i32_1 = arith.constant 0 : i32
    return %c0_i32, %c0_i32_0 : i32, i32
  }
  func.func @transform_10(%arg0: i32) -> (i32, i32, i32, i32) {
    %c0_i32 = arith.constant 0 : i32
    %c0_i32_0 = arith.constant 0 : i32
    %c0_i32_1 = arith.constant 0 : i32
    %c0_i32_2 = arith.constant 0 : i32
    return %arg0, %c0_i32, %c0_i32_0, %c0_i32_1 : i32, i32, i32, i32
  }
}

</mosaic_0001>

<bundles_post_ra>
// kernel: tpu_custom_call.1
= control target key start
LH: loop header
LB: loop body
LE: loop exit
PB: predicated region body
PF: predicated region fallthrough
CT: control target
= control target key end

     0   :  { %15 = vsyncpa [#allocation4], 0  ;;  %s10857_s0 = inlined_call_operand.vmem [shape: bf16[2,18,18,128], index: 0, kind: input, shape index: {}]   ;;  %s10858_s1 = inlined_call_operand.vmem [shape: bf16[9,128,128], index: 1, kind: input, shape index: {}]   ;;  %s10859_s2 = inlined_call_operand.vmem [shape: f32[1,128], index: 2, kind: input, shape index: {}]   ;;  %s10860_s3 = inlined_call_operand.vmem [shape: f32[1,128], index: 3, kind: input, shape index: {}]   ;;  %s10861_s4 = inlined_call_operand.hbm [shape: bf16[9,128,128], index: 4, kind: input, shape index: {}]   ;;  %s10862_s5 = inlined_call_operand.vmem [shape: f32[1,128], index: 5, kind: input, shape index: {}]   ;;  %s10863_s6 = inlined_call_operand.vmem [shape: f32[1,128], index: 6, kind: input, shape index: {}]   ;;  %s10864_s7 = inlined_call_operand.vmem [shape: bf16[128,128], index: 7, kind: input, shape index: {}]   ;;  %s10865_s8 = inlined_call_operand.vmem [shape: f32[1,128], index: 8, kind: input, shape index: {}]   ;;  %s10866_s9 = inlined_call_operand.vmem [shape: f32[1,128], index: 9, kind: input, shape index: {}]   ;;  %s10867_s10 = inlined_call_operand.hbm [shape: bf16[2,16,16,128], index: 10, kind: output, shape index: {}]  }
   0x1   :  { %16 = vsyncpa [#allocation5], 0 }
   0x2   :  { %18 = vsyncpa [#allocation5 + $0x1], 0  ;;  %s8043_s13 = smov 0   ;;  %s8045_s14 = smov 0  }
   0x3   :  { %s8047_s15 = smov 0   ;;  %s8049_s16 = smov 0  }
   0x4 LB: > { %s8064_s17 = sadd.s32 4294967295, %s7980_s16   ;;  %s6560_s18 = sadd.s32 4294967294, %s7980_s16   ;;  %s7980_s16 = sphi %s8049_s16, %s11182_s16   ;;  %s7976_s15 = sphi %s8047_s15, %s11181_s15   ;;  %s7972_s14 = sphi %s8045_s14, %s11180_s14   ;;  %s7968_s13 = sphi %s8043_s13, %s11179_s13  }
   0x5   : > { %s8068_s19 = sadd.s32 1, %s7980_s16   ;;  %s246_s20 = sadd.s32 1, %s7976_s15 }
   0x6   : > { %s243_s21 = ssub.s32 %s7980_s16, %s8068_s19  ;;  %p256_p0 = scmp.ne.s32.totalorder %s7976_s15, %s7972_s14 }
   0x7   : > { %p244_p1 = scmp.eq.s32.totalorder %s243_s21, 0  ;;  %p257_p2 = scmp.eq.s32.totalorder %s8064_s17, 1 }
   0x8   : > { %p262_p3 = scmp.ne.s32.totalorder %s7972_s14, %s7968_s13  ;;  %p263_p4 = scmp.eq.s32.totalorder %s6560_s18, 1 }
   0x9   : > { %s8079_s22 = scalar_select %p244_p1, %s7976_s15, %s246_s20  }
   0xa   : > { %p8081_p5 = por %p257_p2, %p256_p0  ;;  %p8085_p6 = por %p263_p4, %p262_p3 }
   0xb   : > { %p6561_p7 = scmp.ge.s32.totalorder %s7980_s16, 1  ;;  %p270_p8 = scmp.lt.s32.totalorder %s7980_s16, 3 }
   0xc   : > { %p7812_p9 = scmp.eq.s32.totalorder %s8064_s17, 0  ;;  %s290_s27 = sshll.u32 %s10861_s4, 4  ;;  %s291_s27 = int_to_ptr.hbm [resolvable:$true] %s290_s27 }
   0xd   : > { %p271_p10 = pnand %p6561_p7, %p270_p8  ;;  %s7982_s28 = smov [#allocation3]  }
   0xe   : > { %s292_s29 = sshll.u32 %s7982_s28, 4  ;;  %s7983_s30 = smov 64   ;;  %s293_s29 = int_to_ptr.vmem [resolvable:$true] %s292_s29 }
   0xf   : > { %p7804_p11 = pneg %p271_p10  ;;  %s7984_s11 = smov 4  }
  0x10   : > { %331 = sbr.rel (%p271_p10) target bundleno = 1572 (0x624), region = 60 }
  0x11   : > { %p7805_p12 = pnand %p7812_p9, %p7804_p11 }
  0x13   : > { %7807 = dma.hbm_to_vmem [thread:$0]  (!%p7805_p12), %s291_s27, 9216, %s293_s29, [#allocation4], %s7983_s30, %s7983_s30, %s7984_s11  }
  0x15   : > { %7959 = dma.done.wait (%p7812_p9), [#allocation4], 9216  }
  0x16   : > { %7961 = vsyncadd (%p7812_p9), [#allocation4], 4294958080  ;;  %p370_p13 = scmp.lt.s32.totalorder %s8064_s17, 1  ;;  %v7522_v0 = vld [vmem:[%s10858_s1 + $0x78] sm:$0xff]  ;;  %v7521_v3 = vld [vmem:[%s10858_s1 + $0x70] sm:$0xff]  ;;  %vm1300_vm2 = vcmask 1042432  }
  0x17   : > { %v8109_v1 = vld [vmem:[%s10858_s1 + $0x38] sm:$0xff]  ;;  %962 = vmatpush.bf16.msra.mxu0 %v7522_v0  ;;  %7773 = vmatpush.bf16.msra.mxu3 %v7522_v0  ;;  %v8124_v4 = vld [vmem:[%s10858_s1 + $0x30] sm:$0xff]  ;;  %v7520_v6 = vld [vmem:[%s10858_s1 + $0x68] sm:$0xff]  ;;  %vm446_vm0 = vsmask.f32 3328  ;;  %vm1301_vm3 = vcmask 1046532  }
  0x18   : > { %s371_s12 = scalar_select %p370_p13, %s8064_s17, 1  ;;  %v8114_v2 = vld [vmem:[%s10858_s1 + $0xb8] sm:$0xff]  ;;  %1195 = vmatpush.bf16.msra.mxu1 %v8109_v1  ;;  %v8129_v5 = vld [vmem:[%s10858_s1 + $0xb0] sm:$0xff]  ;;  %v8144_v7 = vld [vmem:[%s10858_s1 + $0x28] sm:$0xff]  ;;  %vm447_vm1 = vsmask.f32 7440 }
  0x19   : > { %1544 = vmatpush.bf16.msra.mxu2 %v8114_v2  ;;  %v8149_v8 = vld [vmem:[%s10858_s1 + $0xa8] sm:$0xff]  ;;  %v7519_v9 = vld [vmem:[%s10858_s1 + $0x60] sm:$0xff]  ;;  %v7518_v31 = vld [vmem:[%s10858_s1 + $0x58] sm:$0xff]  ;;  %v10947_v48 = vmov 0  ;;  %vm3017_vm6 = vcmask 1040384   ;;  %vm3440_vm11 = vcmask 1043456  }
  0x1a   : > { %s7797_s28 = smul.u32 216, %s371_s12  ;;  %v8173_v18 = vld [vmem:[%s10858_s1 + $0x20] sm:$0xff]  ;;  %v8202_v35 = vld [vmem:[%s10858_s1 + $0x18] sm:$0xff]  ;;  %vm8219_vm4 = vmor %vm1300_vm2, %vm1301_vm3  ;;  %vm3018_vm7 = vsmask.f32 256  ;;  %s367_s18 = sand.u32 1, %s7972_s14  }
  0x1b   : > { %963 = vmatpush.bf16.msra.mxu0 %v7521_v3  ;;  %7774 = vmatpush.bf16.msra.mxu3 %v7521_v3  ;;  %v8178_v19 = vld [vmem:[%s10858_s1 + $0xa0] sm:$0xff]  ;;  %v8207_v36 = vld [vmem:[%s10858_s1 + $0x98] sm:$0xff]  ;;  %v10948_v48 = vsel %vm8219_vm4, 4294967295, %v10947_v48  ;;  %v7517_v53 = vld [vmem:[%s10858_s1 + $0x50] sm:$0xff]  ;;  %vm3068_vm9 = vsmask.f32 7938 }
  0x1c   : > { %s8134_s26 = scalar_lea.vmem %s10857_s0, %s7797_s28  ;;  %1196 = vmatpush.bf16.msra.mxu1 %v8124_v4  ;;  %10949 = vst [vmem:[#allocation9_spill] sm:$0xff] %v10948_v48  ;;  %vm8232_vm5 = vmor %vm446_vm0, %vm447_vm1  ;;  %v8241_v57 = vld [vmem:[%s10858_s1 + $0x10] sm:$0xff]  ;;  %vm3118_vm13 = vsmask.f32 4368  ;;  %s7677_s21 = sshll.u32 %s8064_s17, 7 }
  0x1d   : > { %1545 = vmatpush.bf16.msra.mxu2 %v8129_v5  ;;  %v8155_v10 = vld [vmem:[%s8134_s26] sm:$0xf]  ;;  %v8158_v11 = vld [vmem:[%s8134_s26 + $0x4] sm:$0xf]  ;;  %v8161_v12 = vld [vmem:[%s8134_s26 + $0x8] sm:$0x1]  ;;  %s6482_s27 = scalar_lea.hbm %s10867_s10, %s7677_s21 }
  0x1e   : > { %v450_v13 = vshrl.u32 %v8155_v10, 16  ;;  %v453_v14 = vshll.u32 %v8155_v10, 16  ;;  %v459_v15 = vshll.u32 %v8158_v11, 16  ;;  %v463_v16 = vshrl.u32 %v8158_v11, 16  ;;  %v8168_v17 = vld [vmem:[%s8134_s26 + $0x90] sm:$0xf]  ;;  %vm9214_vm8 = vmand %vm3017_vm6, %vm3018_vm7 }
  0x1f   : > { %964 = vmatpush.bf16.msra.mxu0 %v7520_v6  ;;  %7775 = vmatpush.bf16.msra.mxu3 %v7520_v6  ;;  %v469_v20 = vshll.u32 %v8161_v12, 16  ;;  %v8182_v21 = vld [vmem:[%s8134_s26 + $0x94] sm:$0xf]  ;;  %v738_v22 = vshrl.u32 %v8168_v17, 16  ;;  %v8190_v27 = vld [vmem:[%s8134_s26 + $0x98] sm:$0x1]  ;;  %vm9234_vm10 = vmand %vm3017_vm6, %vm3068_vm9 }
  0x20   : > { %1197 = vmatpush.bf16.msra.mxu1 %v8144_v7  ;;  %v452_v23 = vrot.slane %v450_v13, 4  ;;  %v455_v24 = vrot.slane %v453_v14, 5  ;;  %v8187_v25 = vrot.slane %v459_v15, 5  ;;  %v465_v26 = vrot.slane %v463_v16, 4  ;;  %v8215_v45 = vld [vmem:[%s8134_s26 + $0xc] sm:$0xf]  ;;  %vm9277_vm12 = vmand %vm3440_vm11, %vm3068_vm9 }
  0x21   : > { %1546 = vmatpush.bf16.msra.mxu2 %v8149_v8  ;;  %v740_v28 = vrot.slane %v738_v22, 4  ;;  %v741_v29 = vshll.u32 %v8168_v17, 16  ;;  %v747_v30 = vshll.u32 %v8182_v21, 16  ;;  %v751_v34 = vshrl.u32 %v8182_v21, 16  ;;  %v8225_v51 = vld [vmem:[%s8134_s26 + $0x10] sm:$0xf]  ;;  %vm9289_vm14 = vmor %vm3018_vm7, %vm3118_vm13 }
  0x22   : > { %v456_v32 = vor.u32 %v455_v24, %v452_v23  ;;  %v466_v33 = vor.u32 %v465_v26, %v8187_v25  ;;  %v757_v39 = vshll.u32 %v8190_v27, 16  ;;  %v1305_v40 = vrot.slane %v8158_v11, 5  ;;  %v8246_v58 = vld [vmem:[%s10858_s1 + $0x90] sm:$0xff]  ;;  %v8255_v3 = vld [vmem:[%s8134_s26 + $0x9c] sm:$0xf]  ;;  %v7516_v13 = vld [vmem:[%s10858_s1 + $0x48] sm:$0xff] }
  0x23   : > { %965 = vmatpush.bf16.msra.mxu0 %v7519_v9  ;;  %7776 = vmatpush.bf16.msra.mxu3 %v7519_v9  ;;  %v743_v37 = vrot.slane %v741_v29, 5  ;;  %v749_v38 = vrot.slane %v747_v30, 5  ;;  %v471_v42 = vrot.slane %v469_v20, 5  ;;  %v753_v43 = vrot.slane %v751_v34, 4  ;;  %v8258_v6 = vld [vmem:[%s8134_s26 + $0xa0] sm:$0xf] }
  0x24   : > { %1198 = vmatpush.bf16.msra.mxu1 %v8173_v18  ;;  %v457_v41 = vrot.slane %v456_v32, 4  ;;  %v6712_v44 = vrot.slane %v8155_v10, 9  ;;  %v467_v46 = vrot.slane %v466_v33, 4  ;;  %v1307_v49 = vrot.slane %v1305_v40, 4  ;;  %v8281_v22 = vld [vmem:[%s10858_s1 + $0x8] sm:$0xff]  ;;  %s6485_s30 = sshll.u32 %s6482_s27, 4  ;;  %s6486_s30 = int_to_ptr.hbm [resolvable:$true] %s6485_s30 }
  0x25   : > { %1547 = vmatpush.bf16.msra.mxu2 %v8178_v19  ;;  %v744_v47 = vor.u32 %v743_v37, %v740_v28  ;;  %v1308_v50 = vrot.slane %v8161_v12, 5  ;;  %v754_v52 = vor.u32 %v753_v43, %v749_v38  ;;  %v759_v56 = vrot.slane %v757_v39, 5  ;;  %v8286_v23 = vld [vmem:[%s10858_s1 + $0x88] sm:$0xff]  ;;  %v8292_v32 = vld [vmem:[%s8134_s26 + $0x14] sm:$0x1]  ;;  %s6471_s17 = scalar_lea.sflag [#allocation5], %s367_s18 }
  0x26   : > { %v474_v60 = vshrl.u32 %v8215_v45, 16  ;;  %v477_v61 = vshll.u32 %v8215_v45, 16  ;;  %v1306_v62 = vsel %vm8219_vm4, %v6712_v44, %v1305_v40  ;;  %v483_v63 = vshll.u32 %v8225_v51, 16  ;;  %v7515_v40 = vld [vmem:[%s10858_s1 + $0x40] sm:$0xff]  ;;  %s7928_s11 = sshra.s32 %s6486_s30, 4  ;;  %s7934_s12 = scalar_lea.hbm %s10867_s10, 256  ;;  %s7929_s11 = int_to_ptr.hbm [resolvable:$true] %s7928_s11 }
  0x27   : > { %966 = vmatpush.bf16.msra.mxu0 %v7518_v31  ;;  %7777 = vmatpush.bf16.msra.mxu3 %v7518_v31  ;;  %v745_v55 = vrot.slane %v744_v47, 4  ;;  %v755_v59 = vrot.slane %v754_v52, 4  ;;  %v487_v0 = vshrl.u32 %v8225_v51, 16  ;;  %v462_v9 = vsel %vm8232_vm5, %v457_v41, %v8187_v25  ;;  %v8310_v47 = vld [vmem:[%s10858_s1 + $0x80] sm:$0xff]  ;;  %s7930_s28 = scalar_lea.hbm %s7929_s11, 128  ;;  %p7935_p3 = scmp.lt.s32.totalorder %s7929_s11, %s10867_s10 }
  0x28   : > { %1199 = vmatpush.bf16.msra.mxu1 %v8202_v35  ;;  %v472_v10 = vsel %vm8232_vm5, %v467_v46, %v471_v42  ;;  %v1309_v11 = vsel %vm8219_vm4, %v1307_v49, %v1308_v50  ;;  %v476_v12 = vrot.slane %v474_v60, 4  ;;  %v479_v16 = vrot.slane %v477_v61, 5  ;;  %v8305_v46 = vld [vmem:[%s10858_s1] sm:$0xff]  ;;  %p7931_p0 = scmp.ne.s32.totalorder %s7929_s11, %s7930_s28  ;;  %p7936_p4 = scmp.lt.s32.totalorder %s7934_s12, %s7930_s28 }
  0x29   : > { %1548 = vmatpush.bf16.msra.mxu2 %v8207_v36  ;;  %v750_v14 = vsel %vm8232_vm5, %v745_v55, %v749_v38  ;;  %v760_v15 = vsel %vm8232_vm5, %v755_v59, %v759_v56  ;;  %v8274_v20 = vrot.slane %v483_v63, 5  ;;  %v489_v24 = vrot.slane %v487_v0, 4  ;;  %v8315_v52 = vld [vmem:[%s8134_s26 + $0xa4] sm:$0x1] }
  0x2a   : > { %v762_v25 = vshrl.u32 %v8255_v3, 16  ;;  %v765_v26 = vshll.u32 %v8255_v3, 16  ;;  %v771_v28 = vshll.u32 %v8258_v6, 16  ;;  %v850_v29 = vunpack.c.l.b16 %v462_v9  ;;  %v7489_v60 = vld [vmem:[%s8134_s26] sm:$0xff]  ;;  %p7932_p1 = pnand %p7931_p0, %p8081_p5  ;;  %p7937_p7 = por %p7936_p4, %p7935_p3 }
  0x2b   : > { %967 = vmatpush.bf16.msra.mxu0 %v7517_v53  ;;  %7778 = vmatpush.bf16.msra.mxu3 %v7517_v53  ;;  %v851_v30 = vunpack.c.l.b16 %v472_v10  ;;  %v1432_v31 = vunpack.c.l.b16 %v1306_v62  ;;  %v775_v33 = vshrl.u32 %v8258_v6, 16  ;;  %v874_v34 = vunpack.c.l.b16 %v750_v14  ;;  %v7546_v53 = vld [vmem:[%s10858_s1 + $0x138] sm:$0xff] }
  0x2c   : > { %1200 = vmatpush.bf16.msra.mxu1 %v8241_v57  ;;  %v875_v37 = vunpack.c.l.b16 %v760_v15  ;;  %v1433_v38 = vunpack.c.l.b16 %v1309_v11  ;;  %v480_v39 = vor.u32 %v479_v16, %v476_v12  ;;  %v764_v41 = vrot.slane %v762_v25, 4  ;;  %v8330_v12 = vld [vmem:[%s8134_s26 + $0x18] sm:$0xf]  ;;  %v8336_v15 = vld [vmem:[%s8134_s26 + $0x1c] sm:$0xf]  ;;  %p7933_p2 = pneg %p7932_p1 }
  0x2d   : > { %1549 = vmatpush.bf16.msra.mxu2 %v8246_v58  ;;  %v767_v42 = vrot.slane %v765_v26, 5  ;;  %v8298_v43 = vrot.slane %v771_v28, 5  ;;  %v777_v44 = vrot.slane %v775_v33, 4  ;;  %v490_v49 = vor.u32 %v489_v24, %v8274_v20  ;;  %v8339_v16 = vld [vmem:[%s8134_s26 + $0xa8] sm:$0xf] }
  0x2e   : > { %v493_v50 = vshll.u32 %v8292_v32, 16  ;;  %v882_v55 = vpack.c.b16 %v851_v30, %v850_v29  ;;  %v8320_v56 = vpack.c.b16 %v875_v37, %v874_v34  ;;  %v1464_v59 = vpack.c.b16 %v1433_v38, %v1432_v31  ;;  %v8345_v26 = vld [vmem:[%s8134_s26 + $0xac] sm:$0xf]  ;;  %p7938_p8 = pnand %p7937_p7, %p7933_p2 }
  0x2f   : > { %968 = vmatpush.bf16.msra.mxu0 %v7516_v13  ;;  %7779 = vmatpush.bf16.msra.mxu3 %v7516_v13  ;;  %v481_v61 = vrot.slane %v480_v39, 4  ;;  %v768_v62 = vor.u32 %v767_v42, %v764_v41  ;;  %v778_v63 = vor.u32 %v777_v44, %v8298_v43  ;;  %v781_v0 = vshll.u32 %v8315_v52, 16 }
  0x30   : > { %1201 = vmatpush.bf16.msra.mxu1 %v8281_v22  ;;  %10952 = vst [vmem:[#allocation10_spill] sm:$0xff] %v8320_v56  ;;  %v491_v9 = vrot.slane %v490_v49, 4  ;;  %v495_v10 = vrot.slane %v493_v50, 5  ;;  %v1312_v11 = vrot.slane %v8225_v51, 5  ;;  %v6713_v13 = vrot.slane %v8215_v45, 9  ;;  %v7545_v45 = vld [vmem:[%s10858_s1 + $0x130] sm:$0xff] }
  0x31   : > { %1550 = vmatpush.bf16.msra.mxu2 %v8286_v23  ;;  %v1315_v14 = vrot.slane %v8292_v32, 5  ;;  %v769_v51 = vrot.slane %v768_v62, 4  ;;  %v779_v24 = vrot.slane %v778_v63, 4  ;;  %v783_v25 = vrot.slane %v781_v0, 5  ;;  %v384_v62 = vld [vmem:[%s8134_s26 + $0x20] sm:$0x1] }
  0x32   : > { %v496_v28 = vsel %vm8232_vm5, %v491_v9, %v495_v10  ;;  %v1314_v29 = vrot.slane %v1312_v11, 4  ;;  %v498_v30 = vshrl.u32 %v8330_v12, 16  ;;  %v501_v31 = vshll.u32 %v8330_v12, 16 }
  0x33   : > { %969 = vmatpush.bf16.msra.mxu0 %v7515_v40  ;;  %7780 = vmatpush.bf16.msra.mxu3 %v7515_v40  ;;  %v511_v32 = vshrl.u32 %v8336_v15, 16  ;;  %v786_v33 = vshrl.u32 %v8339_v16, 16  ;;  %v789_v34 = vshll.u32 %v8339_v16, 16  ;;  %v795_v37 = vshll.u32 %v8345_v26, 16 }
  0x34   : > { %1202 = vmatpush.bf16.msra.mxu1 %v8305_v46  ;;  %v799_v38 = vshrl.u32 %v8345_v26, 16  ;;  %v853_v40 = vunpack.c.l.b16 %v496_v28  ;;  %v784_v41 = vsel %vm8232_vm5, %v779_v24, %v783_v25  ;;  %v1313_v42 = vsel %vm8219_vm4, %v6713_v13, %v1312_v11  ;;  %v8373_v11 = vld [vmem:[%s8134_s26 + $0xb0] sm:$0x1] }
  0x35   : > { %1551 = vmatpush.bf16.msra.mxu2 %v8310_v47  ;;  %v1316_v44 = vsel %vm8219_vm4, %v1314_v29, %v1315_v14  ;;  %v500_v49 = vrot.slane %v498_v30, 4  ;;  %v503_v50 = vrot.slane %v501_v31, 5  ;;  %v797_v63 = vrot.slane %v795_v37, 5  ;;  %v7490_v29 = vld [vmem:[%s8134_s26 + $0xc] sm:$0xff] }
  0x36   : > { %970 = vmatmul.bf16.vlgmr.msra.gmra.mxu0 %v882_v55  ;;  %1030 = vmatmul.bf16.vlgmr.msra.gmra.mxu3 %v8320_v56  ;;  %v513_v55 = vrot.slane %v511_v32, 4  ;;  %v801_v0 = vrot.slane %v799_v38, 4  ;;  %v1434_v9 = vunpack.c.l.b16 %v1313_v42  ;;  %v1435_v10 = vunpack.c.l.b16 %v1316_v44  ;;  %v8407_v42 = vld [vmem:[%s8134_s26 + $0xb8] sm:$0xf] }
  0x37   : > { %7781 = vmatpush.bf16.msrb.mxu3 %v8109_v1  ;;  %1950 = vmatpush.bf16.msrb.mxu0 %v7546_v53  ;;  %v486_v1 = vsel %vm8232_vm5, %v481_v61, %v8274_v20  ;;  %v507_v20 = vshll.u32 %v8336_v15, 16  ;;  %v504_v13 = vor.u32 %v503_v50, %v500_v49  ;;  %v1319_v28 = vrot.slane %v8336_v15, 5 }
  0x38   : > { %1203 = vmatmul.bf16.vlgmr.msra.gmra.mxu1 %v7489_v60  ;;  %1552 = vmatmul.bf16.vlgmr.msra.gmra.mxu2 %v1464_v59  ;;  %v852_v39 = vunpack.c.l.b16 %v486_v1  ;;  %v788_v59 = vrot.slane %v786_v33, 4  ;;  %v791_v60 = vrot.slane %v789_v34, 5  ;;  %v517_v1 = vshll.u32 %v384_v62, 16 }
  0x39   : > { %v509_v53 = vrot.slane %v507_v20, 5  ;;  %v802_v25 = vor.u32 %v801_v0, %v797_v63  ;;  %v8383_v30 = vpack.c.b16 %v1435_v10, %v1434_v9  ;;  %v505_v31 = vrot.slane %v504_v13, 4 }
  0x3a   : > { %v8375_v14 = vpack.c.b16 %v853_v40, %v852_v39  ;;  %v6714_v20 = vrot.slane %v8330_v12, 9  ;;  %v1321_v37 = vrot.slane %v1319_v28, 4  ;;  %v1322_v38 = vrot.slane %v384_v62, 5  ;;  %v8390_v39 = vld [vmem:[%s8134_s26 + $0x24] sm:$0xf]  ;;  %v7544_v40 = vld [vmem:[%s10858_s1 + $0x128] sm:$0xff] }
  0x3b   : > { %7782 = vmatpush.bf16.msrb.mxu3 %v8124_v4  ;;  %1951 = vmatpush.bf16.msrb.mxu0 %v7545_v45  ;;  %v774_v4 = vsel %vm8232_vm5, %v769_v51, %v8298_v43  ;;  %v877_v43 = vunpack.c.l.b16 %v784_v41  ;;  %v792_v51 = vor.u32 %v791_v60, %v788_v59  ;;  %v805_v45 = vshll.u32 %v8373_v11, 16  ;;  %v8394_v12 = vld [vmem:[%s8134_s26 + $0x28] sm:$0xf]  ;;  %v8404_v41 = vld [vmem:[%s8134_s26 + $0xb4] sm:$0xf] }
  0x3c   : > { %v876_v61 = vunpack.c.l.b16 %v774_v4  ;;  %10953 = vst [vmem:[#allocation11_spill] sm:$0xff] %v8375_v14  ;;  %v803_v34 = vrot.slane %v802_v25, 4  ;;  %v1320_v4 = vsel %vm8219_vm4, %v6714_v20, %v1319_v28  ;;  %v522_v50 = vshrl.u32 %v8390_v39, 16 }
  0x3d   : > { %v793_v33 = vrot.slane %v792_v51, 4  ;;  %v807_v15 = vrot.slane %v805_v45, 5  ;;  %v1323_v59 = vsel %vm8219_vm4, %v1321_v37, %v1322_v38  ;;  %v531_v60 = vshll.u32 %v8394_v12, 16 }
  0x3e   : > { %v8378_v24 = vpack.c.b16 %v877_v43, %v876_v61  ;;  %v535_v61 = vshrl.u32 %v8394_v12, 16  ;;  %v810_v43 = vshrl.u32 %v8404_v41, 16  ;;  %v819_v62 = vshll.u32 %v8407_v42, 16 }
  0x3f   : > { %7783 = vmatpush.bf16.msrb.mxu3 %v8144_v7  ;;  %v514_v7 = vor.u32 %v513_v55, %v509_v53  ;;  %v798_v49 = vsel %vm8232_vm5, %v793_v33, %v797_v63  ;;  %v525_v55 = vshll.u32 %v8390_v39, 16  ;;  %1952 = vmatpush.bf16.msrb.mxu0 %v7544_v40  ;;  %v823_v63 = vshrl.u32 %v8407_v42, 16  ;;  %v8429_v33 = vld [vmem:[%s8134_s26 + $0xbc] sm:$0x1] }
  0x40   : > { %10954 = vst [vmem:[#allocation12_spill] sm:$0xff] %v8378_v24  ;;  %v1436_v9 = vunpack.c.l.b16 %v1320_v4  ;;  %v878_v13 = vunpack.c.l.b16 %v798_v49  ;;  %v1437_v25 = vunpack.c.l.b16 %v1323_v59  ;;  %v533_v45 = vrot.slane %v531_v60, 5 }
  0x41   : > { %v515_v32 = vrot.slane %v514_v7, 4  ;;  %v524_v7 = vrot.slane %v522_v50, 4  ;;  %v537_v28 = vrot.slane %v535_v61, 4  ;;  %v1326_v40 = vrot.slane %v8394_v12, 5 }
  0x42   : > { %v8441_v4 = vpack.c.b16 %v1437_v25, %v1436_v9  ;;  %v829_v50 = vshll.u32 %v8429_v33, 16 }
  0x43   : > { %7784 = vmatpush.bf16.msrb.mxu3 %v8173_v18  ;;  %v519_v18 = vrot.slane %v517_v1, 5  ;;  %v527_v1 = vrot.slane %v525_v55, 5 }
  0x45   : > { %v520_v44 = vsel %vm8232_vm5, %v515_v32, %v519_v18  ;;  %v821_v32 = vrot.slane %v819_v62, 5  ;;  %v825_v18 = vrot.slane %v823_v63, 4  ;;  %v389_v62 = vld [vmem:[%s8134_s26 + $0x34] sm:$0xf] }
  0x46   : > { %975 = vmatmul.bf16.gmra.mxu0 %v8375_v14  ;;  %1035 = vmatmul.bf16.gmra.mxu3 %v8378_v24  ;;  %v855_v10 = vunpack.c.l.b16 %v520_v44 }
  0x47   : > { %7785 = vmatpush.bf16.msrb.mxu3 %v8202_v35  ;;  %v510_v35 = vsel %vm8232_vm5, %v505_v31, %v509_v53  ;;  %v808_v53 = vsel %vm8232_vm5, %v803_v34, %v807_v15  ;;  %v812_v31 = vrot.slane %v810_v43, 4  ;;  %v528_v15 = vor.u32 %v527_v1, %v524_v7 }
  0x48   : > { %1208 = vmatmul.bf16.gmra.mxu1 %v7490_v29  ;;  %1557 = vmatmul.bf16.gmra.mxu2 %v8383_v30  ;;  %v854_v0 = vunpack.c.l.b16 %v510_v35  ;;  %v879_v51 = vunpack.c.l.b16 %v808_v53  ;;  %v387_v29 = vld [vmem:[%s8134_s26 + $0x2c] sm:$0x1]  ;;  %v8439_v35 = vld [vmem:[%s8134_s26 + $0x18] sm:$0xff]  ;;  %v826_v49 = vor.u32 %v825_v18, %v821_v32  ;;  %v831_v43 = vrot.slane %v829_v50, 5 }
  0x49   : > { %v541_v38 = vshll.u32 %v387_v29, 16  ;;  %v529_v55 = vrot.slane %v528_v15, 4  ;;  %v1329_v59 = vrot.slane %v387_v29, 5  ;;  %v555_v1 = vshll.u32 %v389_v62, 16 }
  0x4a   : > { %v8431_v34 = vpack.c.b16 %v855_v10, %v854_v0  ;;  %v8434_v37 = vpack.c.b16 %v879_v51, %v878_v13  ;;  %v827_v61 = vrot.slane %v826_v49, 4  ;;  %v559_v51 = vshrl.u32 %v389_v62, 16 }
  0x4b   : > { %7786 = vmatpush.bf16.msrb.mxu3 %v8241_v57  ;;  %v813_v57 = vshll.u32 %v8404_v41, 16  ;;  %v543_v53 = vrot.slane %v541_v38, 5 }
  0x4c   : > { %10955 = vst [vmem:[#allocation13_spill] sm:$0xff] %v8431_v34  ;;  %v561_v38 = vrot.slane %v559_v51, 4 }
  0x4d   : > { %v815_v20 = vrot.slane %v813_v57, 5  ;;  %10956 = vst [vmem:[#allocation14_spill] sm:$0xff] %v8434_v37  ;;  %v388_v57 = vld [vmem:[%s8134_s26 + $0x30] sm:$0xf] }
  0x4e   : > { %v546_v10 = vshrl.u32 %v388_v57, 16  ;;  %v549_v13 = vshll.u32 %v388_v57, 16 }
  0x4f   : > { %7787 = vmatpush.bf16.msrb.mxu3 %v8281_v22  ;;  %v538_v22 = vor.u32 %v537_v28, %v533_v45  ;;  %v816_v44 = vor.u32 %v815_v20, %v812_v31 }
  0x50   : > { %v548_v18 = vrot.slane %v546_v10, 4  ;;  %v551_v15 = vrot.slane %v549_v13, 5 }
  0x51   : > { %v539_v12 = vrot.slane %v538_v22, 4  ;;  %v817_v60 = vrot.slane %v816_v44, 4  ;;  %v557_v22 = vrot.slane %v555_v1, 5 }
  0x52   : > { %v552_v50 = vor.u32 %v551_v15, %v548_v18 }
  0x53   : > { %7788 = vmatpush.bf16.msrb.mxu3 %v8305_v46  ;;  %v6715_v46 = vrot.slane %v8390_v39, 9  ;;  %v534_v39 = vsel %vm8232_vm5, %v529_v55, %v533_v45  ;;  %v544_v0 = vsel %vm8232_vm5, %v539_v12, %v543_v53  ;;  %v822_v7 = vsel %vm8232_vm5, %v817_v60, %v821_v32  ;;  %v390_v32 = vld [vmem:[%s8134_s26 + $0x38] sm:$0x1]  ;;  %v392_v60 = vld [vmem:[%s8134_s26 + $0x40] sm:$0xf] }
  0x54   : > { %v856_v25 = vunpack.c.l.b16 %v534_v39  ;;  %v857_v28 = vunpack.c.l.b16 %v544_v0  ;;  %v880_v29 = vunpack.c.l.b16 %v822_v7  ;;  %v562_v55 = vor.u32 %v561_v38, %v557_v22 }
  0x55   : > { %v1327_v63 = vsel %vm8219_vm4, %v6715_v46, %v1326_v40  ;;  %v565_v46 = vshll.u32 %v390_v32, 16  ;;  %v1333_v12 = vrot.slane %v389_v62, 5  ;;  %v553_v53 = vrot.slane %v552_v50, 4 }
  0x56   : > { %980 = vmatmul.bf16.gmra.mxu0 %v8431_v34  ;;  %1040 = vmatmul.bf16.gmra.mxu3 %v8434_v37  ;;  %v1438_v45 = vunpack.c.l.b16 %v1327_v63  ;;  %v579_v0 = vshll.u32 %v392_v60, 16 }
  0x57   : > { %7789 = vmatpush.bf16.msra.mxu3 %v8114_v2  ;;  %v1328_v2 = vrot.slane %v1326_v40, 4  ;;  %v8467_v40 = vpack.c.b16 %v857_v28, %v856_v25  ;;  %v1335_v62 = vrot.slane %v1333_v12, 4  ;;  %v558_v10 = vsel %vm8232_vm5, %v553_v53, %v557_v22  ;;  %v393_v25 = vld [vmem:[%s8134_s26 + $0x44] sm:$0x1]  ;;  %v7501_v22 = vld [vmem:[%s8134_s26 + $0x90] sm:$0xff] }
  0x58   : > { %1213 = vmatmul.bf16.gmra.mxu1 %v8439_v35  ;;  %1562 = vmatmul.bf16.gmra.mxu2 %v8441_v4  ;;  %v858_v1 = vunpack.c.l.b16 %v558_v10  ;;  %v589_v18 = vshll.u32 %v393_v25, 16 }
  0x59   : > { %v1330_v9 = vsel %vm8219_vm4, %v1328_v2, %v1329_v59  ;;  %10957 = vst [vmem:[#allocation15_spill] sm:$0xff] %v8467_v40  ;;  %v563_v2 = vrot.slane %v562_v55, 4  ;;  %v567_v59 = vrot.slane %v565_v46, 5 }
  0x5a   : > { %v1439_v20 = vunpack.c.l.b16 %v1330_v9  ;;  %v583_v9 = vshrl.u32 %v392_v60, 16  ;;  %v591_v46 = vrot.slane %v589_v18, 5 }
  0x5b   : > { %7790 = vmatpush.bf16.msra.mxu3 %v8129_v5  ;;  %v832_v5 = vsel %vm8232_vm5, %v827_v61, %v831_v43  ;;  %v7543_v61 = vld [vmem:[%s10858_s1 + $0x120] sm:$0xff]  ;;  %v6716_v43 = vrot.slane %v388_v57, 9  ;;  %v568_v13 = vsel %vm8232_vm5, %v563_v2, %v567_v59  ;;  %v1343_v2 = vrot.slane %v393_v25, 5  ;;  %v7542_v59 = vld [vmem:[%s10858_s1 + $0x118] sm:$0xff]  ;;  %v396_v25 = vld [vmem:[%s8134_s26 + $0x50] sm:$0x1] }
  0x5c   : > { %v881_v31 = vunpack.c.l.b16 %v832_v5  ;;  %v8474_v49 = vpack.c.b16 %v1439_v20, %v1438_v45  ;;  %1953 = vmatpush.bf16.msrb.mxu0 %v7543_v61  ;;  %v859_v51 = vunpack.c.l.b16 %v568_v13  ;;  %v581_v45 = vrot.slane %v579_v0, 5  ;;  %v395_v61 = vld [vmem:[%s8134_s26 + $0x4c] sm:$0xf] }
  0x5d   : > { %v1334_v7 = vsel %vm8219_vm4, %v6716_v43, %v1333_v12  ;;  %v585_v28 = vrot.slane %v583_v9, 4  ;;  %v603_v0 = vshll.u32 %v395_v61, 16  ;;  %v607_v9 = vshrl.u32 %v395_v61, 16 }
  0x5e   : > { %v8469_v44 = vpack.c.b16 %v881_v31, %v880_v29  ;;  %v1440_v29 = vunpack.c.l.b16 %v1334_v7  ;;  %v8498_v15 = vpack.c.b16 %v859_v51, %v858_v1 }
  0x5f   : > { %7791 = vmatpush.bf16.msra.mxu3 %v8149_v8  ;;  %v8472_v8 = vld [vmem:[%s8134_s26 + $0x24] sm:$0xff]  ;;  %v586_v38 = vor.u32 %v585_v28, %v581_v45  ;;  %v605_v1 = vrot.slane %v603_v0, 5  ;;  %v609_v51 = vrot.slane %v607_v9, 4  ;;  %v7502_v28 = vld [vmem:[%s8134_s26 + $0x9c] sm:$0xff] }
  0x60   : > { %10958 = vst [vmem:[#allocation16_spill] sm:$0xff] %v8469_v44  ;;  %1954 = vmatpush.bf16.msrb.mxu0 %v7542_v59  ;;  %v1350_v59 = vrot.slane %v396_v25, 5 }
  0x61   : > { %10959 = vst [vmem:[#allocation17_spill] sm:$0xff] %v8498_v15  ;;  %v587_v12 = vrot.slane %v586_v38, 4  ;;  %v610_v18 = vor.u32 %v609_v51, %v605_v1  ;;  %v1347_v38 = vrot.slane %v395_v61, 5 }
  0x63   : > { %7792 = vmatpush.bf16.msra.mxu3 %v8178_v19  ;;  %v391_v19 = vld [vmem:[%s8134_s26 + $0x3c] sm:$0xf] }
  0x64   : > { %v570_v39 = vshrl.u32 %v391_v19, 16  ;;  %v573_v63 = vshll.u32 %v391_v19, 16 }
  0x66   : > { %985 = vmatmul.bf16.gmra.mxu0 %v8467_v40  ;;  %1045 = vmatmul.bf16.gmra.mxu3 %v8469_v44  ;;  %v575_v5 = vrot.slane %v573_v63, 5 }
  0x67   : > { %7793 = vmatpush.bf16.msra.mxu3 %v8207_v36  ;;  %v1336_v36 = vrot.slane %v390_v32, 5  ;;  %v8502_v32 = vld [vmem:[%s8134_s26 + $0x30] sm:$0xff] }
  0x68   : > { %1218 = vmatmul.bf16.gmra.mxu1 %v8472_v8  ;;  %1567 = vmatmul.bf16.gmra.mxu2 %v8474_v49 }
  0x69   : > { %v1337_v57 = vsel %vm8219_vm4, %v1335_v62, %v1336_v36 }
  0x6a   : > { %v1441_v31 = vunpack.c.l.b16 %v1337_v57 }
  0x6b   : > { %7794 = vmatpush.bf16.msra.mxu3 %v8246_v58  ;;  %v572_v58 = vrot.slane %v570_v39, 4 }
  0x6c   : > { %v8504_v50 = vpack.c.b16 %v1441_v31, %v1440_v29  ;;  %v8527_v29 = vld [vmem:[%s8134_s26 + $0x3c] sm:$0xff] }
  0x6d   : > { %v576_v20 = vor.u32 %v575_v5, %v572_v58 }
  0x6e   : > { %10960 = vst [vmem:[#allocation18_spill] sm:$0xff] %v8504_v50 }
  0x6f   : > { %7795 = vmatpush.bf16.msra.mxu3 %v8286_v23  ;;  %v1340_v23 = vrot.slane %v392_v60, 5  ;;  %v577_v55 = vrot.slane %v576_v20, 4  ;;  %v394_v60 = vld [vmem:[%s8134_s26 + $0x48] sm:$0xf] }
  0x70   : > { %v594_v39 = vshrl.u32 %v394_v60, 16  ;;  %v597_v63 = vshll.u32 %v394_v60, 16 }
  0x71   : > { %v1342_v53 = vrot.slane %v1340_v23, 4  ;;  %v582_v43 = vsel %vm8232_vm5, %v577_v55, %v581_v45  ;;  %v398_v55 = vld [vmem:[%s8134_s26 + $0x58] sm:$0xf] }
  0x72   : > { %v860_v10 = vunpack.c.l.b16 %v582_v43  ;;  %v596_v58 = vrot.slane %v594_v39, 4  ;;  %v599_v5 = vrot.slane %v597_v63, 5  ;;  %v631_v61 = vshrl.u32 %v398_v55, 16 }
  0x73   : > { %7796 = vmatpush.bf16.msra.mxu3 %v8310_v47  ;;  %v6717_v47 = vrot.slane %v391_v19, 9  ;;  %v592_v19 = vsel %vm8232_vm5, %v587_v12, %v591_v46  ;;  %v1344_v36 = vsel %vm8219_vm4, %v1342_v53, %v1343_v2  ;;  %v611_v12 = vrot.slane %v610_v18, 4  ;;  %v7503_v18 = vld [vmem:[%s8134_s26 + $0xa8] sm:$0xff] }
  0x74   : > { %v861_v13 = vunpack.c.l.b16 %v592_v19  ;;  %v1443_v57 = vunpack.c.l.b16 %v1344_v36  ;;  %v600_v20 = vor.u32 %v599_v5, %v596_v58  ;;  %v6718_v53 = vrot.slane %v394_v60, 9  ;;  %v399_v58 = vld [vmem:[%s8134_s26 + $0x5c] sm:$0x1] }
  0x75   : > { %v1341_v62 = vsel %vm8219_vm4, %v6717_v47, %v1340_v23  ;;  %v397_v23 = vld [vmem:[%s8134_s26 + $0x54] sm:$0xf]  ;;  %v1349_v2 = vrot.slane %v1347_v38, 4 }
  0x76   : > { %990 = vmatmul.bf16.gmra.mxu0 %v8498_v15  ;;  %1263 = vmatmul.bf16.vlgmr.msrb.gmra.mxu3 %v7501_v22  ;;  %v1442_v7 = vunpack.c.l.b16 %v1341_v62  ;;  %v8523_v45 = vpack.c.b16 %v861_v13, %v860_v10  ;;  %v613_v22 = vshll.u32 %v396_v25, 16  ;;  %v601_v46 = vrot.slane %v600_v20, 4 }
  0x77   : > { %v618_v43 = vshrl.u32 %v397_v23, 16  ;;  %v621_v19 = vshll.u32 %v397_v23, 16  ;;  %v627_v62 = vshll.u32 %v398_v55, 16  ;;  %v1348_v63 = vsel %vm8219_vm4, %v6718_v53, %v1347_v38 }
  0x78   : > { %1223 = vmatmul.bf16.gmra.mxu1 %v8502_v32  ;;  %1572 = vmatmul.bf16.gmra.mxu2 %v8504_v50  ;;  %10961 = vst [vmem:[#allocation19_spill] sm:$0xff] %v8523_v45  ;;  %v8529_v31 = vpack.c.b16 %v1443_v57, %v1442_v7  ;;  %v615_v47 = vrot.slane %v613_v22, 5  ;;  %v606_v36 = vsel %vm8232_vm5, %v601_v46, %v605_v1  ;;  %v633_v13 = vrot.slane %v631_v61, 4  ;;  %v8549_v22 = vld [vmem:[%s8134_s26 + $0x48] sm:$0xff] }
  0x79   : > { %v1351_v60 = vsel %vm8219_vm4, %v1349_v2, %v1350_v59  ;;  %v620_v0 = vrot.slane %v618_v43, 4  ;;  %v623_v9 = vrot.slane %v621_v19, 5  ;;  %v629_v10 = vrot.slane %v627_v62, 5  ;;  %v8555_v2 = vld [vmem:[%s8134_s26 + $0x60] sm:$0xf]  ;;  %v7538_v43 = vld [vmem:[%s10858_s1 + $0xf8] sm:$0xff] }
  0x7a   : > { %v616_v39 = vsel %vm8232_vm5, %v611_v12, %v615_v47  ;;  %v862_v7 = vunpack.c.l.b16 %v606_v36  ;;  %v1444_v5 = vunpack.c.l.b16 %v1348_v63  ;;  %v1445_v1 = vunpack.c.l.b16 %v1351_v60  ;;  %v8560_v59 = vld [vmem:[%s8134_s26 + $0x64] sm:$0xf]  ;;  %1736 = vmatpush.bf16.msrb.mxu3 %v7538_v43 }
  0x7b   : > { %v863_v57 = vunpack.c.l.b16 %v616_v39  ;;  %v624_v51 = vor.u32 %v623_v9, %v620_v0  ;;  %v634_v25 = vor.u32 %v633_v13, %v629_v10  ;;  %v1354_v46 = vrot.slane %v398_v55, 5  ;;  %v7541_v55 = vld [vmem:[%s10858_s1 + $0x110] sm:$0xff] }
  0x7c   : > { %v8551_v38 = vpack.c.b16 %v1445_v1, %v1444_v5  ;;  %v6719_v19 = vrot.slane %v397_v23, 9  ;;  %v1357_v61 = vrot.slane %v399_v58, 5  ;;  %1955 = vmatpush.bf16.msrb.mxu0 %v7541_v55  ;;  %v642_v63 = vshrl.u32 %v8555_v2, 16  ;;  %v8588_v55 = vld [vmem:[%s8134_s26 + $0x54] sm:$0xff] }
  0x7d   : > { %v8545_v20 = vpack.c.b16 %v863_v57, %v862_v7  ;;  %v625_v12 = vrot.slane %v624_v51, 4  ;;  %v635_v47 = vrot.slane %v634_v25, 4  ;;  %v1356_v62 = vrot.slane %v1354_v46, 4  ;;  %v7537_v57 = vld [vmem:[%s10858_s1 + $0xf0] sm:$0xff] }
  0x7e   : > { %v645_v60 = vshll.u32 %v8555_v2, 16  ;;  %v651_v0 = vshll.u32 %v8560_v59, 16  ;;  %v655_v23 = vshrl.u32 %v8560_v59, 16  ;;  %v1355_v9 = vsel %vm8219_vm4, %v6719_v19, %v1354_v46  ;;  %1737 = vmatpush.bf16.msrb.mxu3 %v7537_v57 }
  0x7f   : > { %10962 = vst [vmem:[#allocation20_spill] sm:$0xff] %v8545_v20  ;;  %v630_v36 = vsel %vm8232_vm5, %v625_v12, %v629_v10  ;;  %v1358_v10 = vsel %vm8219_vm4, %v1356_v62, %v1357_v61  ;;  %v1446_v25 = vunpack.c.l.b16 %v1355_v9  ;;  %v7504_v12 = vld [vmem:[%s8134_s26 + $0xb4] sm:$0xff]  ;;  %v1389_v62 = vrot.slane %v8182_v21, 5  ;;  %v8603_v21 = vld [vmem:[%s8134_s26 + $0x70] sm:$0xf] }
  0x80   : > { %v864_v13 = vunpack.c.l.b16 %v630_v36  ;;  %v647_v5 = vrot.slane %v645_v60, 5  ;;  %v653_v1 = vrot.slane %v651_v0, 5  ;;  %v657_v51 = vrot.slane %v655_v23, 4  ;;  %v8596_v60 = vld [vmem:[%s8134_s26 + $0x6c] sm:$0xf] }
  0x81   : > { %v1361_v61 = vrot.slane %v8560_v59, 5  ;;  %v6724_v0 = vrot.slane %v8168_v17, 9  ;;  %v1391_v23 = vrot.slane %v1389_v62, 4  ;;  %v1392_v9 = vrot.slane %v8190_v27, 5  ;;  %v7536_v59 = vld [vmem:[%s10858_s1 + $0xe8] sm:$0xff] }
  0x82   : > { %v666_v57 = vshrl.u32 %v8596_v60, 16  ;;  %1738 = vmatpush.bf16.msrb.mxu3 %v7536_v59 }
  0x86   : > { %995 = vmatmul.bf16.gmra.mxu0 %v8523_v45  ;;  %1268 = vmatmul.bf16.gmra.mxu3 %v7502_v28  ;;  %v637_v28 = vshll.u32 %v399_v58, 16  ;;  %v644_v58 = vrot.slane %v642_v63, 4 }
  0x88   : > { %1228 = vmatmul.bf16.gmra.mxu1 %v8527_v29  ;;  %1577 = vmatmul.bf16.gmra.mxu2 %v8529_v31  ;;  %v639_v53 = vrot.slane %v637_v28, 5  ;;  %v1447_v28 = vunpack.c.l.b16 %v1358_v10  ;;  %v6720_v10 = vrot.slane %v8555_v2, 9  ;;  %v1390_v2 = vsel %vm8219_vm4, %v6724_v0, %v1389_v62  ;;  %v7540_v62 = vld [vmem:[%s10858_s1 + $0x108] sm:$0xff] }
  0x89   : > { %1956 = vmatpush.bf16.msrb.mxu0 %v7540_v62 }
  0x8a   : > { %v640_v39 = vsel %vm8232_vm5, %v635_v47, %v639_v53  ;;  %v648_v47 = vor.u32 %v647_v5, %v644_v58  ;;  %v658_v53 = vor.u32 %v657_v51, %v653_v1  ;;  %v8590_v19 = vpack.c.b16 %v1447_v28, %v1446_v25 }
  0x8b   : > { %v865_v7 = vunpack.c.l.b16 %v640_v39  ;;  %v669_v58 = vshll.u32 %v8596_v60, 16  ;;  %v675_v5 = vshll.u32 %v8603_v21, 16  ;;  %v679_v51 = vshrl.u32 %v8603_v21, 16 }
  0x8c   : > { %v649_v36 = vrot.slane %v648_v47, 4  ;;  %v659_v39 = vrot.slane %v658_v53, 4  ;;  %v1393_v25 = vsel %vm8219_vm4, %v1391_v23, %v1392_v9  ;;  %v1362_v28 = vsel %vm8219_vm4, %v6720_v10, %v1361_v61  ;;  %v405_v9 = vld [vmem:[%s8134_s26 + $0x74] sm:$0x1] }
  0x8d   : > { %v8584_v46 = vpack.c.b16 %v865_v7, %v864_v13  ;;  %v1363_v13 = vrot.slane %v1361_v61, 4  ;;  %v668_v47 = vrot.slane %v666_v57, 4  ;;  %v671_v53 = vrot.slane %v669_v58, 5 }
  0x8e   : > { %v654_v17 = vsel %vm8232_vm5, %v649_v36, %v653_v1  ;;  %v1456_v36 = vunpack.c.l.b16 %v1390_v2  ;;  %v681_v61 = vrot.slane %v679_v51, 4  ;;  %v1448_v0 = vunpack.c.l.b16 %v1362_v28 }
  0x8f   : > { %10963 = vst [vmem:[#allocation21_spill] sm:$0xff] %v8584_v46  ;;  %v672_v10 = vor.u32 %v671_v53, %v668_v47  ;;  %v685_v57 = vshll.u32 %v405_v9, 16  ;;  %v1368_v58 = vrot.slane %v8603_v21, 5  ;;  %v1396_v51 = vrot.slane %v8258_v6, 5 }
  0x90   : > { %v6721_v47 = vrot.slane %v8596_v60, 9  ;;  %v1371_v6 = vrot.slane %v405_v9, 5 }
  0x91   : > { %v673_v28 = vrot.slane %v672_v10, 4  ;;  %v687_v21 = vrot.slane %v685_v57, 5  ;;  %v1370_v53 = vrot.slane %v1368_v58, 4  ;;  %v1398_v62 = vrot.slane %v1396_v51, 4 }
  0x92   : > { %v1369_v57 = vsel %vm8219_vm4, %v6721_v47, %v1368_v58 }
  0x93   : > { %v1372_v44 = vsel %vm8219_vm4, %v1370_v53, %v1371_v6 }
  0x94   : > { %v1451_v37 = vunpack.c.l.b16 %v1372_v44 }
  0x96   : > { %1000 = vmatmul.bf16.gmra.mxu0 %v8545_v20  ;;  %1273 = vmatmul.bf16.gmra.mxu3 %v7503_v18  ;;  %v402_v18 = vld [vmem:[%s8134_s26 + $0x68] sm:$0x1] }
  0x97   : > { %v661_v43 = vshll.u32 %v402_v18, 16  ;;  %v1364_v7 = vrot.slane %v402_v18, 5  ;;  %v866_v18 = vunpack.c.l.b16 %v654_v17 }
  0x98   : > { %1233 = vmatmul.bf16.gmra.mxu1 %v8549_v22  ;;  %1582 = vmatmul.bf16.gmra.mxu2 %v8551_v38 }
  0x99   : > { %v663_v63 = vrot.slane %v661_v43, 5  ;;  %v1365_v1 = vsel %vm8219_vm4, %v1363_v13, %v1364_v7  ;;  %v7535_v43 = vld [vmem:[%s10858_s1 + $0xe0] sm:$0xff] }
  0x9a   : > { %v1449_v23 = vunpack.c.l.b16 %v1365_v1  ;;  %1739 = vmatpush.bf16.msrb.mxu3 %v7535_v43  ;;  %v8644_v1 = vld [vmem:[%s8134_s26 + $0x78] sm:$0xf]  ;;  %v6725_v43 = vrot.slane %v8255_v3, 9 }
  0x9b   : > { %v664_v27 = vsel %vm8232_vm5, %v659_v39, %v663_v63  ;;  %v1457_v39 = vunpack.c.l.b16 %v1393_v25  ;;  %v677_v63 = vrot.slane %v675_v5, 5  ;;  %v690_v60 = vshrl.u32 %v8644_v1, 16 }
  0x9c   : > { %v8640_v5 = vpack.c.b16 %v1449_v23, %v1448_v0  ;;  %v693_v0 = vshll.u32 %v8644_v1, 16 }
  0x9d   : > { %v8634_v13 = vpack.c.b16 %v1457_v39, %v1456_v36  ;;  %v682_v7 = vor.u32 %v681_v61, %v677_v63  ;;  %v1399_v36 = vrot.slane %v8315_v52, 5  ;;  %v7534_v39 = vld [vmem:[%s10858_s1 + $0xd8] sm:$0xff]  ;;  %v678_v10 = vsel %vm8232_vm5, %v673_v28, %v677_v63 }
  0x9e   : > { %10966 = vst [vmem:[#allocation24_spill] sm:$0xff] %v8640_v5  ;;  %v7562_v61 = vld [vmem:[%s10858_s1 + $0x1b8] sm:$0xff]  ;;  %1740 = vmatpush.bf16.msrb.mxu3 %v7534_v39  ;;  %v1397_v39 = vsel %vm8219_vm4, %v6725_v43, %v1396_v51  ;;  %v7533_v51 = vld [vmem:[%s10858_s1 + $0xd0] sm:$0xff]  ;;  %v868_v53 = vunpack.c.l.b16 %v678_v10  ;;  %v1403_v10 = vrot.slane %v8345_v26, 5 }
  0x9f   : > { %10965 = vst [vmem:[#allocation23_spill] sm:$0xff] %v8634_v13  ;;  %2340 = vmatpush.bf16.msrb.mxu2 %v7562_v61  ;;  %v1400_v61 = vsel %vm8219_vm4, %v1398_v62, %v1399_v36  ;;  %v7554_v63 = vld [vmem:[%s10858_s1 + $0x178] sm:$0xff]  ;;  %v1458_v43 = vunpack.c.l.b16 %v1397_v39  ;;  %v1450_v36 = vunpack.c.l.b16 %v1369_v57 }
  0xa0   : > { %2148 = vmatpush.bf16.msrb.mxu1 %v7554_v63  ;;  %v1459_v62 = vunpack.c.l.b16 %v1400_v61  ;;  %v8708_v63 = vld [vmem:[%s8134_s26 + $0x6c] sm:$0xff] }
  0xa2   : > { %1741 = vmatpush.bf16.msrb.mxu3 %v7533_v51  ;;  %v8703_v61 = vpack.c.b16 %v1459_v62, %v1458_v43  ;;  %v6726_v43 = vrot.slane %v8339_v16, 9  ;;  %v1406_v62 = vrot.slane %v8373_v11, 5  ;;  %v7539_v16 = vld [vmem:[%s10858_s1 + $0x100] sm:$0xff] }
  0xa3   : > { %1957 = vmatpush.bf16.msrb.mxu0 %v7539_v16 }
  0xa4   : > { %10969 = vst [vmem:[#allocation27_spill] sm:$0xff] %v8703_v61 }
  0xa6   : > { %1005 = vmatmul.bf16.gmra.mxu0 %v8584_v46  ;;  %1278 = vmatmul.bf16.gmra.mxu3 %v7504_v12  ;;  %v867_v12 = vunpack.c.l.b16 %v664_v27  ;;  %v8638_v27 = vld [vmem:[%s8134_s26 + $0x60] sm:$0xff] }
  0xa8   : > { %1238 = vmatmul.bf16.gmra.mxu1 %v8588_v55  ;;  %1587 = vmatmul.bf16.gmra.mxu2 %v8590_v19  ;;  %v8632_v59 = vpack.c.b16 %v867_v12, %v866_v18  ;;  %v8647_v18 = vld [vmem:[%s8134_s26 + $0x7c] sm:$0xf]  ;;  %v683_v12 = vrot.slane %v682_v7, 4 }
  0xa9   : > { %v699_v23 = vshll.u32 %v8647_v18, 16  ;;  %v703_v9 = vshrl.u32 %v8647_v18, 16  ;;  %v1375_v26 = vrot.slane %v8647_v18, 5  ;;  %v8729_v18 = vld [vmem:[%s8134_s26 + $0x88] sm:$0xf] }
  0xaa   : > { %10964 = vst [vmem:[#allocation22_spill] sm:$0xff] %v8632_v59  ;;  %v688_v7 = vsel %vm8232_vm5, %v683_v12, %v687_v21  ;;  %v692_v12 = vrot.slane %v690_v60, 4  ;;  %v695_v21 = vrot.slane %v693_v0, 5  ;;  %v727_v24 = vshrl.u32 %v8729_v18, 16 }
  0xab   : > { %v8685_v58 = vrot.slane %v699_v23, 5  ;;  %v869_v6 = vunpack.c.l.b16 %v688_v7 }
  0xac   : > { %v696_v60 = vor.u32 %v695_v21, %v692_v12 }
  0xad   : > { %v8701_v39 = vpack.c.b16 %v869_v6, %v868_v53  ;;  %v7553_v53 = vld [vmem:[%s10858_s1 + $0x170] sm:$0xff] }
  0xae   : > { %v697_v21 = vrot.slane %v696_v60, 4  ;;  %v7532_v60 = vld [vmem:[%s10858_s1 + $0xc8] sm:$0xff]  ;;  %2149 = vmatpush.bf16.msrb.mxu1 %v7553_v53 }
  0xaf   : > { %10968 = vst [vmem:[#allocation26_spill] sm:$0xff] %v8701_v39  ;;  %1742 = vmatpush.bf16.msrb.mxu3 %v7532_v60 }
  0xb0   : > { %v702_v11 = vsel %vm8232_vm5, %v697_v21, %v8685_v58 }
  0xb1   : > { %v870_v56 = vunpack.c.l.b16 %v702_v11 }
  0xb3   : > { %v971_v17 = vpop.f32.mrf.mxu0 }
  0xb5   : > { %v1204_v2 = vpop.f32.mrf.mxu1 }
  0xb6   : > { %v1205_v25 = vadd.f32 %v1204_v2, %v971_v17  ;;  %1010 = vmatmul.bf16.gmra.mxu0 %v8632_v59  ;;  %1612 = vmatmul.bf16.vlgmr.msra.gmra.mxu3 %v8634_v13 }
  0xb8   : > { %1243 = vmatmul.bf16.gmra.mxu1 %v8638_v27  ;;  %1592 = vmatmul.bf16.gmra.mxu2 %v8640_v5 }
  0xb9   : > { %v8666_v3 = vpop.f32.mrf.mxu3 }
  0xbb   : > { %v1553_v52 = vpop.f32.mrf.mxu2  ;;  %v973_v2 = vpop.f32.mrf.mxu0 }
  0xbc   : > { %v8674_v17 = vadd.f32 %v1553_v52, %v1205_v25  ;;  %v705_v25 = vrot.slane %v703_v9, 4  ;;  %v8688_v52 = vld [vmem:[%s8134_s26 + $0x80] sm:$0x1]  ;;  %v7561_v9 = vld [vmem:[%s10858_s1 + $0x1b0] sm:$0xff] }
  0xbd   : > { %v1206_v28 = vpop.f32.mrf.mxu1  ;;  %v709_v23 = vshll.u32 %v8688_v52, 16  ;;  %2341 = vmatpush.bf16.msrb.mxu2 %v7561_v9  ;;  %v1378_v9 = vrot.slane %v8688_v52, 5 }
  0xbe   : > { %10967 = vst [vmem:[#allocation25_spill] sm:$0xff] %v8674_v17  ;;  %v1207_v47 = vadd.f32 %v1206_v28, %v973_v2  ;;  %v706_v0 = vor.u32 %v705_v25, %v8685_v58  ;;  %v8710_v28 = vpack.c.b16 %v1451_v37, %v1450_v36  ;;  %v1405_v37 = vrot.slane %v1403_v10, 4  ;;  %v8724_v36 = vld [vmem:[%s8134_s26 + $0x84] sm:$0xf] }
  0xbf   : > { %v711_v51 = vrot.slane %v709_v23, 5  ;;  %v1377_v23 = vrot.slane %v1375_v26, 4  ;;  %v714_v53 = vshrl.u32 %v8724_v36, 16  ;;  %v1382_v17 = vrot.slane %v8729_v18, 5 }
  0xc0   : > { %10971 = vst [vmem:[#allocation29_spill] sm:$0xff] %v8710_v28  ;;  %v707_v25 = vrot.slane %v706_v0, 4  ;;  %v6722_v0 = vrot.slane %v8644_v1, 9  ;;  %v1404_v1 = vsel %vm8219_vm4, %v6726_v43, %v1403_v10  ;;  %v1407_v52 = vsel %vm8219_vm4, %v1405_v37, %v1406_v62  ;;  %v7551_v37 = vld [vmem:[%s10858_s1 + $0x160] sm:$0xff] }
  0xc1   : > { %v8698_v2 = vpop.f32.mrf.mxu3  ;;  %v1379_v43 = vsel %vm8219_vm4, %v1377_v23, %v1378_v9  ;;  %v1460_v16 = vunpack.c.l.b16 %v1404_v1  ;;  %v1461_v11 = vunpack.c.l.b16 %v1407_v52  ;;  %v7557_v1 = vld [vmem:[%s10858_s1 + $0x190] sm:$0xff] }
  0xc2   : > { %v712_v58 = vsel %vm8232_vm5, %v707_v25, %v711_v51  ;;  %v1376_v10 = vsel %vm8219_vm4, %v6722_v0, %v1375_v26  ;;  %v7531_v26 = vld [vmem:[%s10858_s1 + $0xc0] sm:$0xff]  ;;  %v716_v0 = vrot.slane %v714_v53, 4 }
  0xc3   : > { %v1555_v7 = vpop.f32.mrf.mxu2  ;;  %v976_v57 = vpop.f32.mrf.mxu0  ;;  %v871_v60 = vunpack.c.l.b16 %v712_v58  ;;  %1743 = vmatpush.bf16.msrb.mxu3 %v7531_v26  ;;  %v7550_v58 = vld [vmem:[%s10858_s1 + $0x158] sm:$0xff]  ;;  %v1410_v26 = vrot.slane %v8407_v42, 5 }
  0xc4   : > { %v8705_v44 = vadd.f32 %v1555_v7, %v1207_v47  ;;  %v7560_v47 = vld [vmem:[%s10858_s1 + $0x1a8] sm:$0xff] }
  0xc5   : > { %v1209_v12 = vpop.f32.mrf.mxu1  ;;  %2342 = vmatpush.bf16.msrb.mxu2 %v7560_v47  ;;  %v7552_v7 = vld [vmem:[%s10858_s1 + $0x168] sm:$0xff]  ;;  %v717_v47 = vshll.u32 %v8724_v36, 16  ;;  %v8786_v53 = vpack.c.b16 %v871_v60, %v870_v56  ;;  %v7549_v56 = vld [vmem:[%s10858_s1 + $0x150] sm:$0xff] }
  0xc6   : > { %10970 = vst [vmem:[#allocation28_spill] sm:$0xff] %v8705_v44  ;;  %v1210_v6 = vadd.f32 %v1209_v12, %v976_v57  ;;  %1015 = vmatmul.bf16.gmra.mxu0 %v8701_v39  ;;  %1617 = vmatmul.bf16.gmra.mxu3 %v8703_v61  ;;  %v7559_v57 = vld [vmem:[%s10858_s1 + $0x1a0] sm:$0xff]  ;;  %v723_v61 = vshll.u32 %v8729_v18, 16  ;;  %v7570_v18 = vld [vmem:[%s10858_s1 + $0x1f8] sm:$0xff] }
  0xc7   : > { %2150 = vmatpush.bf16.msrb.mxu1 %v7552_v7  ;;  %v719_v23 = vrot.slane %v717_v47, 5  ;;  %v729_v7 = vrot.slane %v727_v24, 4  ;;  %10973 = vst [vmem:[#allocation31_spill] sm:$0xff] %v8786_v53  ;;  %v8788_v24 = vpack.c.b16 %v1461_v11, %v1460_v16  ;;  %2554 = vmatpush.bf16.msra.mxu3 %v7570_v18 }
  0xc8   : > { %1248 = vmatmul.bf16.gmra.mxu1 %v8708_v63  ;;  %1597 = vmatmul.bf16.gmra.mxu2 %v8710_v28  ;;  %v8775_v9 = vrot.slane %v723_v61, 5 }
  0xc9   : > { %v8748_v12 = vpop.f32.mrf.mxu3  ;;  %2343 = vmatpush.bf16.msrb.mxu2 %v7559_v57  ;;  %v1452_v57 = vunpack.c.l.b16 %v1376_v10  ;;  %10974 = vst [vmem:[#allocation32_spill] sm:$0xff] %v8788_v24  ;;  %v720_v47 = vor.u32 %v719_v23, %v716_v0  ;;  %v6727_v0 = vrot.slane %v8404_v41, 9  ;;  %v1412_v23 = vrot.slane %v1410_v26, 4 }
  0xcb   : > { %v1558_v21 = vpop.f32.mrf.mxu2  ;;  %v978_v25 = vpop.f32.mrf.mxu0  ;;  %2151 = vmatpush.bf16.msrb.mxu1 %v7551_v37  ;;  %v721_v16 = vrot.slane %v720_v47, 4 }
  0xcc   : > { %v8760_v13 = vadd.f32 %v1558_v21, %v1210_v6  ;;  %v7558_v6 = vld [vmem:[%s10858_s1 + $0x198] sm:$0xff]  ;;  %v1453_v21 = vunpack.c.l.b16 %v1379_v43 }
  0xcd   : > { %v1211_v51 = vpop.f32.mrf.mxu1  ;;  %2344 = vmatpush.bf16.msrb.mxu2 %v7558_v6  ;;  %v8794_v43 = vld [vmem:[%s8134_s26 + $0x78] sm:$0xff] }
  0xce   : > { %10972 = vst [vmem:[#allocation30_spill] sm:$0xff] %v8760_v13  ;;  %v1212_v62 = vadd.f32 %v1211_v51, %v978_v25  ;;  %v411_v13 = vld [vmem:[%s8134_s26 + $0x8c] sm:$0x1]  ;;  %v730_v25 = vor.u32 %v729_v7, %v8775_v9  ;;  %v8796_v37 = vpack.c.b16 %v1453_v21, %v1452_v57  ;;  %v6723_v7 = vrot.slane %v8724_v36, 9 }
  0xcf   : > { %v733_v6 = vshll.u32 %v411_v13, 16  ;;  %2152 = vmatpush.bf16.msrb.mxu1 %v7550_v58  ;;  %v1384_v57 = vrot.slane %v1382_v17, 4  ;;  %v1385_v21 = vrot.slane %v411_v13, 5  ;;  %v7548_v58 = vld [vmem:[%s10858_s1 + $0x148] sm:$0xff] }
  0xd0   : > { %v731_v42 = vrot.slane %v730_v25, 4  ;;  %v1411_v25 = vsel %vm8219_vm4, %v6727_v0, %v1410_v26  ;;  %v7578_v26 = vld [vmem:[%s10858_s1 + $0x238] sm:$0xff] }
  0xd1   : > { %v8784_v52 = vpop.f32.mrf.mxu3  ;;  %2345 = vmatpush.bf16.msrb.mxu2 %v7557_v1  ;;  %v735_v11 = vrot.slane %v733_v6, 5  ;;  %v7555_v1 = vld [vmem:[%s10858_s1 + $0x180] sm:$0xff]  ;;  %v1462_v18 = vunpack.c.l.b16 %v1411_v25  ;;  %2752 = vmatpush.bf16.msra.mxu0 %v7578_v26 }
  0xd3   : > { %v1560_v61 = vpop.f32.mrf.mxu2  ;;  %v981_v10 = vpop.f32.mrf.mxu0  ;;  %2153 = vmatpush.bf16.msrb.mxu1 %v7549_v56  ;;  %v736_v47 = vsel %vm8232_vm5, %v731_v42, %v735_v11  ;;  %v1383_v56 = vsel %vm8219_vm4, %v6723_v7, %v1382_v17 }
  0xd4   : > { %v8791_v51 = vadd.f32 %v1560_v61, %v1212_v62  ;;  %v7556_v62 = vld [vmem:[%s10858_s1 + $0x188] sm:$0xff]  ;;  %v873_v42 = vunpack.c.l.b16 %v736_v47  ;;  %v1454_v17 = vunpack.c.l.b16 %v1383_v56 }
  0xd5   : > { %v1214_v44 = vpop.f32.mrf.mxu1  ;;  %2346 = vmatpush.bf16.msrb.mxu2 %v7556_v62  ;;  %v1386_v62 = vsel %vm8219_vm4, %v1384_v57, %v1385_v21 }
  0xd6   : > { %v1215_v60 = vadd.f32 %v1214_v44, %v981_v10  ;;  %1020 = vmatmul.bf16.gmra.mxu0 %v8786_v53  ;;  %1622 = vmatmul.bf16.gmra.mxu3 %v8788_v24  ;;  %v1413_v44 = vrot.slane %v8429_v33, 5  ;;  %v726_v33 = vsel %vm8232_vm5, %v721_v16, %v8775_v9  ;;  %v7547_v9 = vld [vmem:[%s10858_s1 + $0x140] sm:$0xff]  ;;  %v1455_v0 = vunpack.c.l.b16 %v1386_v62 }
  0xd7   : > { %2154 = vmatpush.bf16.msrb.mxu1 %v7548_v58  ;;  %v872_v16 = vunpack.c.l.b16 %v726_v33 }
  0xd8   : > { %1253 = vmatmul.bf16.gmra.mxu1 %v8794_v43  ;;  %1602 = vmatmul.bf16.gmra.mxu2 %v8796_v37  ;;  %v1414_v10 = vsel %vm8219_vm4, %v1412_v23, %v1413_v44 }
  0xd9   : > { %v8822_v61 = vpop.f32.mrf.mxu3  ;;  %2347 = vmatpush.bf16.msrb.mxu2 %v7555_v1  ;;  %v1463_v11 = vunpack.c.l.b16 %v1414_v10  ;;  %v8847_v7 = vpack.c.b16 %v873_v42, %v872_v16  ;;  %v8854_v1 = vld [vmem:[%s8134_s26 + $0x84] sm:$0xff] }
  0xdb   : > { %v1563_v41 = vpop.f32.mrf.mxu2  ;;  %v983_v13 = vpop.f32.mrf.mxu0  ;;  %2155 = vmatpush.bf16.msrb.mxu1 %v7547_v9  ;;  %10975 = vst [vmem:[#allocation33_spill] sm:$0xff] %v8847_v7  ;;  %v8849_v57 = vpack.c.b16 %v1463_v11, %v1462_v18  ;;  %v7859_v11 = vld [vmem:[%s8134_s26 + $0xc] sm:$0xff] }
  0xdc   : > { %v8827_v36 = vadd.f32 %v1563_v41, %v1215_v60  ;;  %v8856_v41 = vpack.c.b16 %v1455_v0, %v1454_v17  ;;  %v7569_v17 = vld [vmem:[%s10858_s1 + $0x1f0] sm:$0xff] }
  0xdd   : > { %v1216_v6 = vpop.f32.mrf.mxu1  ;;  %2555 = vmatpush.bf16.msra.mxu3 %v7569_v17 }
  0xde   : > { %v1217_v60 = vadd.f32 %v1216_v6, %v983_v13 }
  0xe1   : > { %v8845_v23 = vpop.f32.mrf.mxu3 }
  0xe3   : > { %v1565_v44 = vpop.f32.mrf.mxu2  ;;  %v986_v58 = vpop.f32.mrf.mxu0 }
  0xe4   : > { %v8851_v21 = vadd.f32 %v1565_v44, %v1217_v60 }
  0xe5   : > { %v1219_v33 = vpop.f32.mrf.mxu1 }
  0xe6   : > { %v1220_v13 = vadd.f32 %v1219_v33, %v986_v58  ;;  %1025 = vmatmul.bf16.gmra.mxu0 %v8847_v7  ;;  %1627 = vmatmul.bf16.gmra.mxu3 %v8849_v57 }
  0xe8   : > { %1258 = vmatmul.bf16.gmra.mxu1 %v8854_v1  ;;  %1607 = vmatmul.bf16.gmra.mxu2 %v8856_v41 }
  0xe9   : > { %v8862_v47 = vpop.f32.mrf.mxu3 }
  0xeb   : > { %v1568_v25 = vpop.f32.mrf.mxu2  ;;  %v988_v6 = vpop.f32.mrf.mxu0 }
  0xec   : > { %v8864_v10 = vadd.f32 %v1568_v25, %v1220_v13 }
  0xed   : > { %v1221_v56 = vpop.f32.mrf.mxu1 }
  0xee   : > { %v1222_v62 = vadd.f32 %v1221_v56, %v988_v6  ;;  %v7577_v56 = vld [vmem:[%s10858_s1 + $0x230] sm:$0xff] }
  0xef   : > { %2753 = vmatpush.bf16.msra.mxu0 %v7577_v56 }
  0xf1   : > { %v8866_v9 = vpop.f32.mrf.mxu3 }
  0xf3   : > { %v1570_v60 = vpop.f32.mrf.mxu2  ;;  %v991_v16 = vpop.f32.mrf.mxu0 }
  0xf4   : > { %v8868_v26 = vadd.f32 %v1570_v60, %v1222_v62 }
  0xf5   : > { %v1224_v42 = vpop.f32.mrf.mxu1 }
  0xf6   : > { %v1225_v18 = vadd.f32 %v1224_v42, %v991_v16  ;;  %1744 = vmatmul.bf16.vlgmr.msrb.gmra.mxu3 %v7859_v11  ;;  %1958 = vmatmul.bf16.vlgmr.msrb.gmra.mxu0 %v8375_v14 }
  0xf8   : > { %2348 = vmatmul.bf16.vlgmr.msrb.gmra.mxu2 %v8439_v35  ;;  %2156 = vmatmul.bf16.vlgmr.msrb.gmra.mxu1 %v8383_v30 }
  0xf9   : > { %v1264_v0 = vpop.f32.mrf.mxu3 }
  0xfa   : > { %v8878_v44 = vadd.f32 %v1264_v0, %v8666_v3 }
  0xfb   : > { %v1573_v58 = vpop.f32.mrf.mxu2  ;;  %v993_v13 = vpop.f32.mrf.mxu0 }
  0xfc   : > { %v8880_v33 = vadd.f32 %v1573_v58, %v1225_v18 }
  0xfd   : > { %v1226_v25 = vpop.f32.mrf.mxu1 }
  0xfe   : > { %v1227_v6 = vadd.f32 %v1226_v25, %v993_v13 }
 0x101   : > { %v1266_v62 = vpop.f32.mrf.mxu3 }
 0x102   : > { %v8886_v60 = vadd.f32 %v1266_v62, %v8698_v2 }
 0x103   : > { %v1575_v30 = vpop.f32.mrf.mxu2  ;;  %v996_v3 = vpop.f32.mrf.mxu0 }
 0x104   : > { %v8888_v16 = vadd.f32 %v1575_v30, %v1227_v6 }
 0x105   : > { %v1229_v42 = vpop.f32.mrf.mxu1 }
 0x106   : > { %v1230_v11 = vadd.f32 %v1229_v42, %v996_v3  ;;  %1749 = vmatmul.bf16.gmra.mxu3 %v8439_v35  ;;  %1963 = vmatmul.bf16.gmra.mxu0 %v8431_v34 }
 0x108   : > { %2353 = vmatmul.bf16.gmra.mxu2 %v8472_v8  ;;  %2161 = vmatmul.bf16.gmra.mxu1 %v8441_v4 }
 0x109   : > { %v1269_v18 = vpop.f32.mrf.mxu3 }
 0x10a   : > { %v8895_v17 = vadd.f32 %v1269_v18, %v8748_v12  ;;  %v7568_v12 = vld [vmem:[%s10858_s1 + $0x1e8] sm:$0xff] }
 0x10b   : > { %v1578_v2 = vpop.f32.mrf.mxu2  ;;  %v998_v58 = vpop.f32.mrf.mxu0  ;;  %2556 = vmatpush.bf16.msra.mxu3 %v7568_v12 }
 0x10c   : > { %v8897_v0 = vadd.f32 %v1578_v2, %v1230_v11 }
 0x10d   : > { %v1231_v13 = vpop.f32.mrf.mxu1 }
 0x10e   : > { %v1232_v25 = vadd.f32 %v1231_v13, %v998_v58 }
 0x111   : > { %v1271_v6 = vpop.f32.mrf.mxu3 }
 0x112   : > { %v8900_v56 = vadd.f32 %v1271_v6, %v8784_v52 }
 0x113   : > { %v1580_v35 = vpop.f32.mrf.mxu2  ;;  %v1001_v30 = vpop.f32.mrf.mxu0 }
 0x114   : > { %v8902_v62 = vadd.f32 %v1580_v35, %v1232_v25  ;;  %v7576_v25 = vld [vmem:[%s10858_s1 + $0x228] sm:$0xff] }
 0x115   : > { %v1234_v3 = vpop.f32.mrf.mxu1  ;;  %2754 = vmatpush.bf16.msra.mxu0 %v7576_v25 }
 0x116   : > { %v1235_v42 = vadd.f32 %v1234_v3, %v1001_v30  ;;  %1754 = vmatmul.bf16.gmra.mxu3 %v8472_v8  ;;  %1968 = vmatmul.bf16.gmra.mxu0 %v8467_v40 }
 0x118   : > { %2358 = vmatmul.bf16.gmra.mxu2 %v8502_v32  ;;  %2166 = vmatmul.bf16.gmra.mxu1 %v8474_v49 }
 0x119   : > { %v1274_v52 = vpop.f32.mrf.mxu3 }
 0x11a   : > { %v8912_v11 = vadd.f32 %v1274_v52, %v8822_v61 }
 0x11b   : > { %v1583_v18 = vpop.f32.mrf.mxu2  ;;  %v1003_v58 = vpop.f32.mrf.mxu0 }
 0x11c   : > { %v8914_v2 = vadd.f32 %v1583_v18, %v1235_v42 }
 0x11d   : > { %v1236_v8 = vpop.f32.mrf.mxu1 }
 0x11e   : > { %v1237_v13 = vadd.f32 %v1236_v8, %v1003_v58 }
 0x121   : > { %v1276_v6 = vpop.f32.mrf.mxu3 }
 0x122   : > { %v8920_v35 = vadd.f32 %v1276_v6, %v8845_v23 }
 0x123   : > { %v1585_v30 = vpop.f32.mrf.mxu2  ;;  %v1006_v61 = vpop.f32.mrf.mxu0 }
 0x124   : > { %v8922_v3 = vadd.f32 %v1585_v30, %v1237_v13 }
 0x125   : > { %v1239_v12 = vpop.f32.mrf.mxu1 }
 0x126   : > { %v1240_v52 = vadd.f32 %v1239_v12, %v1006_v61  ;;  %1759 = vmatmul.bf16.gmra.mxu3 %v8502_v32  ;;  %1973 = vmatmul.bf16.gmra.mxu0 %v8498_v15 }
 0x128   : > { %2363 = vmatmul.bf16.gmra.mxu2 %v8527_v29  ;;  %2171 = vmatmul.bf16.gmra.mxu1 %v8504_v50 }
 0x129   : > { %v1279_v42 = vpop.f32.mrf.mxu3 }
 0x12a   : > { %v8929_v18 = vadd.f32 %v1279_v42, %v8862_v47  ;;  %v7567_v47 = vld [vmem:[%s10858_s1 + $0x1e0] sm:$0xff] }
 0x12b   : > { %v1588_v23 = vpop.f32.mrf.mxu2  ;;  %v1008_v8 = vpop.f32.mrf.mxu0  ;;  %2557 = vmatpush.bf16.msra.mxu3 %v7567_v47 }
 0x12c   : > { %v8931_v58 = vadd.f32 %v1588_v23, %v1240_v52 }
 0x12d   : > { %v1241_v13 = vpop.f32.mrf.mxu1 }
 0x12e   : > { %v1242_v25 = vadd.f32 %v1241_v13, %v1008_v8  ;;  %v7575_v13 = vld [vmem:[%s10858_s1 + $0x220] sm:$0xff] }
 0x12f   : > { %2755 = vmatpush.bf16.msra.mxu0 %v7575_v13 }
 0x131   : > { %v1281_v6 = vpop.f32.mrf.mxu3 }
 0x132   : > { %v8934_v30 = vadd.f32 %v1281_v6, %v8866_v9 }
 0x133   : > { %v1590_v32 = vpop.f32.mrf.mxu2  ;;  %v1011_v12 = vpop.f32.mrf.mxu0 }
 0x134   : > { %v8936_v61 = vadd.f32 %v1590_v32, %v1242_v25 }
 0x135   : > { %v1244_v14 = vpop.f32.mrf.mxu1 }
 0x136   : > { %v1245_v50 = vadd.f32 %v1244_v14, %v1011_v12  ;;  %1764 = vmatmul.bf16.gmra.mxu3 %v8527_v29  ;;  %1978 = vmatmul.bf16.gmra.mxu0 %v8523_v45 }
 0x138   : > { %2368 = vmatmul.bf16.gmra.mxu2 %v8549_v22  ;;  %2176 = vmatmul.bf16.gmra.mxu1 %v8529_v31 }
 0x139   : > { %v1613_v9 = vpop.f32.mrf.mxu3 }
 0x13a   : > { %v8946_v42 = vadd.f32 %v1613_v9, %v8878_v44 }
 0x13b   : > { %v1593_v52 = vpop.f32.mrf.mxu2  ;;  %v1013_v14 = vpop.f32.mrf.mxu0 }
 0x13c   : > { %10976 = vst [vmem:[#allocation34_spill] sm:$0xff] %v8946_v42  ;;  %v8948_v23 = vadd.f32 %v1593_v52, %v1245_v50 }
 0x13d   : > { %v1246_v29 = vpop.f32.mrf.mxu1 }
 0x13e   : > { %v1247_v8 = vadd.f32 %v1246_v29, %v1013_v14 }
 0x141   : > { %v1615_v25 = vpop.f32.mrf.mxu3 }
 0x142   : > { %v8954_v32 = vadd.f32 %v1615_v25, %v8886_v60 }
 0x143   : > { %v1595_v6 = vpop.f32.mrf.mxu2  ;;  %v1016_v47 = vpop.f32.mrf.mxu0 }
 0x144   : > { %10977 = vst [vmem:[#allocation35_spill] sm:$0xff] %v8954_v32  ;;  %v8956_v12 = vadd.f32 %v1595_v6, %v1247_v8 }
 0x145   : > { %v1249_v44 = vpop.f32.mrf.mxu1 }
 0x146   : > { %v1250_v9 = vadd.f32 %v1249_v44, %v1016_v47  ;;  %1769 = vmatmul.bf16.gmra.mxu3 %v8549_v22  ;;  %1983 = vmatmul.bf16.gmra.mxu0 %v8545_v20 }
 0x148   : > { %2373 = vmatmul.bf16.gmra.mxu2 %v8588_v55  ;;  %2181 = vmatmul.bf16.gmra.mxu1 %v8551_v38 }
 0x149   : > { %v1618_v50 = vpop.f32.mrf.mxu3 }
 0x14a   : > { %v8963_v14 = vadd.f32 %v1618_v50, %v8895_v17  ;;  %v7566_v17 = vld [vmem:[%s10858_s1 + $0x1d8] sm:$0xff] }
 0x14b   : > { %v1598_v52 = vpop.f32.mrf.mxu2  ;;  %v1018_v29 = vpop.f32.mrf.mxu0  ;;  %2558 = vmatpush.bf16.msra.mxu3 %v7566_v17 }
 0x14c   : > { %v8965_v60 = vadd.f32 %v1598_v52, %v1250_v9 }
 0x14d   : > { %v1251_v8 = vpop.f32.mrf.mxu1 }
 0x14e   : > { %v1252_v13 = vadd.f32 %v1251_v8, %v1018_v29  ;;  %v7574_v8 = vld [vmem:[%s10858_s1 + $0x218] sm:$0xff] }
 0x14f   : > { %2756 = vmatpush.bf16.msra.mxu0 %v7574_v8 }
 0x151   : > { %v1620_v25 = vpop.f32.mrf.mxu3 }
 0x152   : > { %v8968_v22 = vadd.f32 %v1620_v25, %v8900_v56 }
 0x153   : > { %v1600_v6 = vpop.f32.mrf.mxu2  ;;  %v1021_v44 = vpop.f32.mrf.mxu0 }
 0x154   : > { %v8970_v47 = vadd.f32 %v1600_v6, %v1252_v13 }
 0x155   : > { %v1254_v32 = vpop.f32.mrf.mxu1 }
 0x156   : > { %v1255_v42 = vadd.f32 %v1254_v32, %v1021_v44  ;;  %1774 = vmatmul.bf16.gmra.mxu3 %v8588_v55  ;;  %1988 = vmatmul.bf16.gmra.mxu0 %v8584_v46 }
 0x158   : > { %2378 = vmatmul.bf16.gmra.mxu2 %v8638_v27  ;;  %2186 = vmatmul.bf16.gmra.mxu1 %v8590_v19 }
 0x159   : > { %v1623_v56 = vpop.f32.mrf.mxu3 }
 0x15a   : > { %v8980_v50 = vadd.f32 %v1623_v56, %v8912_v11 }
 0x15b   : > { %v1603_v9 = vpop.f32.mrf.mxu2  ;;  %v1023_v32 = vpop.f32.mrf.mxu0 }
 0x15c   : > { %10978 = vst [vmem:[#allocation36_spill] sm:$0xff] %v8980_v50  ;;  %v8982_v52 = vadd.f32 %v1603_v9, %v1255_v42 }
 0x15d   : > { %v1256_v55 = vpop.f32.mrf.mxu1 }
 0x15e   : > { %v1257_v29 = vadd.f32 %v1256_v55, %v1023_v32 }
 0x161   : > { %v1625_v13 = vpop.f32.mrf.mxu3 }
 0x162   : > { %v8988_v6 = vadd.f32 %v1625_v13, %v8920_v35 }
 0x163   : > { %v1605_v25 = vpop.f32.mrf.mxu2  ;;  %v1026_v17 = vpop.f32.mrf.mxu0 }
 0x164   : > { %10979 = vst [vmem:[#allocation37_spill] sm:$0xff] %v8988_v6  ;;  %v8990_v44 = vadd.f32 %v1605_v25, %v1257_v29 }
 0x165   : > { %v1259_v11 = vpop.f32.mrf.mxu1 }
 0x166   : > { %v1260_v56 = vadd.f32 %v1259_v11, %v1026_v17  ;;  %1779 = vmatmul.bf16.gmra.mxu3 %v8638_v27  ;;  %1993 = vmatmul.bf16.gmra.mxu0 %v8632_v59 }
 0x168   : > { %2383 = vmatmul.bf16.gmra.mxu2 %v8708_v63  ;;  %2191 = vmatmul.bf16.gmra.mxu1 %v8640_v5 }
 0x169   : > { %v1628_v42 = vpop.f32.mrf.mxu3 }
 0x16a   : > { %v8997_v32 = vadd.f32 %v1628_v42, %v8929_v18  ;;  %v7565_v18 = vld [vmem:[%s10858_s1 + $0x1d0] sm:$0xff]  ;;  %v10982_v42 = vld [vmem:[#allocation25_spill] sm:$0xff] }
 0x16b   : > { %v1608_v9 = vpop.f32.mrf.mxu2  ;;  %v1028_v55 = vpop.f32.mrf.mxu0  ;;  %2559 = vmatpush.bf16.msra.mxu3 %v7565_v18  ;;  %v10984_v18 = vld [vmem:[#allocation28_spill] sm:$0xff] }
 0x16c   : > { %10980 = vst [vmem:[#allocation38_spill] sm:$0xff] %v8997_v32  ;;  %v8999_v35 = vadd.f32 %v1608_v9, %v1260_v56  ;;  %v7604_v56 = vld [vmem:[#allocation3 + $0x38] sm:$0xff] }
 0x16d   : > { %v1261_v29 = vpop.f32.mrf.mxu1  ;;  %4370 = vmatpush.bf16.msra.mxu2 %v7604_v56 }
 0x16e   : > { %v1262_v8 = vadd.f32 %v1261_v29, %v1028_v55  ;;  %v7612_v29 = vld [vmem:[#allocation3 + $0x78] sm:$0xff] }
 0x16f   : > { %4137 = vmatpush.bf16.msra.mxu1 %v7612_v29 }
 0x171   : > { %v1630_v13 = vpop.f32.mrf.mxu3 }
 0x172   : > { %v9002_v27 = vadd.f32 %v1630_v13, %v8934_v30 }
 0x173   : > { %v1610_v25 = vpop.f32.mrf.mxu2  ;;  %v1959_v11 = vpop.f32.mrf.mxu0 }
 0x174   : > { %10981 = vst [vmem:[#allocation39_spill] sm:$0xff] %v9002_v27  ;;  %v9004_v17 = vadd.f32 %v1610_v25, %v1262_v8  ;;  %v7573_v27 = vld [vmem:[%s10858_s1 + $0x210] sm:$0xff] }
 0x175   : > { %v2157_v6 = vpop.f32.mrf.mxu1  ;;  %2757 = vmatpush.bf16.msra.mxu0 %v7573_v27  ;;  %v10985_v27 = vld [vmem:[#allocation30_spill] sm:$0xff] }
 0x176   : > { %1784 = vmatmul.bf16.gmra.mxu3 %v8708_v63  ;;  %1998 = vmatmul.bf16.gmra.mxu0 %v8701_v39 }
 0x178   : > { %2388 = vmatmul.bf16.gmra.mxu2 %v8794_v43  ;;  %2196 = vmatmul.bf16.gmra.mxu1 %v8710_v28 }
 0x179   : > { %v1745_v30 = vpop.f32.mrf.mxu3 }
 0x17a   : > { %v1825_v9 = vadd.f32 %v1745_v30, %v10982_v42 }
 0x17b   : > { %v2349_v55 = vpop.f32.mrf.mxu2  ;;  %v1961_v8 = vpop.f32.mrf.mxu0 }
 0x17c   : > { %v2039_v63 = vadd.f32 %v1959_v11, %v1825_v9 }
 0x17d   : > { %v2159_v13 = vpop.f32.mrf.mxu1 }
 0x17e   : > { %v2237_v25 = vadd.f32 %v2157_v6, %v2039_v63 }
 0x180   : > { %v9017_v32 = vadd.f32 %v2349_v55, %v2237_v25 }
 0x181   : > { %v1747_v28 = vpop.f32.mrf.mxu3 }
 0x182   : > { %10983 = vst [vmem:[#allocation25_spill] sm:$0xff] %v9017_v32  ;;  %v1826_v56 = vadd.f32 %v1747_v28, %v10984_v18 }
 0x183   : > { %v2351_v39 = vpop.f32.mrf.mxu2  ;;  %v1964_v50 = vpop.f32.mrf.mxu0 }
 0x184   : > { %v2040_v30 = vadd.f32 %v1961_v8, %v1826_v56 }
 0x185   : > { %v2162_v42 = vpop.f32.mrf.mxu1 }
 0x186   : > { %v2238_v5 = vadd.f32 %v2159_v13, %v2040_v30  ;;  %1789 = vmatmul.bf16.gmra.mxu3 %v8794_v43  ;;  %2003 = vmatmul.bf16.gmra.mxu0 %v8786_v53 }
 0x188   : > { %2393 = vmatmul.bf16.gmra.mxu2 %v8854_v1  ;;  %2201 = vmatmul.bf16.gmra.mxu1 %v8796_v37  ;;  %v9024_v6 = vadd.f32 %v2351_v39, %v2238_v5  ;;  %v7564_v39 = vld [vmem:[%s10858_s1 + $0x1c8] sm:$0xff] }
 0x189   : > { %v1750_v11 = vpop.f32.mrf.mxu3  ;;  %2560 = vmatpush.bf16.msra.mxu3 %v7564_v39 }
 0x18a   : > { %v1827_v9 = vadd.f32 %v1750_v11, %v10985_v27 }
 0x18b   : > { %v2354_v55 = vpop.f32.mrf.mxu2  ;;  %v1966_v28 = vpop.f32.mrf.mxu0 }
 0x18c   : > { %v2041_v29 = vadd.f32 %v1964_v50, %v1827_v9  ;;  %v7603_v50 = vld [vmem:[#allocation3 + $0x30] sm:$0xff] }
 0x18d   : > { %v2164_v8 = vpop.f32.mrf.mxu1  ;;  %4371 = vmatpush.bf16.msra.mxu2 %v7603_v50 }
 0x18e   : > { %v2239_v63 = vadd.f32 %v2162_v42, %v2041_v29  ;;  %v7860_v42 = vld [vmem:[%s8134_s26 + $0x90] sm:$0xff] }
 0x190   : > { %v9027_v13 = vadd.f32 %v2354_v55, %v2239_v63  ;;  %v7572_v63 = vld [vmem:[%s10858_s1 + $0x208] sm:$0xff] }
 0x191   : > { %v1752_v43 = vpop.f32.mrf.mxu3  ;;  %2758 = vmatpush.bf16.msra.mxu0 %v7572_v63 }
 0x192   : > { %v1828_v25 = vadd.f32 %v1752_v43, %v8791_v51 }
 0x193   : > { %v2356_v18 = vpop.f32.mrf.mxu2  ;;  %v1969_v56 = vpop.f32.mrf.mxu0 }
 0x194   : > { %v2042_v30 = vadd.f32 %v1966_v28, %v1828_v25 }
 0x195   : > { %v2167_v32 = vpop.f32.mrf.mxu1 }
 0x196   : > { %v2240_v5 = vadd.f32 %v2164_v8, %v2042_v30  ;;  %1794 = vmatmul.bf16.gmra.mxu3 %v8854_v1  ;;  %2008 = vmatmul.bf16.gmra.mxu0 %v8847_v7  ;;  %v7611_v1 = vld [vmem:[#allocation3 + $0x70] sm:$0xff] }
 0x197   : > { %4138 = vmatpush.bf16.msra.mxu1 %v7611_v1 }
 0x198   : > { %2398 = vmatmul.bf16.gmra.mxu2 %v7860_v42  ;;  %2206 = vmatmul.bf16.gmra.mxu1 %v8856_v41  ;;  %v9037_v11 = vadd.f32 %v2356_v18, %v2240_v5 }
 0x199   : > { %v1755_v51 = vpop.f32.mrf.mxu3 }
 0x19a   : > { %10986 = vst [vmem:[#allocation28_spill] sm:$0xff] %v9037_v11  ;;  %v1829_v27 = vadd.f32 %v1755_v51, %v8827_v36  ;;  %v7861_v51 = vld [vmem:[%s8134_s26 + $0x9c] sm:$0xff] }
 0x19b   : > { %v2359_v9 = vpop.f32.mrf.mxu2  ;;  %v1971_v55 = vpop.f32.mrf.mxu0 }
 0x19c   : > { %v2043_v28 = vadd.f32 %v1969_v56, %v1829_v27  ;;  %v10988_v56 = vld [vmem:[#allocation10_spill] sm:$0xff] }
 0x19d   : > { %v2169_v29 = vpop.f32.mrf.mxu1 }
 0x19e   : > { %v2241_v8 = vadd.f32 %v2167_v32, %v2043_v28  ;;  %v10989_v32 = vld [vmem:[#allocation23_spill] sm:$0xff] }
 0x1a0   : > { %v9043_v43 = vadd.f32 %v2359_v9, %v2241_v8 }
 0x1a1   : > { %v1757_v25 = vpop.f32.mrf.mxu3 }
 0x1a2   : > { %10987 = vst [vmem:[#allocation30_spill] sm:$0xff] %v9043_v43  ;;  %v1830_v18 = vadd.f32 %v1757_v25, %v8851_v21 }
 0x1a3   : > { %v2361_v30 = vpop.f32.mrf.mxu2  ;;  %v1974_v36 = vpop.f32.mrf.mxu0 }
 0x1a4   : > { %v2044_v5 = vadd.f32 %v1971_v55, %v1830_v18 }
 0x1a5   : > { %v2172_v39 = vpop.f32.mrf.mxu1 }
 0x1a6   : > { %v2242_v50 = vadd.f32 %v2169_v29, %v2044_v5  ;;  %1799 = vmatmul.bf16.gmra.mxu3 %v7860_v42  ;;  %2013 = vmatmul.bf16.gmra.mxu0 %v10988_v56 }
 0x1a8   : > { %2403 = vmatmul.bf16.gmra.mxu2 %v7861_v51  ;;  %2211 = vmatmul.bf16.gmra.mxu1 %v10989_v32  ;;  %v9049_v27 = vadd.f32 %v2361_v30, %v2242_v50  ;;  %v10992_v50 = vld [vmem:[#allocation12_spill] sm:$0xff] }
 0x1a9   : > { %v1760_v9 = vpop.f32.mrf.mxu3 }
 0x1aa   : > { %10990 = vst [vmem:[#allocation40_spill] sm:$0xff] %v9049_v27  ;;  %v1831_v1 = vadd.f32 %v1760_v9, %v8864_v10  ;;  %v7563_v10 = vld [vmem:[%s10858_s1 + $0x1c0] sm:$0xff]  ;;  %v7862_v9 = vld [vmem:[%s8134_s26 + $0xa8] sm:$0xff] }
 0x1ab   : > { %v2364_v28 = vpop.f32.mrf.mxu2  ;;  %v1976_v8 = vpop.f32.mrf.mxu0  ;;  %2561 = vmatpush.bf16.msra.mxu3 %v7563_v10  ;;  %v7505_v27 = vld [vmem:[%s8134_s26 + $0xc0] sm:$0xff] }
 0x1ac   : > { %v2045_v21 = vadd.f32 %v1974_v36, %v1831_v1  ;;  %v7602_v36 = vld [vmem:[#allocation3 + $0x28] sm:$0xff] }
 0x1ad   : > { %v2174_v63 = vpop.f32.mrf.mxu1  ;;  %4372 = vmatpush.bf16.msra.mxu2 %v7602_v36 }
 0x1ae   : > { %v2243_v55 = vadd.f32 %v2172_v39, %v2045_v21  ;;  %v10993_v39 = vld [vmem:[#allocation27_spill] sm:$0xff] }
 0x1b0   : > { %v9052_v25 = vadd.f32 %v2364_v28, %v2243_v55 }
 0x1b1   : > { %v1762_v42 = vpop.f32.mrf.mxu3 }
 0x1b2   : > { %10991 = vst [vmem:[#allocation41_spill] sm:$0xff] %v9052_v25  ;;  %v1832_v29 = vadd.f32 %v1762_v42, %v8868_v26  ;;  %v7571_v42 = vld [vmem:[%s10858_s1 + $0x200] sm:$0xff]  ;;  %v426_v25 = vld [vmem:[%s8134_s26 + $0xc8] sm:$0x1] }
 0x1b3   : > { %v2366_v18 = vpop.f32.mrf.mxu2  ;;  %v1979_v5 = vpop.f32.mrf.mxu0  ;;  %2759 = vmatpush.bf16.msra.mxu0 %v7571_v42 }
 0x1b4   : > { %v2046_v43 = vadd.f32 %v1976_v8, %v1832_v29 }
 0x1b5   : > { %v2177_v32 = vpop.f32.mrf.mxu1 }
 0x1b6   : > { %v2244_v30 = vadd.f32 %v2174_v63, %v2046_v43  ;;  %1804 = vmatmul.bf16.gmra.mxu3 %v7861_v51  ;;  %2018 = vmatmul.bf16.gmra.mxu0 %v10992_v50  ;;  %v7610_v51 = vld [vmem:[#allocation3 + $0x68] sm:$0xff] }
 0x1b7   : > { %4139 = vmatpush.bf16.msra.mxu1 %v7610_v51 }
 0x1b8   : > { %2408 = vmatmul.bf16.gmra.mxu2 %v7862_v9  ;;  %2216 = vmatmul.bf16.gmra.mxu1 %v10993_v39  ;;  %v9061_v1 = vadd.f32 %v2366_v18, %v2244_v30 }
 0x1b9   : > { %v1765_v26 = vpop.f32.mrf.mxu3 }
 0x1ba   : > { %10994 = vst [vmem:[#allocation42_spill] sm:$0xff] %v9061_v1  ;;  %v1833_v28 = vadd.f32 %v1765_v26, %v8880_v33  ;;  %v10999_v26 = vld [vmem:[#allocation14_spill] sm:$0xff] }
 0x1bb   : > { %v2369_v43 = vpop.f32.mrf.mxu2  ;;  %v1981_v8 = vpop.f32.mrf.mxu0 }
 0x1bc   : > { %v2047_v21 = vadd.f32 %v1979_v5, %v1833_v28  ;;  %v424_v28 = vld [vmem:[%s8134_s26 + $0xc0] sm:$0xf] }
 0x1bd   : > { %v9064_v63 = vpop.f32.mrf.mxu1  ;;  %v1858_v42 = vshrl.u32 %v424_v28, 16 }
 0x1be   : > { %10995 = vst [vmem:[#allocation43_spill] sm:$0xff] %v9064_v63  ;;  %v2245_v55 = vadd.f32 %v2177_v32, %v2047_v21  ;;  %v7863_v32 = vld [vmem:[%s8134_s26 + $0xb4] sm:$0xff] }
 0x1bf   : > { %v1860_v63 = vrot.slane %v1858_v42, 4 }
 0x1c0   : > { %v9069_v29 = vadd.f32 %v2369_v43, %v2245_v55  ;;  %v425_v43 = vld [vmem:[%s8134_s26 + $0xc4] sm:$0xf] }
 0x1c1   : > { %v1767_v18 = vpop.f32.mrf.mxu3  ;;  %v2074_v42 = vrot.slane %v425_v43, 5 }
 0x1c2   : > { %10996 = vst [vmem:[#allocation44_spill] sm:$0xff] %v9069_v29  ;;  %v1834_v33 = vadd.f32 %v1767_v18, %v8888_v16  ;;  %v1861_v18 = vshll.u32 %v424_v28, 16 }
 0x1c3   : > { %v9072_v30 = vpop.f32.mrf.mxu2  ;;  %v1984_v10 = vpop.f32.mrf.mxu0 }
 0x1c4   : > { %10997 = vst [vmem:[#allocation45_spill] sm:$0xff] %v9072_v30  ;;  %v9074_v5 = vadd.f32 %v1981_v8, %v1834_v33  ;;  %v1867_v8 = vshll.u32 %v425_v43, 16  ;;  %v1871_v33 = vshrl.u32 %v425_v43, 16 }
 0x1c5   : > { %v2182_v36 = vpop.f32.mrf.mxu1 }
 0x1c6   : > { %10998 = vst [vmem:[#allocation46_spill] sm:$0xff] %v9074_v5  ;;  %1809 = vmatmul.bf16.gmra.mxu3 %v7862_v9  ;;  %2023 = vmatmul.bf16.gmra.mxu0 %v10999_v26  ;;  %v1863_v5 = vrot.slane %v1861_v18, 5  ;;  %v1873_v26 = vrot.slane %v1871_v33, 4  ;;  %v11001_v18 = vld [vmem:[#allocation16_spill] sm:$0xff]  ;;  %v2076_v33 = vrot.slane %v2074_v42, 4 }
 0x1c8   : > { %2413 = vmatmul.bf16.gmra.mxu2 %v7863_v32  ;;  %2221 = vmatmul.bf16.gmra.mxu1 %v8788_v24  ;;  %v1869_v24 = vrot.slane %v1867_v8, 5  ;;  %v1864_v56 = vor.u32 %v1863_v5, %v1860_v63  ;;  %v6876_v8 = vrot.slane %v424_v28, 9 }
 0x1c9   : > { %v1770_v51 = vpop.f32.mrf.mxu3 }
 0x1ca   : > { %v1835_v21 = vadd.f32 %v1770_v51, %v8897_v0  ;;  %v1874_v11 = vor.u32 %v1873_v26, %v1869_v24 }
 0x1cb   : > { %v2374_v16 = vpop.f32.mrf.mxu2  ;;  %v1986_v55 = vpop.f32.mrf.mxu0 }
 0x1cc   : > { %v2049_v9 = vadd.f32 %v1984_v10, %v1835_v21  ;;  %v1877_v10 = vshll.u32 %v426_v25, 16 }
 0x1cd   : > { %v9082_v30 = vpop.f32.mrf.mxu1 }
 0x1ce   : > { %v2247_v29 = vadd.f32 %v2182_v36, %v2049_v9  ;;  %v2077_v9 = vrot.slane %v426_v25, 5 }
 0x1d0   : > { %v9084_v1 = vadd.f32 %v2374_v16, %v2247_v29  ;;  %v7601_v29 = vld [vmem:[#allocation3 + $0x20] sm:$0xff]  ;;  %v1865_v16 = vrot.slane %v1864_v56, 4  ;;  %v2075_v56 = vsel %vm8219_vm4, %v6876_v8, %v2074_v42  ;;  %v2078_v25 = vsel %vm8219_vm4, %v2076_v33, %v2077_v9  ;;  %v7506_v42 = vld [vmem:[%s8134_s26 + $0xcc] sm:$0xff] }
 0x1d1   : > { %v1772_v39 = vpop.f32.mrf.mxu3  ;;  %4373 = vmatpush.bf16.msra.mxu2 %v7601_v29  ;;  %v2096_v29 = vunpack.c.l.b16 %v2075_v56 }
 0x1d2   : > { %11000 = vst [vmem:[#allocation47_spill] sm:$0xff] %v9084_v1  ;;  %v1836_v0 = vadd.f32 %v1772_v39, %v8902_v62  ;;  %v1875_v62 = vrot.slane %v1874_v11, 4  ;;  %v1879_v39 = vrot.slane %v1877_v10, 5 }
 0x1d3   : > { %v9088_v51 = vpop.f32.mrf.mxu2  ;;  %v1989_v50 = vpop.f32.mrf.mxu0 }
 0x1d4   : > { %v9091_v21 = vadd.f32 %v1986_v55, %v1836_v0  ;;  %v7609_v55 = vld [vmem:[#allocation3 + $0x60] sm:$0xff]  ;;  %v1880_v0 = vsel %vm8232_vm5, %v1875_v62, %v1879_v39 }
 0x1d5   : > { %v2187_v36 = vpop.f32.mrf.mxu1  ;;  %4140 = vmatpush.bf16.msra.mxu1 %v7609_v55  ;;  %v1899_v10 = vunpack.c.l.b16 %v1880_v0 }
 0x1d6   : > { %1814 = vmatmul.bf16.gmra.mxu3 %v7863_v32  ;;  %2028 = vmatmul.bf16.gmra.mxu0 %v11001_v18  ;;  %v1870_v32 = vsel %vm8232_vm5, %v1865_v16, %v1869_v24 }
 0x1d7   : > { %v1898_v28 = vunpack.c.l.b16 %v1870_v32 }
 0x1d8   : > { %2418 = vmatmul.bf16.gmra.mxu2 %v7505_v27  ;;  %2226 = vmatmul.bf16.gmra.mxu1 %v8849_v57 }
 0x1d9   : > { %v1775_v63 = vpop.f32.mrf.mxu3  ;;  %v9109_v62 = vpack.c.b16 %v1899_v10, %v1898_v28 }
 0x1da   : > { %v1837_v5 = vadd.f32 %v1775_v63, %v8914_v2  ;;  %v2097_v63 = vunpack.c.l.b16 %v2078_v25 }
 0x1db   : > { %v2379_v26 = vpop.f32.mrf.mxu2  ;;  %v1991_v43 = vpop.f32.mrf.mxu0  ;;  %11002 = vst [vmem:[#allocation48_spill] sm:$0xff] %v9109_v62 }
 0x1dc   : > { %v2051_v1 = vadd.f32 %v1989_v50, %v1837_v5  ;;  %v9114_v8 = vpack.c.b16 %v2097_v63, %v2096_v29 }
 0x1dd   : > { %v9100_v11 = vpop.f32.mrf.mxu1 }
 0x1de   : > { %v2249_v2 = vadd.f32 %v2187_v36, %v2051_v1 }
 0x1e0   : > { %v9106_v24 = vadd.f32 %v2379_v26, %v2249_v2 }
 0x1e1   : > { %v1777_v16 = vpop.f32.mrf.mxu3 }
 0x1e2   : > { %v1838_v50 = vadd.f32 %v1777_v16, %v8922_v3 }
 0x1e3   : > { %v9111_v39 = vpop.f32.mrf.mxu2  ;;  %v1994_v5 = vpop.f32.mrf.mxu0 }
 0x1e4   : > { %v9116_v33 = vadd.f32 %v1991_v43, %v1838_v50  ;;  %v7608_v50 = vld [vmem:[#allocation3 + $0x58] sm:$0xff] }
 0x1e5   : > { %v2192_v1 = vpop.f32.mrf.mxu1  ;;  %4141 = vmatpush.bf16.msra.mxu1 %v7608_v50 }
 0x1e6   : > { %1819 = vmatmul.bf16.gmra.mxu3 %v7505_v27  ;;  %2033 = vmatmul.bf16.gmra.mxu0 %v9109_v62 }
 0x1e8   : > { %2423 = vmatmul.bf16.gmra.mxu2 %v7506_v42  ;;  %2231 = vmatmul.bf16.gmra.mxu1 %v9114_v8 }
 0x1e9   : > { %v1780_v36 = vpop.f32.mrf.mxu3 }
 0x1ea   : > { %v1839_v3 = vadd.f32 %v1780_v36, %v8931_v58  ;;  %v7600_v58 = vld [vmem:[#allocation3 + $0x18] sm:$0xff] }
 0x1eb   : > { %v2384_v9 = vpop.f32.mrf.mxu2  ;;  %v1996_v26 = vpop.f32.mrf.mxu0  ;;  %4374 = vmatpush.bf16.msra.mxu2 %v7600_v58 }
 0x1ec   : > { %v2053_v55 = vadd.f32 %v1994_v5, %v1839_v3 }
 0x1ed   : > { %v9121_v32 = vpop.f32.mrf.mxu1 }
 0x1ee   : > { %v2251_v0 = vadd.f32 %v2192_v1, %v2053_v55 }
 0x1f0   : > { %v9123_v56 = vadd.f32 %v2384_v9, %v2251_v0 }
 0x1f1   : > { %v1782_v43 = vpop.f32.mrf.mxu3 }
 0x1f2   : > { %v1840_v25 = vadd.f32 %v1782_v43, %v8936_v61 }
 0x1f3   : > { %v9126_v27 = vpop.f32.mrf.mxu2  ;;  %v1999_v2 = vpop.f32.mrf.mxu0 }
 0x1f4   : > { %v9128_v28 = vadd.f32 %v1996_v26, %v1840_v25 }
 0x1f5   : > { %v2197_v10 = vpop.f32.mrf.mxu1 }
 0x1f6   : > { %2562 = vmatmul.bf16.vlgmr.msra.gmra.mxu3 %v8431_v34  ;;  %2760 = vmatmul.bf16.vlgmr.msra.gmra.mxu0 %v8441_v4 }
 0x1f9   : > { %v1785_v29 = vpop.f32.mrf.mxu3 }
 0x1fa   : > { %v1841_v63 = vadd.f32 %v1785_v29, %v8948_v23 }
 0x1fb   : > { %v2389_v16 = vpop.f32.mrf.mxu2  ;;  %v2001_v5 = vpop.f32.mrf.mxu0 }
 0x1fc   : > { %v2055_v42 = vadd.f32 %v1999_v2, %v1841_v63 }
 0x1fd   : > { %v9133_v61 = vpop.f32.mrf.mxu1 }
 0x1fe   : > { %v2253_v1 = vadd.f32 %v2197_v10, %v2055_v42 }
 0x200   : > { %v9135_v36 = vadd.f32 %v2389_v16, %v2253_v1  ;;  %v7599_v1 = vld [vmem:[#allocation3 + $0x10] sm:$0xff] }
 0x201   : > { %v1787_v3 = vpop.f32.mrf.mxu3  ;;  %4375 = vmatpush.bf16.msra.mxu2 %v7599_v1 }
 0x202   : > { %v1842_v9 = vadd.f32 %v1787_v3, %v8956_v12 }
 0x203   : > { %v9138_v26 = vpop.f32.mrf.mxu2  ;;  %v2004_v4 = vpop.f32.mrf.mxu0 }
 0x204   : > { %v9140_v55 = vadd.f32 %v2001_v5, %v1842_v9 }
 0x205   : > { %v2202_v0 = vpop.f32.mrf.mxu1 }
 0x206   : > { %2567 = vmatmul.bf16.gmra.mxu3 %v8467_v40  ;;  %2765 = vmatmul.bf16.gmra.mxu0 %v8474_v49 }
 0x209   : > { %v1790_v23 = vpop.f32.mrf.mxu3 }
 0x20a   : > { %v1843_v43 = vadd.f32 %v1790_v23, %v8965_v60  ;;  %v11005_v60 = vld [vmem:[#allocation18_spill] sm:$0xff] }
 0x20b   : > { %v2394_v25 = vpop.f32.mrf.mxu2  ;;  %v2006_v2 = vpop.f32.mrf.mxu0 }
 0x20c   : > { %v2057_v10 = vadd.f32 %v2004_v4, %v1843_v43 }
 0x20d   : > { %v9145_v58 = vpop.f32.mrf.mxu1 }
 0x20e   : > { %11003 = vst [vmem:[#allocation49_spill] sm:$0xff] %v9145_v58  ;;  %v2255_v29 = vadd.f32 %v2202_v0, %v2057_v10  ;;  %v7607_v0 = vld [vmem:[#allocation3 + $0x50] sm:$0xff]  ;;  %v7622_v58 = vld [vmem:[#allocation3 + $0xc8] sm:$0xff] }
 0x20f   : > { %4142 = vmatpush.bf16.msra.mxu1 %v7607_v0 }
 0x210   : > { %v9147_v12 = vadd.f32 %v2394_v25, %v2255_v29 }
 0x211   : > { %v1792_v63 = vpop.f32.mrf.mxu3 }
 0x212   : > { %v1844_v16 = vadd.f32 %v1792_v63, %v8970_v47 }
 0x213   : > { %v9150_v50 = vpop.f32.mrf.mxu2  ;;  %v2009_v5 = vpop.f32.mrf.mxu0 }
 0x214   : > { %11004 = vst [vmem:[#allocation50_spill] sm:$0xff] %v9150_v50  ;;  %v9152_v42 = vadd.f32 %v2006_v2, %v1844_v16 }
 0x215   : > { %v2207_v49 = vpop.f32.mrf.mxu1 }
 0x216   : > { %2572 = vmatmul.bf16.gmra.mxu3 %v8498_v15  ;;  %2770 = vmatmul.bf16.gmra.mxu0 %v11005_v60 }
 0x219   : > { %v1795_v3 = vpop.f32.mrf.mxu3 }
 0x21a   : > { %v1845_v9 = vadd.f32 %v1795_v3, %v8982_v52 }
 0x21b   : > { %v2399_v4 = vpop.f32.mrf.mxu2  ;;  %v2011_v23 = vpop.f32.mrf.mxu0 }
 0x21c   : > { %v2059_v43 = vadd.f32 %v2009_v5, %v1845_v9 }
 0x21d   : > { %v9157_v47 = vpop.f32.mrf.mxu1 }
 0x21e   : > { %11006 = vst [vmem:[#allocation18_spill] sm:$0xff] %v9157_v47  ;;  %v2257_v25 = vadd.f32 %v2207_v49, %v2059_v43 }
 0x220   : > { %v9159_v2 = vadd.f32 %v2399_v4, %v2257_v25 }
 0x221   : > { %v1797_v10 = vpop.f32.mrf.mxu3 }
 0x222   : > { %11007 = vst [vmem:[#allocation51_spill] sm:$0xff] %v9159_v2  ;;  %v1846_v29 = vadd.f32 %v1797_v10, %v8990_v44 }
 0x223   : > { %v9162_v63 = vpop.f32.mrf.mxu2  ;;  %v2014_v16 = vpop.f32.mrf.mxu0 }
 0x224   : > { %11008 = vst [vmem:[#allocation52_spill] sm:$0xff] %v9162_v63  ;;  %v9164_v60 = vadd.f32 %v2011_v23, %v1846_v29 }
 0x225   : > { %v2212_v1 = vpop.f32.mrf.mxu1 }
 0x226   : > { %11009 = vst [vmem:[#allocation53_spill] sm:$0xff] %v9164_v60  ;;  %2577 = vmatmul.bf16.gmra.mxu3 %v8523_v45  ;;  %2775 = vmatmul.bf16.gmra.mxu0 %v8529_v31  ;;  %v11017_v45 = vld [vmem:[#allocation35_spill] sm:$0xff] }
 0x229   : > { %v1800_v52 = vpop.f32.mrf.mxu3 }
 0x22a   : > { %v1847_v5 = vadd.f32 %v1800_v52, %v8999_v35  ;;  %v7598_v35 = vld [vmem:[#allocation3 + $0x8] sm:$0xff] }
 0x22b   : > { %v2404_v3 = vpop.f32.mrf.mxu2  ;;  %v2016_v49 = vpop.f32.mrf.mxu0  ;;  %4376 = vmatpush.bf16.msra.mxu2 %v7598_v35  ;;  %v11014_v52 = vld [vmem:[#allocation34_spill] sm:$0xff] }
 0x22c   : > { %v2061_v9 = vadd.f32 %v2014_v16, %v1847_v5 }
 0x22d   : > { %v9169_v4 = vpop.f32.mrf.mxu1 }
 0x22e   : > { %11010 = vst [vmem:[#allocation54_spill] sm:$0xff] %v9169_v4  ;;  %v2259_v0 = vadd.f32 %v2212_v1, %v2061_v9  ;;  %v7605_v4 = vld [vmem:[#allocation3 + $0x40] sm:$0xff] }
 0x230   : > { %v9171_v44 = vadd.f32 %v2404_v3, %v2259_v0  ;;  %v7606_v3 = vld [vmem:[#allocation3 + $0x48] sm:$0xff] }
 0x231   : > { %v1802_v43 = vpop.f32.mrf.mxu3  ;;  %4143 = vmatpush.bf16.msra.mxu1 %v7606_v3 }
 0x232   : > { %11011 = vst [vmem:[#allocation55_spill] sm:$0xff] %v9171_v44  ;;  %v1848_v23 = vadd.f32 %v1802_v43, %v9004_v17 }
 0x233   : > { %v9174_v25 = vpop.f32.mrf.mxu2  ;;  %v2019_v10 = vpop.f32.mrf.mxu0 }
 0x234   : > { %11012 = vst [vmem:[#allocation56_spill] sm:$0xff] %v9174_v25  ;;  %v9176_v29 = vadd.f32 %v2016_v49, %v1848_v23 }
 0x235   : > { %v2217_v31 = vpop.f32.mrf.mxu1  ;;  %4144 = vmatpush.bf16.msra.mxu1 %v7605_v4 }
 0x236   : > { %11013 = vst [vmem:[#allocation57_spill] sm:$0xff] %v9176_v29  ;;  %2582 = vmatmul.bf16.gmra.mxu3 %v8545_v20  ;;  %2780 = vmatmul.bf16.gmra.mxu0 %v8551_v38 }
 0x239   : > { %v1805_v16 = vpop.f32.mrf.mxu3 }
 0x23a   : > { %v1849_v1 = vadd.f32 %v1805_v16, %v11014_v52 }
 0x23b   : > { %v2409_v5 = vpop.f32.mrf.mxu2  ;;  %v2021_v9 = vpop.f32.mrf.mxu0 }
 0x23c   : > { %v2063_v0 = vadd.f32 %v2019_v10, %v1849_v1 }
 0x23d   : > { %v9181_v17 = vpop.f32.mrf.mxu1 }
 0x23e   : > { %11015 = vst [vmem:[#allocation34_spill] sm:$0xff] %v9181_v17  ;;  %v2261_v43 = vadd.f32 %v2217_v31, %v2063_v0 }
 0x240   : > { %v9183_v49 = vadd.f32 %v2409_v5, %v2261_v43 }
 0x241   : > { %v1807_v23 = vpop.f32.mrf.mxu3 }
 0x242   : > { %11016 = vst [vmem:[#allocation58_spill] sm:$0xff] %v9183_v49  ;;  %v1850_v20 = vadd.f32 %v1807_v23, %v11017_v45 }
 0x243   : > { %v9186_v15 = vpop.f32.mrf.mxu2  ;;  %v2024_v38 = vpop.f32.mrf.mxu0 }
 0x244   : > { %11018 = vst [vmem:[#allocation35_spill] sm:$0xff] %v9186_v15  ;;  %v9188_v35 = vadd.f32 %v2021_v9, %v1850_v20  ;;  %v3070_v15 = vld [vmem:[#allocation2 + $0x14] sm:$0x1] }
 0x245   : > { %v2222_v40 = vpop.f32.mrf.mxu1  ;;  %v3071_v17 = vsel %vm9234_vm10, 0, %v3070_v15 }
 0x246   : > { %11019 = vst [vmem:[#allocation59_spill] sm:$0xff] %v9188_v35  ;;  %2587 = vmatmul.bf16.gmra.mxu3 %v8584_v46  ;;  %2785 = vmatmul.bf16.gmra.mxu0 %v8590_v19  ;;  %v11024_v19 = vld [vmem:[#allocation24_spill] sm:$0xff] }
 0x247   : > { %3072 = vst [vmem:[#allocation2 + $0x14] sm:$0x1] %v3071_v17  ;;  %v3023_v17 = vld [vmem:[#allocation2 + $0x18] sm:$0x1] }
 0x249   : > { %v1810_v10 = vpop.f32.mrf.mxu3 }
 0x24a   : > { %v1851_v16 = vadd.f32 %v1810_v10, %v8963_v14  ;;  %v7597_v14 = vld [vmem:[#allocation3] sm:$0xff] }
 0x24b   : > { %v2414_v52 = vpop.f32.mrf.mxu2  ;;  %v2026_v31 = vpop.f32.mrf.mxu0  ;;  %4377 = vmatpush.bf16.msra.mxu2 %v7597_v14 }
 0x24c   : > { %v2065_v1 = vadd.f32 %v2024_v38, %v1851_v16  ;;  %v11025_v16 = vld [vmem:[#allocation36_spill] sm:$0xff] }
 0x24d   : > { %v9193_v5 = vpop.f32.mrf.mxu1 }
 0x24e   : > { %11020 = vst [vmem:[#allocation60_spill] sm:$0xff] %v9193_v5  ;;  %v2263_v3 = vadd.f32 %v2222_v40, %v2065_v1 }
 0x250   : > { %v9195_v45 = vadd.f32 %v2414_v52, %v2263_v3 }
 0x251   : > { %v1812_v0 = vpop.f32.mrf.mxu3 }
 0x252   : > { %11021 = vst [vmem:[#allocation61_spill] sm:$0xff] %v9195_v45  ;;  %v1852_v20 = vadd.f32 %v1812_v0, %v8968_v22  ;;  %v7985_v22 = vmov 0  }
 0x253   : > { %v9198_v9 = vpop.f32.mrf.mxu2  ;;  %v2029_v43 = vpop.f32.mrf.mxu0  ;;  %3009 = vst [vmem:[#allocation2] sm:$0xf] %v7985_v22 }
 0x254   : > { %11022 = vst [vmem:[#allocation62_spill] sm:$0xff] %v9198_v9  ;;  %v9200_v23 = vadd.f32 %v2026_v31, %v1852_v20 }
 0x255   : > { %v2227_v10 = vpop.f32.mrf.mxu1  ;;  %3010 = vst [vmem:[#allocation2 + $0x4] sm:$0xf] %v7985_v22 }
 0x256   : > { %11023 = vst [vmem:[#allocation63_spill] sm:$0xff] %v9200_v23  ;;  %2592 = vmatmul.bf16.gmra.mxu3 %v8632_v59  ;;  %2790 = vmatmul.bf16.gmra.mxu0 %v11024_v19  ;;  %v11028_v19 = vld [vmem:[#allocation37_spill] sm:$0xff] }
 0x257   : > { %3011 = vst [vmem:[#allocation2 + $0x8] sm:$0x1] %v7985_v22 }
 0x258   : > { %3013 = vst [vmem:[#allocation2 + $0xcc] sm:$0xf] %v7985_v22 }
 0x259   : > { %v1815_v38 = vpop.f32.mrf.mxu3  ;;  %3014 = vst [vmem:[#allocation2 + $0xd0] sm:$0xf] %v7985_v22 }
 0x25a   : > { %v1853_v40 = vadd.f32 %v1815_v38, %v11025_v16  ;;  %3015 = vst [vmem:[#allocation2 + $0xd4] sm:$0x1] %v7985_v22 }
 0x25b   : > { %v2419_v52 = vpop.f32.mrf.mxu2  ;;  %v2031_v1 = vpop.f32.mrf.mxu0 }
 0x25c   : > { %v2067_v3 = vadd.f32 %v2029_v43, %v1853_v40  ;;  %v9222_v40 = vld [vmem:[#allocation2] sm:$0xf] }
 0x25d   : > { %v9207_v20 = vpop.f32.mrf.mxu1  ;;  %v3628_v34 = vshll.u32 %v9222_v40, 16  ;;  %v7579_v49 = vld [vmem:[#allocation2] sm:$0xff] }
 0x25e   : > { %v2265_v46 = vadd.f32 %v2227_v10, %v2067_v3  ;;  %11027 = vst [vmem:[#allocation36_spill] sm:$0xff] %v9207_v20  ;;  %v11034_v3 = vld [vmem:[#allocation29_spill] sm:$0xff]  ;;  %v11037_v20 = vld [vmem:[#allocation38_spill] sm:$0xff]  ;;  %4378 = vmatmul.bf16.vlgmr.msra.gmra.mxu2 %v7579_v49 }
 0x260   : > { %v9205_v0 = vadd.f32 %v2419_v52, %v2265_v46  ;;  %v3020_v46 = vld [vmem:[#allocation2 + $0xc] sm:$0x1]  ;;  %v11033_v52 = vld [vmem:[#allocation26_spill] sm:$0xff] }
 0x261   : > { %v1817_v31 = vpop.f32.mrf.mxu3  ;;  %v3021_v16 = vsel %vm9214_vm8, 0, %v3020_v46  ;;  %v3630_v46 = vrot.slane %v3628_v34, 5 }
 0x262   : > { %11026 = vst [vmem:[#allocation24_spill] sm:$0xff] %v9205_v0  ;;  %v1854_v59 = vadd.f32 %v1817_v31, %v11028_v19  ;;  %v9226_v31 = vld [vmem:[#allocation2 + $0x4] sm:$0xf]  ;;  %v3625_v19 = vshrl.u32 %v9222_v40, 16 }
 0x263   : > { %v2034_v14 = vpop.f32.mrf.mxu0  ;;  %v9210_v38 = vpop.f32.mrf.mxu2  ;;  %3022 = vst [vmem:[#allocation2 + $0xc] sm:$0x1] %v3021_v16 }
 0x264   : > { %11029 = vst [vmem:[#allocation37_spill] sm:$0xff] %v9210_v38  ;;  %v9218_v10 = vadd.f32 %v2031_v1, %v1854_v59  ;;  %v3634_v59 = vshll.u32 %v9226_v31, 16  ;;  %v3638_v1 = vshrl.u32 %v9226_v31, 16  ;;  %v3627_v22 = vrot.slane %v3625_v19, 4 }
 0x265   : > { %v2232_v23 = vpop.f32.mrf.mxu1 }
 0x266   : > { %11032 = vst [vmem:[#allocation64_spill] sm:$0xff] %v9218_v10  ;;  %2597 = vmatmul.bf16.gmra.mxu3 %v11033_v52  ;;  %2795 = vmatmul.bf16.gmra.mxu0 %v11034_v3  ;;  %v3556_v3 = vld [vmem:[#allocation2 + $0x8] sm:$0x1]  ;;  %v3636_v38 = vrot.slane %v3634_v59, 5  ;;  %v3640_v0 = vrot.slane %v3638_v1, 4  ;;  %v3631_v9 = vor.u32 %v3630_v46, %v3627_v22 }
 0x267   : > { %v3644_v45 = vshll.u32 %v3556_v3, 16 }
 0x268   : > { %v3641_v19 = vor.u32 %v3640_v0, %v3636_v38  ;;  %v3632_v35 = vrot.slane %v3631_v9, 4  ;;  %v11039_v9 = vld [vmem:[#allocation39_spill] sm:$0xff] }
 0x269   : > { %v1820_v16 = vpop.f32.mrf.mxu3  ;;  %v3646_v25 = vrot.slane %v3644_v45, 5 }
 0x26a   : > { %v1855_v10 = vadd.f32 %v1820_v16, %v11037_v20  ;;  %v3642_v59 = vrot.slane %v3641_v19, 4  ;;  %v3637_v20 = vsel %vm8232_vm5, %v3632_v35, %v3636_v38  ;;  %v9258_v35 = vld [vmem:[%s10859_s2] ss:$0 sm:$0xff] }
 0x26b   : > { %v2036_v5 = vpop.f32.mrf.mxu0  ;;  %v2424_v44 = vpop.f32.mrf.mxu2  ;;  %v4025_v0 = vunpack.c.l.b16 %v3637_v20  ;;  %v9263_v19 = vld [vmem:[%s10860_s3] ss:$0 sm:$0xff] }
 0x26c   : > { %v2069_v34 = vadd.f32 %v2034_v14, %v1855_v10  ;;  %v3647_v22 = vsel %vm8232_vm5, %v3642_v59, %v3646_v25 }
 0x26d   : > { %v4026_v10 = vunpack.c.l.b16 %v3647_v22 }
 0x26e   : > { %v2267_v1 = vadd.f32 %v2232_v23, %v2069_v34  ;;  %v3024_v23 = vsel %vm9214_vm8, 0, %v3023_v17 }
 0x26f   : > { %v4057_v46 = vpack.c.b16 %v4026_v10, %v4025_v0  ;;  %3025 = vst [vmem:[#allocation2 + $0x18] sm:$0x1] %v3024_v23  ;;  %v7644_v23 = vld [vmem:[#allocation3 + $0x178] sm:$0xff] }
 0x270   : > { %v9245_v14 = vadd.f32 %v2424_v44, %v2267_v1  ;;  %v11041_v44 = vld [vmem:[#allocation25_spill] sm:$0xff]  ;;  %5320 = vmatpush.bf16.msrb.mxu2 %v7644_v23 }
 0x271   : > { %v1822_v15 = vpop.f32.mrf.mxu3  ;;  %4145 = vmatmul.bf16.vlgmr.msra.gmra.mxu1 %v4057_v46 }
 0x272   : > { %11038 = vst [vmem:[#allocation29_spill] sm:$0xff] %v9245_v14  ;;  %v1856_v45 = vadd.f32 %v1822_v15, %v11039_v9  ;;  %v3026_v15 = vld [vmem:[#allocation2 + $0x24] sm:$0x1] }
 0x273   : > { %v2761_v16 = vpop.f32.mrf.mxu0  ;;  %v3027_v46 = vsel %vm9214_vm8, 0, %v3026_v15 }
 0x274   : > { %v9248_v49 = vadd.f32 %v2036_v5, %v1856_v45  ;;  %v3073_v5 = vld [vmem:[#allocation2 + $0x20] sm:$0x1]  ;;  %3028 = vst [vmem:[#allocation2 + $0x24] sm:$0x1] %v3027_v46 }
 0x275   : > { %v3074_v34 = vsel %vm9234_vm10, 0, %v3073_v5  ;;  %v3442_v5 = vld [vmem:[#allocation2 + $0xc] sm:$0xf] }
 0x276   : > { %11040 = vst [vmem:[#allocation38_spill] sm:$0xff] %v9248_v49  ;;  %2602 = vmatmul.bf16.gmra.mxu3 %v8786_v53  ;;  %2800 = vmatmul.bf16.gmra.mxu0 %v8796_v37  ;;  %v7620_v37 = vld [vmem:[#allocation3 + $0xb8] sm:$0xff] }
 0x277   : > { %3075 = vst [vmem:[#allocation2 + $0x20] sm:$0x1] %v3074_v34  ;;  %4716 = vmatpush.bf16.msrb.mxu3 %v7620_v37 }
 0x279   : > { %v2563_v4 = vpop.f32.mrf.mxu3 }
 0x27a   : > { %v2643_v25 = vadd.f32 %v2563_v4, %v11041_v44  ;;  %v7628_v4 = vld [vmem:[#allocation3 + $0xf8] sm:$0xff] }
 0x27b   : > { %v2763_v38 = vpop.f32.mrf.mxu0  ;;  %4908 = vmatpush.bf16.msrb.mxu0 %v7628_v4 }
 0x27c   : > { %v2841_v3 = vadd.f32 %v2761_v16, %v2643_v25 }
 0x27e   : > { %v2877_v59 = vmul.f32 %v9258_v35, %v2841_v3 }
 0x280   : > { %v2913_v1 = vadd.f32 %v9263_v19, %v2877_v59 }
 0x281   : > { %v2565_v20 = vpop.f32.mrf.mxu3 }
 0x282   : > { %v2945_v22 = vmax.f32 %v2913_v1, 0.0  ;;  %v2644_v0 = vadd.f32 %v2565_v20, %v9024_v6  ;;  %v3076_v1 = vld [vmem:[#allocation2 + $0x2c] sm:$0x1] }
 0x283   : > { %v2766_v10 = vpop.f32.mrf.mxu0  ;;  %v3077_v15 = vsel %vm9234_vm10, 0, %v3076_v1  ;;  %v3029_v1 = vld [vmem:[#allocation2 + $0x30] sm:$0x1] }
 0x284   : > { %v2977_v9 = vpack.c.bf16 %v2945_v22, %v2945_v22  ;;  %v2842_v45 = vadd.f32 %v2763_v38, %v2644_v0  ;;  %3078 = vst [vmem:[#allocation2 + $0x2c] sm:$0x1] %v3077_v15 }
 0x286   : > { %v3121_v16 = vshrl.u32 %v2977_v9, 16  ;;  %v2878_v17 = vmul.f32 %v9258_v35, %v2842_v45  ;;  %2607 = vmatmul.bf16.gmra.mxu3 %v8847_v7  ;;  %2805 = vmatmul.bf16.gmra.mxu0 %v8856_v41  ;;  %v3124_v6 = vshll.u32 %v2977_v9, 16  ;;  %v7636_v9 = vld [vmem:[#allocation3 + $0x138] sm:$0xff] }
 0x287   : > { %5122 = vmatpush.bf16.msrb.mxu1 %v7636_v9  ;;  %v3030_v9 = vsel %vm9214_vm8, 0, %v3029_v1  ;;  %v11049_v1 = vld [vmem:[#allocation30_spill] sm:$0xff] }
 0x288   : > { %v3123_v44 = vrot.slane %v3121_v16, 7  ;;  %v2914_v25 = vadd.f32 %v9263_v19, %v2878_v17  ;;  %3031 = vst [vmem:[#allocation2 + $0x30] sm:$0x1] %v3030_v9 }
 0x289   : > { %v2568_v3 = vpop.f32.mrf.mxu3 }
 0x28a   : > { %v3126_v34 = vor.u32 %v3124_v6, %v3123_v44  ;;  %v2946_v37 = vmax.f32 %v2914_v25, 0.0  ;;  %v2645_v59 = vadd.f32 %v2568_v3, %v9027_v13  ;;  %v3127_v23 = vrot.slane %v3123_v44, 4 }
 0x28b   : > { %v2768_v41 = vpop.f32.mrf.mxu0 }
 0x28c   : > { %v3443_v20 = vsel %vm9277_vm12, %v3126_v34, %v3442_v5  ;;  %v2978_v22 = vpack.c.bf16 %v2946_v37, %v2946_v37  ;;  %v2843_v0 = vadd.f32 %v2766_v10, %v2645_v59  ;;  %v3446_v10 = vld [vmem:[#allocation2 + $0x14] sm:$0x1] }
 0x28d   : > { %3444 = vst [vmem:[#allocation2 + $0xc] sm:$0xf] %v3443_v20  ;;  %v11046_v34 = vld [vmem:[#allocation28_spill] sm:$0xff] }
 0x28e   : > { %v3129_v45 = vshrl.u32 %v2978_v22, 16  ;;  %v2879_v46 = vmul.f32 %v9258_v35, %v2843_v0  ;;  %v3132_v13 = vshll.u32 %v2978_v22, 16 }
 0x290   : > { %v3131_v16 = vrot.slane %v3129_v45, 7  ;;  %v2915_v17 = vadd.f32 %v9263_v19, %v2879_v46 }
 0x291   : > { %v2570_v6 = vpop.f32.mrf.mxu3 }
 0x292   : > { %v3134_v25 = vor.u32 %v3132_v13, %v3131_v16  ;;  %v3136_v5 = vrot.slane %v3131_v16, 4  ;;  %v2947_v3 = vmax.f32 %v2915_v17, 0.0  ;;  %v2646_v37 = vadd.f32 %v2570_v6, %v11046_v34  ;;  %v11047_v13 = vld [vmem:[#allocation10_spill] sm:$0xff]  ;;  %v11048_v17 = vld [vmem:[#allocation23_spill] sm:$0xff] }
 0x293   : > { %v2771_v59 = vpop.f32.mrf.mxu0 }
 0x294   : > { %v3135_v20 = vsel %vm9289_vm14, %v3127_v23, %v3134_v25  ;;  %v3447_v44 = vsel %vm9214_vm8, %v3136_v5, %v3446_v10  ;;  %v2979_v22 = vpack.c.bf16 %v2947_v3, %v2947_v3  ;;  %v2844_v0 = vadd.f32 %v2768_v41, %v2646_v37  ;;  %v3557_v15 = vld [vmem:[#allocation2 + $0xc] sm:$0xf]  ;;  %v3449_v25 = vld [vmem:[#allocation2 + $0x18] sm:$0xf] }
 0x295   : > { %3445 = vst [vmem:[#allocation2 + $0x10] sm:$0xf] %v3135_v20  ;;  %v3649_v45 = vshrl.u32 %v3557_v15, 16  ;;  %v3652_v23 = vshll.u32 %v3557_v15, 16 }
 0x296   : > { %3448 = vst [vmem:[#allocation2 + $0x14] sm:$0x1] %v3447_v44  ;;  %v3138_v46 = vshrl.u32 %v2979_v22, 16  ;;  %v2880_v16 = vmul.f32 %v9258_v35, %v2844_v0  ;;  %2612 = vmatmul.bf16.gmra.mxu3 %v11047_v13  ;;  %2810 = vmatmul.bf16.gmra.mxu0 %v11048_v17  ;;  %v3141_v10 = vshll.u32 %v2979_v22, 16 }
 0x297   : > { %v3651_v3 = vrot.slane %v3649_v45, 4  ;;  %v3654_v44 = vrot.slane %v3652_v23, 5 }
 0x298   : > { %v3140_v6 = vrot.slane %v3138_v46, 7  ;;  %v2916_v41 = vadd.f32 %v9263_v19, %v2880_v16  ;;  %v7203_v16 = vrot.slane %v3557_v15, 9 }
 0x299   : > { %v2573_v5 = vpop.f32.mrf.mxu3 }
 0x29a   : > { %v3143_v34 = vor.u32 %v3141_v10, %v3140_v6  ;;  %v2948_v37 = vmax.f32 %v2916_v41, 0.0  ;;  %v2647_v20 = vadd.f32 %v2573_v5, %v11049_v1  ;;  %v3655_v10 = vor.u32 %v3654_v44, %v3651_v3  ;;  %v7619_v41 = vld [vmem:[#allocation3 + $0xb0] sm:$0xff] }
 0x29b   : > { %v2773_v7 = vpop.f32.mrf.mxu0  ;;  %4717 = vmatpush.bf16.msrb.mxu3 %v7619_v41 }
 0x29c   : > { %v3450_v0 = vsel %vm9277_vm12, %v3143_v34, %v3449_v25  ;;  %v2980_v13 = vpack.c.bf16 %v2948_v37, %v2948_v37  ;;  %v2845_v17 = vadd.f32 %v2771_v59, %v2647_v20  ;;  %v9307_v53 = vld [vmem:[#allocation2 + $0xc] sm:$0xff]  ;;  %v3079_v34 = vld [vmem:[#allocation2 + $0x38] sm:$0x1]  ;;  %v3453_v20 = vld [vmem:[#allocation2 + $0x20] sm:$0x1] }
 0x29d   : > { %v3558_v9 = vld [vmem:[#allocation2 + $0x10] sm:$0xf]  ;;  %3451 = vst [vmem:[#allocation2 + $0x18] sm:$0xf] %v3450_v0  ;;  %v3559_v22 = vld [vmem:[#allocation2 + $0x14] sm:$0x1]  ;;  %4383 = vmatmul.bf16.gmra.mxu2 %v9307_v53 }
 0x29e   : > { %v3658_v46 = vshll.u32 %v3558_v9, 16  ;;  %v3146_v14 = vshrl.u32 %v2980_v13, 16  ;;  %v2881_v45 = vmul.f32 %v9258_v35, %v2845_v17  ;;  %v3662_v23 = vshrl.u32 %v3558_v9, 16 }
 0x29f   : > { %v3149_v5 = vshll.u32 %v2980_v13, 16  ;;  %v3668_v25 = vshll.u32 %v3559_v22, 16  ;;  %v4484_v59 = vrot.slane %v3558_v9, 5  ;;  %v3080_v15 = vsel %vm9234_vm10, 0, %v3079_v34 }
 0x2a0   : > { %v3660_v1 = vrot.slane %v3658_v46, 5  ;;  %v3148_v37 = vrot.slane %v3146_v14, 7  ;;  %v2917_v0 = vadd.f32 %v9263_v19, %v2881_v45  ;;  %v3664_v49 = vrot.slane %v3662_v23, 4  ;;  %3081 = vst [vmem:[#allocation2 + $0x38] sm:$0x1] %v3080_v15  ;;  %v11050_v14 = vld [vmem:[#allocation40_spill] sm:$0xff] }
 0x2a1   : > { %v3144_v17 = vrot.slane %v3140_v6, 4  ;;  %v2575_v29 = vpop.f32.mrf.mxu3  ;;  %v4485_v3 = vsel %vm8219_vm4, %v7203_v16, %v4484_v59  ;;  %v4486_v13 = vrot.slane %v4484_v59, 4  ;;  %v4487_v44 = vrot.slane %v3559_v22, 5  ;;  %v11051_v15 = vld [vmem:[#allocation12_spill] sm:$0xff] }
 0x2a2   : > { %v3151_v46 = vor.u32 %v3149_v5, %v3148_v37  ;;  %v3153_v63 = vrot.slane %v3148_v37, 4  ;;  %v2949_v9 = vmax.f32 %v2917_v0, 0.0  ;;  %v2648_v2 = vadd.f32 %v2575_v29, %v11050_v14  ;;  %v3032_v29 = vld [vmem:[#allocation2 + $0x3c] sm:$0x1] }
 0x2a3   : > { %v2776_v47 = vpop.f32.mrf.mxu0  ;;  %v3656_v45 = vrot.slane %v3655_v10, 4  ;;  %v3665_v23 = vor.u32 %v3664_v49, %v3660_v1  ;;  %v3670_v41 = vrot.slane %v3668_v25, 5  ;;  %v4488_v34 = vsel %vm8219_vm4, %v4486_v13, %v4487_v44 }
 0x2a4   : > { %v3152_v6 = vsel %vm9289_vm14, %v3144_v17, %v3151_v46  ;;  %v3454_v16 = vsel %vm9214_vm8, %v3153_v63, %v3453_v20  ;;  %v2981_v59 = vpack.c.bf16 %v2949_v9, %v2949_v9  ;;  %v2846_v22 = vadd.f32 %v2773_v7, %v2648_v2  ;;  %v9323_v5 = vld [vmem:[#allocation2 + $0x18] sm:$0xf]  ;;  %v11052_v17 = vld [vmem:[#allocation27_spill] sm:$0xff] }
 0x2a5   : > { %3452 = vst [vmem:[#allocation2 + $0x1c] sm:$0xf] %v3152_v6  ;;  %v3666_v37 = vrot.slane %v3665_v23, 4  ;;  %v3673_v10 = vshrl.u32 %v9323_v5, 16  ;;  %v4607_v49 = vunpack.c.l.b16 %v4488_v34  ;;  %v3661_v63 = vsel %vm8232_vm5, %v3656_v45, %v3660_v1  ;;  %v7643_v7 = vld [vmem:[#allocation3 + $0x170] sm:$0xff] }
 0x2a6   : > { %3455 = vst [vmem:[#allocation2 + $0x20] sm:$0x1] %v3454_v16  ;;  %v3155_v25 = vshrl.u32 %v2981_v59, 16  ;;  %v2882_v0 = vmul.f32 %v9258_v35, %v2846_v22  ;;  %2617 = vmatmul.bf16.gmra.mxu3 %v11051_v15  ;;  %2815 = vmatmul.bf16.gmra.mxu0 %v11052_v17  ;;  %v7627_v2 = vld [vmem:[#allocation3 + $0xf0] sm:$0xff]  ;;  %v4606_v20 = vunpack.c.l.b16 %v4485_v3  ;;  %v3158_v13 = vshll.u32 %v2981_v59, 16  ;;  %v11053_v22 = vld [vmem:[#allocation41_spill] sm:$0xff] }
 0x2a7   : > { %v3671_v44 = vsel %vm8232_vm5, %v3666_v37, %v3670_v41  ;;  %v3033_v46 = vsel %vm9214_vm8, 0, %v3032_v29  ;;  %v3676_v9 = vshll.u32 %v9323_v5, 16  ;;  %5321 = vmatpush.bf16.msrb.mxu2 %v7643_v7  ;;  %4909 = vmatpush.bf16.msrb.mxu0 %v7627_v2  ;;  %v3456_v45 = vld [vmem:[#allocation2 + $0x24] sm:$0xf]  ;;  %v4027_v6 = vunpack.c.l.b16 %v3661_v63 }
 0x2a8   : > { %v3157_v14 = vrot.slane %v3155_v25, 7  ;;  %v2918_v23 = vadd.f32 %v9263_v19, %v2882_v0  ;;  %v4028_v34 = vunpack.c.l.b16 %v3671_v44  ;;  %3034 = vst [vmem:[#allocation2 + $0x3c] sm:$0x1] %v3033_v46  ;;  %v9337_v1 = vpack.c.b16 %v4607_v49, %v4606_v20 }
 0x2a9   : > { %v2578_v3 = vpop.f32.mrf.mxu3  ;;  %v3675_v16 = vrot.slane %v3673_v10, 4  ;;  %v3678_v29 = vrot.slane %v3676_v9, 5  ;;  %v7204_v20 = vrot.slane %v9323_v5, 9 }
 0x2aa   : > { %v3160_v59 = vor.u32 %v3158_v13, %v3157_v14  ;;  %v2950_v41 = vmax.f32 %v2918_v23, 0.0  ;;  %v2649_v37 = vadd.f32 %v2578_v3, %v11053_v22  ;;  %v9340_v17 = vpack.c.b16 %v4028_v34, %v4027_v6  ;;  %v7635_v34 = vld [vmem:[#allocation3 + $0x130] sm:$0xff]  ;;  %v3082_v3 = vld [vmem:[#allocation2 + $0x44] sm:$0x1] }
 0x2ab   : > { %v2778_v25 = vpop.f32.mrf.mxu0  ;;  %v3679_v9 = vor.u32 %v3678_v29, %v3675_v16  ;;  %5123 = vmatpush.bf16.msrb.mxu1 %v7635_v34  ;;  %v3161_v5 = vrot.slane %v3157_v14, 4 }
 0x2ac   : > { %11054 = vst [vmem:[#allocation39_spill] sm:$0xff] %v9340_v17  ;;  %v3457_v0 = vsel %vm9277_vm12, %v3160_v59, %v3456_v45  ;;  %v2982_v7 = vpack.c.bf16 %v2950_v41, %v2950_v41  ;;  %v2847_v2 = vadd.f32 %v2776_v47, %v2649_v37  ;;  %v7581_v44 = vld [vmem:[#allocation2 + $0x18] sm:$0xff]  ;;  %4150 = vmatmul.bf16.gmra.mxu1 %v9340_v17  ;;  %v3083_v47 = vsel %vm9234_vm10, 0, %v3082_v3  ;;  %v11055_v3 = vld [vmem:[#allocation42_spill] sm:$0xff] }
 0x2ad   : > { %v3561_v49 = vld [vmem:[#allocation2 + $0x1c] sm:$0xf]  ;;  %3458 = vst [vmem:[#allocation2 + $0x24] sm:$0xf] %v3457_v0  ;;  %v3562_v63 = vld [vmem:[#allocation2 + $0x20] sm:$0x1]  ;;  %4388 = vmatmul.bf16.gmra.mxu2 %v7581_v44 }
 0x2ae   : > { %v3682_v10 = vshll.u32 %v3561_v49, 16  ;;  %v3163_v13 = vshrl.u32 %v2982_v7, 16  ;;  %v2883_v46 = vmul.f32 %v9258_v35, %v2847_v2  ;;  %v3686_v23 = vshrl.u32 %v3561_v49, 16  ;;  %3084 = vst [vmem:[#allocation2 + $0x44] sm:$0x1] %v3083_v47 }
 0x2af   : > { %v3692_v6 = vshll.u32 %v3562_v63, 16  ;;  %v4491_v59 = vrot.slane %v3561_v49, 5  ;;  %v3166_v22 = vshll.u32 %v2982_v7, 16  ;;  %v3460_v2 = vld [vmem:[#allocation2 + $0x2c] sm:$0x1]  ;;  %v3680_v7 = vrot.slane %v3679_v9, 4 }
 0x2b0   : > { %v3684_v45 = vrot.slane %v3682_v10, 5  ;;  %v3165_v41 = vrot.slane %v3163_v13, 7  ;;  %v2919_v37 = vadd.f32 %v9263_v19, %v2883_v46  ;;  %v3688_v0 = vrot.slane %v3686_v23, 4 }
 0x2b1   : > { %v2580_v44 = vpop.f32.mrf.mxu3  ;;  %v4492_v16 = vsel %vm8219_vm4, %v7204_v20, %v4491_v59  ;;  %v4493_v29 = vrot.slane %v4491_v59, 4  ;;  %v4494_v10 = vrot.slane %v3562_v63, 5  ;;  %v3694_v46 = vrot.slane %v3692_v6, 5 }
 0x2b2   : > { %v3168_v15 = vor.u32 %v3166_v22, %v3165_v41  ;;  %v3170_v17 = vrot.slane %v3165_v41, 4  ;;  %v2951_v60 = vmax.f32 %v2919_v37, 0.0  ;;  %v2650_v49 = vadd.f32 %v2580_v44, %v11055_v3  ;;  %v3035_v41 = vld [vmem:[#allocation2 + $0x48] sm:$0x1]  ;;  %v11056_v44 = vld [vmem:[#allocation14_spill] sm:$0xff] }
 0x2b3   : > { %v2781_v13 = vpop.f32.mrf.mxu0  ;;  %v3689_v50 = vor.u32 %v3688_v0, %v3684_v45  ;;  %v4495_v23 = vsel %vm8219_vm4, %v4493_v29, %v4494_v10  ;;  %v4608_v22 = vunpack.c.l.b16 %v4492_v16 }
 0x2b4   : > { %v3169_v14 = vsel %vm9289_vm14, %v3161_v5, %v3168_v15  ;;  %v3461_v20 = vsel %vm9214_vm8, %v3170_v17, %v3460_v2  ;;  %v2983_v34 = vpack.c.bf16 %v2951_v60, %v2951_v60  ;;  %v2848_v63 = vadd.f32 %v2778_v25, %v2650_v49  ;;  %v9359_v47 = vld [vmem:[#allocation2 + $0x24] sm:$0xf]  ;;  %v11057_v15 = vld [vmem:[#allocation32_spill] sm:$0xff]  ;;  %v11060_v49 = vld [vmem:[#allocation43_spill] sm:$0xff] }
 0x2b5   : > { %3459 = vst [vmem:[#allocation2 + $0x28] sm:$0xf] %v3169_v14  ;;  %v3690_v59 = vrot.slane %v3689_v50, 4  ;;  %v3697_v9 = vshrl.u32 %v9359_v47, 16  ;;  %v4609_v6 = vunpack.c.l.b16 %v4495_v23  ;;  %v3685_v60 = vsel %vm8232_vm5, %v3680_v7, %v3684_v45  ;;  %v11059_v45 = vld [vmem:[#allocation46_spill] sm:$0xff] }
 0x2b6   : > { %3462 = vst [vmem:[#allocation2 + $0x2c] sm:$0x1] %v3461_v20  ;;  %v3172_v37 = vshrl.u32 %v2983_v34, 16  ;;  %v2884_v0 = vmul.f32 %v9258_v35, %v2848_v63  ;;  %2622 = vmatmul.bf16.gmra.mxu3 %v11056_v44  ;;  %2820 = vmatmul.bf16.gmra.mxu0 %v11057_v15  ;;  %v3036_v17 = vsel %vm9214_vm8, 0, %v3035_v41  ;;  %v3700_v5 = vshll.u32 %v9359_v47, 16 }
 0x2b7   : > { %v3695_v50 = vsel %vm8232_vm5, %v3690_v59, %v3694_v46  ;;  %3037 = vst [vmem:[#allocation2 + $0x48] sm:$0x1] %v3036_v17  ;;  %v3699_v25 = vrot.slane %v3697_v9, 4  ;;  %v9372_v2 = vpack.c.b16 %v4609_v6, %v4608_v22  ;;  %v3175_v29 = vshll.u32 %v2983_v34, 16  ;;  %v3463_v46 = vld [vmem:[#allocation2 + $0x30] sm:$0xf] }
 0x2b8   : > { %v9374_v16 = vrot.slane %v3172_v37, 7  ;;  %v2920_v10 = vadd.f32 %v9263_v19, %v2884_v0  ;;  %v4030_v3 = vunpack.c.l.b16 %v3695_v50  ;;  %v2246_v7 = vadd.f32 %v11060_v49, %v11059_v45  ;;  %v11061_v9 = vld [vmem:[#allocation44_spill] sm:$0xff]  ;;  %v9388_v15 = vld [vmem:[%s8134_s26 + $0xcc] sm:$0xf]  ;;  %v7618_v49 = vld [vmem:[#allocation3 + $0xa8] sm:$0xff] }
 0x2b9   : > { %11058 = vst [vmem:[#allocation25_spill] sm:$0xff] %v9372_v2  ;;  %v2248_v23 = vadd.f32 %v9082_v30, %v9091_v21  ;;  %v2583_v14 = vpop.f32.mrf.mxu3  ;;  %v4029_v20 = vunpack.c.l.b16 %v3685_v60  ;;  %v3702_v63 = vrot.slane %v3700_v5, 5  ;;  %v2250_v59 = vadd.f32 %v9100_v11, %v9116_v33  ;;  %v11064_v11 = vld [vmem:[#allocation45_spill] sm:$0xff]  ;;  %4718 = vmatpush.bf16.msrb.mxu3 %v7618_v49 }
 0x2ba   : > { %v3177_v41 = vor.u32 %v3175_v29, %v9374_v16  ;;  %v2952_v34 = vmax.f32 %v2920_v10, 0.0  ;;  %v2651_v22 = vadd.f32 %v2583_v14, %v11061_v9  ;;  %v2438_v33 = vadd.f32 %v11064_v11, %v2246_v7  ;;  %v7626_v9 = vld [vmem:[#allocation3 + $0xe8] sm:$0xff] }
 0x2bb   : > { %v9385_v6 = vpack.c.b16 %v4030_v3, %v4029_v20  ;;  %v2783_v37 = vpop.f32.mrf.mxu0  ;;  %v3703_v0 = vor.u32 %v3702_v63, %v3699_v25  ;;  %v9398_v5 = vadd.f32 %v9088_v51, %v2248_v23  ;;  %v2462_v10 = vshrl.u32 %v9388_v15, 16  ;;  %v3467_v23 = vld [vmem:[#allocation2 + $0x38] sm:$0x1]  ;;  %v3085_v63 = vld [vmem:[#allocation2 + $0x50] sm:$0x1]  ;;  %4910 = vmatpush.bf16.msrb.mxu0 %v7626_v9 }
 0x2bc   : > { %v3464_v30 = vsel %vm9277_vm12, %v3177_v41, %v3463_v46  ;;  %v2984_v21 = vpack.c.bf16 %v2952_v34, %v2952_v34  ;;  %v2849_v60 = vadd.f32 %v2781_v13, %v2651_v22  ;;  %v9392_v17 = vld [vmem:[#allocation2 + $0x24] sm:$0xff]  ;;  %v9406_v13 = vadd.f32 %v9111_v39, %v2250_v59  ;;  %v9416_v22 = vld [vmem:[%s8134_s26 + $0xd0] sm:$0xf] }
 0x2bd   : > { %11062 = vst [vmem:[#allocation28_spill] sm:$0xff] %v9385_v6  ;;  %v9394_v50 = vld [vmem:[#allocation2 + $0x28] sm:$0xf]  ;;  %4155 = vmatmul.bf16.gmra.mxu1 %v9385_v6  ;;  %v9401_v25 = vld [vmem:[#allocation2 + $0x2c] sm:$0x1]  ;;  %4393 = vmatmul.bf16.gmra.mxu2 %v9392_v17  ;;  %v3704_v46 = vrot.slane %v3703_v0, 4 }
 0x2be   : > { %11063 = vst [vmem:[#allocation23_spill] sm:$0xff] %v9392_v17  ;;  %v3706_v29 = vshll.u32 %v9394_v50, 16  ;;  %v3180_v3 = vshrl.u32 %v2984_v21, 16  ;;  %v2885_v45 = vmul.f32 %v9258_v35, %v2849_v60  ;;  %v3710_v51 = vshrl.u32 %v9394_v50, 16 }
 0x2bf   : > { %3465 = vst [vmem:[#allocation2 + $0x30] sm:$0xf] %v3464_v30  ;;  %v3183_v7 = vshll.u32 %v2984_v21, 16  ;;  %v3716_v20 = vshll.u32 %v9401_v25, 16  ;;  %v3086_v34 = vsel %vm9234_vm10, 0, %v3085_v63  ;;  %v3178_v30 = vrot.slane %v9374_v16, 4 }
 0x2c0   : > { %v3708_v14 = vrot.slane %v3706_v29, 5  ;;  %v3182_v41 = vrot.slane %v3180_v3, 7  ;;  %v2921_v39 = vadd.f32 %v9263_v19, %v2885_v45  ;;  %v3712_v59 = vrot.slane %v3710_v51, 4  ;;  %3087 = vst [vmem:[#allocation2 + $0x50] sm:$0x1] %v3086_v34 }
 0x2c1   : > { %v2585_v21 = vpop.f32.mrf.mxu3  ;;  %v2464_v60 = vrot.slane %v2462_v10, 4  ;;  %v2465_v11 = vshll.u32 %v9388_v15, 16  ;;  %v3718_v44 = vrot.slane %v3716_v20, 5  ;;  %v2471_v16 = vshll.u32 %v9416_v22, 16 }
 0x2c2   : > { %v3709_v0 = vsel %vm8232_vm5, %v3704_v46, %v3708_v14  ;;  %v3185_v29 = vor.u32 %v3183_v7, %v3182_v41  ;;  %v3187_v3 = vrot.slane %v3182_v41, 4  ;;  %v2953_v45 = vmax.f32 %v2921_v39, 0.0  ;;  %v7617_v41 = vld [vmem:[#allocation3 + $0xa0] sm:$0xff] }
 0x2c3   : > { %v2652_v51 = vadd.f32 %v2585_v21, %v2438_v33  ;;  %v2786_v49 = vpop.f32.mrf.mxu0  ;;  %v3713_v63 = vor.u32 %v3712_v59, %v3708_v14  ;;  %v2467_v6 = vrot.slane %v2465_v11, 5  ;;  %v7625_v39 = vld [vmem:[#allocation3 + $0xe0] sm:$0xff]  ;;  %v9430_v33 = vld [vmem:[%s8134_s26 + $0xd4] sm:$0x1]  ;;  %v9434_v14 = vadd.f32 %v9121_v32, %v9128_v28  ;;  %v7642_v11 = vld [vmem:[#allocation3 + $0x168] sm:$0xff]  ;;  %4719 = vmatpush.bf16.msrb.mxu3 %v7617_v41  ;;  %s6566_s26 = sshll.u32 %s367_s18, 7 }
 0x2c4   : > { %v3186_v17 = vsel %vm9289_vm14, %v3178_v30, %v3185_v29  ;;  %v3468_v10 = vsel %vm9214_vm8, %v3187_v3, %v3467_v23  ;;  %v2985_v46 = vpack.c.bf16 %v2953_v45, %v2953_v45  ;;  %v3038_v59 = vld [vmem:[#allocation2 + $0x54] sm:$0x1]  ;;  %v4031_v21 = vunpack.c.l.b16 %v3709_v0  ;;  %4911 = vmatpush.bf16.msrb.mxu0 %v7625_v39  ;;  %5322 = vmatpush.bf16.msrb.mxu2 %v7642_v11  ;;  %s10588_s20 = scalar_lea.vmem [#allocation6], %s6566_s26 }
 0x2c5   : > { %v2850_v34 = vadd.f32 %v2783_v37, %v2652_v51  ;;  %3466 = vst [vmem:[#allocation2 + $0x34] sm:$0xf] %v3186_v17  ;;  %v3714_v20 = vrot.slane %v3713_v63, 4  ;;  %v2468_v30 = vor.u32 %v2467_v6, %v2464_v60  ;;  %v3039_v32 = vsel %vm9214_vm8, 0, %v3038_v59  ;;  %v7616_v45 = vld [vmem:[#allocation3 + $0x98] sm:$0xff]  ;;  %v11065_v59 = vld [vmem:[#allocation47_spill] sm:$0xff] }
 0x2c6   : > { %v9427_v7 = vld [vmem:[#allocation2 + $0x30] sm:$0xf]  ;;  %3469 = vst [vmem:[#allocation2 + $0x38] sm:$0x1] %v3468_v10  ;;  %v3189_v23 = vshrl.u32 %v2985_v46, 16  ;;  %2627 = vmatmul.bf16.gmra.mxu3 %v11001_v18  ;;  %2825 = vmatmul.bf16.gmra.mxu0 %v8849_v57  ;;  %v3192_v28 = vshll.u32 %v2985_v46, 16 }
 0x2c7   : > { %v3721_v9 = vshrl.u32 %v9427_v7, 16  ;;  %v2886_v37 = vmul.f32 %v9258_v35, %v2850_v34  ;;  %v3719_v17 = vsel %vm8232_vm5, %v3714_v20, %v3718_v44  ;;  %3040 = vst [vmem:[#allocation2 + $0x54] sm:$0x1] %v3039_v32  ;;  %v3724_v6 = vshll.u32 %v9427_v7, 16  ;;  %v7624_v51 = vld [vmem:[#allocation3 + $0xd8] sm:$0xff]  ;;  %4720 = vmatpush.bf16.msrb.mxu3 %v7616_v45  ;;  %s6483_s29 = sshll.u32 %s10588_s20, 4  ;;  %s6484_s29 = int_to_ptr.vmem [resolvable:$true] %s6483_s29 }
 0x2c8   : > { %v9445_v60 = vrot.slane %v3189_v23, 7  ;;  %v4032_v57 = vunpack.c.l.b16 %v3719_v17  ;;  %v2469_v0 = vrot.slane %v2468_v30, 4  ;;  %v3470_v63 = vld [vmem:[#allocation2 + $0x3c] sm:$0xf]  ;;  %v2473_v34 = vrot.slane %v2471_v16, 5  ;;  %4912 = vmatpush.bf16.msrb.mxu0 %v7624_v51 }
 0x2c9   : > { %v3723_v29 = vrot.slane %v3721_v9, 4  ;;  %v2922_v3 = vadd.f32 %v9263_v19, %v2886_v37  ;;  %v2588_v10 = vpop.f32.mrf.mxu3  ;;  %v3726_v46 = vrot.slane %v3724_v6, 5  ;;  %v2475_v44 = vshrl.u32 %v9416_v22, 16 }
 0x2ca   : > { %v2481_v20 = vshll.u32 %v9430_v33, 16  ;;  %v3194_v41 = vor.u32 %v3192_v28, %v9445_v60  ;;  %v2653_v9 = vadd.f32 %v2588_v10, %v11065_v59  ;;  %v7025_v23 = vrot.slane %v9388_v15, 9  ;;  %v7615_v15 = vld [vmem:[#allocation3 + $0x90] sm:$0xff] }
 0x2cb   : > { %v2954_v39 = vmax.f32 %v2922_v3, 0.0  ;;  %v3195_v37 = vrot.slane %v9445_v60, 4  ;;  %v9454_v30 = vpack.c.b16 %v4032_v57, %v4031_v21  ;;  %v2788_v11 = vpop.f32.mrf.mxu0  ;;  %v3727_v32 = vor.u32 %v3726_v46, %v3723_v29  ;;  %4721 = vmatpush.bf16.msrb.mxu3 %v7615_v15 }
 0x2cc   : > { %v2477_v17 = vrot.slane %v2475_v44, 4  ;;  %v3471_v16 = vsel %vm9277_vm12, %v3194_v41, %v3470_v63  ;;  %v2851_v18 = vadd.f32 %v2786_v49, %v2653_v9  ;;  %v9458_v28 = vld [vmem:[#allocation2 + $0x30] sm:$0xff]  ;;  %v2483_v10 = vrot.slane %v2481_v20, 5  ;;  %v7634_v44 = vld [vmem:[#allocation3 + $0x128] sm:$0xff] }
 0x2cd   : > { %11066 = vst [vmem:[#allocation30_spill] sm:$0xff] %v9454_v30  ;;  %v2986_v6 = vpack.c.bf16 %v2954_v39, %v2954_v39  ;;  %v9460_v3 = vld [vmem:[#allocation2 + $0x34] sm:$0xf]  ;;  %4160 = vmatmul.bf16.gmra.mxu1 %v9454_v30  ;;  %v9463_v21 = vld [vmem:[#allocation2 + $0x38] sm:$0x1]  ;;  %v3728_v29 = vrot.slane %v3727_v32, 4  ;;  %v2474_v57 = vsel %vm8232_vm5, %v2469_v0, %v2473_v34  ;;  %4398 = vmatmul.bf16.gmra.mxu2 %v9458_v28 }
 0x2ce   : > { %11067 = vst [vmem:[#allocation40_spill] sm:$0xff] %v9458_v28  ;;  %v3730_v60 = vshll.u32 %v9460_v3, 16  ;;  %v2478_v45 = vor.u32 %v2477_v17, %v2473_v34  ;;  %v2887_v63 = vmul.f32 %v9258_v35, %v2851_v18  ;;  %v3734_v46 = vshrl.u32 %v9460_v3, 16  ;;  %v3088_v39 = vld [vmem:[#allocation2 + $0x5c] sm:$0x1]  ;;  %5124 = vmatpush.bf16.msrb.mxu1 %v7634_v44  ;;  %v7623_v17 = vld [vmem:[#allocation3 + $0xd0] sm:$0xff] }
 0x2cf   : > { %3472 = vst [vmem:[#allocation2 + $0x3c] sm:$0xf] %v3471_v16  ;;  %v3197_v51 = vshrl.u32 %v2986_v6, 16  ;;  %v3200_v49 = vshll.u32 %v2986_v6, 16  ;;  %v3740_v41 = vshll.u32 %v9463_v21, 16  ;;  %v2678_v9 = vrot.slane %v9416_v22, 5  ;;  %4913 = vmatpush.bf16.msrb.mxu0 %v7623_v17 }
 0x2d0   : > { %v3732_v20 = vrot.slane %v3730_v60, 5  ;;  %v2479_v59 = vrot.slane %v2478_v45, 4  ;;  %v2923_v0 = vadd.f32 %v9263_v19, %v2887_v63  ;;  %v3736_v34 = vrot.slane %v3734_v46, 4  ;;  %v7614_v16 = vld [vmem:[#allocation3 + $0x88] sm:$0xff] }
 0x2d1   : > { %v3199_v32 = vrot.slane %v3197_v51, 7  ;;  %v3089_v18 = vsel %vm9234_vm10, 0, %v3088_v39  ;;  %v3474_v6 = vld [vmem:[#allocation2 + $0x44] sm:$0x1]  ;;  %v2590_v30 = vpop.f32.mrf.mxu3  ;;  %v9480_v15 = vunpack.c.l.b16 %v2474_v57  ;;  %v9484_v45 = vsel %vm8219_vm4, %v7025_v23, %v2678_v9  ;;  %4722 = vmatpush.bf16.msrb.mxu3 %v7614_v16 }
 0x2d2   : > { %v3733_v60 = vsel %vm8232_vm5, %v3728_v29, %v3732_v20  ;;  %3090 = vst [vmem:[#allocation2 + $0x5c] sm:$0x1] %v3089_v18  ;;  %v2484_v22 = vsel %vm8232_vm5, %v2479_v59, %v2483_v10  ;;  %v2955_v46 = vmax.f32 %v2923_v0, 0.0  ;;  %v2654_v44 = vadd.f32 %v2590_v30, %v9398_v5 }
 0x2d3   : > { %v3202_v51 = vor.u32 %v3200_v49, %v3199_v32  ;;  %v3204_v63 = vrot.slane %v3199_v32, 4  ;;  %v2791_v39 = vpop.f32.mrf.mxu0  ;;  %v3737_v28 = vor.u32 %v3736_v34, %v3732_v20  ;;  %v3742_v2 = vrot.slane %v3740_v41, 5  ;;  %v7613_v32 = vld [vmem:[#allocation3 + $0x80] sm:$0xff]  ;;  %4914 = vmatpush.bf16.msrb.mxu0 %v7622_v58 }
 0x2d4   : > { %v4033_v29 = vunpack.c.l.b16 %v3733_v60  ;;  %v2680_v18 = vrot.slane %v2678_v9, 4  ;;  %v2987_v57 = vpack.c.bf16 %v2955_v46, %v2955_v46  ;;  %v2852_v49 = vadd.f32 %v2788_v11, %v2654_v44  ;;  %v3041_v9 = vld [vmem:[#allocation2 + $0x60] sm:$0x1] }
 0x2d5   : > { %v3203_v10 = vsel %vm9289_vm14, %v3195_v37, %v3202_v51  ;;  %v3475_v23 = vsel %vm9214_vm8, %v3204_v63, %v3474_v6  ;;  %v3738_v5 = vrot.slane %v3737_v28, 4  ;;  %v9493_v30 = vunpack.c.l.b16 %v2484_v22  ;;  %4723 = vmatpush.bf16.msrb.mxu3 %v7613_v32  ;;  %v7621_v6 = vld [vmem:[#allocation3 + $0xc0] sm:$0xff]  ;;  %v3477_v51 = vld [vmem:[#allocation2 + $0x48] sm:$0xf] }
 0x2d6   : > { %v9491_v59 = vld [vmem:[#allocation2 + $0x3c] sm:$0xf]  ;;  %3473 = vst [vmem:[#allocation2 + $0x40] sm:$0xf] %v3203_v10  ;;  %v2681_v20 = vrot.slane %v9430_v33, 5  ;;  %v2700_v41 = vunpack.c.l.b16 %v9484_v45  ;;  %v3206_v0 = vshrl.u32 %v2987_v57, 16  ;;  %v2888_v34 = vmul.f32 %v9258_v35, %v2852_v49  ;;  %2632 = vmatmul.bf16.gmra.mxu3 %v9109_v62  ;;  %2830 = vmatmul.bf16.gmra.mxu0 %v9114_v8 }
 0x2d7   : > { %3476 = vst [vmem:[#allocation2 + $0x44] sm:$0x1] %v3475_v23  ;;  %v3209_v37 = vshll.u32 %v2987_v57, 16  ;;  %v3042_v11 = vsel %vm9214_vm8, 0, %v3041_v9  ;;  %v3743_v28 = vsel %vm8232_vm5, %v3738_v5, %v3742_v2  ;;  %v3745_v17 = vshrl.u32 %v9491_v59, 16  ;;  %4915 = vmatpush.bf16.msrb.mxu0 %v7621_v6 }
 0x2d8   : > { %v2682_v33 = vsel %vm8219_vm4, %v2680_v18, %v2681_v20  ;;  %3043 = vst [vmem:[#allocation2 + $0x60] sm:$0x1] %v3042_v11  ;;  %v3748_v16 = vshll.u32 %v9491_v59, 16  ;;  %v9508_v60 = vrot.slane %v3206_v0, 7  ;;  %v2924_v8 = vadd.f32 %v9263_v19, %v2888_v34 }
 0x2d9   : > { %v4034_v22 = vunpack.c.l.b16 %v3743_v28  ;;  %v2701_v45 = vunpack.c.l.b16 %v2682_v33  ;;  %v2593_v63 = vpop.f32.mrf.mxu3  ;;  %v3747_v2 = vrot.slane %v3745_v17, 4  ;;  %v7202_v44 = vrot.slane %v9222_v40, 9 }
 0x2da   : > { %v3750_v46 = vrot.slane %v3748_v16, 5  ;;  %v4477_v18 = vrot.slane %v9226_v31, 5  ;;  %v3211_v10 = vor.u32 %v3209_v37, %v9508_v60  ;;  %v2956_v23 = vmax.f32 %v2924_v8, 0.0 }
 0x2db   : > { %v2655_v58 = vadd.f32 %v2593_v63, %v9106_v24  ;;  %v7205_v57 = vrot.slane %v9359_v47, 9  ;;  %v3212_v49 = vrot.slane %v9508_v60, 4  ;;  %v9517_v32 = vpack.c.b16 %v4034_v22, %v4033_v29  ;;  %v2793_v5 = vpop.f32.mrf.mxu0  ;;  %v7864_v60 = vld [vmem:[#allocation2 + $0x8] sm:$0x1] }
 0x2dc   : > { %v2504_v20 = vpack.c.b16 %v9493_v30, %v9480_v15  ;;  %v3751_v9 = vor.u32 %v3750_v46, %v3747_v2  ;;  %v3478_v40 = vsel %vm9277_vm12, %v3211_v10, %v3477_v51  ;;  %v2988_v31 = vpack.c.bf16 %v2956_v23, %v2956_v23  ;;  %v3481_v46 = vld [vmem:[#allocation2 + $0x50] sm:$0x1] }
 0x2dd   : > { %11068 = vst [vmem:[#allocation27_spill] sm:$0xff] %v9517_v32  ;;  %v2853_v0 = vadd.f32 %v2791_v39, %v2655_v58  ;;  %v9523_v37 = vld [vmem:[#allocation2 + $0x3c] sm:$0xff]  ;;  %v4479_v47 = vrot.slane %v4477_v18, 4  ;;  %4165 = vmatmul.bf16.gmra.mxu1 %v9517_v32  ;;  %v2702_v29 = vpack.c.b16 %v2701_v45, %v2700_v41  ;;  %v4478_v30 = vsel %vm8219_vm4, %v7202_v44, %v4477_v18  ;;  %v3091_v41 = vld [vmem:[#allocation2 + $0x68] sm:$0x1] }
 0x2de   : > { %v9525_v24 = vld [vmem:[#allocation2 + $0x40] sm:$0xf]  ;;  %3479 = vst [vmem:[#allocation2 + $0x48] sm:$0xf] %v3478_v40  ;;  %v9528_v34 = vld [vmem:[#allocation2 + $0x44] sm:$0x1]  ;;  %4403 = vmatmul.bf16.gmra.mxu2 %v9523_v37  ;;  %v4604_v23 = vunpack.c.l.b16 %v4478_v30 }
 0x2df   : > { %v3752_v11 = vrot.slane %v3751_v9, 4  ;;  %v3754_v15 = vshll.u32 %v9525_v24, 16  ;;  %v3214_v28 = vshrl.u32 %v2988_v31, 16  ;;  %v3217_v33 = vshll.u32 %v2988_v31, 16 }
 0x2e0   : > { %v2889_v39 = vmul.f32 %v9258_v35, %v2853_v0  ;;  %v3758_v17 = vshrl.u32 %v9525_v24, 16  ;;  %v3764_v6 = vshll.u32 %v9528_v34, 16  ;;  %v4480_v8 = vrot.slane %v7864_v60, 5 }
 0x2e1   : > { %v3756_v16 = vrot.slane %v3754_v15, 5  ;;  %v4498_v22 = vrot.slane %v9394_v50, 5  ;;  %v3216_v45 = vrot.slane %v3214_v28, 7  ;;  %v3092_v2 = vsel %vm9234_vm10, 0, %v3091_v41  ;;  %v2595_v44 = vpop.f32.mrf.mxu3 }
 0x2e2   : > { %v2925_v51 = vadd.f32 %v9263_v19, %v2889_v39  ;;  %v3760_v63 = vrot.slane %v3758_v17, 4  ;;  %3093 = vst [vmem:[#allocation2 + $0x68] sm:$0x1] %v3092_v2  ;;  %v4481_v10 = vsel %vm8219_vm4, %v4479_v47, %v4480_v8  ;;  %v2656_v40 = vadd.f32 %v2595_v44, %v9406_v13 }
 0x2e3   : > { %v3757_v18 = vsel %vm8232_vm5, %v3752_v11, %v3756_v16  ;;  %v9547_v50 = vsel %vm8219_vm4, %v7205_v57, %v4498_v22  ;;  %v3219_v58 = vor.u32 %v3217_v33, %v3216_v45  ;;  %v3221_v19 = vrot.slane %v3216_v45, 4  ;;  %v2796_v31 = vpop.f32.mrf.mxu0 }
 0x2e4   : > { %v2957_v9 = vmax.f32 %v2925_v51, 0.0  ;;  %v3761_v0 = vor.u32 %v3760_v63, %v3756_v16  ;;  %v3766_v15 = vrot.slane %v3764_v6, 5  ;;  %v4605_v28 = vunpack.c.l.b16 %v4481_v10  ;;  %v3044_v6 = vld [vmem:[#allocation2 + $0x6c] sm:$0x1] }
 0x2e5   : > { %v4500_v39 = vrot.slane %v4498_v22, 4  ;;  %v3220_v11 = vsel %vm9289_vm14, %v3212_v49, %v3219_v58  ;;  %v3482_v47 = vsel %vm9214_vm8, %v3221_v19, %v3481_v46  ;;  %v2854_v17 = vadd.f32 %v2793_v5, %v2656_v40  ;;  %v9554_v57 = vld [vmem:[#allocation2 + $0x48] sm:$0xf]  ;;  %v7641_v5 = vld [vmem:[#allocation3 + $0x160] sm:$0xff]  ;;  %v3484_v46 = vld [vmem:[#allocation2 + $0x54] sm:$0xf] }
 0x2e6   : > { %v2989_v30 = vpack.c.bf16 %v2957_v9, %v2957_v9  ;;  %v9558_v33 = vadd.f32 %v9126_v27, %v9434_v14  ;;  %3480 = vst [vmem:[#allocation2 + $0x4c] sm:$0xf] %v3220_v11  ;;  %v3762_v13 = vrot.slane %v3761_v0, 4  ;;  %v4035_v16 = vunpack.c.l.b16 %v3757_v18  ;;  %2637 = vmatmul.bf16.gmra.mxu3 %v2504_v20  ;;  %2835 = vmatmul.bf16.gmra.mxu0 %v2702_v29  ;;  %v9575_v20 = vld [vmem:[%s10860_s3] ss:$0 sm:$0xff] }
 0x2e7   : > { %v3769_v41 = vshrl.u32 %v9554_v57, 16  ;;  %3483 = vst [vmem:[#allocation2 + $0x50] sm:$0x1] %v3482_v47  ;;  %v2890_v49 = vmul.f32 %v9258_v35, %v2854_v17  ;;  %v9562_v8 = vpack.c.b16 %v4605_v28, %v4604_v23  ;;  %v3045_v22 = vsel %vm9214_vm8, 0, %v3044_v6  ;;  %5323 = vmatpush.bf16.msrb.mxu2 %v7641_v5 }
 0x2e8   : > { %v3223_v60 = vshrl.u32 %v2989_v30, 16  ;;  %v3767_v27 = vsel %vm8232_vm5, %v3762_v13, %v3766_v15  ;;  %3046 = vst [vmem:[#allocation2 + $0x6c] sm:$0x1] %v3045_v22  ;;  %v3772_v45 = vshll.u32 %v9554_v57, 16  ;;  %v4501_v51 = vrot.slane %v9401_v25, 5 }
 0x2e9   : > { %v3771_v14 = vrot.slane %v3769_v41, 4  ;;  %v3226_v35 = vshll.u32 %v2989_v30, 16  ;;  %v2926_v29 = vadd.f32 %v9575_v20, %v2890_v49  ;;  %v4036_v2 = vunpack.c.l.b16 %v3767_v27  ;;  %v2598_v44 = vpop.f32.mrf.mxu3  ;;  %v7633_v27 = vld [vmem:[#allocation3 + $0x120] sm:$0xff] }
 0x2ea   : > { %v9570_v63 = vrot.slane %v3223_v60, 7  ;;  %v3774_v18 = vrot.slane %v3772_v45, 5  ;;  %v4502_v10 = vsel %vm8219_vm4, %v4500_v39, %v4501_v51  ;;  %v7206_v25 = vrot.slane %v9427_v7, 9  ;;  %v3094_v51 = vld [vmem:[#allocation2 + $0x74] sm:$0x1]  ;;  %5125 = vmatpush.bf16.msrb.mxu1 %v7633_v27 }
 0x2eb   : > { %v4505_v23 = vrot.slane %v9460_v3, 5  ;;  %v2958_v19 = vmax.f32 %v2926_v29, 0.0  ;;  %v2657_v9 = vadd.f32 %v2598_v44, %v9123_v56  ;;  %v4610_v40 = vunpack.c.l.b16 %v9547_v50  ;;  %v2798_v15 = vpop.f32.mrf.mxu0  ;;  %v3488_v29 = vld [vmem:[#allocation2 + $0x5c] sm:$0x1] }
 0x2ec   : > { %v3228_v58 = vor.u32 %v3226_v35, %v9570_v63  ;;  %v9585_v0 = vpack.c.b16 %v4036_v2, %v4035_v16  ;;  %v3775_v28 = vor.u32 %v3774_v18, %v3771_v14  ;;  %v4611_v11 = vunpack.c.l.b16 %v4502_v10 }
 0x2ed   : > { %v4506_v47 = vsel %vm8219_vm4, %v7206_v25, %v4505_v23  ;;  %v2990_v39 = vpack.c.bf16 %v2958_v19, %v2958_v19  ;;  %v2855_v3 = vadd.f32 %v2796_v31, %v2657_v9  ;;  %v9591_v30 = vld [vmem:[#allocation2 + $0x48] sm:$0xff]  ;;  %v4507_v56 = vrot.slane %v4505_v23, 4  ;;  %v9604_v31 = vld [vmem:[%s10859_s2] ss:$0 sm:$0xff]  ;;  %v9619_v19 = vpop.f32.mrf.mxu1 }
 0x2ee   : > { %11069 = vst [vmem:[#allocation41_spill] sm:$0xff] %v9585_v0  ;;  %v3485_v7 = vsel %vm9277_vm12, %v3228_v58, %v3484_v46  ;;  %v9593_v17 = vld [vmem:[#allocation2 + $0x4c] sm:$0xf]  ;;  %v3229_v50 = vrot.slane %v9570_v63, 4  ;;  %4170 = vmatmul.bf16.gmra.mxu1 %v9585_v0  ;;  %v9598_v16 = vpack.c.b16 %v4611_v11, %v4610_v40  ;;  %v4508_v6 = vrot.slane %v9463_v21, 5  ;;  %4408 = vmatmul.bf16.gmra.mxu2 %v9591_v30 }
 0x2ef   : > { %3486 = vst [vmem:[#allocation2 + $0x54] sm:$0xf] %v3485_v7  ;;  %v3778_v13 = vshll.u32 %v9593_v17, 16  ;;  %v3231_v41 = vshrl.u32 %v2990_v39, 16  ;;  %v2891_v60 = vmul.f32 %v9604_v31, %v2855_v3  ;;  %v9608_v49 = vld [vmem:[#allocation2 + $0x50] sm:$0x1]  ;;  %v4612_v63 = vunpack.c.l.b16 %v4506_v47  ;;  %v9622_v47 = vpop.f32.mrf.mxu2 }
 0x2f0   : > { %11070 = vst [vmem:[#allocation42_spill] sm:$0xff] %v9598_v16  ;;  %v3776_v5 = vrot.slane %v3775_v28, 4  ;;  %v3782_v22 = vshrl.u32 %v9593_v17, 16  ;;  %v3234_v14 = vshll.u32 %v2990_v39, 16  ;;  %v4509_v21 = vsel %vm8219_vm4, %v4507_v56, %v4508_v6 }
 0x2f1   : > { %v3780_v45 = vrot.slane %v3778_v13, 5  ;;  %v3233_v35 = vrot.slane %v3231_v41, 7  ;;  %v2927_v2 = vadd.f32 %v9575_v20, %v2891_v60  ;;  %v3095_v44 = vsel %vm9234_vm10, 0, %v3094_v51  ;;  %v2600_v18 = vpop.f32.mrf.mxu3  ;;  %v3047_v51 = vld [vmem:[#allocation2 + $0x78] sm:$0x1] }
 0x2f2   : > { %v3784_v46 = vrot.slane %v3782_v22, 4  ;;  %v3788_v10 = vshll.u32 %v9608_v49, 16  ;;  %3096 = vst [vmem:[#allocation2 + $0x74] sm:$0x1] %v3095_v44  ;;  %v4613_v25 = vunpack.c.l.b16 %v4509_v21  ;;  %v7207_v23 = vrot.slane %v9491_v59, 9 }
 0x2f3   : > { %v4512_v58 = vrot.slane %v9525_v24, 5  ;;  %v3236_v9 = vor.u32 %v3234_v14, %v3233_v35  ;;  %v3238_v40 = vrot.slane %v3233_v35, 4  ;;  %v2959_v28 = vmax.f32 %v2927_v2, 0.0  ;;  %v2801_v7 = vpop.f32.mrf.mxu0 }
 0x2f4   : > { %v2658_v11 = vadd.f32 %v2600_v18, %v9558_v33  ;;  %v3781_v39 = vsel %vm8232_vm5, %v3776_v5, %v3780_v45  ;;  %v3785_v3 = vor.u32 %v3784_v46, %v3780_v45  ;;  %v9626_v56 = vpack.c.b16 %v4613_v25, %v4612_v63 }
 0x2f5   : > { %v9630_v59 = vsel %vm8219_vm4, %v7207_v23, %v4512_v58  ;;  %v3237_v24 = vsel %vm9289_vm14, %v3229_v50, %v3236_v9  ;;  %v3489_v13 = vsel %vm9214_vm8, %v3238_v40, %v3488_v29  ;;  %v2991_v33 = vpack.c.bf16 %v2959_v28, %v2959_v28  ;;  %v4146_v28 = vpop.f32.mrf.mxu1 }
 0x2f6   : > { %11071 = vst [vmem:[#allocation32_spill] sm:$0xff] %v9626_v56  ;;  %v2856_v6 = vadd.f32 %v2798_v15, %v2658_v11  ;;  %v9636_v41 = vld [vmem:[#allocation2 + $0x54] sm:$0xf]  ;;  %v3786_v60 = vrot.slane %v3785_v3, 4  ;;  %v3790_v5 = vrot.slane %v3788_v10, 5  ;;  %v2254_v14 = vadd.f32 %v9133_v61, %v9140_v55  ;;  %4724 = vmatmul.bf16.vlgmr.msrb.gmra.mxu3 %v9562_v8  ;;  %4916 = vmatmul.bf16.vlgmr.msrb.gmra.mxu0 %v9307_v53 }
 0x2f7   : > { %3487 = vst [vmem:[#allocation2 + $0x58] sm:$0xf] %v3237_v24  ;;  %v3793_v22 = vshrl.u32 %v9636_v41, 16  ;;  %v3796_v27 = vshll.u32 %v9636_v41, 16  ;;  %v3240_v45 = vshrl.u32 %v2991_v33, 16  ;;  %v4037_v15 = vunpack.c.l.b16 %v3781_v39  ;;  %v4379_v3 = vpop.f32.mrf.mxu2 }
 0x2f8   : > { %3490 = vst [vmem:[#allocation2 + $0x5c] sm:$0x1] %v3489_v13  ;;  %v2892_v50 = vmul.f32 %v9604_v31, %v2856_v6  ;;  %v3243_v21 = vshll.u32 %v2991_v33, 16  ;;  %v3791_v63 = vsel %vm8232_vm5, %v3786_v60, %v3790_v5  ;;  %v3048_v35 = vsel %vm9214_vm8, 0, %v3047_v51  ;;  %v3491_v8 = vld [vmem:[#allocation2 + $0x60] sm:$0xf] }
 0x2f9   : > { %v4514_v29 = vrot.slane %v4512_v58, 4  ;;  %v9649_v2 = vrot.slane %v3240_v45, 7  ;;  %v4038_v55 = vunpack.c.l.b16 %v3791_v63  ;;  %3049 = vst [vmem:[#allocation2 + $0x78] sm:$0x1] %v3048_v35  ;;  %v3795_v46 = vrot.slane %v3793_v22, 4  ;;  %v2603_v44 = vpop.f32.mrf.mxu3 }
 0x2fa   : > { %v2928_v61 = vadd.f32 %v9575_v20, %v2892_v50  ;;  %v3798_v53 = vrot.slane %v3796_v27, 5  ;;  %v4515_v18 = vrot.slane %v9528_v34, 5  ;;  %v7208_v10 = vrot.slane %v9554_v57, 9  ;;  %v3097_v50 = vld [vmem:[#allocation2 + $0x80] sm:$0x1] }
 0x2fb   : > { %v4519_v25 = vrot.slane %v9593_v17, 5  ;;  %v2446_v23 = vadd.f32 %v9138_v26, %v2254_v14  ;;  %v3245_v58 = vor.u32 %v3243_v21, %v9649_v2  ;;  %v2659_v40 = vadd.f32 %v2603_v44, %v9135_v36  ;;  %v2803_v39 = vpop.f32.mrf.mxu0  ;;  %v3495_v44 = vld [vmem:[#allocation2 + $0x68] sm:$0x1] }
 0x2fc   : > { %v2960_v9 = vmax.f32 %v2928_v61, 0.0  ;;  %v9658_v11 = vpack.c.b16 %v4038_v55, %v4037_v15  ;;  %v4516_v24 = vsel %vm8219_vm4, %v4514_v29, %v4515_v18  ;;  %v4614_v34 = vunpack.c.l.b16 %v9630_v59 }
 0x2fd   : > { %v9665_v57 = vsel %vm8219_vm4, %v7208_v10, %v4519_v25  ;;  %v3492_v26 = vsel %vm9277_vm12, %v3245_v58, %v3491_v8  ;;  %v2857_v13 = vadd.f32 %v2801_v7, %v2659_v40  ;;  %v9673_v6 = vadd.f32 %v4379_v3, %v4146_v28 }
 0x2fe   : > { %11072 = vst [vmem:[#allocation46_spill] sm:$0xff] %v9658_v11  ;;  %v2992_v17 = vpack.c.bf16 %v2960_v9, %v2960_v9  ;;  %v9669_v36 = vld [vmem:[#allocation2 + $0x54] sm:$0xff]  ;;  %4175 = vmatmul.bf16.gmra.mxu1 %v9658_v11  ;;  %v3799_v59 = vor.u32 %v3798_v53, %v3795_v46  ;;  %v4615_v27 = vunpack.c.l.b16 %v4516_v24  ;;  %v4522_v15 = vrot.slane %v9608_v49, 5 }
 0x2ff   : > { %v9671_v33 = vld [vmem:[#allocation2 + $0x58] sm:$0xf]  ;;  %3493 = vst [vmem:[#allocation2 + $0x60] sm:$0xf] %v3492_v26  ;;  %v9676_v60 = vld [vmem:[#allocation2 + $0x5c] sm:$0x1]  ;;  %v2893_v7 = vmul.f32 %v9604_v31, %v2857_v13  ;;  %4413 = vmatmul.bf16.gmra.mxu2 %v9669_v36 }
 0x300   : > { %v3802_v5 = vshll.u32 %v9671_v33, 16  ;;  %v3806_v22 = vshrl.u32 %v9671_v33, 16  ;;  %v3248_v14 = vshrl.u32 %v2992_v17, 16  ;;  %v3812_v45 = vshll.u32 %v9676_v60, 16 }
 0x301   : > { %v3098_v63 = vsel %vm9234_vm10, 0, %v3097_v50  ;;  %v9686_v35 = vpack.c.b16 %v4615_v27, %v4614_v34  ;;  %v3251_v61 = vshll.u32 %v2992_v17, 16  ;;  %v2929_v55 = vadd.f32 %v9575_v20, %v2893_v7  ;;  %v2605_v53 = vpop.f32.mrf.mxu3  ;;  %v7640_v50 = vld [vmem:[#allocation3 + $0x158] sm:$0xff] }
 0x302   : > { %v3804_v51 = vrot.slane %v3802_v5, 5  ;;  %v3808_v21 = vrot.slane %v3806_v22, 4  ;;  %v3250_v29 = vrot.slane %v3248_v14, 7  ;;  %3099 = vst [vmem:[#allocation2 + $0x80] sm:$0x1] %v3098_v63  ;;  %v4521_v46 = vrot.slane %v4519_v25, 4  ;;  %5324 = vmatpush.bf16.msrb.mxu2 %v7640_v50 }
 0x303   : > { %11073 = vst [vmem:[#allocation43_spill] sm:$0xff] %v9686_v35  ;;  %v3246_v8 = vrot.slane %v9649_v2, 4  ;;  %v3800_v18 = vrot.slane %v3799_v59, 4  ;;  %v3814_v49 = vrot.slane %v3812_v45, 5  ;;  %v2961_v40 = vmax.f32 %v2929_v55, 0.0  ;;  %v2806_v3 = vpop.f32.mrf.mxu0  ;;  %v7867_v45 = vld [vmem:[#allocation2 + $0x18] sm:$0xff] }
 0x304   : > { %v3809_v10 = vor.u32 %v3808_v21, %v3804_v51  ;;  %v3253_v58 = vor.u32 %v3251_v61, %v3250_v29  ;;  %v3255_v9 = vrot.slane %v3250_v29, 4  ;;  %v2660_v28 = vadd.f32 %v2605_v53, %v2446_v23  ;;  %v3498_v55 = vld [vmem:[#allocation2 + $0x6c] sm:$0xf] }
 0x305   : > { %v3805_v24 = vsel %vm8232_vm5, %v3800_v18, %v3804_v51  ;;  %v4523_v26 = vsel %vm8219_vm4, %v4521_v46, %v4522_v15  ;;  %v4616_v25 = vunpack.c.l.b16 %v9665_v57  ;;  %v2993_v13 = vpack.c.bf16 %v2961_v40, %v2961_v40  ;;  %v3050_v51 = vld [vmem:[#allocation2 + $0x84] sm:$0x1] }
 0x306   : > { %v3810_v34 = vrot.slane %v3809_v10, 4  ;;  %v3254_v2 = vsel %vm9289_vm14, %v3246_v8, %v3253_v58  ;;  %v3496_v17 = vsel %vm9214_vm8, %v3255_v9, %v3495_v44  ;;  %v2858_v59 = vadd.f32 %v2803_v39, %v2660_v28  ;;  %v9699_v5 = vld [vmem:[#allocation2 + $0x60] sm:$0xf]  ;;  %4729 = vmatmul.bf16.gmra.mxu3 %v9337_v1  ;;  %4921 = vmatmul.bf16.gmra.mxu0 %v7867_v45 }
 0x307   : > { %3494 = vst [vmem:[#allocation2 + $0x64] sm:$0xf] %v3254_v2  ;;  %v3817_v22 = vshrl.u32 %v9699_v5, 16  ;;  %v3820_v27 = vshll.u32 %v9699_v5, 16  ;;  %v4617_v14 = vunpack.c.l.b16 %v4523_v26  ;;  %v3257_v57 = vshrl.u32 %v2993_v13, 16  ;;  %v11076_v26 = vld [vmem:[#allocation49_spill] sm:$0xff] }
 0x308   : > { %v3815_v23 = vsel %vm8232_vm5, %v3810_v34, %v3814_v49  ;;  %3497 = vst [vmem:[#allocation2 + $0x68] sm:$0x1] %v3496_v17  ;;  %v2894_v7 = vmul.f32 %v9604_v31, %v2858_v59  ;;  %v4039_v15 = vunpack.c.l.b16 %v3805_v24  ;;  %v7209_v63 = vrot.slane %v9636_v41, 9 }
 0x309   : > { %v4040_v39 = vunpack.c.l.b16 %v3815_v23  ;;  %v9707_v21 = vpack.c.b16 %v4617_v14, %v4616_v25  ;;  %v9710_v29 = vrot.slane %v3257_v57, 7  ;;  %v3260_v61 = vshll.u32 %v2993_v13, 16  ;;  %v2608_v44 = vpop.f32.mrf.mxu3  ;;  %v7632_v57 = vld [vmem:[#allocation3 + $0x118] sm:$0xff] }
 0x30a   : > { %v2930_v46 = vadd.f32 %v9575_v20, %v2894_v7  ;;  %v3051_v8 = vsel %vm9214_vm8, 0, %v3050_v51  ;;  %v3819_v18 = vrot.slane %v3817_v22, 4  ;;  %v3822_v10 = vrot.slane %v3820_v27, 5  ;;  %v3100_v7 = vld [vmem:[#allocation2 + $0x8c] sm:$0x1]  ;;  %5126 = vmatpush.bf16.msrb.mxu1 %v7632_v57 }
 0x30b   : > { %11074 = vst [vmem:[#allocation44_spill] sm:$0xff] %v9707_v21  ;;  %v9715_v53 = vpack.c.b16 %v4040_v39, %v4039_v15  ;;  %v4526_v49 = vrot.slane %v9671_v33, 5  ;;  %v3262_v41 = vor.u32 %v3260_v61, %v9710_v29  ;;  %v2661_v9 = vadd.f32 %v2608_v44, %v9147_v12  ;;  %v2808_v40 = vpop.f32.mrf.mxu0  ;;  %v11080_v57 = vld [vmem:[#allocation23_spill] sm:$0xff] }
 0x30c   : > { %3052 = vst [vmem:[#allocation2 + $0x84] sm:$0x1] %v3051_v8  ;;  %v2962_v58 = vmax.f32 %v2930_v46, 0.0  ;;  %v4529_v34 = vrot.slane %v9676_v60, 5  ;;  %v2256_v25 = vadd.f32 %v11076_v26, %v9152_v42  ;;  %v3823_v23 = vor.u32 %v3822_v10, %v3819_v18  ;;  %v3502_v18 = vld [vmem:[#allocation2 + $0x74] sm:$0x1] }
 0x30d   : > { %11075 = vst [vmem:[#allocation45_spill] sm:$0xff] %v9715_v53  ;;  %v4527_v28 = vsel %vm8219_vm4, %v7209_v63, %v4526_v49  ;;  %v4528_v24 = vrot.slane %v4526_v49, 4  ;;  %v3499_v2 = vsel %vm9277_vm12, %v3262_v41, %v3498_v55  ;;  %v2859_v33 = vadd.f32 %v2806_v3, %v2661_v9  ;;  %v11077_v63 = vld [vmem:[#allocation50_spill] sm:$0xff] }
 0x30e   : > { %v2994_v17 = vpack.c.bf16 %v2962_v58, %v2962_v58  ;;  %v9727_v13 = vld [vmem:[#allocation2 + $0x60] sm:$0xff]  ;;  %3500 = vst [vmem:[#allocation2 + $0x6c] sm:$0xf] %v3499_v2  ;;  %4180 = vmatmul.bf16.gmra.mxu1 %v9715_v53  ;;  %v4618_v45 = vunpack.c.l.b16 %v4527_v28  ;;  %v3101_v15 = vsel %vm9234_vm10, 0, %v3100_v7  ;;  %v2448_v61 = vadd.f32 %v11077_v63, %v2256_v25  ;;  %v3053_v7 = vld [vmem:[#allocation2 + $0x90] sm:$0x1] }
 0x30f   : > { %v9729_v59 = vld [vmem:[#allocation2 + $0x64] sm:$0xf]  ;;  %v9732_v12 = vld [vmem:[#allocation2 + $0x68] sm:$0x1]  ;;  %v4530_v42 = vsel %vm8219_vm4, %v4528_v24, %v4529_v34  ;;  %v2895_v3 = vmul.f32 %v9604_v31, %v2859_v33  ;;  %4418 = vmatmul.bf16.gmra.mxu2 %v9727_v13  ;;  %3102 = vst [vmem:[#allocation2 + $0x8c] sm:$0x1] %v3101_v15 }
 0x310   : > { %v3826_v60 = vshll.u32 %v9729_v59, 16  ;;  %v3830_v22 = vshrl.u32 %v9729_v59, 16  ;;  %v3265_v27 = vshrl.u32 %v2994_v17, 16  ;;  %v3836_v14 = vshll.u32 %v9732_v12, 16  ;;  %v11081_v15 = vld [vmem:[#allocation53_spill] sm:$0xff] }
 0x311   : > { %v4619_v51 = vunpack.c.l.b16 %v4530_v42  ;;  %v3268_v46 = vshll.u32 %v2994_v17, 16  ;;  %v2931_v8 = vadd.f32 %v9575_v20, %v2895_v3  ;;  %v3263_v44 = vrot.slane %v9710_v29, 4  ;;  %v2610_v10 = vpop.f32.mrf.mxu3  ;;  %v11079_v3 = vld [vmem:[#allocation25_spill] sm:$0xff] }
 0x312   : > { %v3828_v39 = vrot.slane %v3826_v60, 5  ;;  %v3832_v50 = vrot.slane %v3830_v22, 4  ;;  %v3267_v55 = vrot.slane %v3265_v27, 7  ;;  %v3824_v49 = vrot.slane %v3823_v23, 4 }
 0x313   : > { %v9746_v58 = vpack.c.b16 %v4619_v51, %v4618_v45  ;;  %v2963_v24 = vmax.f32 %v2931_v8, 0.0  ;;  %v2662_v34 = vadd.f32 %v2610_v10, %v2448_v61  ;;  %v2811_v26 = vpop.f32.mrf.mxu0  ;;  %v3838_v17 = vrot.slane %v3836_v14, 5  ;;  %v11082_v51 = vld [vmem:[#allocation18_spill] sm:$0xff]  ;;  %v3505_v8 = vld [vmem:[#allocation2 + $0x78] sm:$0xf] }
 0x314   : > { %v3833_v41 = vor.u32 %v3832_v50, %v3828_v39  ;;  %v3270_v9 = vor.u32 %v3268_v46, %v3267_v55  ;;  %v3272_v28 = vrot.slane %v3267_v55, 4  ;;  %v3829_v25 = vsel %vm8232_vm5, %v3824_v49, %v3828_v39 }
 0x315   : > { %11078 = vst [vmem:[#allocation47_spill] sm:$0xff] %v9746_v58  ;;  %v2995_v23 = vpack.c.bf16 %v2963_v24, %v2963_v24  ;;  %v2860_v60 = vadd.f32 %v2808_v40, %v2662_v34  ;;  %v4041_v45 = vunpack.c.l.b16 %v3829_v25  ;;  %v3054_v39 = vsel %vm9214_vm8, 0, %v3053_v7 }
 0x316   : > { %v3834_v2 = vrot.slane %v3833_v41, 4  ;;  %v3271_v33 = vsel %vm9289_vm14, %v3263_v44, %v3270_v9  ;;  %v3503_v29 = vsel %vm9214_vm8, %v3272_v28, %v3502_v18  ;;  %4734 = vmatmul.bf16.gmra.mxu3 %v11079_v3  ;;  %4926 = vmatmul.bf16.gmra.mxu0 %v11080_v57  ;;  %v7210_v40 = vrot.slane %v9699_v5, 9  ;;  %3055 = vst [vmem:[#allocation2 + $0x90] sm:$0x1] %v3054_v39  ;;  %v9766_v44 = vpop.f32.mrf.mxu2  ;;  %v11084_v28 = vld [vmem:[#allocation51_spill] sm:$0xff] }
 0x317   : > { %3501 = vst [vmem:[#allocation2 + $0x70] sm:$0xf] %v3271_v33  ;;  %v3274_v42 = vshrl.u32 %v2995_v23, 16  ;;  %v2896_v27 = vmul.f32 %v9604_v31, %v2860_v60  ;;  %v4533_v50 = vrot.slane %v9729_v59, 5  ;;  %v2258_v63 = vadd.f32 %v11082_v51, %v11081_v15 }
 0x318   : > { %v3839_v22 = vsel %vm8232_vm5, %v3834_v2, %v3838_v17  ;;  %3504 = vst [vmem:[#allocation2 + $0x74] sm:$0x1] %v3503_v29  ;;  %v3277_v55 = vshll.u32 %v2995_v23, 16  ;;  %v4536_v59 = vrot.slane %v9732_v12, 5  ;;  %v9782_v12 = vld [vmem:[#allocation2 + $0x6c] sm:$0xf] }
 0x319   : > { %v4042_v14 = vunpack.c.l.b16 %v3839_v22  ;;  %v3276_v61 = vrot.slane %v3274_v42, 7  ;;  %v2932_v46 = vadd.f32 %v9575_v20, %v2896_v27  ;;  %v2613_v18 = vpop.f32.mrf.mxu3  ;;  %v4534_v49 = vsel %vm8219_vm4, %v7210_v40, %v4533_v50  ;;  %v11085_v22 = vld [vmem:[#allocation52_spill] sm:$0xff] }
 0x31a   : > { %v4535_v5 = vrot.slane %v4533_v50, 4  ;;  %v2663_v24 = vadd.f32 %v2613_v18, %v11084_v28  ;;  %v2450_v42 = vadd.f32 %v11085_v22, %v2258_v63  ;;  %v3844_v40 = vshll.u32 %v9782_v12, 16 }
 0x31b   : > { %v9768_v10 = vpack.c.b16 %v4042_v14, %v4041_v45  ;;  %v3279_v41 = vor.u32 %v3277_v55, %v3276_v61  ;;  %v2964_v9 = vmax.f32 %v2932_v46, 0.0  ;;  %v3280_v34 = vrot.slane %v3276_v61, 4  ;;  %v2813_v25 = vpop.f32.mrf.mxu0  ;;  %v3103_v55 = vld [vmem:[#allocation2 + $0x98] sm:$0x1] }
 0x31c   : > { %v4537_v2 = vsel %vm8219_vm4, %v4535_v5, %v4536_v59  ;;  %v2861_v29 = vadd.f32 %v2811_v26, %v2663_v24  ;;  %v3841_v26 = vshrl.u32 %v9782_v12, 16  ;;  %v4620_v45 = vunpack.c.l.b16 %v4534_v49 }
 0x31d   : > { %11083 = vst [vmem:[#allocation49_spill] sm:$0xff] %v9768_v10  ;;  %v3506_v17 = vsel %vm9277_vm12, %v3279_v41, %v3505_v8  ;;  %v2996_v33 = vpack.c.bf16 %v2964_v9, %v2964_v9  ;;  %v4621_v60 = vunpack.c.l.b16 %v4537_v2  ;;  %v3509_v8 = vld [vmem:[#allocation2 + $0x80] sm:$0x1]  ;;  %v3846_v59 = vrot.slane %v3844_v40, 5  ;;  %v9798_v2 = vpop.f32.mrf.mxu1 }
 0x31e   : > { %v9778_v23 = vld [vmem:[#allocation2 + $0x6c] sm:$0xff]  ;;  %3507 = vst [vmem:[#allocation2 + $0x78] sm:$0xf] %v3506_v17  ;;  %4185 = vmatmul.bf16.gmra.mxu1 %v9768_v10  ;;  %v2897_v14 = vmul.f32 %v9604_v31, %v2861_v29  ;;  %v3843_v61 = vrot.slane %v3841_v26, 4 }
 0x31f   : > { %v9784_v27 = vld [vmem:[#allocation2 + $0x70] sm:$0xf]  ;;  %v3282_v57 = vshrl.u32 %v2996_v33, 16  ;;  %4423 = vmatmul.bf16.gmra.mxu2 %v9778_v23  ;;  %v9788_v7 = vld [vmem:[#allocation2 + $0x74] sm:$0x1]  ;;  %v3285_v39 = vshll.u32 %v2996_v33, 16  ;;  %v9795_v46 = vpack.c.b16 %v4621_v60, %v4620_v45 }
 0x320   : > { %v3850_v50 = vshll.u32 %v9784_v27, 16  ;;  %v3854_v15 = vshrl.u32 %v9784_v27, 16  ;;  %v2933_v63 = vadd.f32 %v9575_v20, %v2897_v14  ;;  %v4384_v5 = vpop.f32.mrf.mxu2  ;;  %v3860_v9 = vshll.u32 %v9788_v7, 16 }
 0x321   : > { %v3284_v51 = vrot.slane %v3282_v57, 7  ;;  %11086 = vst [vmem:[#allocation50_spill] sm:$0xff] %v9795_v46  ;;  %v2615_v18 = vpop.f32.mrf.mxu3  ;;  %v3847_v22 = vor.u32 %v3846_v59, %v3843_v61  ;;  %v3104_v60 = vsel %vm9234_vm10, 0, %v3103_v55 }
 0x322   : > { %v3852_v41 = vrot.slane %v3850_v50, 5  ;;  %v3856_v49 = vrot.slane %v3854_v15, 4  ;;  %v2965_v17 = vmax.f32 %v2933_v63, 0.0  ;;  %v2664_v33 = vadd.f32 %v2615_v18, %v2450_v42  ;;  %3105 = vst [vmem:[#allocation2 + $0x98] sm:$0x1] %v3104_v60  ;;  %v11087_v42 = vld [vmem:[#allocation57_spill] sm:$0xff] }
 0x323   : > { %v3287_v28 = vor.u32 %v3285_v39, %v3284_v51  ;;  %v3289_v24 = vrot.slane %v3284_v51, 4  ;;  %v2816_v29 = vpop.f32.mrf.mxu0  ;;  %v3848_v39 = vrot.slane %v3847_v22, 4  ;;  %v3862_v15 = vrot.slane %v3860_v9, 5  ;;  %v11088_v51 = vld [vmem:[#allocation54_spill] sm:$0xff]  ;;  %v7639_v18 = vld [vmem:[#allocation3 + $0x150] sm:$0xff] }
 0x324   : > { %v3857_v57 = vor.u32 %v3856_v49, %v3852_v41  ;;  %v2997_v45 = vpack.c.bf16 %v2965_v17, %v2965_v17  ;;  %v2862_v40 = vadd.f32 %v2813_v25, %v2664_v33  ;;  %v2260_v63 = vadd.f32 %v11088_v51, %v11087_v42  ;;  %v3056_v9 = vld [vmem:[#allocation2 + $0x9c] sm:$0x1]  ;;  %5325 = vmatpush.bf16.msrb.mxu2 %v7639_v18 }
 0x325   : > { %v3288_v14 = vsel %vm9289_vm14, %v3280_v34, %v3287_v28  ;;  %v3510_v26 = vsel %vm9214_vm8, %v3289_v24, %v3509_v8  ;;  %v11089_v34 = vld [vmem:[#allocation40_spill] sm:$0xff]  ;;  %v7211_v8 = vrot.slane %v9782_v12, 9  ;;  %v3853_v59 = vsel %vm8232_vm5, %v3848_v39, %v3852_v41 }
 0x326   : > { %3508 = vst [vmem:[#allocation2 + $0x7c] sm:$0xf] %v3288_v14  ;;  %v3858_v50 = vrot.slane %v3857_v57, 4  ;;  %v3291_v61 = vshrl.u32 %v2997_v45, 16  ;;  %v2898_v55 = vmul.f32 %v9604_v31, %v2862_v40  ;;  %4739 = vmatmul.bf16.gmra.mxu3 %v9598_v16  ;;  %4931 = vmatmul.bf16.gmra.mxu0 %v11089_v34  ;;  %v3294_v25 = vshll.u32 %v2997_v45, 16 }
 0x327   : > { %3511 = vst [vmem:[#allocation2 + $0x80] sm:$0x1] %v3510_v26  ;;  %v4540_v28 = vrot.slane %v9784_v27, 5  ;;  %v4543_v22 = vrot.slane %v9788_v7, 5  ;;  %v3512_v57 = vld [vmem:[#allocation2 + $0x84] sm:$0xf]  ;;  %v4043_v60 = vunpack.c.l.b16 %v3853_v59 }
 0x328   : > { %v3863_v49 = vsel %vm8232_vm5, %v3858_v50, %v3862_v15  ;;  %v9817_v24 = vrot.slane %v3291_v61, 7  ;;  %v2934_v17 = vadd.f32 %v9575_v20, %v2898_v55  ;;  %v4386_v14 = vpop.f32.mrf.mxu2  ;;  %v3057_v41 = vsel %vm9214_vm8, 0, %v3056_v9  ;;  %v11090_v50 = vld [vmem:[#allocation55_spill] sm:$0xff]  ;;  %v11092_v59 = vld [vmem:[#allocation56_spill] sm:$0xff] }
 0x329   : > { %v4044_v33 = vunpack.c.l.b16 %v3863_v49  ;;  %v2618_v12 = vpop.f32.mrf.mxu3  ;;  %v4541_v26 = vsel %vm8219_vm4, %v7211_v8, %v4540_v28  ;;  %v4542_v45 = vrot.slane %v4540_v28, 4  ;;  %v4151_v39 = vpop.f32.mrf.mxu1  ;;  %3058 = vst [vmem:[#allocation2 + $0x9c] sm:$0x1] %v3057_v41  ;;  %v2452_v49 = vadd.f32 %v11092_v59, %v2260_v63 }
 0x32a   : > { %v3296_v27 = vor.u32 %v3294_v25, %v9817_v24  ;;  %v2966_v40 = vmax.f32 %v2934_v17, 0.0  ;;  %v2665_v15 = vadd.f32 %v2618_v12, %v11090_v50  ;;  %v9827_v42 = vadd.f32 %v4384_v5, %v4151_v39  ;;  %v9840_v5 = vld [vmem:[#allocation2 + $0x78] sm:$0xf]  ;;  %v3516_v50 = vld [vmem:[#allocation2 + $0x8c] sm:$0x1] }
 0x32b   : > { %v9829_v7 = vpack.c.b16 %v4044_v33, %v4043_v60  ;;  %v2818_v51 = vpop.f32.mrf.mxu0  ;;  %v4544_v61 = vsel %vm8219_vm4, %v4542_v45, %v4543_v22  ;;  %v3297_v55 = vrot.slane %v9817_v24, 4  ;;  %v4622_v28 = vunpack.c.l.b16 %v4541_v26  ;;  %v7631_v22 = vld [vmem:[#allocation3 + $0x110] sm:$0xff]  ;;  %v3106_v45 = vld [vmem:[#allocation2 + $0xa4] sm:$0x1] }
 0x32c   : > { %v3513_v34 = vsel %vm9277_vm12, %v3296_v27, %v3512_v57  ;;  %v2998_v18 = vpack.c.bf16 %v2966_v40, %v2966_v40  ;;  %v2863_v8 = vadd.f32 %v2816_v29, %v2665_v15  ;;  %v3865_v29 = vshrl.u32 %v9840_v5, 16  ;;  %5127 = vmatpush.bf16.msrb.mxu1 %v7631_v22 }
 0x32d   : > { %11091 = vst [vmem:[#allocation25_spill] sm:$0xff] %v9829_v7  ;;  %v9836_v25 = vld [vmem:[#allocation2 + $0x78] sm:$0xff]  ;;  %v4623_v57 = vunpack.c.l.b16 %v4544_v61  ;;  %v3868_v12 = vshll.u32 %v9840_v5, 16  ;;  %v3107_v39 = vsel %vm9234_vm10, 0, %v3106_v45 }
 0x32e   : > { %3514 = vst [vmem:[#allocation2 + $0x84] sm:$0xf] %v3513_v34  ;;  %4190 = vmatmul.bf16.gmra.mxu1 %v9829_v7  ;;  %v9842_v9 = vld [vmem:[#allocation2 + $0x7c] sm:$0xf]  ;;  %v3299_v17 = vshrl.u32 %v2998_v18, 16  ;;  %v2899_v24 = vmul.f32 %v9604_v31, %v2863_v8  ;;  %v3302_v63 = vshll.u32 %v2998_v18, 16 }
 0x32f   : > { %4428 = vmatmul.bf16.gmra.mxu2 %v9836_v25  ;;  %v9846_v33 = vld [vmem:[#allocation2 + $0x80] sm:$0x1]  ;;  %v3874_v60 = vshll.u32 %v9842_v9, 16  ;;  %v3878_v41 = vshrl.u32 %v9842_v9, 16  ;;  %v3867_v40 = vrot.slane %v3865_v29, 4  ;;  %v3870_v61 = vrot.slane %v3868_v12, 5 }
 0x330   : > { %v3301_v26 = vrot.slane %v3299_v17, 7  ;;  %v2935_v27 = vadd.f32 %v9575_v20, %v2899_v24  ;;  %v4389_v34 = vpop.f32.mrf.mxu2  ;;  %v3884_v59 = vshll.u32 %v9846_v33, 16  ;;  %3108 = vst [vmem:[#allocation2 + $0xa4] sm:$0x1] %v3107_v39  ;;  %v9858_v45 = vpack.c.b16 %v4623_v57, %v4622_v28  ;;  %v11094_v39 = vld [vmem:[#allocation59_spill] sm:$0xff] }
 0x331   : > { %v2620_v15 = vpop.f32.mrf.mxu3  ;;  %v3876_v18 = vrot.slane %v3874_v60, 5  ;;  %v3880_v8 = vrot.slane %v3878_v41, 4  ;;  %v4153_v53 = vpop.f32.mrf.mxu1  ;;  %v3871_v22 = vor.u32 %v3870_v61, %v3867_v40  ;;  %v3519_v61 = vld [vmem:[#allocation2 + $0x90] sm:$0xf] }
 0x332   : > { %v3304_v62 = vor.u32 %v3302_v63, %v3301_v26  ;;  %v3306_v7 = vrot.slane %v3301_v26, 4  ;;  %v2967_v10 = vmax.f32 %v2935_v27, 0.0  ;;  %v2666_v17 = vadd.f32 %v2620_v15, %v2452_v49  ;;  %11093 = vst [vmem:[#allocation23_spill] sm:$0xff] %v9858_v45 }
 0x333   : > { %v9856_v24 = vadd.f32 %v4386_v14, %v4153_v53  ;;  %v2821_v29 = vpop.f32.mrf.mxu0  ;;  %v3881_v11 = vor.u32 %v3880_v8, %v3876_v18  ;;  %v3872_v26 = vrot.slane %v3871_v22, 4  ;;  %v3886_v49 = vrot.slane %v3884_v59, 5  ;;  %v11095_v53 = vld [vmem:[#allocation34_spill] sm:$0xff] }
 0x334   : > { %v3305_v12 = vsel %vm9289_vm14, %v3297_v55, %v3304_v62  ;;  %v3517_v60 = vsel %vm9214_vm8, %v3306_v7, %v3516_v50  ;;  %v2999_v41 = vpack.c.bf16 %v2967_v10, %v2967_v10  ;;  %v2864_v63 = vadd.f32 %v2818_v51, %v2666_v17  ;;  %v3059_v62 = vld [vmem:[#allocation2 + $0xa8] sm:$0x1] }
 0x335   : > { %3515 = vst [vmem:[#allocation2 + $0x88] sm:$0xf] %v3305_v12  ;;  %v3882_v27 = vrot.slane %v3881_v11, 4  ;;  %v2262_v14 = vadd.f32 %v11095_v53, %v11094_v39  ;;  %v7212_v7 = vrot.slane %v9840_v5, 9  ;;  %v3877_v10 = vsel %vm8232_vm5, %v3872_v26, %v3876_v18 }
 0x336   : > { %3518 = vst [vmem:[#allocation2 + $0x8c] sm:$0x1] %v3517_v60  ;;  %v3308_v40 = vshrl.u32 %v2999_v41, 16  ;;  %v2900_v28 = vmul.f32 %v9604_v31, %v2864_v63  ;;  %4744 = vmatmul.bf16.gmra.mxu3 %v9626_v56  ;;  %4936 = vmatmul.bf16.gmra.mxu0 %v9523_v37  ;;  %v3060_v51 = vsel %vm9214_vm8, 0, %v3059_v62  ;;  %v4547_v55 = vrot.slane %v9842_v9, 5  ;;  %v11096_v63 = vld [vmem:[#allocation58_spill] sm:$0xff] }
 0x337   : > { %v3887_v11 = vsel %vm8232_vm5, %v3882_v27, %v3886_v49  ;;  %v3311_v50 = vshll.u32 %v2999_v41, 16  ;;  %3061 = vst [vmem:[#allocation2 + $0xa8] sm:$0x1] %v3060_v51  ;;  %v4045_v8 = vunpack.c.l.b16 %v3877_v10  ;;  %v4550_v22 = vrot.slane %v9846_v33, 5  ;;  %v11098_v10 = vld [vmem:[#allocation35_spill] sm:$0xff] }
 0x338   : > { %v9877_v57 = vrot.slane %v3308_v40, 7  ;;  %v2936_v15 = vadd.f32 %v9575_v20, %v2900_v28  ;;  %v4046_v37 = vunpack.c.l.b16 %v3887_v11  ;;  %v4391_v59 = vpop.f32.mrf.mxu2  ;;  %v4548_v18 = vsel %vm8219_vm4, %v7212_v7, %v4547_v55 }
 0x339   : > { %v2623_v5 = vpop.f32.mrf.mxu3  ;;  %v4549_v17 = vrot.slane %v4547_v55, 4  ;;  %v2454_v11 = vadd.f32 %v11098_v10, %v2262_v14 }
 0x33a   : > { %v3313_v12 = vor.u32 %v3311_v50, %v9877_v57  ;;  %v2968_v9 = vmax.f32 %v2936_v15, 0.0  ;;  %v4156_v60 = vpop.f32.mrf.mxu1  ;;  %v2667_v41 = vadd.f32 %v2623_v5, %v11096_v63  ;;  %v3314_v26 = vrot.slane %v9877_v57, 4 }
 0x33b   : > { %v9886_v27 = vadd.f32 %v4389_v34, %v4156_v60  ;;  %v9888_v49 = vpack.c.b16 %v4046_v37, %v4045_v8  ;;  %v2823_v39 = vpop.f32.mrf.mxu0  ;;  %v4551_v53 = vsel %vm8219_vm4, %v4549_v17, %v4550_v22  ;;  %v9898_v34 = vld [vmem:[#allocation2 + $0x84] sm:$0xf]  ;;  %v4624_v15 = vunpack.c.l.b16 %v4548_v18  ;;  %v3523_v60 = vld [vmem:[#allocation2 + $0x98] sm:$0x1] }
 0x33c   : > { %v3520_v40 = vsel %vm9277_vm12, %v3313_v12, %v3519_v61  ;;  %v3000_v33 = vpack.c.bf16 %v2968_v9, %v2968_v9  ;;  %v2865_v28 = vadd.f32 %v2821_v29, %v2667_v41  ;;  %v9894_v62 = vld [vmem:[#allocation2 + $0x84] sm:$0xff]  ;;  %v4625_v7 = vunpack.c.l.b16 %v4551_v53  ;;  %v3109_v12 = vld [vmem:[#allocation2 + $0xb0] sm:$0x1] }
 0x33d   : > { %11097 = vst [vmem:[#allocation53_spill] sm:$0xff] %v9888_v49  ;;  %v9900_v51 = vld [vmem:[#allocation2 + $0x88] sm:$0xf]  ;;  %v9904_v50 = vld [vmem:[#allocation2 + $0x8c] sm:$0x1]  ;;  %v3889_v29 = vshrl.u32 %v9898_v34, 16 }
 0x33e   : > { %3521 = vst [vmem:[#allocation2 + $0x90] sm:$0xf] %v3520_v40  ;;  %4195 = vmatmul.bf16.gmra.mxu1 %v9888_v49  ;;  %v3316_v55 = vshrl.u32 %v3000_v33, 16  ;;  %v2901_v57 = vmul.f32 %v9604_v31, %v2865_v28  ;;  %v3319_v37 = vshll.u32 %v3000_v33, 16  ;;  %v3892_v14 = vshll.u32 %v9898_v34, 16 }
 0x33f   : > { %4433 = vmatmul.bf16.gmra.mxu2 %v9894_v62  ;;  %v3898_v61 = vshll.u32 %v9900_v51, 16  ;;  %v3902_v5 = vshrl.u32 %v9900_v51, 16  ;;  %v3891_v22 = vrot.slane %v3889_v29, 4  ;;  %v9911_v9 = vpack.c.b16 %v4625_v7, %v4624_v15 }
 0x340   : > { %v3318_v8 = vrot.slane %v3316_v55, 7  ;;  %v2937_v17 = vadd.f32 %v9575_v20, %v2901_v57  ;;  %v4394_v41 = vpop.f32.mrf.mxu2  ;;  %v3894_v53 = vrot.slane %v3892_v14, 5  ;;  %v3908_v33 = vshll.u32 %v9904_v50, 16 }
 0x341   : > { %11099 = vst [vmem:[#allocation18_spill] sm:$0xff] %v9911_v9  ;;  %v2625_v63 = vpop.f32.mrf.mxu3  ;;  %v3900_v40 = vrot.slane %v3898_v61, 5  ;;  %v3904_v18 = vrot.slane %v3902_v5, 4  ;;  %v3110_v7 = vsel %vm9234_vm10, 0, %v3109_v12 }
 0x342   : > { %v3321_v28 = vor.u32 %v3319_v37, %v3318_v8  ;;  %v3323_v10 = vrot.slane %v3318_v8, 4  ;;  %v2969_v49 = vmax.f32 %v2937_v17, 0.0  ;;  %v4158_v0 = vpop.f32.mrf.mxu1  ;;  %v2668_v32 = vadd.f32 %v2625_v63, %v2454_v11  ;;  %3111 = vst [vmem:[#allocation2 + $0xb0] sm:$0x1] %v3110_v7  ;;  %v11101_v8 = vld [vmem:[#allocation60_spill] sm:$0xff] }
 0x343   : > { %v9914_v55 = vadd.f32 %v4391_v59, %v4158_v0  ;;  %v2826_v57 = vpop.f32.mrf.mxu0  ;;  %v3895_v29 = vor.u32 %v3894_v53, %v3891_v22  ;;  %v3905_v56 = vor.u32 %v3904_v18, %v3900_v40  ;;  %v3910_v0 = vrot.slane %v3908_v33, 5  ;;  %v11100_v59 = vld [vmem:[#allocation63_spill] sm:$0xff] }
 0x344   : > { %v3322_v15 = vsel %vm9289_vm14, %v3314_v26, %v3321_v28  ;;  %v3524_v14 = vsel %vm9214_vm8, %v3323_v10, %v3523_v60  ;;  %v3001_v61 = vpack.c.bf16 %v2969_v49, %v2969_v49  ;;  %v2866_v37 = vadd.f32 %v2823_v39, %v2668_v32  ;;  %v7638_v26 = vld [vmem:[#allocation3 + $0x148] sm:$0xff]  ;;  %v3062_v60 = vld [vmem:[#allocation2 + $0xb4] sm:$0x1]  ;;  %v3526_v28 = vld [vmem:[#allocation2 + $0x9c] sm:$0xf] }
 0x345   : > { %3522 = vst [vmem:[#allocation2 + $0x94] sm:$0xf] %v3322_v15  ;;  %v3896_v5 = vrot.slane %v3895_v29, 4  ;;  %v3906_v11 = vrot.slane %v3905_v56, 4  ;;  %v2264_v17 = vadd.f32 %v11101_v8, %v11100_v59  ;;  %v7213_v49 = vrot.slane %v9898_v34, 9  ;;  %5326 = vmatpush.bf16.msrb.mxu2 %v7638_v26 }
 0x346   : > { %3525 = vst [vmem:[#allocation2 + $0x98] sm:$0x1] %v3524_v14  ;;  %v3325_v22 = vshrl.u32 %v3001_v61, 16  ;;  %v2902_v12 = vmul.f32 %v9604_v31, %v2866_v37  ;;  %4749 = vmatmul.bf16.gmra.mxu3 %v9686_v35  ;;  %4941 = vmatmul.bf16.gmra.mxu0 %v9591_v30  ;;  %v3328_v32 = vshll.u32 %v3001_v61, 16  ;;  %v4554_v63 = vrot.slane %v9900_v51, 5 }
 0x347   : > { %v3901_v39 = vsel %vm8232_vm5, %v3896_v5, %v3900_v40  ;;  %v3911_v56 = vsel %vm8232_vm5, %v3906_v11, %v3910_v0  ;;  %v4557_v30 = vrot.slane %v9904_v50, 5  ;;  %v3063_v40 = vsel %vm9214_vm8, 0, %v3062_v60 }
 0x348   : > { %v9933_v53 = vrot.slane %v3325_v22, 7  ;;  %v2938_v18 = vadd.f32 %v9575_v20, %v2902_v12  ;;  %v4048_v33 = vunpack.c.l.b16 %v3911_v56  ;;  %v4047_v10 = vunpack.c.l.b16 %v3901_v39  ;;  %v4396_v29 = vpop.f32.mrf.mxu2  ;;  %v11102_v20 = vld [vmem:[#allocation61_spill] sm:$0xff]  ;;  %3064 = vst [vmem:[#allocation2 + $0xb4] sm:$0x1] %v3063_v40 }
 0x349   : > { %v2628_v34 = vpop.f32.mrf.mxu3  ;;  %v4555_v7 = vsel %vm8219_vm4, %v7213_v49, %v4554_v63  ;;  %v4556_v15 = vrot.slane %v4554_v63, 4  ;;  %v11104_v49 = vld [vmem:[#allocation62_spill] sm:$0xff] }
 0x34a   : > { %v3330_v51 = vor.u32 %v3328_v32, %v9933_v53  ;;  %v2970_v14 = vmax.f32 %v2938_v18, 0.0  ;;  %v4161_v61 = vpop.f32.mrf.mxu1  ;;  %v2669_v37 = vadd.f32 %v2628_v34, %v11102_v20  ;;  %v9945_v50 = vpack.c.b16 %v4048_v33, %v4047_v10  ;;  %v7630_v18 = vld [vmem:[#allocation3 + $0x108] sm:$0xff]  ;;  %v3112_v10 = vld [vmem:[#allocation2 + $0xbc] sm:$0x1] }
 0x34b   : > { %v9943_v5 = vadd.f32 %v4394_v41, %v4161_v61  ;;  %v2828_v11 = vpop.f32.mrf.mxu0  ;;  %v4558_v0 = vsel %vm8219_vm4, %v4556_v15, %v4557_v30  ;;  %v3331_v59 = vrot.slane %v9933_v53, 4  ;;  %v2456_v32 = vadd.f32 %v11104_v49, %v2264_v17  ;;  %v9956_v41 = vld [vmem:[#allocation2 + $0x90] sm:$0xf]  ;;  %5128 = vmatpush.bf16.msrb.mxu1 %v7630_v18 }
 0x34c   : > { %11103 = vst [vmem:[#allocation51_spill] sm:$0xff] %v9945_v50  ;;  %v3527_v8 = vsel %vm9277_vm12, %v3330_v51, %v3526_v28  ;;  %v3002_v22 = vpack.c.bf16 %v2970_v14, %v2970_v14  ;;  %v2867_v12 = vadd.f32 %v2826_v57, %v2669_v37  ;;  %v9952_v26 = vld [vmem:[#allocation2 + $0x90] sm:$0xff]  ;;  %v4626_v56 = vunpack.c.l.b16 %v4555_v7  ;;  %v3530_v14 = vld [vmem:[#allocation2 + $0xa4] sm:$0x1] }
 0x34d   : > { %3528 = vst [vmem:[#allocation2 + $0x9c] sm:$0xf] %v3527_v8  ;;  %v9958_v39 = vld [vmem:[#allocation2 + $0x94] sm:$0xf]  ;;  %v9962_v53 = vld [vmem:[#allocation2 + $0x98] sm:$0x1]  ;;  %v4627_v33 = vunpack.c.l.b16 %v4558_v0 }
 0x34e   : > { %4200 = vmatmul.bf16.gmra.mxu1 %v9945_v50  ;;  %v3333_v60 = vshrl.u32 %v3002_v22, 16  ;;  %v2903_v63 = vmul.f32 %v9604_v31, %v2867_v12  ;;  %v3913_v57 = vshrl.u32 %v9956_v41, 16  ;;  %v3336_v17 = vshll.u32 %v3002_v22, 16  ;;  %v9971_v31 = vld [vmem:[%s10860_s3] ss:$0 sm:$0xff] }
 0x34f   : > { %4438 = vmatmul.bf16.gmra.mxu2 %v9952_v26  ;;  %v3916_v30 = vshll.u32 %v9956_v41, 16  ;;  %v3922_v28 = vshll.u32 %v9958_v39, 16  ;;  %v3926_v34 = vshrl.u32 %v9958_v39, 16  ;;  %v3113_v51 = vsel %vm9234_vm10, 0, %v3112_v10 }
 0x350   : > { %v3335_v40 = vrot.slane %v3333_v60, 7  ;;  %v2939_v7 = vadd.f32 %v9971_v31, %v2903_v63  ;;  %v3915_v15 = vrot.slane %v3913_v57, 4  ;;  %v4399_v20 = vpop.f32.mrf.mxu2  ;;  %v3932_v22 = vshll.u32 %v9962_v53, 16  ;;  %3114 = vst [vmem:[#allocation2 + $0xbc] sm:$0x1] %v3113_v51  ;;  %v11106_v51 = vld [vmem:[#allocation64_spill] sm:$0xff] }
 0x351   : > { %v2630_v61 = vpop.f32.mrf.mxu3  ;;  %v3918_v37 = vrot.slane %v3916_v30, 5  ;;  %v3924_v0 = vrot.slane %v3922_v28, 5  ;;  %v3928_v8 = vrot.slane %v3926_v34, 4  ;;  %v9979_v10 = vpack.c.b16 %v4627_v33, %v4626_v56  ;;  %v9990_v56 = vld [vmem:[%s10859_s2] ss:$0 sm:$0xff] }
 0x352   : > { %v3338_v12 = vor.u32 %v3336_v17, %v3335_v40  ;;  %v3340_v49 = vrot.slane %v3335_v40, 4  ;;  %v2971_v60 = vmax.f32 %v2939_v7, 0.0  ;;  %v4163_v50 = vpop.f32.mrf.mxu1  ;;  %v2670_v35 = vadd.f32 %v2630_v61, %v2456_v32 }
 0x353   : > { %v9977_v63 = vadd.f32 %v4396_v29, %v4163_v50  ;;  %v2831_v57 = vpop.f32.mrf.mxu0  ;;  %v3919_v18 = vor.u32 %v3918_v37, %v3915_v15  ;;  %v3929_v16 = vor.u32 %v3928_v8, %v3924_v0  ;;  %v3934_v32 = vrot.slane %v3932_v22, 5  ;;  %v11107_v29 = vld [vmem:[#allocation36_spill] sm:$0xff] }
 0x354   : > { %v3339_v30 = vsel %vm9289_vm14, %v3331_v59, %v3338_v12  ;;  %v3531_v28 = vsel %vm9214_vm8, %v3340_v49, %v3530_v14  ;;  %v3003_v34 = vpack.c.bf16 %v2971_v60, %v2971_v60  ;;  %v2868_v17 = vadd.f32 %v2828_v11, %v2670_v35  ;;  %v3065_v35 = vld [vmem:[#allocation2 + $0xc0] sm:$0x1]  ;;  %v3533_v12 = vld [vmem:[#allocation2 + $0xa8] sm:$0xf] }
 0x355   : > { %11105 = vst [vmem:[#allocation52_spill] sm:$0xff] %v9977_v63  ;;  %v3920_v40 = vrot.slane %v3919_v18, 4  ;;  %v3930_v7 = vrot.slane %v3929_v16, 4  ;;  %v2266_v50 = vadd.f32 %v11107_v29, %v11106_v51  ;;  %v7214_v16 = vrot.slane %v9956_v41, 9 }
 0x356   : > { %3529 = vst [vmem:[#allocation2 + $0xa0] sm:$0xf] %v3339_v30  ;;  %v3342_v15 = vshrl.u32 %v3003_v34, 16  ;;  %v2904_v59 = vmul.f32 %v9990_v56, %v2868_v17  ;;  %4754 = vmatmul.bf16.gmra.mxu3 %v9707_v21  ;;  %4946 = vmatmul.bf16.gmra.mxu0 %v9669_v36  ;;  %v3066_v14 = vsel %vm9214_vm8, 0, %v3065_v35  ;;  %v4561_v61 = vrot.slane %v9958_v39, 5 }
 0x357   : > { %3532 = vst [vmem:[#allocation2 + $0xa4] sm:$0x1] %v3531_v28  ;;  %v3925_v11 = vsel %vm8232_vm5, %v3920_v40, %v3924_v0  ;;  %v3935_v33 = vsel %vm8232_vm5, %v3930_v7, %v3934_v32  ;;  %v3345_v8 = vshll.u32 %v3003_v34, 16  ;;  %v4564_v30 = vrot.slane %v9962_v53, 5  ;;  %v11108_v40 = vld [vmem:[#allocation24_spill] sm:$0xff] }
 0x358   : > { %v10003_v37 = vrot.slane %v3342_v15, 7  ;;  %v2940_v22 = vadd.f32 %v9971_v31, %v2904_v59  ;;  %v4050_v36 = vunpack.c.l.b16 %v3935_v33  ;;  %3067 = vst [vmem:[#allocation2 + $0xc0] sm:$0x1] %v3066_v14  ;;  %v4049_v49 = vunpack.c.l.b16 %v3925_v11  ;;  %v4401_v60 = vpop.f32.mrf.mxu2  ;;  %v11112_v33 = vld [vmem:[#allocation37_spill] sm:$0xff] }
 0x359   : > { %v2633_v41 = vpop.f32.mrf.mxu3  ;;  %v4562_v0 = vsel %vm8219_vm4, %v7214_v16, %v4561_v61  ;;  %v4563_v18 = vrot.slane %v4561_v61, 4  ;;  %v2458_v14 = vadd.f32 %v11112_v33, %v2266_v50 }
 0x35a   : > { %v3347_v28 = vor.u32 %v3345_v8, %v10003_v37  ;;  %v2972_v39 = vmax.f32 %v2940_v22, 0.0  ;;  %v4166_v17 = vpop.f32.mrf.mxu1  ;;  %v2671_v34 = vadd.f32 %v2633_v41, %v11108_v40  ;;  %v3348_v7 = vrot.slane %v10003_v37, 4  ;;  %v3537_v40 = vld [vmem:[#allocation2 + $0xb0] sm:$0x1] }
 0x35b   : > { %v10012_v32 = vadd.f32 %v4399_v20, %v4166_v17  ;;  %v10014_v51 = vpack.c.b16 %v4050_v36, %v4049_v49  ;;  %v2833_v29 = vpop.f32.mrf.mxu0  ;;  %v4565_v15 = vsel %vm8219_vm4, %v4563_v18, %v4564_v30  ;;  %v10024_v20 = vld [vmem:[#allocation2 + $0x9c] sm:$0xf]  ;;  %v4628_v36 = vunpack.c.l.b16 %v4562_v0 }
 0x35c   : > { %v3534_v59 = vsel %vm9277_vm12, %v3347_v28, %v3533_v12  ;;  %v3004_v53 = vpack.c.bf16 %v2972_v39, %v2972_v39  ;;  %v2869_v35 = vadd.f32 %v2831_v57, %v2671_v34  ;;  %v4629_v11 = vunpack.c.l.b16 %v4565_v15  ;;  %v3115_v39 = vld [vmem:[#allocation2 + $0xc8] sm:$0x1] }
 0x35d   : > { %11109 = vst [vmem:[#allocation57_spill] sm:$0xff] %v10012_v32  ;;  %v10020_v16 = vld [vmem:[#allocation2 + $0x9c] sm:$0xff]  ;;  %v3937_v57 = vshrl.u32 %v10024_v20, 16  ;;  %v3940_v50 = vshll.u32 %v10024_v20, 16 }
 0x35e   : > { %11110 = vst [vmem:[#allocation54_spill] sm:$0xff] %v10014_v51  ;;  %4205 = vmatmul.bf16.gmra.mxu1 %v10014_v51  ;;  %v10026_v61 = vld [vmem:[#allocation2 + $0xa0] sm:$0xf]  ;;  %v3350_v37 = vshrl.u32 %v3004_v53, 16  ;;  %v2905_v8 = vmul.f32 %v9990_v56, %v2869_v35  ;;  %v10030_v22 = vld [vmem:[#allocation2 + $0xa4] sm:$0x1]  ;;  %v10037_v17 = vpack.c.b16 %v4629_v11, %v4628_v36 }
 0x35f   : > { %11111 = vst [vmem:[#allocation40_spill] sm:$0xff] %v10020_v16  ;;  %4443 = vmatmul.bf16.gmra.mxu2 %v10020_v16  ;;  %v3353_v12 = vshll.u32 %v3004_v53, 16  ;;  %v3946_v41 = vshll.u32 %v10026_v61, 16  ;;  %v3950_v49 = vshrl.u32 %v10026_v61, 16  ;;  %v3939_v28 = vrot.slane %v3937_v57, 4 }
 0x360   : > { %3535 = vst [vmem:[#allocation2 + $0xa8] sm:$0xf] %v3534_v59  ;;  %v3352_v18 = vrot.slane %v3350_v37, 7  ;;  %v2941_v30 = vadd.f32 %v9971_v31, %v2905_v8  ;;  %v3942_v59 = vrot.slane %v3940_v50, 5  ;;  %v3956_v53 = vshll.u32 %v10030_v22, 16 }
 0x361   : > { %v2635_v34 = vpop.f32.mrf.mxu3  ;;  %v4404_v15 = vpop.f32.mrf.mxu2  ;;  %v3948_v35 = vrot.slane %v3946_v41, 5  ;;  %v3952_v0 = vrot.slane %v3950_v49, 4  ;;  %v3116_v11 = vsel %vm9234_vm10, 0, %v3115_v39 }
 0x362   : > { %v3355_v33 = vor.u32 %v3353_v12, %v3352_v18  ;;  %v3357_v51 = vrot.slane %v3352_v18, 4  ;;  %v2973_v21 = vmax.f32 %v2941_v30, 0.0  ;;  %v4168_v32 = vpop.f32.mrf.mxu1  ;;  %v2672_v16 = vadd.f32 %v2635_v34, %v2458_v14  ;;  %3117 = vst [vmem:[#allocation2 + $0xc8] sm:$0x1] %v3116_v11 }
 0x363   : > { %v10040_v37 = vadd.f32 %v4401_v60, %v4168_v32  ;;  %v2836_v8 = vpop.f32.mrf.mxu0  ;;  %v3943_v57 = vor.u32 %v3942_v59, %v3939_v28  ;;  %v3953_v63 = vor.u32 %v3952_v0, %v3948_v35  ;;  %v3958_v60 = vrot.slane %v3956_v53, 5  ;;  %v11113_v32 = vld [vmem:[#allocation38_spill] sm:$0xff] }
 0x364   : > { %v3356_v36 = vsel %vm9289_vm14, %v3348_v7, %v3355_v33  ;;  %v3538_v50 = vsel %vm9214_vm8, %v3357_v51, %v3537_v40  ;;  %v3005_v41 = vpack.c.bf16 %v2973_v21, %v2973_v21  ;;  %v2870_v12 = vadd.f32 %v2833_v29, %v2672_v16  ;;  %v7637_v7 = vld [vmem:[#allocation3 + $0x140] sm:$0xff] }
 0x365   : > { %3536 = vst [vmem:[#allocation2 + $0xac] sm:$0xf] %v3356_v36  ;;  %v3944_v49 = vrot.slane %v3943_v57, 4  ;;  %v3954_v14 = vrot.slane %v3953_v63, 4  ;;  %v2268_v18 = vadd.f32 %v9619_v19, %v11113_v32  ;;  %v7629_v51 = vld [vmem:[#allocation3 + $0x100] sm:$0xff]  ;;  %v7215_v21 = vrot.slane %v10024_v20, 9  ;;  %5327 = vmatpush.bf16.msrb.mxu2 %v7637_v7 }
 0x366   : > { %3539 = vst [vmem:[#allocation2 + $0xb0] sm:$0x1] %v3538_v50  ;;  %v3359_v30 = vshrl.u32 %v3005_v41, 16  ;;  %v2906_v52 = vmul.f32 %v9990_v56, %v2870_v12  ;;  %4759 = vmatmul.bf16.gmra.mxu3 %v9746_v58  ;;  %4951 = vmatmul.bf16.gmra.mxu0 %v9727_v13  ;;  %v3362_v29 = vshll.u32 %v3005_v41, 16  ;;  %v4568_v28 = vrot.slane %v10026_v61, 5  ;;  %v11114_v50 = vld [vmem:[#allocation29_spill] sm:$0xff] }
 0x367   : > { %v3949_v63 = vsel %vm8232_vm5, %v3944_v49, %v3948_v35  ;;  %v3959_v16 = vsel %vm8232_vm5, %v3954_v14, %v3958_v60  ;;  %v10058_v19 = vld [vmem:[#allocation2 + $0xa8] sm:$0xf]  ;;  %5129 = vmatpush.bf16.msrb.mxu1 %v7629_v51  ;;  %v3540_v20 = vld [vmem:[#allocation2 + $0xb4] sm:$0xf]  ;;  %v4571_v12 = vrot.slane %v10030_v22, 5 }
 0x368   : > { %v10061_v39 = vrot.slane %v3359_v30, 7  ;;  %v2942_v40 = vadd.f32 %v9971_v31, %v2906_v52  ;;  %v4051_v13 = vunpack.c.l.b16 %v3949_v63  ;;  %v4052_v34 = vunpack.c.l.b16 %v3959_v16 }
 0x369   : > { %v2638_v59 = vpop.f32.mrf.mxu3  ;;  %v4406_v0 = vpop.f32.mrf.mxu2  ;;  %v3961_v35 = vshrl.u32 %v10058_v19, 16  ;;  %v3964_v53 = vshll.u32 %v10058_v19, 16  ;;  %v4569_v33 = vsel %vm8219_vm4, %v7215_v21, %v4568_v28  ;;  %v4570_v57 = vrot.slane %v4568_v28, 4 }
 0x36a   : > { %v3364_v61 = vor.u32 %v3362_v29, %v10061_v39  ;;  %v2974_v11 = vmax.f32 %v2942_v40, 0.0  ;;  %v2673_v41 = vadd.f32 %v2638_v59, %v11114_v50  ;;  %v10073_v14 = vpack.c.b16 %v4052_v34, %v4051_v13  ;;  %v3544_v50 = vld [vmem:[#allocation2 + $0xbc] sm:$0x1] }
 0x36b   : > { %v4171_v36 = vpop.f32.mrf.mxu1  ;;  %v2838_v60 = vpop.f32.mrf.mxu0  ;;  %v3963_v32 = vrot.slane %v3961_v35, 4  ;;  %v3966_v30 = vrot.slane %v3964_v53, 5  ;;  %v4572_v63 = vsel %vm8219_vm4, %v4570_v57, %v4571_v12  ;;  %v4630_v13 = vunpack.c.l.b16 %v4569_v33 }
 0x36c   : > { %v10071_v49 = vadd.f32 %v4404_v15, %v4171_v36  ;;  %11115 = vst [vmem:[#allocation55_spill] sm:$0xff] %v10073_v14  ;;  %v3541_v52 = vsel %vm9277_vm12, %v3364_v61, %v3540_v20  ;;  %v3006_v7 = vpack.c.bf16 %v2974_v11, %v2974_v11  ;;  %v2871_v51 = vadd.f32 %v2836_v8, %v2673_v41  ;;  %v10077_v21 = vld [vmem:[#allocation2 + $0xa8] sm:$0xff] }
 0x36d   : > { %v10079_v29 = vld [vmem:[#allocation2 + $0xac] sm:$0xf]  ;;  %3542 = vst [vmem:[#allocation2 + $0xb4] sm:$0xf] %v3541_v52  ;;  %v10084_v22 = vld [vmem:[#allocation2 + $0xb0] sm:$0x1]  ;;  %v3967_v15 = vor.u32 %v3966_v30, %v3963_v32  ;;  %v4631_v35 = vunpack.c.l.b16 %v4572_v63  ;;  %v2460_v53 = vadd.f32 %v9622_v47, %v2268_v18 }
 0x36e   : > { %4210 = vmatmul.bf16.gmra.mxu1 %v10073_v14  ;;  %v3970_v16 = vshll.u32 %v10079_v29, 16  ;;  %v3974_v28 = vshrl.u32 %v10079_v29, 16  ;;  %v3367_v40 = vshrl.u32 %v3006_v7, 16  ;;  %v2907_v8 = vmul.f32 %v9990_v56, %v2871_v51 }
 0x36f   : > { %4448 = vmatmul.bf16.gmra.mxu2 %v10077_v21  ;;  %v3980_v59 = vshll.u32 %v10084_v22, 16  ;;  %v3370_v61 = vshll.u32 %v3006_v7, 16  ;;  %v3365_v36 = vrot.slane %v10061_v39, 4  ;;  %v3968_v32 = vrot.slane %v3967_v15, 4 }
 0x370   : > { %v3972_v34 = vrot.slane %v3970_v16, 5  ;;  %v3976_v20 = vrot.slane %v3974_v28, 4  ;;  %v3369_v57 = vrot.slane %v3367_v40, 7  ;;  %v2943_v11 = vadd.f32 %v9971_v31, %v2907_v8  ;;  %v7652_v40 = vld [vmem:[#allocation3 + $0x1b8] sm:$0xff] }
 0x371   : > { %v2640_v41 = vpop.f32.mrf.mxu3  ;;  %v4409_v12 = vpop.f32.mrf.mxu2  ;;  %v10094_v52 = vpack.c.b16 %v4631_v35, %v4630_v13  ;;  %v3982_v7 = vrot.slane %v3980_v59, 5  ;;  %5512 = vmatpush.bf16.msra.mxu3 %v7652_v40 }
 0x372   : > { %v3977_v30 = vor.u32 %v3976_v20, %v3972_v34  ;;  %v3372_v33 = vor.u32 %v3370_v61, %v3369_v57  ;;  %v3374_v51 = vrot.slane %v3369_v57, 4  ;;  %v2975_v16 = vmax.f32 %v2943_v11, 0.0  ;;  %v7676_v61 = vld [vmem:[%s10864_s7 + $0x38] sm:$0xff] }
 0x373   : > { %11116 = vst [vmem:[#allocation56_spill] sm:$0xff] %v10094_v52  ;;  %v4173_v28 = vpop.f32.mrf.mxu1  ;;  %v2674_v63 = vadd.f32 %v2640_v41, %v2460_v53  ;;  %v10098_v47 = vpop.f32.mrf.mxu0  ;;  %v3973_v18 = vsel %vm8232_vm5, %v3968_v32, %v3972_v34  ;;  %6181 = vmatpush.bf16.msra.mxu2 %v7676_v61 }
 0x374   : > { %v10096_v14 = vadd.f32 %v4406_v0, %v4173_v28  ;;  %v3978_v39 = vrot.slane %v3977_v30, 4  ;;  %v3373_v15 = vsel %vm9289_vm14, %v3365_v36, %v3372_v33  ;;  %v3545_v8 = vsel %vm9214_vm8, %v3374_v51, %v3544_v50  ;;  %v10106_v35 = vld [vmem:[#allocation2 + $0xb4] sm:$0xf]  ;;  %v3547_v33 = vld [vmem:[#allocation2 + $0xc0] sm:$0xf] }
 0x375   : > { %v3007_v13 = vpack.c.bf16 %v2975_v16, %v2975_v16  ;;  %v2872_v20 = vadd.f32 %v2838_v60, %v2674_v63  ;;  %3543 = vst [vmem:[#allocation2 + $0xb8] sm:$0xf] %v3373_v15  ;;  %v3985_v53 = vshrl.u32 %v10106_v35, 16  ;;  %v3988_v60 = vshll.u32 %v10106_v35, 16 }
 0x376   : > { %v3983_v0 = vsel %vm8232_vm5, %v3978_v39, %v3982_v7  ;;  %3546 = vst [vmem:[#allocation2 + $0xbc] sm:$0x1] %v3545_v8  ;;  %4764 = vmatmul.bf16.gmra.mxu3 %v9795_v46  ;;  %4956 = vmatmul.bf16.gmra.mxu0 %v9778_v23  ;;  %v4053_v11 = vunpack.c.l.b16 %v3973_v18  ;;  %v7216_v36 = vrot.slane %v10058_v19, 9  ;;  %v4575_v50 = vrot.slane %v10079_v29, 5  ;;  %v7660_v8 = vld [vmem:[#allocation3 + $0x1f8] sm:$0xff] }
 0x377   : > { %v3376_v34 = vshrl.u32 %v3007_v13, 16  ;;  %v2908_v59 = vmul.f32 %v9990_v56, %v2872_v20  ;;  %v4054_v57 = vunpack.c.l.b16 %v3983_v0  ;;  %v3379_v32 = vshll.u32 %v3007_v13, 16  ;;  %5726 = vmatpush.bf16.msra.mxu0 %v7660_v8 }
 0x378   : > { %v3987_v30 = vrot.slane %v3985_v53, 4  ;;  %v4576_v28 = vsel %vm8219_vm4, %v7216_v36, %v4575_v50  ;;  %v4577_v63 = vrot.slane %v4575_v50, 4  ;;  %v4578_v18 = vrot.slane %v10084_v22, 5 }
 0x379   : > { %v3378_v41 = vrot.slane %v3376_v34, 7  ;;  %v2944_v56 = vadd.f32 %v9971_v31, %v2908_v59  ;;  %v4725_v23 = vpop.f32.mrf.mxu3  ;;  %v10121_v51 = vpack.c.b16 %v4054_v57, %v4053_v11  ;;  %v4411_v16 = vpop.f32.mrf.mxu2  ;;  %v3990_v40 = vrot.slane %v3988_v60, 5  ;;  %v7668_v11 = vld [vmem:[#allocation3 + $0x238] sm:$0xff] }
 0x37a   : > { %v4805_v7 = vadd.f32 %v4725_v23, %v9673_v6  ;;  %v4579_v13 = vsel %vm8219_vm4, %v4577_v63, %v4578_v18  ;;  %v4632_v34 = vunpack.c.l.b16 %v4576_v28  ;;  %5924 = vmatpush.bf16.msra.mxu1 %v7668_v11  ;;  %v3551_v23 = vld [vmem:[#allocation2 + $0xc8] sm:$0x1]  ;;  %v7217_v43 = vrot.slane %v10106_v35, 9 }
 0x37b   : > { %v3381_v19 = vor.u32 %v3379_v32, %v3378_v41  ;;  %v2976_v39 = vmax.f32 %v2944_v56, 0.0  ;;  %v4176_v29 = vpop.f32.mrf.mxu1  ;;  %v10129_v15 = vpop.f32.mrf.mxu0  ;;  %v4633_v59 = vunpack.c.l.b16 %v4579_v13  ;;  %v3991_v61 = vor.u32 %v3990_v40, %v3987_v30 }
 0x37c   : > { %v10127_v31 = vadd.f32 %v4409_v12, %v4176_v29  ;;  %v10135_v53 = vld [vmem:[#allocation2 + $0xb4] sm:$0xff] }
 0x37d   : > { %v3548_v20 = vsel %vm9277_vm12, %v3381_v19, %v3547_v33  ;;  %v3008_v0 = vpack.c.bf16 %v2976_v39, %v2976_v39  ;;  %v3600_v22 = vld [vmem:[#allocation2 + $0xb8] sm:$0xf]  ;;  %v3601_v6 = vld [vmem:[#allocation2 + $0xbc] sm:$0x1]  ;;  %v10139_v38 = vpack.c.b16 %v4633_v59, %v4632_v34  ;;  %v3382_v19 = vrot.slane %v3378_v41, 4 }
 0x37e   : > { %3549 = vst [vmem:[#allocation2 + $0xc0] sm:$0xf] %v3548_v20  ;;  %4215 = vmatmul.bf16.gmra.mxu1 %v10121_v51  ;;  %v3994_v12 = vshll.u32 %v3600_v22, 16  ;;  %v3998_v57 = vshrl.u32 %v3600_v22, 16  ;;  %v4004_v32 = vshll.u32 %v3601_v6, 16  ;;  %v3992_v13 = vrot.slane %v3991_v61, 4 }
 0x37f   : > { %v3384_v60 = vshrl.u32 %v3008_v0, 16  ;;  %4453 = vmatmul.bf16.gmra.mxu2 %v10135_v53  ;;  %11117 = vst [vmem:[#allocation59_spill] sm:$0xff] %v10139_v38  ;;  %v3387_v33 = vshll.u32 %v3008_v0, 16  ;;  %v4382_v61 = vadd.f32 %v9766_v44, %v9798_v2 }
 0x380   : > { %v3996_v36 = vrot.slane %v3994_v12, 5  ;;  %v4000_v50 = vrot.slane %v3998_v57, 4  ;;  %v4006_v34 = vrot.slane %v4004_v32, 5  ;;  %v10154_v57 = vadd.f32 %v10098_v47, %v4805_v7 }
 0x381   : > { %v3386_v56 = vrot.slane %v3384_v60, 7  ;;  %v4727_v28 = vpop.f32.mrf.mxu3  ;;  %v4582_v60 = vrot.slane %v3600_v22, 5 }
 0x382   : > { %v4414_v63 = vpop.f32.mrf.mxu2  ;;  %v4001_v18 = vor.u32 %v4000_v50, %v3996_v36  ;;  %v3997_v12 = vsel %vm8232_vm5, %v3992_v13, %v3996_v36 }
 0x383   : > { %v3389_v39 = vor.u32 %v3387_v33, %v3386_v56  ;;  %v3391_v29 = vrot.slane %v3386_v56, 4  ;;  %v4178_v8 = vpop.f32.mrf.mxu1  ;;  %v4922_v30 = vpop.f32.mrf.mxu0  ;;  %v4055_v4 = vunpack.c.l.b16 %v3997_v12  ;;  %v4583_v32 = vsel %vm8219_vm4, %v7217_v43, %v4582_v60  ;;  %v7659_v12 = vld [vmem:[#allocation3 + $0x1f0] sm:$0xff] }
 0x384   : > { %v10141_v20 = vadd.f32 %v4411_v16, %v4178_v8  ;;  %v4002_v40 = vrot.slane %v4001_v18, 4  ;;  %v4584_v56 = vrot.slane %v4582_v60, 4  ;;  %v4806_v33 = vadd.f32 %v4727_v28, %v4382_v61  ;;  %v7651_v8 = vld [vmem:[#allocation3 + $0x1b0] sm:$0xff]  ;;  %5727 = vmatpush.bf16.msra.mxu0 %v7659_v12 }
 0x385   : > { %v3390_v59 = vsel %vm9289_vm14, %v3382_v19, %v3389_v39  ;;  %v3552_v0 = vsel %vm9214_vm8, %v3391_v29, %v3551_v23  ;;  %v4634_v44 = vunpack.c.l.b16 %v4583_v32  ;;  %5513 = vmatpush.bf16.msra.mxu3 %v7651_v8 }
 0x386   : > { %3550 = vst [vmem:[#allocation2 + $0xc4] sm:$0xf] %v3390_v59  ;;  %v4007_v41 = vsel %vm8232_vm5, %v4002_v40, %v4006_v34  ;;  %4769 = vmatmul.bf16.gmra.mxu3 %v9858_v45  ;;  %4961 = vmatmul.bf16.gmra.mxu0 %v9836_v25  ;;  %v4585_v25 = vrot.slane %v3601_v6, 5  ;;  %v10173_v6 = vadd.f32 %v10129_v15, %v4806_v33 }
 0x387   : > { %3553 = vst [vmem:[#allocation2 + $0xc8] sm:$0x1] %v3552_v0  ;;  %v4056_v16 = vunpack.c.l.b16 %v4007_v41  ;;  %v11119_v41 = vld [vmem:[#allocation39_spill] sm:$0xff] }
 0x388   : > { %v4586_v22 = vsel %vm8219_vm4, %v4584_v56, %v4585_v25 }
 0x389   : > { %v4730_v11 = vpop.f32.mrf.mxu3  ;;  %v10159_v36 = vpack.c.b16 %v4056_v16, %v4055_v4  ;;  %v4635_v2 = vunpack.c.l.b16 %v4586_v22 }
 0x38a   : > { %v4416_v50 = vpop.f32.mrf.mxu2  ;;  %v4807_v47 = vadd.f32 %v4730_v11, %v9827_v42 }
 0x38b   : > { %v4181_v23 = vpop.f32.mrf.mxu1  ;;  %v4924_v35 = vpop.f32.mrf.mxu0  ;;  %v10170_v18 = vpack.c.b16 %v4635_v2, %v4634_v44 }
 0x38c   : > { %v10164_v7 = vadd.f32 %v4414_v63, %v4181_v23  ;;  %v10183_v15 = vadd.f32 %v4922_v30, %v4807_v47  ;;  %v11120_v47 = vld [vmem:[#allocation28_spill] sm:$0xff] }
 0x38d   : > { %11118 = vst [vmem:[#allocation34_spill] sm:$0xff] %v10170_v18 }
 0x38e   : > { %4220 = vmatmul.bf16.gmra.mxu1 %v10159_v36 }
 0x38f   : > { %5328 = vmatmul.bf16.vlgmr.msrb.gmra.mxu2 %v9337_v1  ;;  %v7675_v1 = vld [vmem:[%s10864_s7 + $0x30] sm:$0xff] }
 0x390   : > { %6182 = vmatpush.bf16.msra.mxu2 %v7675_v1 }
 0x391   : > { %v4732_v28 = vpop.f32.mrf.mxu3 }
 0x392   : > { %v4419_v19 = vpop.f32.mrf.mxu2  ;;  %v4808_v63 = vadd.f32 %v4732_v28, %v9856_v24 }
 0x393   : > { %v4183_v42 = vpop.f32.mrf.mxu1  ;;  %v4927_v29 = vpop.f32.mrf.mxu0 }
 0x394   : > { %v10176_v39 = vadd.f32 %v4416_v50, %v4183_v42  ;;  %v10190_v16 = vadd.f32 %v4924_v35, %v4808_v63  ;;  %v7650_v63 = vld [vmem:[#allocation3 + $0x1a8] sm:$0xff] }
 0x395   : > { %5514 = vmatpush.bf16.msra.mxu3 %v7650_v63 }
 0x396   : > { %4774 = vmatmul.bf16.gmra.mxu3 %v9911_v9  ;;  %4966 = vmatmul.bf16.gmra.mxu0 %v9894_v62  ;;  %v7667_v62 = vld [vmem:[#allocation3 + $0x230] sm:$0xff] }
 0x397   : > { %5925 = vmatpush.bf16.msra.mxu1 %v7667_v62  ;;  %v11125_v62 = vld [vmem:[#allocation30_spill] sm:$0xff] }
 0x399   : > { %v4735_v13 = vpop.f32.mrf.mxu3 }
 0x39a   : > { %v4421_v40 = vpop.f32.mrf.mxu2  ;;  %v4809_v24 = vadd.f32 %v4735_v13, %v9886_v27 }
 0x39b   : > { %v4186_v34 = vpop.f32.mrf.mxu1  ;;  %v4929_v0 = vpop.f32.mrf.mxu0 }
 0x39c   : > { %v10186_v59 = vadd.f32 %v4419_v19, %v4186_v34  ;;  %v10197_v11 = vadd.f32 %v4927_v29, %v4809_v24  ;;  %v7674_v29 = vld [vmem:[%s10864_s7 + $0x28] sm:$0xff]  ;;  %v11124_v34 = vld [vmem:[#allocation57_spill] sm:$0xff] }
 0x39d   : > { %6183 = vmatpush.bf16.msra.mxu2 %v7674_v29  ;;  %v7648_v29 = vld [vmem:[#allocation3 + $0x198] sm:$0xff] }
 0x39e   : > { %5130 = vmatmul.bf16.vlgmr.msrb.gmra.mxu1 %v11119_v41  ;;  %v7658_v41 = vld [vmem:[#allocation3 + $0x1e8] sm:$0xff] }
 0x39f   : > { %5333 = vmatmul.bf16.gmra.mxu2 %v11079_v3  ;;  %5728 = vmatpush.bf16.msra.mxu0 %v7658_v41 }
 0x3a1   : > { %v4737_v30 = vpop.f32.mrf.mxu3 }
 0x3a2   : > { %v4424_v4 = vpop.f32.mrf.mxu2  ;;  %v4810_v60 = vadd.f32 %v4737_v30, %v9914_v55  ;;  %v11121_v55 = vld [vmem:[#allocation42_spill] sm:$0xff] }
 0x3a3   : > { %v4188_v43 = vpop.f32.mrf.mxu1  ;;  %v4932_v27 = vpop.f32.mrf.mxu0  ;;  %v7666_v30 = vld [vmem:[#allocation3 + $0x228] sm:$0xff] }
 0x3a4   : > { %v10193_v61 = vadd.f32 %v4421_v40, %v4188_v43  ;;  %v10204_v35 = vadd.f32 %v4929_v0, %v4810_v60  ;;  %5926 = vmatpush.bf16.msra.mxu1 %v7666_v30 }
 0x3a6   : > { %4779 = vmatmul.bf16.gmra.mxu3 %v9979_v10  ;;  %4971 = vmatmul.bf16.gmra.mxu0 %v9952_v26  ;;  %v11122_v26 = vld [vmem:[#allocation52_spill] sm:$0xff] }
 0x3a9   : > { %v4740_v50 = vpop.f32.mrf.mxu3 }
 0x3aa   : > { %v4426_v32 = vpop.f32.mrf.mxu2  ;;  %v4811_v25 = vadd.f32 %v4740_v50, %v9943_v5  ;;  %v11123_v5 = vld [vmem:[#allocation40_spill] sm:$0xff] }
 0x3ab   : > { %v4191_v56 = vpop.f32.mrf.mxu1  ;;  %v4934_v23 = vpop.f32.mrf.mxu0 }
 0x3ac   : > { %v10200_v33 = vadd.f32 %v4424_v4, %v4191_v56  ;;  %v10214_v8 = vadd.f32 %v4932_v27, %v4811_v25  ;;  %v11126_v4 = vld [vmem:[#allocation32_spill] sm:$0xff] }
 0x3ae   : > { %5135 = vmatmul.bf16.gmra.mxu1 %v11120_v47 }
 0x3af   : > { %5338 = vmatmul.bf16.gmra.mxu2 %v11121_v55  ;;  %v11134_v55 = vld [vmem:[#allocation49_spill] sm:$0xff] }
 0x3b1   : > { %v4742_v22 = vpop.f32.mrf.mxu3 }
 0x3b2   : > { %v4429_v44 = vpop.f32.mrf.mxu2  ;;  %v4812_v28 = vadd.f32 %v4742_v22, %v11122_v26  ;;  %v7649_v22 = vld [vmem:[#allocation3 + $0x1a0] sm:$0xff] }
 0x3b3   : > { %v4193_v2 = vpop.f32.mrf.mxu1  ;;  %v4937_v42 = vpop.f32.mrf.mxu0  ;;  %5515 = vmatpush.bf16.msra.mxu3 %v7649_v22  ;;  %v7654_v22 = vld [vmem:[#allocation3 + $0x1c8] sm:$0xff] }
 0x3b4   : > { %v10207_v19 = vadd.f32 %v4426_v32, %v4193_v2  ;;  %v10221_v43 = vadd.f32 %v4934_v23, %v4812_v28 }
 0x3b6   : > { %4784 = vmatmul.bf16.gmra.mxu3 %v10037_v17  ;;  %4976 = vmatmul.bf16.gmra.mxu0 %v11123_v5 }
 0x3b7   : > { %5516 = vmatpush.bf16.msra.mxu3 %v7648_v29 }
 0x3b9   : > { %v4745_v1 = vpop.f32.mrf.mxu3 }
 0x3ba   : > { %v4431_v13 = vpop.f32.mrf.mxu2  ;;  %v4813_v24 = vadd.f32 %v4745_v1, %v11124_v34  ;;  %v7656_v1 = vld [vmem:[#allocation3 + $0x1d8] sm:$0xff]  ;;  %v11128_v34 = vld [vmem:[#allocation43_spill] sm:$0xff] }
 0x3bb   : > { %v4196_v40 = vpop.f32.mrf.mxu1  ;;  %v4939_v12 = vpop.f32.mrf.mxu0 }
 0x3bc   : > { %v10217_v0 = vadd.f32 %v4429_v44, %v4196_v40  ;;  %v7657_v44 = vld [vmem:[#allocation3 + $0x1e0] sm:$0xff]  ;;  %v10228_v2 = vadd.f32 %v4937_v42, %v4813_v24  ;;  %v7647_v40 = vld [vmem:[#allocation3 + $0x190] sm:$0xff] }
 0x3bd   : > { %5729 = vmatpush.bf16.msra.mxu0 %v7657_v44  ;;  %5517 = vmatpush.bf16.msra.mxu3 %v7647_v40  ;;  %v7645_v44 = vld [vmem:[#allocation3 + $0x180] sm:$0xff] }
 0x3be   : > { %5140 = vmatmul.bf16.gmra.mxu1 %v11125_v62 }
 0x3bf   : > { %5343 = vmatmul.bf16.gmra.mxu2 %v11126_v4 }
 0x3c1   : > { %v4747_v60 = vpop.f32.mrf.mxu3  ;;  %5730 = vmatpush.bf16.msra.mxu0 %v7656_v1 }
 0x3c2   : > { %v4434_v27 = vpop.f32.mrf.mxu2  ;;  %v4814_v32 = vadd.f32 %v4747_v60, %v10040_v37 }
 0x3c3   : > { %v4198_v50 = vpop.f32.mrf.mxu1  ;;  %v4942_v25 = vpop.f32.mrf.mxu0 }
 0x3c4   : > { %v10224_v56 = vadd.f32 %v4431_v13, %v4198_v50  ;;  %v11127_v13 = vld [vmem:[#allocation27_spill] sm:$0xff]  ;;  %v10235_v42 = vadd.f32 %v4939_v12, %v4814_v32  ;;  %v7646_v50 = vld [vmem:[#allocation3 + $0x188] sm:$0xff] }
 0x3c5   : > { %5518 = vmatpush.bf16.msra.mxu3 %v7646_v50  ;;  %v7673_v12 = vld [vmem:[%s10864_s7 + $0x20] sm:$0xff] }
 0x3c6   : > { %4789 = vmatmul.bf16.gmra.mxu3 %v10094_v52  ;;  %4981 = vmatmul.bf16.gmra.mxu0 %v10077_v21  ;;  %v7655_v21 = vld [vmem:[#allocation3 + $0x1d0] sm:$0xff] }
 0x3c7   : > { %5731 = vmatpush.bf16.msra.mxu0 %v7655_v21  ;;  %6184 = vmatpush.bf16.msra.mxu2 %v7673_v12  ;;  %v7665_v21 = vld [vmem:[#allocation3 + $0x220] sm:$0xff] }
 0x3c8   : > { %5927 = vmatpush.bf16.msra.mxu1 %v7665_v21 }
 0x3c9   : > { %v4750_v23 = vpop.f32.mrf.mxu3  ;;  %5519 = vmatpush.bf16.msra.mxu3 %v7645_v44 }
 0x3ca   : > { %v4436_v26 = vpop.f32.mrf.mxu2  ;;  %v4815_v63 = vadd.f32 %v4750_v23, %v10071_v49 }
 0x3cb   : > { %v4201_v28 = vpop.f32.mrf.mxu1  ;;  %v4944_v37 = vpop.f32.mrf.mxu0  ;;  %5732 = vmatpush.bf16.msra.mxu0 %v7654_v22 }
 0x3cc   : > { %v10231_v5 = vadd.f32 %v4434_v27, %v4201_v28  ;;  %v10245_v32 = vadd.f32 %v4942_v25, %v4815_v63 }
 0x3ce   : > { %5145 = vmatmul.bf16.gmra.mxu1 %v11127_v13 }
 0x3cf   : > { %5348 = vmatmul.bf16.gmra.mxu2 %v11128_v34  ;;  %v7870_v34 = vld [vmem:[#allocation2 + $0x18] sm:$0xff] }
 0x3d1   : > { %v4752_v24 = vpop.f32.mrf.mxu3 }
 0x3d2   : > { %v4439_v41 = vpop.f32.mrf.mxu2  ;;  %v4816_v49 = vadd.f32 %v4752_v24, %v10096_v14  ;;  %v7653_v14 = vld [vmem:[#allocation3 + $0x1c0] sm:$0xff]  ;;  %v11130_v24 = vld [vmem:[#allocation44_spill] sm:$0xff] }
 0x3d3   : > { %v4203_v30 = vpop.f32.mrf.mxu1  ;;  %v4947_v27 = vpop.f32.mrf.mxu0  ;;  %5733 = vmatpush.bf16.msra.mxu0 %v7653_v14 }
 0x3d4   : > { %v10238_v60 = vadd.f32 %v4436_v26, %v4203_v30  ;;  %v10252_v25 = vadd.f32 %v4944_v37, %v4816_v49 }
 0x3d6   : > { %4794 = vmatmul.bf16.gmra.mxu3 %v10139_v38  ;;  %4986 = vmatmul.bf16.gmra.mxu0 %v10135_v53  ;;  %v11129_v53 = vld [vmem:[#allocation41_spill] sm:$0xff] }
 0x3d9   : > { %v4755_v23 = vpop.f32.mrf.mxu3 }
 0x3da   : > { %v4441_v26 = vpop.f32.mrf.mxu2  ;;  %v4817_v29 = vadd.f32 %v4755_v23, %v10127_v31 }
 0x3db   : > { %v4206_v28 = vpop.f32.mrf.mxu1  ;;  %v4949_v40 = vpop.f32.mrf.mxu0 }
 0x3dc   : > { %v10248_v1 = vadd.f32 %v4439_v41, %v4206_v28  ;;  %v10257_v41 = vld [vmem:[#allocation2 + $0xc0] sm:$0xff]  ;;  %v10261_v12 = vadd.f32 %v4947_v27, %v4817_v29 }
 0x3dd   : > { %11131 = vst [vmem:[#allocation58_spill] sm:$0xff] %v10257_v41 }
 0x3de   : > { %5150 = vmatmul.bf16.gmra.mxu1 %v11129_v53 }
 0x3df   : > { %5353 = vmatmul.bf16.gmra.mxu2 %v11130_v24 }
 0x3e1   : > { %v4757_v63 = vpop.f32.mrf.mxu3 }
 0x3e2   : > { %v4444_v30 = vpop.f32.mrf.mxu2  ;;  %v4818_v22 = vadd.f32 %v4757_v63, %v10141_v20  ;;  %v11132_v20 = vld [vmem:[#allocation46_spill] sm:$0xff] }
 0x3e3   : > { %v4208_v50 = vpop.f32.mrf.mxu1  ;;  %v4952_v31 = vpop.f32.mrf.mxu0 }
 0x3e4   : > { %v10255_v44 = vadd.f32 %v4441_v26, %v4208_v50  ;;  %v10268_v26 = vadd.f32 %v4949_v40, %v4818_v22 }
 0x3e6   : > { %4799 = vmatmul.bf16.gmra.mxu3 %v10170_v18  ;;  %4991 = vmatmul.bf16.gmra.mxu0 %v10257_v41 }
 0x3e9   : > { %v4760_v14 = vpop.f32.mrf.mxu3 }
 0x3ea   : > { %v4446_v37 = vpop.f32.mrf.mxu2  ;;  %v4819_v23 = vadd.f32 %v4760_v14, %v10164_v7  ;;  %v7672_v7 = vld [vmem:[%s10864_s7 + $0x18] sm:$0xff] }
 0x3eb   : > { %v4211_v49 = vpop.f32.mrf.mxu1  ;;  %v4954_v21 = vpop.f32.mrf.mxu0  ;;  %6185 = vmatpush.bf16.msra.mxu2 %v7672_v7 }
 0x3ec   : > { %v10264_v28 = vadd.f32 %v4444_v30, %v4211_v49  ;;  %v10277_v30 = vadd.f32 %v4952_v31, %v4819_v23 }
 0x3ee   : > { %5155 = vmatmul.bf16.gmra.mxu1 %v11132_v20 }
 0x3ef   : > { %5358 = vmatmul.bf16.gmra.mxu2 %v9746_v58 }
 0x3f1   : > { %v4762_v63 = vpop.f32.mrf.mxu3 }
 0x3f2   : > { %v4449_v50 = vpop.f32.mrf.mxu2  ;;  %v4820_v27 = vadd.f32 %v4762_v63, %v10176_v39 }
 0x3f3   : > { %v4213_v24 = vpop.f32.mrf.mxu1  ;;  %v4957_v41 = vpop.f32.mrf.mxu0 }
 0x3f4   : > { %v10271_v29 = vadd.f32 %v4446_v37, %v4213_v24  ;;  %v11133_v37 = vld [vmem:[#allocation45_spill] sm:$0xff] }
 0x3f6   : > { %5520 = vmatmul.bf16.vlgmr.msra.gmra.mxu3 %v7870_v34  ;;  %5734 = vmatmul.bf16.vlgmr.msra.gmra.mxu0 %v11120_v47  ;;  %v7664_v34 = vld [vmem:[#allocation3 + $0x218] sm:$0xff]  ;;  %v10284_v47 = vadd.f32 %v4954_v21, %v4820_v27 }
 0x3f7   : > { %5928 = vmatpush.bf16.msra.mxu1 %v7664_v34 }
 0x3f9   : > { %v4765_v40 = vpop.f32.mrf.mxu3 }
 0x3fa   : > { %v4451_v22 = vpop.f32.mrf.mxu2  ;;  %v4821_v49 = vadd.f32 %v4765_v40, %v10186_v59  ;;  %v7871_v59 = vld [vmem:[#allocation2 + $0x24] sm:$0xff] }
 0x3fb   : > { %v4216_v14 = vpop.f32.mrf.mxu1  ;;  %v4959_v24 = vpop.f32.mrf.mxu0 }
 0x3fc   : > { %v10280_v39 = vadd.f32 %v4449_v50, %v4216_v14  ;;  %v10290_v50 = vadd.f32 %v4957_v41, %v4821_v49 }
 0x3fe   : > { %5160 = vmatmul.bf16.gmra.mxu1 %v11133_v37 }
 0x3ff   : > { %5363 = vmatmul.bf16.gmra.mxu2 %v9795_v46 }
 0x401   : > { %v4767_v63 = vpop.f32.mrf.mxu3 }
 0x402   : > { %v4454_v31 = vpop.f32.mrf.mxu2  ;;  %v4822_v7 = vadd.f32 %v4767_v63, %v10193_v61 }
 0x403   : > { %v4218_v23 = vpop.f32.mrf.mxu1  ;;  %v4962_v4 = vpop.f32.mrf.mxu0 }
 0x404   : > { %v10287_v58 = vadd.f32 %v4451_v22, %v4218_v23  ;;  %v10297_v61 = vadd.f32 %v4959_v24, %v4822_v7 }
 0x406   : > { %5525 = vmatmul.bf16.gmra.mxu3 %v7871_v59  ;;  %5739 = vmatmul.bf16.gmra.mxu0 %v11125_v62  ;;  %v7872_v59 = vld [vmem:[#allocation2 + $0x30] sm:$0xff] }
 0x409   : > { %v4770_v40 = vpop.f32.mrf.mxu3 }
 0x40a   : > { %v4456_v14 = vpop.f32.mrf.mxu2  ;;  %v4823_v21 = vadd.f32 %v4770_v40, %v10200_v33 }
 0x40b   : > { %v4221_v46 = vpop.f32.mrf.mxu1  ;;  %v4964_v34 = vpop.f32.mrf.mxu0 }
 0x40c   : > { %v10293_v27 = vadd.f32 %v4454_v31, %v4221_v46  ;;  %v7671_v46 = vld [vmem:[%s10864_s7 + $0x10] sm:$0xff]  ;;  %v10306_v33 = vadd.f32 %v4962_v4, %v4823_v21 }
 0x40d   : > { %6186 = vmatpush.bf16.msra.mxu2 %v7671_v46 }
 0x40e   : > { %5165 = vmatmul.bf16.gmra.mxu1 %v11134_v55  ;;  %11135 = vst [vmem:[#allocation35_spill] sm:$0xff] %v10306_v33 }
 0x40f   : > { %5368 = vmatmul.bf16.gmra.mxu2 %v9858_v45 }
 0x411   : > { %v4772_v22 = vpop.f32.mrf.mxu3 }
 0x412   : > { %v5329_v63 = vpop.f32.mrf.mxu2  ;;  %v4824_v62 = vadd.f32 %v4772_v22, %v10207_v19  ;;  %v11136_v22 = vld [vmem:[#allocation25_spill] sm:$0xff] }
 0x413   : > { %v4223_v23 = vpop.f32.mrf.mxu1  ;;  %v4967_v49 = vpop.f32.mrf.mxu0 }
 0x414   : > { %v10300_v41 = vadd.f32 %v4456_v14, %v4223_v23  ;;  %v7663_v23 = vld [vmem:[#allocation3 + $0x210] sm:$0xff] }
 0x415   : > { %5929 = vmatpush.bf16.msra.mxu1 %v7663_v23 }
 0x416   : > { %5530 = vmatmul.bf16.gmra.mxu3 %v7872_v59  ;;  %5744 = vmatmul.bf16.gmra.mxu0 %v11127_v13  ;;  %v10312_v13 = vadd.f32 %v4964_v34, %v4824_v62 }
 0x418   : > { %11137 = vst [vmem:[#allocation63_spill] sm:$0xff] %v10312_v13 }
 0x419   : > { %v4775_v24 = vpop.f32.mrf.mxu3 }
 0x41a   : > { %v5331_v31 = vpop.f32.mrf.mxu2  ;;  %v4825_v40 = vadd.f32 %v4775_v24, %v10217_v0 }
 0x41b   : > { %v5131_v7 = vpop.f32.mrf.mxu1  ;;  %v4969_v14 = vpop.f32.mrf.mxu0 }
 0x41c   : > { %v5211_v19 = vadd.f32 %v5131_v7, %v10154_v57  ;;  %v7873_v57 = vld [vmem:[#allocation2 + $0x3c] sm:$0xff]  ;;  %v10319_v24 = vadd.f32 %v4967_v49, %v4825_v40 }
 0x41e   : > { %5170 = vmatmul.bf16.gmra.mxu1 %v11136_v22  ;;  %v10316_v0 = vadd.f32 %v5329_v63, %v5211_v19 }
 0x41f   : > { %5373 = vmatmul.bf16.gmra.mxu2 %v9911_v9 }
 0x421   : > { %v4777_v59 = vpop.f32.mrf.mxu3 }
 0x422   : > { %v5334_v4 = vpop.f32.mrf.mxu2  ;;  %v4826_v46 = vadd.f32 %v4777_v59, %v10224_v56 }
 0x423   : > { %v5133_v21 = vpop.f32.mrf.mxu1  ;;  %v4972_v33 = vpop.f32.mrf.mxu0 }
 0x424   : > { %v5212_v45 = vadd.f32 %v5133_v21, %v10173_v6  ;;  %v11138_v6 = vld [vmem:[#allocation53_spill] sm:$0xff]  ;;  %v10327_v63 = vadd.f32 %v4969_v14, %v4826_v46 }
 0x426   : > { %5535 = vmatmul.bf16.gmra.mxu3 %v7873_v57  ;;  %5749 = vmatmul.bf16.gmra.mxu0 %v11129_v53  ;;  %v10323_v56 = vadd.f32 %v5331_v31, %v5212_v45  ;;  %v7670_v45 = vld [vmem:[%s10864_s7 + $0x8] sm:$0xff] }
 0x427   : > { %6187 = vmatpush.bf16.msra.mxu2 %v7670_v45 }
 0x429   : > { %v4780_v7 = vpop.f32.mrf.mxu3 }
 0x42a   : > { %v5336_v34 = vpop.f32.mrf.mxu2  ;;  %v4827_v23 = vadd.f32 %v4780_v7, %v10231_v5  ;;  %v11139_v7 = vld [vmem:[#allocation51_spill] sm:$0xff] }
 0x42b   : > { %v5136_v62 = vpop.f32.mrf.mxu1  ;;  %v4974_v13 = vpop.f32.mrf.mxu0 }
 0x42c   : > { %v5213_v9 = vadd.f32 %v5136_v62, %v10183_v15  ;;  %v7874_v15 = vld [vmem:[#allocation2 + $0x48] sm:$0xff]  ;;  %v10337_v31 = vadd.f32 %v4972_v33, %v4827_v23 }
 0x42e   : > { %5175 = vmatmul.bf16.gmra.mxu1 %v11138_v6  ;;  %v10331_v5 = vadd.f32 %v5334_v4, %v5213_v9 }
 0x42f   : > { %5378 = vmatmul.bf16.gmra.mxu2 %v9979_v10 }
 0x431   : > { %v4782_v19 = vpop.f32.mrf.mxu3 }
 0x432   : > { %v5339_v53 = vpop.f32.mrf.mxu2  ;;  %v4828_v40 = vadd.f32 %v4782_v19, %v10238_v60 }
 0x433   : > { %v5138_v49 = vpop.f32.mrf.mxu1  ;;  %v4977_v21 = vpop.f32.mrf.mxu0 }
 0x434   : > { %v5214_v59 = vadd.f32 %v5138_v49, %v10190_v16  ;;  %v10345_v62 = vadd.f32 %v4974_v13, %v4828_v40 }
 0x436   : > { %5540 = vmatmul.bf16.gmra.mxu3 %v7874_v15  ;;  %5754 = vmatmul.bf16.gmra.mxu0 %v11132_v20  ;;  %v10341_v4 = vadd.f32 %v5336_v34, %v5214_v59  ;;  %v7662_v20 = vld [vmem:[#allocation3 + $0x208] sm:$0xff]  ;;  %v7875_v34 = vld [vmem:[#allocation2 + $0x54] sm:$0xff] }
 0x437   : > { %5930 = vmatpush.bf16.msra.mxu1 %v7662_v20 }
 0x439   : > { %v4785_v14 = vpop.f32.mrf.mxu3 }
 0x43a   : > { %v5341_v46 = vpop.f32.mrf.mxu2  ;;  %v4829_v60 = vadd.f32 %v4785_v14, %v10248_v1 }
 0x43b   : > { %v5141_v57 = vpop.f32.mrf.mxu1  ;;  %v4979_v9 = vpop.f32.mrf.mxu0 }
 0x43c   : > { %v5215_v16 = vadd.f32 %v5141_v57, %v10197_v11  ;;  %v10352_v59 = vadd.f32 %v4977_v21, %v4829_v60 }
 0x43e   : > { %5180 = vmatmul.bf16.gmra.mxu1 %v11139_v7  ;;  %v10349_v11 = vadd.f32 %v5339_v53, %v5215_v16 }
 0x43f   : > { %5383 = vmatmul.bf16.gmra.mxu2 %v10037_v17 }
 0x441   : > { %v4787_v33 = vpop.f32.mrf.mxu3 }
 0x442   : > { %v5344_v23 = vpop.f32.mrf.mxu2  ;;  %v4830_v49 = vadd.f32 %v4787_v33, %v10255_v44 }
 0x443   : > { %v5143_v19 = vpop.f32.mrf.mxu1  ;;  %v4982_v15 = vpop.f32.mrf.mxu0 }
 0x444   : > { %v5216_v1 = vadd.f32 %v5143_v19, %v10204_v35  ;;  %v11140_v35 = vld [vmem:[#allocation54_spill] sm:$0xff]  ;;  %v10360_v53 = vadd.f32 %v4979_v9, %v4830_v49 }
 0x446   : > { %5545 = vmatmul.bf16.gmra.mxu3 %v7875_v34  ;;  %5759 = vmatmul.bf16.gmra.mxu0 %v11133_v37  ;;  %v10356_v44 = vadd.f32 %v5341_v46, %v5216_v1  ;;  %v7669_v46 = vld [vmem:[%s10864_s7] sm:$0xff] }
 0x447   : > { %6188 = vmatpush.bf16.msra.mxu2 %v7669_v46 }
 0x449   : > { %v4790_v45 = vpop.f32.mrf.mxu3 }
 0x44a   : > { %v5346_v13 = vpop.f32.mrf.mxu2  ;;  %v4831_v14 = vadd.f32 %v4790_v45, %v10264_v28 }
 0x44b   : > { %v5146_v40 = vpop.f32.mrf.mxu1  ;;  %v4984_v20 = vpop.f32.mrf.mxu0 }
 0x44c   : > { %v5217_v57 = vadd.f32 %v5146_v40, %v10214_v8  ;;  %v7876_v8 = vld [vmem:[#allocation2 + $0x60] sm:$0xff]  ;;  %v10370_v9 = vadd.f32 %v4982_v15, %v4831_v14  ;;  %v11141_v40 = vld [vmem:[#allocation55_spill] sm:$0xff] }
 0x44e   : > { %5185 = vmatmul.bf16.gmra.mxu1 %v11140_v35  ;;  %v10364_v28 = vadd.f32 %v5344_v23, %v5217_v57 }
 0x44f   : > { %5388 = vmatmul.bf16.gmra.mxu2 %v10094_v52 }
 0x451   : > { %v4792_v16 = vpop.f32.mrf.mxu3 }
 0x452   : > { %v5349_v37 = vpop.f32.mrf.mxu2  ;;  %v4832_v60 = vadd.f32 %v4792_v16, %v10271_v29 }
 0x453   : > { %v5148_v21 = vpop.f32.mrf.mxu1  ;;  %v4987_v19 = vpop.f32.mrf.mxu0 }
 0x454   : > { %v5218_v33 = vadd.f32 %v5148_v21, %v10221_v43  ;;  %v10378_v57 = vadd.f32 %v4984_v20, %v4832_v60 }
 0x456   : > { %5550 = vmatmul.bf16.gmra.mxu3 %v7876_v8  ;;  %5764 = vmatmul.bf16.gmra.mxu0 %v11134_v55  ;;  %v10374_v45 = vadd.f32 %v5346_v13, %v5218_v33  ;;  %v7661_v55 = vld [vmem:[#allocation3 + $0x200] sm:$0xff]  ;;  %v7877_v13 = vld [vmem:[#allocation2 + $0x6c] sm:$0xff] }
 0x457   : > { %5931 = vmatpush.bf16.msra.mxu1 %v7661_v55 }
 0x459   : > { %v4795_v49 = vpop.f32.mrf.mxu3 }
 0x45a   : > { %v5351_v1 = vpop.f32.mrf.mxu2  ;;  %v4833_v29 = vadd.f32 %v4795_v49, %v10280_v39 }
 0x45b   : > { %v5151_v34 = vpop.f32.mrf.mxu1  ;;  %v4989_v23 = vpop.f32.mrf.mxu0 }
 0x45c   : > { %v5219_v43 = vadd.f32 %v5151_v34, %v10228_v2  ;;  %v10385_v33 = vadd.f32 %v4987_v19, %v4833_v29  ;;  %v3603_v34 = vld [vmem:[#allocation2 + $0xc4] sm:$0xf] }
 0x45e   : > { %5190 = vmatmul.bf16.gmra.mxu1 %v11141_v40  ;;  %v10382_v2 = vadd.f32 %v5349_v37, %v5219_v43 }
 0x45f   : > { %5393 = vmatmul.bf16.gmra.mxu2 %v10139_v38 }
 0x460   : > { %11142 = vst [vmem:[#allocation60_spill] sm:$0xff] %v10382_v2 }
 0x461   : > { %v4797_v15 = vpop.f32.mrf.mxu3 }
 0x462   : > { %v5354_v14 = vpop.f32.mrf.mxu2  ;;  %v4834_v21 = vadd.f32 %v4797_v15, %v10287_v58 }
 0x463   : > { %v5153_v16 = vpop.f32.mrf.mxu1  ;;  %v4992_v8 = vpop.f32.mrf.mxu0 }
 0x464   : > { %v5220_v39 = vadd.f32 %v5153_v16, %v10235_v42  ;;  %v5246_v42 = vrot.slane %v3603_v34, 5  ;;  %v10393_v37 = vadd.f32 %v4989_v23, %v4834_v21 }
 0x466   : > { %5555 = vmatmul.bf16.gmra.mxu3 %v7877_v13  ;;  %5769 = vmatmul.bf16.gmra.mxu0 %v11136_v22  ;;  %v10389_v15 = vadd.f32 %v5351_v1, %v5220_v39  ;;  %v3604_v22 = vld [vmem:[#allocation2 + $0xc8] sm:$0x1]  ;;  %v5248_v43 = vrot.slane %v5246_v42, 4  ;;  %v3602_v13 = vld [vmem:[#allocation2 + $0xc0] sm:$0xf]  ;;  %v5039_v1 = vshll.u32 %v3603_v34, 16 }
 0x467   : > { %v5043_v39 = vshrl.u32 %v3603_v34, 16  ;;  %v7318_v38 = vrot.slane %v3602_v13, 9 }
 0x468   : > { %11143 = vst [vmem:[#allocation61_spill] sm:$0xff] %v10389_v15  ;;  %v5041_v34 = vrot.slane %v5039_v1, 5 }
 0x469   : > { %v4800_v46 = vpop.f32.mrf.mxu3 }
 0x46a   : > { %v5356_v20 = vpop.f32.mrf.mxu2  ;;  %v4835_v49 = vadd.f32 %v4800_v46, %v10293_v27  ;;  %v5249_v46 = vrot.slane %v3604_v22, 5 }
 0x46b   : > { %v5156_v60 = vpop.f32.mrf.mxu1  ;;  %v4994_v58 = vpop.f32.mrf.mxu0 }
 0x46c   : > { %v5221_v55 = vadd.f32 %v5156_v60, %v10245_v32  ;;  %v5250_v23 = vsel %vm8219_vm4, %v5248_v43, %v5249_v46  ;;  %v10402_v15 = vadd.f32 %v4992_v8, %v4835_v49 }
 0x46e   : > { %5195 = vmatmul.bf16.gmra.mxu1 %v10121_v51  ;;  %v10397_v60 = vadd.f32 %v5354_v14, %v5221_v55  ;;  %v5045_v14 = vrot.slane %v5043_v39, 4 }
 0x46f   : > { %5398 = vmatmul.bf16.gmra.mxu2 %v10170_v18  ;;  %v7878_v18 = vld [vmem:[#allocation2 + $0x78] sm:$0xff] }
 0x470   : > { %11144 = vst [vmem:[#allocation62_spill] sm:$0xff] %v10397_v60  ;;  %v5046_v49 = vor.u32 %v5045_v14, %v5041_v34 }
 0x471   : > { %v4802_v19 = vpop.f32.mrf.mxu3 }
 0x472   : > { %v5359_v29 = vpop.f32.mrf.mxu2  ;;  %v4836_v27 = vadd.f32 %v4802_v19, %v10300_v41  ;;  %v5247_v41 = vsel %vm8219_vm4, %v7318_v38, %v5246_v42  ;;  %v5269_v19 = vunpack.c.l.b16 %v5250_v23  ;;  %v5049_v38 = vshll.u32 %v3604_v22, 16  ;;  %v7879_v22 = vld [vmem:[#allocation2 + $0x84] sm:$0xff] }
 0x473   : > { %v5158_v16 = vpop.f32.mrf.mxu1  ;;  %v5735_v21 = vpop.f32.mrf.mxu0  ;;  %v5268_v46 = vunpack.c.l.b16 %v5247_v41 }
 0x474   : > { %v5222_v32 = vadd.f32 %v5158_v16, %v10252_v25  ;;  %v5030_v25 = vshrl.u32 %v3602_v13, 16  ;;  %v5033_v16 = vshll.u32 %v3602_v13, 16  ;;  %v10414_v42 = vadd.f32 %v4994_v58, %v4836_v27 }
 0x475   : > { %v5051_v41 = vrot.slane %v5049_v38, 5 }
 0x476   : > { %5560 = vmatmul.bf16.gmra.mxu3 %v7878_v18  ;;  %5774 = vmatmul.bf16.gmra.mxu0 %v11138_v6  ;;  %v5032_v52 = vrot.slane %v5030_v25, 4  ;;  %v10408_v6 = vpack.c.b16 %v5269_v19, %v5268_v46  ;;  %v5035_v8 = vrot.slane %v5033_v16, 5  ;;  %v10410_v48 = vadd.f32 %v5356_v20, %v5222_v32 }
 0x478   : > { %v5036_v1 = vor.u32 %v5035_v8, %v5032_v52 }
 0x479   : > { %v5521_v55 = vpop.f32.mrf.mxu3 }
 0x47a   : > { %v5361_v60 = vpop.f32.mrf.mxu2  ;;  %v5601_v43 = vadd.f32 %v5521_v55, %v10316_v0  ;;  %v5047_v0 = vrot.slane %v5046_v49, 4  ;;  %v5037_v20 = vrot.slane %v5036_v1, 4 }
 0x47b   : > { %v5161_v2 = vpop.f32.mrf.mxu1  ;;  %v5737_v13 = vpop.f32.mrf.mxu0 }
 0x47c   : > { %v5223_v18 = vadd.f32 %v5161_v2, %v10261_v12  ;;  %v5052_v32 = vsel %vm8232_vm5, %v5047_v0, %v5051_v41  ;;  %v5042_v52 = vsel %vm8232_vm5, %v5037_v20, %v5041_v34  ;;  %v10425_v58 = vadd.f32 %v5735_v21, %v5601_v43 }
 0x47d   : > { %v5071_v27 = vunpack.c.l.b16 %v5052_v32  ;;  %v5070_v16 = vunpack.c.l.b16 %v5042_v52 }
 0x47e   : > { %5200 = vmatmul.bf16.gmra.mxu1 %v10159_v36  ;;  %v10420_v19 = vadd.f32 %v5359_v29, %v5223_v18 }
 0x47f   : > { %5403 = vmatmul.bf16.gmra.mxu2 %v10408_v6  ;;  %v10429_v18 = vpack.c.b16 %v5071_v27, %v5070_v16 }
 0x481   : > { %v5523_v39 = vpop.f32.mrf.mxu3 }
 0x482   : > { %v5364_v23 = vpop.f32.mrf.mxu2  ;;  %v5602_v2 = vadd.f32 %v5523_v39, %v10323_v56 }
 0x483   : > { %v5163_v12 = vpop.f32.mrf.mxu1 }
 0x484   : > { %v5224_v25 = vadd.f32 %v5163_v12, %v10268_v26  ;;  %v5740_v26 = vpop.f32.mrf.mxu0  ;;  %v10435_v21 = vadd.f32 %v5737_v13, %v5602_v2 }
 0x486   : > { %5565 = vmatmul.bf16.gmra.mxu3 %v7879_v22  ;;  %5779 = vmatmul.bf16.gmra.mxu0 %v11139_v7  ;;  %v10431_v8 = vadd.f32 %v5361_v60, %v5224_v25  ;;  %v11145_v7 = vld [vmem:[#allocation11_spill] sm:$0xff] }
 0x489   : > { %v5526_v56 = vpop.f32.mrf.mxu3 }
 0x48a   : > { %v5366_v14 = vpop.f32.mrf.mxu2  ;;  %v5603_v46 = vadd.f32 %v5526_v56, %v10331_v5 }
 0x48b   : > { %v5166_v55 = vpop.f32.mrf.mxu1 }
 0x48c   : > { %v5225_v29 = vadd.f32 %v5166_v55, %v10277_v30  ;;  %v5742_v5 = vpop.f32.mrf.mxu0  ;;  %v7880_v30 = vld [vmem:[#allocation2 + $0x90] sm:$0xff]  ;;  %v10442_v60 = vadd.f32 %v5740_v26, %v5603_v46  ;;  %v11147_v55 = vld [vmem:[#allocation35_spill] sm:$0xff] }
 0x48e   : > { %5205 = vmatmul.bf16.gmra.mxu1 %v10429_v18  ;;  %v10439_v0 = vadd.f32 %v5364_v23, %v5225_v29 }
 0x48f   : > { %6189 = vmatmul.bf16.vlgmr.msra.gmra.mxu2 %v11145_v7 }
 0x491   : > { %v5528_v34 = vpop.f32.mrf.mxu3 }
 0x492   : > { %v5369_v43 = vpop.f32.mrf.mxu2  ;;  %v5604_v38 = vadd.f32 %v5528_v34, %v10341_v4  ;;  %v11146_v4 = vld [vmem:[#allocation13_spill] sm:$0xff] }
 0x493   : > { %v5168_v49 = vpop.f32.mrf.mxu1 }
 0x494   : > { %v5226_v1 = vadd.f32 %v5168_v49, %v10284_v47  ;;  %v5745_v47 = vpop.f32.mrf.mxu0  ;;  %v10450_v23 = vadd.f32 %v5742_v5, %v5604_v38 }
 0x496   : > { %5570 = vmatmul.bf16.gmra.mxu3 %v7880_v30  ;;  %5784 = vmatmul.bf16.gmra.mxu0 %v11140_v35  ;;  %v10446_v25 = vadd.f32 %v5366_v14, %v5226_v1  ;;  %v11150_v1 = vld [vmem:[#allocation63_spill] sm:$0xff] }
 0x499   : > { %v5531_v39 = vpop.f32.mrf.mxu3 }
 0x49a   : > { %v5371_v12 = vpop.f32.mrf.mxu2  ;;  %v5605_v2 = vadd.f32 %v5531_v39, %v10349_v11  ;;  %v7881_v11 = vld [vmem:[#allocation2 + $0x9c] sm:$0xff] }
 0x49b   : > { %v5171_v13 = vpop.f32.mrf.mxu1 }
 0x49c   : > { %v5227_v41 = vadd.f32 %v5171_v13, %v10290_v50  ;;  %v10457_v50 = vadd.f32 %v5745_v47, %v5605_v2 }
 0x49e   : > { %5932 = vmatmul.bf16.vlgmr.msra.gmra.mxu1 %v11079_v3  ;;  %v10454_v27 = vadd.f32 %v5369_v43, %v5227_v41  ;;  %v5747_v3 = vpop.f32.mrf.mxu0 }
 0x49f   : > { %6194 = vmatmul.bf16.gmra.mxu2 %v11146_v4  ;;  %v11151_v4 = vld [vmem:[#allocation32_spill] sm:$0xff] }
 0x4a1   : > { %v5533_v20 = vpop.f32.mrf.mxu3 }
 0x4a2   : > { %v5374_v35 = vpop.f32.mrf.mxu2  ;;  %v5606_v22 = vadd.f32 %v5533_v20, %v10356_v44  ;;  %v11148_v44 = vld [vmem:[#allocation42_spill] sm:$0xff] }
 0x4a3   : > { %v5173_v32 = vpop.f32.mrf.mxu1 }
 0x4a4   : > { %v5228_v52 = vadd.f32 %v5173_v32, %v10297_v61  ;;  %v11149_v61 = vld [vmem:[#allocation15_spill] sm:$0xff]  ;;  %v10465_v7 = vadd.f32 %v5747_v3, %v5606_v22 }
 0x4a6   : > { %5575 = vmatmul.bf16.gmra.mxu3 %v7881_v11  ;;  %5789 = vmatmul.bf16.gmra.mxu0 %v11141_v40  ;;  %v10461_v29 = vadd.f32 %v5371_v12, %v5228_v52  ;;  %v5750_v38 = vpop.f32.mrf.mxu0  ;;  %v7883_v52 = vld [vmem:[#allocation2 + $0xb4] sm:$0xff] }
 0x4a9   : > { %v5536_v56 = vpop.f32.mrf.mxu3 }
 0x4aa   : > { %v5376_v16 = vpop.f32.mrf.mxu2  ;;  %v5607_v26 = vadd.f32 %v5536_v56, %v10364_v28  ;;  %v7882_v28 = vld [vmem:[#allocation2 + $0xa8] sm:$0xff] }
 0x4ab   : > { %v5176_v14 = vpop.f32.mrf.mxu1 }
 0x4ac   : > { %v5229_v46 = vadd.f32 %v5176_v14, %v11147_v55  ;;  %v10472_v39 = vadd.f32 %v5750_v38, %v5607_v26  ;;  %v10489_v14 = vld [vmem:[#allocation2 + $0xcc] sm:$0xf]  ;;  %v10491_v26 = vld [vmem:[#allocation2 + $0xd0] sm:$0xf] }
 0x4ad   : > { %v11154_v55 = vld [vmem:[#allocation19_spill] sm:$0xff] }
 0x4ae   : > { %5937 = vmatmul.bf16.gmra.mxu1 %v11148_v44  ;;  %v10469_v30 = vadd.f32 %v5374_v35, %v5229_v46  ;;  %v5752_v47 = vpop.f32.mrf.mxu0  ;;  %v5637_v46 = vshll.u32 %v10489_v14, 16  ;;  %v5647_v44 = vshrl.u32 %v10491_v26, 16 }
 0x4af   : > { %6199 = vmatmul.bf16.gmra.mxu2 %v11149_v61  ;;  %v10498_v61 = vld [vmem:[#allocation2 + $0xd4] sm:$0x1] }
 0x4b1   : > { %v5538_v34 = vpop.f32.mrf.mxu3 }
 0x4b2   : > { %v5379_v40 = vpop.f32.mrf.mxu2  ;;  %v5608_v49 = vadd.f32 %v5538_v34, %v10374_v45  ;;  %v11152_v45 = vld [vmem:[#allocation17_spill] sm:$0xff]  ;;  %v5639_v34 = vrot.slane %v5637_v46, 5 }
 0x4b3   : > { %v5178_v43 = vpop.f32.mrf.mxu1 }
 0x4b4   : > { %v5230_v5 = vadd.f32 %v5178_v43, %v11150_v1  ;;  %v10479_v20 = vadd.f32 %v5752_v47, %v5608_v49  ;;  %v5649_v43 = vrot.slane %v5647_v44, 4 }
 0x4b6   : > { %5580 = vmatmul.bf16.gmra.mxu3 %v7882_v28  ;;  %5794 = vmatmul.bf16.gmra.mxu0 %v10121_v51  ;;  %v10475_v41 = vadd.f32 %v5376_v16, %v5230_v5  ;;  %v11153_v16 = vld [vmem:[#allocation43_spill] sm:$0xff] }
 0x4ba   : > { %v5381_v12 = vpop.f32.mrf.mxu2 }
 0x4bb   : > { %v5181_v13 = vpop.f32.mrf.mxu1 }
 0x4bc   : > { %v5231_v2 = vadd.f32 %v5181_v13, %v10319_v24 }
 0x4be   : > { %5942 = vmatmul.bf16.gmra.mxu1 %v11151_v4  ;;  %v10482_v51 = vadd.f32 %v5379_v40, %v5231_v2  ;;  %v11155_v2 = vld [vmem:[#allocation58_spill] sm:$0xff] }
 0x4bf   : > { %6204 = vmatmul.bf16.gmra.mxu2 %v11152_v45 }
 0x4c2   : > { %v5384_v35 = vpop.f32.mrf.mxu2 }
 0x4c3   : > { %v5183_v32 = vpop.f32.mrf.mxu1 }
 0x4c4   : > { %v5232_v22 = vadd.f32 %v5183_v32, %v10327_v63  ;;  %v5634_v63 = vshrl.u32 %v10489_v14, 16 }
 0x4c6   : > { %5585 = vmatmul.bf16.gmra.mxu3 %v7883_v52  ;;  %5799 = vmatmul.bf16.gmra.mxu0 %v10159_v36  ;;  %v10486_v56 = vadd.f32 %v5381_v12, %v5232_v22  ;;  %v5643_v36 = vshll.u32 %v10491_v26, 16  ;;  %v5653_v12 = vshll.u32 %v10498_v61, 16 }
 0x4c8   : > { %v5645_v40 = vrot.slane %v5643_v36, 5  ;;  %v5655_v45 = vrot.slane %v5653_v12, 5  ;;  %v7596_v36 = vld [vmem:[#allocation2 + $0xcc] sm:$0xff] }
 0x4ca   : > { %v5386_v24 = vpop.f32.mrf.mxu2  ;;  %v5650_v28 = vor.u32 %v5649_v43, %v5645_v40  ;;  %v11158_v43 = vld [vmem:[#allocation47_spill] sm:$0xff] }
 0x4cb   : > { %v5186_v11 = vpop.f32.mrf.mxu1 }
 0x4cc   : > { %v5233_v3 = vadd.f32 %v5186_v11, %v10337_v31  ;;  %v5636_v31 = vrot.slane %v5634_v63, 4  ;;  %v5651_v4 = vrot.slane %v5650_v28, 4 }
 0x4ce   : > { %5947 = vmatmul.bf16.gmra.mxu1 %v11153_v16  ;;  %v5640_v5 = vor.u32 %v5639_v34, %v5636_v31  ;;  %v10502_v13 = vadd.f32 %v5384_v35, %v5233_v3  ;;  %v5656_v11 = vsel %vm8232_vm5, %v5651_v4, %v5655_v45  ;;  %v11156_v35 = vld [vmem:[#allocation44_spill] sm:$0xff]  ;;  %v11160_v4 = vld [vmem:[#allocation50_spill] sm:$0xff] }
 0x4cf   : > { %6209 = vmatmul.bf16.gmra.mxu2 %v11154_v55  ;;  %v11157_v3 = vld [vmem:[#allocation20_spill] sm:$0xff]  ;;  %v5675_v55 = vunpack.c.l.b16 %v5656_v11 }
 0x4d0   : > { %v5641_v47 = vrot.slane %v5640_v5, 4 }
 0x4d2   : > { %v5389_v49 = vpop.f32.mrf.mxu2 }
 0x4d3   : > { %v5188_v38 = vpop.f32.mrf.mxu1 }
 0x4d4   : > { %v5234_v1 = vadd.f32 %v5188_v38, %v10345_v62  ;;  %v5646_v62 = vsel %vm8232_vm5, %v5641_v47, %v5645_v40  ;;  %v11159_v38 = vld [vmem:[#allocation21_spill] sm:$0xff] }
 0x4d6   : > { %5590 = vmatmul.bf16.gmra.mxu3 %v11155_v2  ;;  %5804 = vmatmul.bf16.gmra.mxu0 %v10429_v18  ;;  %v10511_v16 = vadd.f32 %v5386_v24, %v5234_v1  ;;  %v5674_v18 = vunpack.c.l.b16 %v5646_v62 }
 0x4d8   : > { %v5676_v44 = vpack.c.b16 %v5675_v55, %v5674_v18 }
 0x4da   : > { %v5391_v32 = vpop.f32.mrf.mxu2 }
 0x4db   : > { %v5191_v22 = vpop.f32.mrf.mxu1 }
 0x4dc   : > { %v5235_v52 = vadd.f32 %v5191_v22, %v10352_v59 }
 0x4de   : > { %5952 = vmatmul.bf16.gmra.mxu1 %v11156_v35  ;;  %v10516_v31 = vadd.f32 %v5389_v49, %v5235_v52 }
 0x4df   : > { %6214 = vmatmul.bf16.gmra.mxu2 %v11157_v3  ;;  %v11162_v3 = vld [vmem:[#allocation23_spill] sm:$0xff] }
 0x4e2   : > { %v5394_v63 = vpop.f32.mrf.mxu2 }
 0x4e3   : > { %v5193_v46 = vpop.f32.mrf.mxu1 }
 0x4e4   : > { %v5236_v59 = vadd.f32 %v5193_v46, %v10360_v53 }
 0x4e6   : > { %5595 = vmatmul.bf16.gmra.mxu3 %v7596_v36  ;;  %5809 = vmatmul.bf16.gmra.mxu0 %v5676_v44  ;;  %v10519_v40 = vadd.f32 %v5391_v32, %v5236_v59  ;;  %v10545_v44 = vld [vmem:[%s10865_s8] ss:$0 sm:$0xff] }
 0x4e7   : > { %v10551_v59 = vld [vmem:[%s10862_s5] ss:$0 sm:$0xff] }
 0x4ea   : > { %v5396_v54 = vpop.f32.mrf.mxu2 }
 0x4eb   : > { %v5196_v34 = vpop.f32.mrf.mxu1 }
 0x4ec   : > { %v5237_v24 = vadd.f32 %v5196_v34, %v10370_v9  ;;  %v11161_v9 = vld [vmem:[#allocation22_spill] sm:$0xff]  ;;  %v11165_v34 = vld [vmem:[#allocation31_spill] sm:$0xff] }
 0x4ee   : > { %5957 = vmatmul.bf16.gmra.mxu1 %v11158_v43  ;;  %v10524_v12 = vadd.f32 %v5394_v63, %v5237_v24  ;;  %v10561_v43 = vld [vmem:[%s10866_s9] ss:$0 sm:$0xff] }
 0x4ef   : > { %6219 = vmatmul.bf16.gmra.mxu2 %v11159_v38  ;;  %v10567_v38 = vld [vmem:[%s10863_s6] ss:$0 sm:$0xff] }
 0x4f2   : > { %v5399_v1 = vpop.f32.mrf.mxu2 }
 0x4f3   : > { %v5198_v5 = vpop.f32.mrf.mxu1 }
 0x4f4   : > { %v5238_v28 = vadd.f32 %v5198_v5, %v10378_v57 }
 0x4f6   : > { %v10527_v47 = vadd.f32 %v5396_v54, %v5238_v28 }
 0x4fa   : > { %v5401_v53 = vpop.f32.mrf.mxu2 }
 0x4fb   : > { %v5201_v49 = vpop.f32.mrf.mxu1 }
 0x4fc   : > { %v5239_v2 = vadd.f32 %v5201_v49, %v10385_v33  ;;  %v11163_v33 = vld [vmem:[#allocation26_spill] sm:$0xff] }
 0x4fe   : > { %5962 = vmatmul.bf16.gmra.mxu1 %v11160_v4  ;;  %v10532_v52 = vadd.f32 %v5399_v1, %v5239_v2  ;;  %v10573_v4 = vpop.f32.mrf.mxu3 }
 0x4ff   : > { %6224 = vmatmul.bf16.gmra.mxu2 %v11161_v9 }
 0x502   : > { %v5404_v45 = vpop.f32.mrf.mxu2 }
 0x503   : > { %v5203_v32 = vpop.f32.mrf.mxu1 }
 0x504   : > { %v5240_v22 = vadd.f32 %v5203_v32, %v10393_v37 }
 0x506   : > { %v10535_v35 = vadd.f32 %v5401_v53, %v5240_v22 }
 0x50a   : > { %v5406_v62 = vpop.f32.mrf.mxu2 }
 0x50b   : > { %v5206_v57 = vpop.f32.mrf.mxu1 }
 0x50c   : > { %v5241_v11 = vadd.f32 %v5206_v57, %v10402_v15 }
 0x50e   : > { %5967 = vmatmul.bf16.gmra.mxu1 %v11162_v3  ;;  %v10540_v46 = vadd.f32 %v5404_v45, %v5241_v11 }
 0x50f   : > { %6229 = vmatmul.bf16.gmra.mxu2 %v11163_v33 }
 0x512   : > { %v6190_v18 = vpop.f32.mrf.mxu2 }
 0x513   : > { %v5208_v55 = vpop.f32.mrf.mxu1  ;;  %v6274_v24 = vmul.f32 %v10545_v44, %v6190_v18 }
 0x514   : > { %v5242_v63 = vadd.f32 %v5208_v55, %v10414_v42  ;;  %v11164_v42 = vld [vmem:[#allocation18_spill] sm:$0xff] }
 0x515   : > { %v6310_v28 = vadd.f32 %v10561_v43, %v6274_v24 }
 0x516   : > { %v10553_v54 = vadd.f32 %v5406_v62, %v5242_v63  ;;  %v10579_v62 = vpop.f32.mrf.mxu0  ;;  %v10585_v63 = vpop.f32.mrf.mxu3 }
 0x51a   : > { %v6192_v36 = vpop.f32.mrf.mxu2 }
 0x51b   : > { %v5933_v37 = vpop.f32.mrf.mxu1  ;;  %v6275_v49 = vmul.f32 %v10545_v44, %v6192_v36  ;;  %v11166_v36 = vld [vmem:[#allocation33_spill] sm:$0xff] }
 0x51c   : > { %v6013_v15 = vadd.f32 %v5933_v37, %v10425_v58 }
 0x51d   : > { %v6311_v32 = vadd.f32 %v10561_v43, %v6275_v49 }
 0x51e   : > { %5972 = vmatmul.bf16.gmra.mxu1 %v11164_v42  ;;  %v6049_v58 = vmul.f32 %v10551_v59, %v6013_v15  ;;  %v10593_v24 = vpop.f32.mrf.mxu0 }
 0x51f   : > { %6234 = vmatmul.bf16.gmra.mxu2 %v11165_v34 }
 0x520   : > { %v6085_v53 = vadd.f32 %v10567_v38, %v6049_v58 }
 0x522   : > { %v6195_v1 = vpop.f32.mrf.mxu2  ;;  %v6342_v45 = vadd.f32 %v6310_v28, %v6085_v53 }
 0x523   : > { %v5935_v5 = vpop.f32.mrf.mxu1  ;;  %v6276_v37 = vmul.f32 %v10545_v44, %v6195_v1 }
 0x524   : > { %v6014_v2 = vadd.f32 %v5935_v5, %v10435_v21  ;;  %v6374_v33 = vmax.f32 %v6342_v45, 0.0 }
 0x526   : > { %v6050_v9 = vmul.f32 %v10551_v59, %v6014_v2  ;;  %v10602_v2 = vpop.f32.mrf.mxu3 }
 0x528   : > { %v6086_v22 = vadd.f32 %v10567_v38, %v6050_v9 }
 0x52a   : > { %v6343_v57 = vadd.f32 %v6311_v32, %v6086_v22  ;;  %v6197_v11 = vpop.f32.mrf.mxu2 }
 0x52b   : > { %v5938_v3 = vpop.f32.mrf.mxu1  ;;  %v6277_v58 = vmul.f32 %v10545_v44, %v6197_v11  ;;  %v10605_v11 = vpop.f32.mrf.mxu0 }
 0x52c   : > { %v6375_v18 = vmax.f32 %v6343_v57, 0.0  ;;  %v6015_v21 = vadd.f32 %v5938_v3, %v10442_v60  ;;  %v6312_v60 = vadd.f32 %v10561_v43, %v6276_v37 }
 0x52d   : > { %v6313_v1 = vadd.f32 %v10561_v43, %v6277_v58 }
 0x52e   : > { %v7681_v55 = vpack.c.bf16 %v6375_v18, %v6374_v33  ;;  %5977 = vmatmul.bf16.gmra.mxu1 %v9979_v10  ;;  %v6051_v15 = vmul.f32 %v10551_v59, %v6015_v21  ;;  %v11167_v33 = vld [vmem:[#allocation10_spill] sm:$0xff] }
 0x52f   : > { %6239 = vmatmul.bf16.gmra.mxu2 %v11166_v36  ;;  %v10612_v36 = vpop.f32.mrf.mxu3 }
 0x530   : > { %7682 = vst [vmem:[%s10588_s20] sm:$0xff] %v7681_v55   ;;  %v6087_v10 = vadd.f32 %v10567_v38, %v6051_v15 }
 0x532   : > { %v6200_v42 = vpop.f32.mrf.mxu2  ;;  %v6344_v53 = vadd.f32 %v6312_v60, %v6087_v10 }
 0x533   : > { %v5940_v34 = vpop.f32.mrf.mxu1  ;;  %v6278_v18 = vmul.f32 %v10545_v44, %v6200_v42  ;;  %v10619_v10 = vpop.f32.mrf.mxu0 }
 0x534   : > { %v6016_v5 = vadd.f32 %v5940_v34, %v10450_v23  ;;  %v6376_v22 = vmax.f32 %v6344_v53, 0.0 }
 0x535   : > { %v6314_v15 = vadd.f32 %v10561_v43, %v6278_v18 }
 0x536   : > { %v6052_v28 = vmul.f32 %v10551_v59, %v6016_v5 }
 0x538   : > { %v6088_v49 = vadd.f32 %v10567_v38, %v6052_v28 }
 0x53a   : > { %v6345_v9 = vadd.f32 %v6313_v1, %v6088_v49  ;;  %v6202_v45 = vpop.f32.mrf.mxu2 }
 0x53b   : > { %v5943_v32 = vpop.f32.mrf.mxu1  ;;  %v6279_v34 = vmul.f32 %v10545_v44, %v6202_v45  ;;  %v10624_v45 = vpop.f32.mrf.mxu3 }
 0x53c   : > { %v6377_v57 = vmax.f32 %v6345_v9, 0.0  ;;  %v6017_v3 = vadd.f32 %v5943_v32, %v10457_v50 }
 0x53d   : > { %v6315_v58 = vadd.f32 %v10561_v43, %v6279_v34  ;;  %v11170_v34 = vld [vmem:[#allocation60_spill] sm:$0xff] }
 0x53e   : > { %v7686_v23 = vpack.c.bf16 %v6377_v57, %v6376_v22  ;;  %5982 = vmatmul.bf16.gmra.mxu1 %v10037_v17  ;;  %v6053_v21 = vmul.f32 %v10551_v59, %v6017_v3  ;;  %v11168_v22 = vld [vmem:[#allocation56_spill] sm:$0xff] }
 0x53f   : > { %6244 = vmatmul.bf16.gmra.mxu2 %v11167_v33  ;;  %v11169_v57 = vld [vmem:[#allocation12_spill] sm:$0xff]  ;;  %v10631_v33 = vpop.f32.mrf.mxu0 }
 0x540   : > { %7758 = vst [vmem:[%s10588_s20 + $0x8] sm:$0xff] %v7686_v23   ;;  %v6089_v50 = vadd.f32 %v10567_v38, %v6053_v21 }
 0x542   : > { %v6205_v55 = vpop.f32.mrf.mxu2  ;;  %v6346_v42 = vadd.f32 %v6314_v15, %v6089_v50 }
 0x543   : > { %v5945_v37 = vpop.f32.mrf.mxu1  ;;  %v6280_v3 = vmul.f32 %v10545_v44, %v6205_v55  ;;  %v10640_v55 = vpop.f32.mrf.mxu3 }
 0x544   : > { %v6018_v60 = vadd.f32 %v5945_v37, %v10465_v7  ;;  %v6378_v49 = vmax.f32 %v6346_v42, 0.0 }
 0x545   : > { %v6316_v37 = vadd.f32 %v10561_v43, %v6280_v3  ;;  %v11172_v3 = vld [vmem:[#allocation59_spill] sm:$0xff] }
 0x546   : > { %v6054_v17 = vmul.f32 %v10551_v59, %v6018_v60  ;;  %v5609_v60 = vadd.f32 %v10573_v4, %v11170_v34 }
 0x548   : > { %v6090_v5 = vadd.f32 %v10567_v38, %v6054_v17 }
 0x54a   : > { %v6347_v28 = vadd.f32 %v6315_v58, %v6090_v5  ;;  %v6207_v53 = vpop.f32.mrf.mxu2 }
 0x54b   : > { %v5948_v1 = vpop.f32.mrf.mxu1  ;;  %v6281_v15 = vmul.f32 %v10545_v44, %v6207_v53 }
 0x54c   : > { %v6379_v9 = vmax.f32 %v6347_v28, 0.0  ;;  %v6019_v32 = vadd.f32 %v5948_v1, %v10472_v39  ;;  %v5823_v1 = vadd.f32 %v10579_v62, %v5609_v60 }
 0x54d   : > { %v6317_v58 = vadd.f32 %v10561_v43, %v6281_v15 }
 0x54e   : > { %v7691_v7 = vpack.c.bf16 %v6379_v9, %v6378_v49  ;;  %5987 = vmatmul.bf16.gmra.mxu1 %v11168_v22  ;;  %v6055_v23 = vmul.f32 %v10551_v59, %v6019_v32  ;;  %v10645_v9 = vpop.f32.mrf.mxu0 }
 0x54f   : > { %6249 = vmatmul.bf16.gmra.mxu2 %v11169_v57 }
 0x550   : > { %7759 = vst [vmem:[%s10588_s20 + $0x10] sm:$0xff] %v7691_v7   ;;  %v6091_v39 = vadd.f32 %v10567_v38, %v6055_v23  ;;  %v11171_v7 = vld [vmem:[#allocation61_spill] sm:$0xff]  ;;  %v11173_v23 = vld [vmem:[#allocation14_spill] sm:$0xff] }
 0x551   : > { %v5610_v22 = vadd.f32 %v10585_v63, %v11171_v7 }
 0x552   : > { %v6210_v18 = vpop.f32.mrf.mxu2  ;;  %v6348_v42 = vadd.f32 %v6316_v37, %v6091_v39  ;;  %v10654_v37 = vpop.f32.mrf.mxu3 }
 0x553   : > { %v5950_v21 = vpop.f32.mrf.mxu1  ;;  %v5824_v39 = vadd.f32 %v10593_v24, %v5610_v22 }
 0x554   : > { %v6020_v50 = vadd.f32 %v5950_v21, %v10479_v20  ;;  %v6380_v20 = vmax.f32 %v6348_v42, 0.0  ;;  %v6282_v21 = vmul.f32 %v10545_v44, %v6210_v18  ;;  %v11174_v42 = vld [vmem:[#allocation62_spill] sm:$0xff] }
 0x556   : > { %v6056_v17 = vmul.f32 %v10551_v59, %v6020_v50  ;;  %v6318_v34 = vadd.f32 %v10561_v43, %v6282_v21  ;;  %v11176_v21 = vld [vmem:[#allocation16_spill] sm:$0xff] }
 0x558   : > { %v6092_v5 = vadd.f32 %v10567_v38, %v6056_v17 }
 0x55a   : > { %v6349_v28 = vadd.f32 %v6317_v58, %v6092_v5  ;;  %v6212_v49 = vpop.f32.mrf.mxu2  ;;  %v5611_v58 = vadd.f32 %v10602_v2, %v11174_v42  ;;  %v10662_v5 = vpop.f32.mrf.mxu0 }
 0x55b   : > { %v5953_v53 = vpop.f32.mrf.mxu1  ;;  %v6283_v60 = vmul.f32 %v10545_v44, %v6212_v49 }
 0x55c   : > { %v6381_v32 = vmax.f32 %v6349_v28, 0.0  ;;  %v6021_v4 = vadd.f32 %v5953_v53, %v5823_v1 }
 0x55d   : > { %v6319_v24 = vadd.f32 %v10561_v43, %v6283_v60 }
 0x55e   : > { %v7696_v57 = vpack.c.bf16 %v6381_v32, %v6380_v20  ;;  %5992 = vmatmul.bf16.gmra.mxu1 %v11172_v3  ;;  %v6057_v62 = vmul.f32 %v10551_v59, %v6021_v4  ;;  %v5825_v20 = vadd.f32 %v10605_v11, %v5611_v58  ;;  %v10668_v4 = vpop.f32.mrf.mxu3  ;;  %v5613_v58 = vadd.f32 %v10624_v45, %v10420_v19 }
 0x55f   : > { %6254 = vmatmul.bf16.gmra.mxu2 %v11173_v23  ;;  %v11175_v23 = vld [vmem:[#allocation34_spill] sm:$0xff]  ;;  %v5614_v45 = vadd.f32 %v10640_v55, %v10431_v8 }
 0x560   : > { %7760 = vst [vmem:[%s10588_s20 + $0x18] sm:$0xff] %v7696_v57   ;;  %v6093_v63 = vadd.f32 %v10567_v38, %v6057_v62  ;;  %v5612_v57 = vadd.f32 %v10612_v36, %v10410_v48 }
 0x562   : > { %v6215_v15 = vpop.f32.mrf.mxu2  ;;  %v6350_v28 = vadd.f32 %v6318_v34, %v6093_v63  ;;  %v10674_v62 = vpop.f32.mrf.mxu0 }
 0x563   : > { %v5955_v50 = vpop.f32.mrf.mxu1  ;;  %v6284_v11 = vmul.f32 %v10545_v44, %v6215_v15 }
 0x564   : > { %v6022_v17 = vadd.f32 %v5955_v50, %v5824_v39  ;;  %v6382_v7 = vmax.f32 %v6350_v28, 0.0  ;;  %v5826_v50 = vadd.f32 %v10619_v10, %v5612_v57 }
 0x565   : > { %v6320_v60 = vadd.f32 %v10561_v43, %v6284_v11 }
 0x566   : > { %v6058_v18 = vmul.f32 %v10551_v59, %v6022_v17  ;;  %v10683_v42 = vpop.f32.mrf.mxu3 }
 0x568   : > { %v6094_v1 = vadd.f32 %v10567_v38, %v6058_v18 }
 0x56a   : > { %v6351_v53 = vadd.f32 %v6319_v24, %v6094_v1  ;;  %v6217_v32 = vpop.f32.mrf.mxu2  ;;  %v10690_v24 = vpop.f32.mrf.mxu0 }
 0x56b   : > { %v5958_v49 = vpop.f32.mrf.mxu1  ;;  %v6285_v36 = vmul.f32 %v10545_v44, %v6217_v32 }
 0x56c   : > { %v6383_v22 = vmax.f32 %v6351_v53, 0.0  ;;  %v6023_v2 = vadd.f32 %v5958_v49, %v5825_v20  ;;  %v5827_v53 = vadd.f32 %v10631_v33, %v5613_v58  ;;  %v5850_v49 = vrot.slane %v10491_v26, 5 }
 0x56d   : > { %v6321_v28 = vadd.f32 %v10561_v43, %v6285_v36  ;;  %v5615_v36 = vadd.f32 %v10654_v37, %v10439_v0  ;;  %v5616_v37 = vadd.f32 %v10668_v4, %v10446_v25  ;;  %v5617_v4 = vadd.f32 %v10683_v42, %v10454_v27 }
 0x56e   : > { %v7701_v3 = vpack.c.bf16 %v6383_v22, %v6382_v7  ;;  %5997 = vmatmul.bf16.gmra.mxu1 %v11175_v23  ;;  %v6059_v39 = vmul.f32 %v10551_v59, %v6023_v2  ;;  %v10697_v57 = vpop.f32.mrf.mxu3  ;;  %v7419_v23 = vrot.slane %v10489_v14, 9  ;;  %v5852_v33 = vrot.slane %v5850_v49, 4 }
 0x56f   : > { %6259 = vmatmul.bf16.gmra.mxu2 %v11176_v21  ;;  %v5853_v21 = vrot.slane %v10498_v61, 5  ;;  %v5618_v27 = vadd.f32 %v10697_v57, %v10461_v29 }
 0x570   : > { %7761 = vst [vmem:[%s10588_s20 + $0x20] sm:$0xff] %v7701_v3   ;;  %v6095_v48 = vadd.f32 %v10567_v38, %v6059_v39  ;;  %v11177_v3 = vld [vmem:[#allocation48_spill] sm:$0xff]  ;;  %v5828_v39 = vadd.f32 %v10645_v9, %v5614_v45 }
 0x572   : > { %v6220_v34 = vpop.f32.mrf.mxu2  ;;  %v6352_v18 = vadd.f32 %v6320_v60, %v6095_v48  ;;  %v5777_v60 = vpop.f32.mrf.mxu0 }
 0x573   : > { %v5960_v63 = vpop.f32.mrf.mxu1  ;;  %v6286_v26 = vmul.f32 %v10545_v44, %v6220_v34 }
 0x574   : > { %v6024_v17 = vadd.f32 %v5960_v63, %v5826_v50  ;;  %v6384_v7 = vmax.f32 %v6352_v18, 0.0  ;;  %v5854_v63 = vsel %vm8219_vm4, %v5852_v33, %v5853_v21 }
 0x575   : > { %v6322_v14 = vadd.f32 %v10561_v43, %v6286_v26  ;;  %v5873_v58 = vunpack.c.l.b16 %v5854_v63 }
 0x576   : > { %v6060_v15 = vmul.f32 %v10551_v59, %v6024_v17 }
 0x578   : > { %v6096_v10 = vadd.f32 %v10567_v38, %v6060_v15 }
 0x57a   : > { %v6353_v1 = vadd.f32 %v6321_v28, %v6096_v10  ;;  %v6222_v20 = vpop.f32.mrf.mxu2  ;;  %v5566_v10 = vpop.f32.mrf.mxu3 }
 0x57b   : > { %v5963_v32 = vpop.f32.mrf.mxu1  ;;  %v6287_v48 = vmul.f32 %v10545_v44, %v6222_v20 }
 0x57c   : > { %v6385_v22 = vmax.f32 %v6353_v1, 0.0  ;;  %v6025_v19 = vadd.f32 %v5963_v32, %v5827_v53  ;;  %v5829_v53 = vadd.f32 %v10662_v5, %v5615_v36 }
 0x57d   : > { %v6323_v18 = vadd.f32 %v10561_v43, %v6287_v48 }
 0x57e   : > { %v7706_v2 = vpack.c.bf16 %v6385_v22, %v6384_v7  ;;  %6002 = vmatmul.bf16.gmra.mxu1 %v10408_v6  ;;  %v6061_v11 = vmul.f32 %v10551_v59, %v6025_v19  ;;  %v5851_v6 = vsel %vm8219_vm4, %v7419_v23, %v5850_v49  ;;  %v5780_v19 = vpop.f32.mrf.mxu0  ;;  %v5830_v23 = vadd.f32 %v10674_v62, %v5616_v37 }
 0x57f   : > { %6264 = vmatmul.bf16.gmra.mxu2 %v11177_v3  ;;  %v5872_v17 = vunpack.c.l.b16 %v5851_v6 }
 0x580   : > { %7762 = vst [vmem:[%s10588_s20 + $0x28] sm:$0xff] %v7706_v2   ;;  %v6097_v61 = vadd.f32 %v10567_v38, %v6061_v11 }
 0x581   : > { %v5874_v32 = vpack.c.b16 %v5873_v58, %v5872_v17 }
 0x582   : > { %v6225_v8 = vpop.f32.mrf.mxu2  ;;  %v6354_v15 = vadd.f32 %v6322_v14, %v6097_v61  ;;  %v5568_v33 = vpop.f32.mrf.mxu3  ;;  %v5831_v14 = vadd.f32 %v10690_v24, %v5617_v4 }
 0x583   : > { %v5965_v55 = vpop.f32.mrf.mxu1  ;;  %v6288_v2 = vmul.f32 %v10545_v44, %v6225_v8 }
 0x584   : > { %v6026_v34 = vadd.f32 %v5965_v55, %v5828_v39  ;;  %v6386_v7 = vmax.f32 %v6354_v15, 0.0 }
 0x585   : > { %v6324_v26 = vadd.f32 %v10561_v43, %v6288_v2 }
 0x586   : > { %v6062_v9 = vmul.f32 %v10551_v59, %v6026_v34  ;;  %v5782_v55 = vpop.f32.mrf.mxu0 }
 0x588   : > { %v6098_v28 = vadd.f32 %v10567_v38, %v6062_v9 }
 0x58a   : > { %v6355_v1 = vadd.f32 %v6323_v18, %v6098_v28  ;;  %v6227_v20 = vpop.f32.mrf.mxu2  ;;  %v5571_v17 = vpop.f32.mrf.mxu3  ;;  %v5832_v28 = vadd.f32 %v5777_v60, %v5618_v27 }
 0x58b   : > { %v5968_v49 = vpop.f32.mrf.mxu1  ;;  %v6289_v39 = vmul.f32 %v10545_v44, %v6227_v20 }
 0x58c   : > { %v6387_v22 = vmax.f32 %v6355_v1, 0.0  ;;  %v6027_v0 = vadd.f32 %v5968_v49, %v5829_v53 }
 0x58d   : > { %v6325_v62 = vadd.f32 %v10561_v43, %v6289_v39 }
 0x58e   : > { %v7711_v45 = vpack.c.bf16 %v6387_v22, %v6386_v7  ;;  %6007 = vmatmul.bf16.gmra.mxu1 %v5874_v32  ;;  %v6063_v3 = vmul.f32 %v10551_v59, %v6027_v0  ;;  %v5785_v18 = vpop.f32.mrf.mxu0  ;;  %v5619_v7 = vadd.f32 %v5566_v10, %v10469_v30 }
 0x590   : > { %7763 = vst [vmem:[%s10588_s20 + $0x30] sm:$0xff] %v7711_v45   ;;  %v6099_v11 = vadd.f32 %v10567_v38, %v6063_v3  ;;  %v5833_v45 = vadd.f32 %v5780_v19, %v5619_v7 }
 0x592   : > { %v6230_v5 = vpop.f32.mrf.mxu2  ;;  %v6356_v50 = vadd.f32 %v6324_v26, %v6099_v11  ;;  %v5573_v57 = vpop.f32.mrf.mxu3  ;;  %v5620_v11 = vadd.f32 %v5568_v33, %v10475_v41 }
 0x593   : > { %v5970_v21 = vpop.f32.mrf.mxu1  ;;  %v6290_v58 = vmul.f32 %v10545_v44, %v6230_v5 }
 0x594   : > { %v6028_v25 = vadd.f32 %v5970_v21, %v5830_v23  ;;  %v6388_v34 = vmax.f32 %v6356_v50, 0.0  ;;  %v5834_v4 = vadd.f32 %v5782_v55, %v5620_v11 }
 0x595   : > { %v6326_v24 = vadd.f32 %v10561_v43, %v6290_v58 }
 0x596   : > { %v6064_v8 = vmul.f32 %v10551_v59, %v6028_v25  ;;  %v5787_v23 = vpop.f32.mrf.mxu0 }
 0x598   : > { %v6100_v6 = vadd.f32 %v10567_v38, %v6064_v8 }
 0x59a   : > { %v6357_v63 = vadd.f32 %v6325_v62, %v6100_v6  ;;  %v6232_v61 = vpop.f32.mrf.mxu2  ;;  %v5576_v25 = vpop.f32.mrf.mxu3 }
 0x59b   : > { %v5973_v48 = vpop.f32.mrf.mxu1  ;;  %v6291_v20 = vmul.f32 %v10545_v44, %v6232_v61 }
 0x59c   : > { %v6389_v36 = vmax.f32 %v6357_v63, 0.0  ;;  %v6029_v9 = vadd.f32 %v5973_v48, %v5831_v14  ;;  %v5621_v14 = vadd.f32 %v5571_v17, %v10482_v51 }
 0x59d   : > { %v6327_v0 = vadd.f32 %v10561_v43, %v6291_v20 }
 0x59e   : > { %v7716_v42 = vpack.c.bf16 %v6389_v36, %v6388_v34  ;;  %v6065_v15 = vmul.f32 %v10551_v59, %v6029_v9  ;;  %v5790_v41 = vpop.f32.mrf.mxu0  ;;  %v5835_v36 = vadd.f32 %v5785_v18, %v5621_v14 }
 0x5a0   : > { %7764 = vst [vmem:[%s10588_s20 + $0x38] sm:$0xff] %v7716_v42   ;;  %v6101_v32 = vadd.f32 %v10567_v38, %v6065_v15 }
 0x5a2   : > { %v6235_v1 = vpop.f32.mrf.mxu2  ;;  %v6358_v22 = vadd.f32 %v6326_v24, %v6101_v32  ;;  %v5578_v27 = vpop.f32.mrf.mxu3 }
 0x5a3   : > { %v5975_v53 = vpop.f32.mrf.mxu1  ;;  %v6292_v10 = vmul.f32 %v10545_v44, %v6235_v1  ;;  %v5622_v1 = vadd.f32 %v5573_v57, %v10486_v56  ;;  %v5623_v56 = vadd.f32 %v5576_v25, %v10502_v13 }
 0x5a4   : > { %v6030_v49 = vadd.f32 %v5975_v53, %v5832_v28  ;;  %v6390_v5 = vmax.f32 %v6358_v22, 0.0 }
 0x5a5   : > { %v6328_v19 = vadd.f32 %v10561_v43, %v6292_v10  ;;  %v5836_v32 = vadd.f32 %v5787_v23, %v5622_v1  ;;  %v5837_v23 = vadd.f32 %v5790_v41, %v5623_v56  ;;  %v5624_v10 = vadd.f32 %v5578_v27, %v10511_v16 }
 0x5a6   : > { %v6066_v29 = vmul.f32 %v10551_v59, %v6030_v49  ;;  %v5792_v17 = vpop.f32.mrf.mxu0 }
 0x5a8   : > { %v6102_v60 = vadd.f32 %v10567_v38, %v6066_v29 }
 0x5aa   : > { %v6359_v37 = vadd.f32 %v6327_v0, %v6102_v60  ;;  %v6237_v2 = vpop.f32.mrf.mxu2  ;;  %v5581_v0 = vpop.f32.mrf.mxu3 }
 0x5ab   : > { %v5978_v3 = vpop.f32.mrf.mxu1  ;;  %v6293_v6 = vmul.f32 %v10545_v44, %v6237_v2  ;;  %v5625_v16 = vadd.f32 %v5581_v0, %v10516_v31 }
 0x5ac   : > { %v6391_v21 = vmax.f32 %v6359_v37, 0.0  ;;  %v6031_v26 = vadd.f32 %v5978_v3, %v5833_v45 }
 0x5ad   : > { %v6329_v48 = vadd.f32 %v10561_v43, %v6293_v6 }
 0x5ae   : > { %v7721_v30 = vpack.c.bf16 %v6391_v21, %v6390_v5  ;;  %v6067_v39 = vmul.f32 %v10551_v59, %v6031_v26  ;;  %v5795_v2 = vpop.f32.mrf.mxu0 }
 0x5b0   : > { %7765 = vst [vmem:[%s10588_s20 + $0x40] sm:$0xff] %v7721_v30   ;;  %v6103_v62 = vadd.f32 %v10567_v38, %v6067_v39 }
 0x5b2   : > { %v6240_v8 = vpop.f32.mrf.mxu2  ;;  %v6360_v61 = vadd.f32 %v6328_v19, %v6103_v62  ;;  %v5583_v13 = vpop.f32.mrf.mxu3 }
 0x5b3   : > { %v5980_v50 = vpop.f32.mrf.mxu1  ;;  %v6294_v53 = vmul.f32 %v10545_v44, %v6240_v8  ;;  %v5838_v8 = vadd.f32 %v5792_v17, %v5624_v10  ;;  %v5626_v1 = vadd.f32 %v5583_v13, %v10519_v40 }
 0x5b4   : > { %v6032_v63 = vadd.f32 %v5980_v50, %v5834_v4  ;;  %v6392_v58 = vmax.f32 %v6360_v61, 0.0 }
 0x5b5   : > { %v6330_v18 = vadd.f32 %v10561_v43, %v6294_v53 }
 0x5b6   : > { %v6068_v33 = vmul.f32 %v10551_v59, %v6032_v63  ;;  %v5797_v62 = vpop.f32.mrf.mxu0 }
 0x5b8   : > { %v6104_v55 = vadd.f32 %v10567_v38, %v6068_v33 }
 0x5ba   : > { %v6361_v34 = vadd.f32 %v6329_v48, %v6104_v55  ;;  %v6242_v9 = vpop.f32.mrf.mxu2 }
 0x5bb   : > { %v5983_v42 = vpop.f32.mrf.mxu1  ;;  %v6295_v29 = vmul.f32 %v10545_v44, %v6242_v9  ;;  %v5839_v9 = vadd.f32 %v5795_v2, %v5625_v16 }
 0x5bc   : > { %v6393_v15 = vmax.f32 %v6361_v34, 0.0  ;;  %v6033_v28 = vadd.f32 %v5983_v42, %v5835_v36  ;;  %v5586_v34 = vpop.f32.mrf.mxu3 }
 0x5bd   : > { %v6331_v37 = vadd.f32 %v10561_v43, %v6295_v29  ;;  %v5627_v40 = vadd.f32 %v5586_v34, %v10524_v12 }
 0x5be   : > { %v7726_v51 = vpack.c.bf16 %v6393_v15, %v6392_v58  ;;  %v6069_v24 = vmul.f32 %v10551_v59, %v6033_v28 }
 0x5c0   : > { %7766 = vst [vmem:[%s10588_s20 + $0x48] sm:$0xff] %v7726_v51   ;;  %v6105_v7 = vadd.f32 %v10567_v38, %v6069_v24  ;;  %v5800_v51 = vpop.f32.mrf.mxu0  ;;  %v5840_v24 = vadd.f32 %v5797_v62, %v5626_v1 }
 0x5c1   : > { %v5841_v2 = vadd.f32 %v5800_v51, %v5627_v40 }
 0x5c2   : > { %v6245_v20 = vpop.f32.mrf.mxu2  ;;  %v6362_v60 = vadd.f32 %v6330_v18, %v6105_v7 }
 0x5c3   : > { %v5985_v49 = vpop.f32.mrf.mxu1  ;;  %v6296_v25 = vmul.f32 %v10545_v44, %v6245_v20 }
 0x5c4   : > { %v6034_v22 = vadd.f32 %v5985_v49, %v5836_v32  ;;  %v6394_v26 = vmax.f32 %v6362_v60, 0.0  ;;  %v5588_v20 = vpop.f32.mrf.mxu3 }
 0x5c5   : > { %v6332_v6 = vadd.f32 %v10561_v43, %v6296_v25 }
 0x5c6   : > { %v6070_v57 = vmul.f32 %v10551_v59, %v6034_v22 }
 0x5c8   : > { %v6106_v45 = vadd.f32 %v10567_v38, %v6070_v57  ;;  %v5802_v56 = vpop.f32.mrf.mxu0 }
 0x5ca   : > { %v6363_v3 = vadd.f32 %v6331_v37, %v6106_v45  ;;  %v6247_v5 = vpop.f32.mrf.mxu2 }
 0x5cb   : > { %v5988_v21 = vpop.f32.mrf.mxu1  ;;  %v6297_v14 = vmul.f32 %v10545_v44, %v6247_v5 }
 0x5cc   : > { %v6395_v11 = vmax.f32 %v6363_v3, 0.0  ;;  %v6035_v30 = vadd.f32 %v5988_v21, %v5837_v23 }
 0x5cd   : > { %v6333_v48 = vadd.f32 %v10561_v43, %v6297_v14 }
 0x5ce   : > { %v7731_v39 = vpack.c.bf16 %v6395_v11, %v6394_v26  ;;  %v6071_v4 = vmul.f32 %v10551_v59, %v6035_v30  ;;  %v5591_v11 = vpop.f32.mrf.mxu3  ;;  %v5628_v30 = vadd.f32 %v5588_v20, %v10527_v47 }
 0x5d0   : > { %7767 = vst [vmem:[%s10588_s20 + $0x50] sm:$0xff] %v7731_v39   ;;  %v6107_v63 = vadd.f32 %v10567_v38, %v6071_v4  ;;  %v5805_v13 = vpop.f32.mrf.mxu0  ;;  %v5842_v25 = vadd.f32 %v5802_v56, %v5628_v30 }
 0x5d2   : > { %v6250_v50 = vpop.f32.mrf.mxu2  ;;  %v6364_v61 = vadd.f32 %v6332_v6, %v6107_v63  ;;  %v5629_v63 = vadd.f32 %v5591_v11, %v10532_v52 }
 0x5d3   : > { %v5990_v19 = vpop.f32.mrf.mxu1  ;;  %v6298_v17 = vmul.f32 %v10545_v44, %v6250_v50 }
 0x5d4   : > { %v6036_v41 = vadd.f32 %v5990_v19, %v5838_v8  ;;  %v6396_v58 = vmax.f32 %v6364_v61, 0.0 }
 0x5d5   : > { %v6334_v18 = vadd.f32 %v10561_v43, %v6298_v17 }
 0x5d6   : > { %v6072_v33 = vmul.f32 %v10551_v59, %v6036_v41  ;;  %v5593_v14 = vpop.f32.mrf.mxu3 }
 0x5d8   : > { %v6108_v55 = vadd.f32 %v10567_v38, %v6072_v33 }
 0x5da   : > { %v6365_v36 = vadd.f32 %v6333_v48, %v6108_v55  ;;  %v6252_v27 = vpop.f32.mrf.mxu2  ;;  %v5843_v48 = vadd.f32 %v5805_v13, %v5629_v63 }
 0x5db   : > { %v5993_v42 = vpop.f32.mrf.mxu1  ;;  %v6299_v29 = vmul.f32 %v10545_v44, %v6252_v27  ;;  %v5807_v27 = vpop.f32.mrf.mxu0 }
 0x5dc   : > { %v6397_v15 = vmax.f32 %v6365_v36, 0.0  ;;  %v6037_v28 = vadd.f32 %v5993_v42, %v5839_v9 }
 0x5dd   : > { %v6335_v60 = vadd.f32 %v10561_v43, %v6299_v29 }
 0x5de   : > { %v7736_v31 = vpack.c.bf16 %v6397_v15, %v6396_v58  ;;  %v6073_v53 = vmul.f32 %v10551_v59, %v6037_v28  ;;  %v5630_v58 = vadd.f32 %v5593_v14, %v10535_v35  ;;  %v5596_v1 = vpop.f32.mrf.mxu3 }
 0x5e0   : > { %7768 = vst [vmem:[%s10588_s20 + $0x58] sm:$0xff] %v7736_v31   ;;  %v6109_v7 = vadd.f32 %v10567_v38, %v6073_v53  ;;  %v5844_v51 = vadd.f32 %v5807_v27, %v5630_v58 }
 0x5e2   : > { %v6255_v32 = vpop.f32.mrf.mxu2  ;;  %v6366_v57 = vadd.f32 %v6334_v18, %v6109_v7 }
 0x5e3   : > { %v5995_v49 = vpop.f32.mrf.mxu1  ;;  %v6300_v10 = vmul.f32 %v10545_v44, %v6255_v32  ;;  %v5810_v20 = vpop.f32.mrf.mxu0 }
 0x5e4   : > { %v6038_v22 = vadd.f32 %v5995_v49, %v5840_v24  ;;  %v6398_v5 = vmax.f32 %v6366_v57, 0.0  ;;  %v5631_v49 = vadd.f32 %v5596_v1, %v10540_v46 }
 0x5e5   : > { %v6336_v50 = vadd.f32 %v10561_v43, %v6300_v10 }
 0x5e6   : > { %v6074_v0 = vmul.f32 %v10551_v59, %v6038_v22  ;;  %v5845_v40 = vadd.f32 %v5810_v20, %v5631_v49  ;;  %v5598_v56 = vpop.f32.mrf.mxu3 }
 0x5e8   : > { %v6110_v37 = vadd.f32 %v10567_v38, %v6074_v0 }
 0x5ea   : > { %v6367_v45 = vadd.f32 %v6335_v60, %v6110_v37  ;;  %v6257_v3 = vpop.f32.mrf.mxu2 }
 0x5eb   : > { %v5998_v23 = vpop.f32.mrf.mxu1  ;;  %v6301_v62 = vmul.f32 %v10545_v44, %v6257_v3  ;;  %v5812_v3 = vpop.f32.mrf.mxu0 }
 0x5ec   : > { %v6399_v21 = vmax.f32 %v6367_v45, 0.0  ;;  %v6039_v26 = vadd.f32 %v5998_v23, %v5841_v2  ;;  %v5632_v2 = vadd.f32 %v5598_v56, %v10553_v54 }
 0x5ed   : > { %v6337_v16 = vadd.f32 %v10561_v43, %v6301_v62 }
 0x5ee   : > { %v7741_v12 = vpack.c.bf16 %v6399_v21, %v6398_v5  ;;  %v6075_v39 = vmul.f32 %v10551_v59, %v6039_v26  ;;  %v5846_v26 = vadd.f32 %v5812_v3, %v5632_v2 }
 0x5f0   : > { %7769 = vst [vmem:[%s10588_s20 + $0x60] sm:$0xff] %v7741_v12   ;;  %v6111_v19 = vadd.f32 %v10567_v38, %v6075_v39 }
 0x5f2   : > { %v6260_v8 = vpop.f32.mrf.mxu2  ;;  %v6368_v41 = vadd.f32 %v6336_v50, %v6111_v19 }
 0x5f3   : > { %v6000_v4 = vpop.f32.mrf.mxu1  ;;  %v6302_v15 = vmul.f32 %v10545_v44, %v6260_v8 }
 0x5f4   : > { %v6040_v6 = vadd.f32 %v6000_v4, %v5842_v25  ;;  %v6400_v34 = vmax.f32 %v6368_v41, 0.0 }
 0x5f5   : > { %v6338_v17 = vadd.f32 %v10561_v43, %v6302_v15 }
 0x5f6   : > { %v6076_v47 = vmul.f32 %v10551_v59, %v6040_v6 }
 0x5f8   : > { %v6112_v33 = vadd.f32 %v10567_v38, %v6076_v47 }
 0x5fa   : > { %v6369_v61 = vadd.f32 %v6337_v16, %v6112_v33  ;;  %v6262_v42 = vpop.f32.mrf.mxu2 }
 0x5fb   : > { %v6003_v55 = vpop.f32.mrf.mxu1  ;;  %v6303_v24 = vmul.f32 %v10545_v44, %v6262_v42 }
 0x5fc   : > { %v6401_v36 = vmax.f32 %v6369_v61, 0.0  ;;  %v6041_v9 = vadd.f32 %v6003_v55, %v5843_v48 }
 0x5fd   : > { %v6339_v29 = vadd.f32 %v10561_v43, %v6303_v24 }
 0x5fe   : > { %v7746_v52 = vpack.c.bf16 %v6401_v36, %v6400_v34  ;;  %v6077_v28 = vmul.f32 %v10551_v59, %v6041_v9 }
 0x600   : > { %7770 = vst [vmem:[%s10588_s20 + $0x68] sm:$0xff] %v7746_v52   ;;  %v6113_v53 = vadd.f32 %v10567_v38, %v6077_v28 }
 0x602   : > { %v6265_v18 = vpop.f32.mrf.mxu2  ;;  %v6370_v7 = vadd.f32 %v6338_v17, %v6113_v53 }
 0x603   : > { %v6005_v31 = vpop.f32.mrf.mxu1  ;;  %v6304_v23 = vmul.f32 %v10545_v44, %v6265_v18 }
 0x604   : > { %v6042_v32 = vadd.f32 %v6005_v31, %v5844_v51  ;;  %v6402_v60 = vmax.f32 %v6370_v7, 0.0 }
 0x605   : > { %v6340_v30 = vadd.f32 %v10561_v43, %v6304_v23 }
 0x606   : > { %v6078_v35 = vmul.f32 %v10551_v59, %v6042_v32 }
 0x608   : > { %v6114_v22 = vadd.f32 %v10567_v38, %v6078_v35 }
 0x60a   : > { %v6371_v0 = vadd.f32 %v6339_v29, %v6114_v22  ;;  %v6267_v21 = vpop.f32.mrf.mxu2 }
 0x60b   : > { %v6008_v57 = vpop.f32.mrf.mxu1  ;;  %v6305_v10 = vmul.f32 %v10545_v44, %v6267_v21 }
 0x60c   : > { %v6403_v37 = vmax.f32 %v6371_v0, 0.0  ;;  %v6043_v45 = vadd.f32 %v6008_v57, %v5845_v40 }
 0x60d   : > { %v6341_v25 = vadd.f32 %v10561_v43, %v6305_v10 }
 0x60e   : > { %v7751_v46 = vpack.c.bf16 %v6403_v37, %v6402_v60  ;;  %v6079_v5 = vmul.f32 %v10551_v59, %v6043_v45 }
 0x610   : > { %7771 = vst [vmem:[%s10588_s20 + $0x70] sm:$0xff] %v7751_v46   ;;  %v6115_v12 = vadd.f32 %v10567_v38, %v6079_v5 }
 0x612   : > { %v6372_v13 = vadd.f32 %v6340_v30, %v6115_v12 }
 0x613   : > { %v6010_v11 = vpop.f32.mrf.mxu1 }
 0x614   : > { %v6044_v39 = vadd.f32 %v6010_v11, %v5846_v26  ;;  %v6404_v44 = vmax.f32 %v6372_v13, 0.0 }
 0x616   : > { %v6080_v54 = vmul.f32 %v10551_v59, %v6044_v39 }
 0x618   : > { %v6116_v4 = vadd.f32 %v10567_v38, %v6080_v54 }
 0x61a   : > { %v6373_v8 = vadd.f32 %v6341_v25, %v6116_v4 }
 0x61c   : > { %v6405_v50 = vmax.f32 %v6373_v8, 0.0 }
 0x61e   : > { %v7756_v19 = vpack.c.bf16 %v6405_v50, %v6404_v44 }
 0x620   : > { %7772 = vst [vmem:[%s10588_s20 + $0x78] sm:$0xff] %v7756_v19  }
 0x621   : > { %7941 = shalt.err (!%p7938_p8)
}
 0x622   : > { %s7986_s18 = smov 64   ;;  %s7987_s20 = smov 4  }
 0x623   : > { %7802 = dma.vmem_to_hbm [thread:$0]  (%p8081_p5), %s6484_s29, 2048, %s6486_s30, %s6471_s17, %s7986_s18, %s7986_s18, %s7987_s20  }
 0x624 PF: > { %p7814_p9 = scmp.ge.s32.totalorder %s7980_s16, 2  ;;  %s6500_s26 = sand.u32 1, %s7968_s13  }
 0x625   : > { %s6501_s21 = scalar_lea.sflag [#allocation5], %s6500_s26 }
 0x626   : > { %p7809_p10 = pnand %p7814_p9, %p8085_p6 }
 0x628   : > { %p7810_p11 = pneg %p7809_p10 }
 0x62a   : > { %7963 = dma.done.wait (%p7810_p11), %s6501_s21, 2048  }
 0x62b   : > { %7965 = vsyncadd (%p7810_p11), %s6501_s21, 4294965248  ;;  %p21_p12 = scmp.ge.s32.totalorder %s8068_s19, 4   ;;  %s11179_s13 = smov %s7972_s14 }
 0x62c   : > { %s11180_s14 = smov %s7976_s15  ;;  %s11181_s15 = smov %s8079_s22 }
 0x62d   : > { %s11182_s16 = smov %s8068_s19  ;;  %23 = sbr.rel (!%p21_p12) target bundleno = 4 (0x4), region = 118 }
 0x632   :  { %6507 = vsyncpa [#allocation4], 1 }
 0x633   :  { %6509 = vsyncpa [#allocation4 + $0x1], 1 }
 0x634   :  { %6510 = vsyncpa [#allocation5], 1 }
 0x635   :  { %6512 = vsyncpa [#allocation5 + $0x1], 1 }

</bundles_post_ra>
